<compile_context>
chip_gen: v7x
topology: tpu7x:2x2x1
jax: 0.10.0
libtpu: 0.0.40
codegen_flags: <defaults>
</compile_context>

<pallas_src>
import functools

import jax
import jax.numpy as jnp
from jax.experimental import pallas as pl
from jax.experimental.pallas import tpu as pltpu


# ----------------------------------------------------------------------------
# Fused kernel: one image per grid step
# ----------------------------------------------------------------------------
def _fused_network_kernel(w_ref, aff_ref, x_ref, o_ref, pad_a, pad_b,
                          *, H, W, C, layers):
    """Whole Network.forward for one image; `fea` lives in VMEM the whole time.

    w_ref   : (243,) f32 SMEM   all conv weights, flat [conv][co][ci][dh][dw]
                                (torch Conv2d (cout, cin, 3, 3) row-major)
    aff_ref : (6, C) f32 SMEM   folded per-conv affine rows:
                                [scale_in, shift_in, scale_blk, shift_blk, scale_out, shift_out]
                                (conv bias + eval-mode BN folded: y = conv*scale + shift)
    x_ref   : (1, 3, H, W)      input image tile (VMEM)
    o_ref   : (1, 3, H, W)      output r = clamp(x / illu, 0, 1)
    pad_a/b : (C, H+2, W+2)     VMEM scratch, ping-pong zero-padded feature maps
    """
    cins = (3, C, C)
    couts = (C, C, 3)
    w_offs = (0, 3 * C * 9, 3 * C * 9 + C * C * 9)

    def conv3x3(planes, conv_idx, act):
        """3x3 same-conv as Cout*Cin*9 scalar-FMA taps on shifted (H,W) windows."""
        cin, cout = cins[conv_idx], couts[conv_idx]
        base = w_offs[conv_idx]
        outs = []
        for co in range(cout):
            acc = jnp.zeros((H, W), jnp.float32)
            for ci in range(cin):
                p = planes[ci]                     # (H+2, W+2) padded plane
                for dh in range(3):
                    for dw in range(3):
                        wv = w_ref[base + ((co * cin + ci) * 3 + dh) * 3 + dw]
                        acc = acc + wv * p[dh:dh + H, dw:dw + W]
            # folded conv-bias + BatchNorm (eval mode) affine
            acc = acc * aff_ref[2 * conv_idx, co] + aff_ref[2 * conv_idx + 1, co]
            if act == "relu":
                acc = jnp.maximum(acc, 0.0)
            elif act == "sigmoid":
                acc = jax.nn.sigmoid(acc)
            outs.append(acc)
        return outs

    # Zero both padded scratch buffers (halos stay zero; interiors overwritten below).
    zeros_pad = jnp.zeros((C, H + 2, W + 2), jnp.float32)
    pad_a[...] = zeros_pad
    pad_b[...] = zeros_pad

    # Load the input image once; it is re-used for the final divide/clamp.
    x = x_ref[0]                                   # (3, H, W)
    for c in range(3):
        pad_a[c, 1:1 + H, 1:1 + W] = x[c]          # in-kernel zero padding of the input

    # in_conv: Conv(3->C) + ReLU
    fea = conv3x3([pad_a[c] for c in range(3)], 0, "relu")
    for c in range(C):
        pad_b[c, 1:1 + H, 1:1 + W] = fea[c]

    # blocks: fea = fea + ReLU(BN(Conv(fea))); all blocks share the same weights
    cur, nxt = pad_b, pad_a
    for _ in range(layers):                        # `layers` is a static Python int
        blk = conv3x3([cur[c] for c in range(C)], 1, "relu")
        for c in range(C):
            nxt[c, 1:1 + H, 1:1 + W] = cur[c, 1:1 + H, 1:1 + W] + blk[c]
        cur, nxt = nxt, cur

    # out_conv: Conv(C->3) + Sigmoid
    out = conv3x3([cur[c] for c in range(C)], 2, "sigmoid")

    # illu = clamp(fea + x, 1e-4, 1);  r = clamp(x / illu, 0, 1)
    for c in range(3):
        illu = jnp.clip(out[c] + x[c], 0.0001, 1.0)
        o_ref[0, c] = jnp.clip(x[c] / illu, 0.0, 1.0)


# ----------------------------------------------------------------------------
# pallas_call wrapper
# ----------------------------------------------------------------------------
def fused_network(x_nchw, wflat, aff, *, channels=3, layers=1):
    """x_nchw: (N, 3, H, W) float32 in [0,1] -> r: (N, 3, H, W) float32 in [0,1]."""
    N, _, H, W = x_nchw.shape
    C = channels
    kernel = functools.partial(_fused_network_kernel, H=H, W=W, C=C, layers=layers)
    return pl.pallas_call(
        kernel,
        out_shape=jax.ShapeDtypeStruct((N, 3, H, W), jnp.float32),
        grid=(N,),
        in_specs=[
            # Tiny parameter tables live in SMEM: read scalar-by-scalar, never re-DMA'd.
            pl.BlockSpec(memory_space=pltpu.MemorySpace.SMEM),   # wflat (243,)
            pl.BlockSpec(memory_space=pltpu.MemorySpace.SMEM),   # aff   (6, C)
            pl.BlockSpec((1, 3, H, W), lambda n: (n, 0, 0, 0)),  # one image per step
        ],
        out_specs=pl.BlockSpec((1, 3, H, W), lambda n: (n, 0, 0, 0)),
        scratch_shapes=[
            pltpu.VMEM((C, H + 2, W + 2), jnp.float32),          # padded fea, buffer A
            pltpu.VMEM((C, H + 2, W + 2), jnp.float32),          # padded fea, buffer B
        ],
        compiler_params=pltpu.CompilerParams(
            dimension_semantics=("parallel",)),                  # v7x: shard batch over 2 TCs
    )(wflat, aff, x_nchw)


# ----------------------------------------------------------------------------
# Parameter construction (deterministic; mirrors weights_init statistics)
# ----------------------------------------------------------------------------
def init_params(key, channels=3):
    # TODO(synk): the original module loads a .pt checkpoint (torch.load); we initialize
    # deterministically instead (Conv ~ N(0, 0.02), bias = 0, BN gamma ~ N(1, 0.02),
    # beta = 0, running stats = identity).
    assert channels == 3, "Network hard-codes 3 image channels"
    C = channels
    ks = jax.random.split(key, 4)
    eps = 1e-5

    def conv_w(k, cout, cin):
        # torch Conv2d weight layout (cout, cin, kh, kw)
        return (0.02 * jax.random.normal(k, (cout, cin, 3, 3))).astype(jnp.float32)

    w_in = conv_w(ks[0], C, 3)
    b_in = jnp.zeros((C,), jnp.float32)

    # NOTE: all `layers` blocks share the SAME nn.Sequential in the torch code
    # (self.blocks.append(self.conv)), so there is a single shared block param set.
    w_blk = conv_w(ks[1], C, C)
    b_blk = jnp.zeros((C,), jnp.float32)
    gamma = (1.0 + 0.02 * jax.random.normal(ks[2], (C,))).astype(jnp.float32)
    beta = jnp.zeros((C,), jnp.float32)
    run_mean = jnp.zeros((C,), jnp.float32)
    run_var = jnp.ones((C,), jnp.float32)

    w_out = conv_w(ks[3], 3, C)
    b_out = jnp.zeros((3,), jnp.float32)

    # Fold conv bias + eval-mode BatchNorm into one per-channel affine: y = conv*scale + shift.
    bn_scale = gamma / jnp.sqrt(run_var + eps)
    s_in, t_in = jnp.ones((C,), jnp.float32), b_in
    s_blk = bn_scale
    t_blk = (b_blk - run_mean) * bn_scale + beta
    s_out, t_out = jnp.ones((3,), jnp.float32), b_out

    wflat = jnp.concatenate(
        [w_in.reshape(-1), w_blk.reshape(-1), w_out.reshape(-1)]).astype(jnp.float32)
    aff = jnp.stack([s_in, t_in, s_blk, t_blk, s_out, t_out], axis=0)  # (6, C)
    return {"wflat": wflat, "aff": aff}


# ----------------------------------------------------------------------------
# Forward pass (Network.forward semantics)
# ----------------------------------------------------------------------------
@functools.partial(jax.jit, static_argnames=("channels", "layers"))
def network_forward(x_nchw, params, channels=3, layers=1):
    """Input: NCHW float32 in [0,1]. Returns (r_nchw, img_hwc_uint8)."""
    r = fused_network(x_nchw, params["wflat"], params["aff"],
                      channels=channels, layers=layers)
    # torch: image_numpy = r[0].transpose(1,2,0); uint8(clip(*255)).
    # TODO(synk): PIL Image.fromarray has no device-side equivalent; we return the
    # uint8 HWC array the PIL image would be built from.
    img = jnp.clip(jnp.transpose(r[0], (1, 2, 0)) * 255.0, 0.0, 255.0).astype(jnp.uint8)
    return r, img


# ----------------------------------------------------------------------------
if __name__ == "__main__":
    key = jax.random.PRNGKey(0)
    k_param, k_input = jax.random.split(key)

    params = init_params(k_param, channels=3)

    # Small image-like input: batch=2, channels=3 (fixed by the module), 16x16 spatial.
    x = jax.random.uniform(k_input, (2, 3, 16, 16), dtype=jnp.float32,
                           minval=0.05, maxval=1.0)

    r, img = network_forward(x, params, channels=3, layers=1)
    jax.block_until_ready(r)
    jax.block_until_ready(img)

    assert r.shape == (2, 3, 16, 16) and r.dtype == jnp.float32
    assert img.shape == (16, 16, 3) and img.dtype == jnp.uint8
    assert bool(jnp.all(r >= 0.0)) and bool(jnp.all(r <= 1.0))
    assert bool(jnp.all(jnp.isfinite(r)))

    print("KERNEL_OK")
</pallas_src>

<mosaic_0001>
module attributes {stable_mosaic.version = 11 : i64} {
  func.func @_fused_network_kernel(%arg0: i32, %arg1: memref<243xf32, #tpu.memory_space<smem>>, %arg2: memref<6x3xf32, #tpu.memory_space<smem>>, %arg3: memref<1x3x16x16xf32, #tpu.memory_space<vmem>>, %arg4: memref<1x3x16x16xf32, #tpu.memory_space<vmem>>, %arg5: memref<3x18x18xf32, #tpu.memory_space<vmem>>, %arg6: memref<3x18x18xf32, #tpu.memory_space<vmem>>) attributes {dimension_semantics = [#tpu.dimension_semantics<parallel>], iteration_bounds = array<i64: 2>, scalar_prefetch = 0 : i64, scratch_operands = 2 : i64, tpu.core_type = #tpu.core_type<tc>, window_params = [{transform_indices = @transform_0, window_bounds = array<i64: 243>}, {transform_indices = @transform_1, window_bounds = array<i64: 6, 3>}, {transform_indices = @transform_2, window_bounds = array<i64: 1, 3, 16, 16>}, {transform_indices = @transform_3, window_bounds = array<i64: 1, 3, 16, 16>}]} {
    %cst = arith.constant 0.000000e+00 : f32
    %0 = vector.broadcast %cst : f32 to vector<3x18x18xf32>
    %c0 = arith.constant 0 : index
    %c0_0 = arith.constant 0 : index
    %c0_1 = arith.constant 0 : index
    %1 = vector.load %arg5[%c0, %c0_0, %c0_1] : memref<3x18x18xf32, #tpu.memory_space<vmem>>, vector<3x18x18xf32>
    tpu.vector_store %arg5[%c0, %c0_0, %c0_1], %0 {strides = array<i32>} : memref<3x18x18xf32, #tpu.memory_space<vmem>>, vector<3x18x18xf32>,
    %c0_2 = arith.constant 0 : index
    %c0_3 = arith.constant 0 : index
    %c0_4 = arith.constant 0 : index
    %2 = vector.load %arg6[%c0_2, %c0_3, %c0_4] : memref<3x18x18xf32, #tpu.memory_space<vmem>>, vector<3x18x18xf32>
    tpu.vector_store %arg6[%c0_2, %c0_3, %c0_4], %0 {strides = array<i32>} : memref<3x18x18xf32, #tpu.memory_space<vmem>>, vector<3x18x18xf32>,
    %c0_5 = arith.constant 0 : index
    %c0_6 = arith.constant 0 : index
    %c0_7 = arith.constant 0 : index
    %c0_8 = arith.constant 0 : index
    %3 = vector.load %arg3[%c0_5, %c0_6, %c0_7, %c0_8] : memref<1x3x16x16xf32, #tpu.memory_space<vmem>>, vector<1x3x16x16xf32>
    %4 = vector.shape_cast %3 : vector<1x3x16x16xf32> to vector<3x16x16xf32>
    %5 = vector.extract_strided_slice %4 {offsets = [0, 0, 0], sizes = [1, 16, 16], strides = [1, 1, 1]} : vector<3x16x16xf32> to vector<1x16x16xf32>
    %6 = vector.shape_cast %5 : vector<1x16x16xf32> to vector<16x16xf32>
    %c0_9 = arith.constant 0 : index
    %c1 = arith.constant 1 : index
    %c1_10 = arith.constant 1 : index
    %7 = vector.load %arg5[%c0_9, %c1, %c1_10] : memref<3x18x18xf32, #tpu.memory_space<vmem>>, vector<1x16x16xf32>
    %8 = vector.shape_cast %7 : vector<1x16x16xf32> to vector<16x16xf32>
    %9 = vector.shape_cast %6 : vector<16x16xf32> to vector<1x16x16xf32>
    tpu.vector_store %arg5[%c0_9, %c1, %c1_10], %9 {strides = array<i32>} : memref<3x18x18xf32, #tpu.memory_space<vmem>>, vector<1x16x16xf32>,
    %10 = vector.extract_strided_slice %4 {offsets = [1, 0, 0], sizes = [1, 16, 16], strides = [1, 1, 1]} : vector<3x16x16xf32> to vector<1x16x16xf32>
    %11 = vector.shape_cast %10 : vector<1x16x16xf32> to vector<16x16xf32>
    %c1_11 = arith.constant 1 : index
    %c1_12 = arith.constant 1 : index
    %c1_13 = arith.constant 1 : index
    %12 = vector.load %arg5[%c1_11, %c1_12, %c1_13] : memref<3x18x18xf32, #tpu.memory_space<vmem>>, vector<1x16x16xf32>
    %13 = vector.shape_cast %12 : vector<1x16x16xf32> to vector<16x16xf32>
    %14 = vector.shape_cast %11 : vector<16x16xf32> to vector<1x16x16xf32>
    tpu.vector_store %arg5[%c1_11, %c1_12, %c1_13], %14 {strides = array<i32>} : memref<3x18x18xf32, #tpu.memory_space<vmem>>, vector<1x16x16xf32>,
    %15 = vector.extract_strided_slice %4 {offsets = [2, 0, 0], sizes = [1, 16, 16], strides = [1, 1, 1]} : vector<3x16x16xf32> to vector<1x16x16xf32>
    %16 = vector.shape_cast %15 : vector<1x16x16xf32> to vector<16x16xf32>
    %c2 = arith.constant 2 : index
    %c1_14 = arith.constant 1 : index
    %c1_15 = arith.constant 1 : index
    %17 = vector.load %arg5[%c2, %c1_14, %c1_15] : memref<3x18x18xf32, #tpu.memory_space<vmem>>, vector<1x16x16xf32>
    %18 = vector.shape_cast %17 : vector<1x16x16xf32> to vector<16x16xf32>
    %19 = vector.shape_cast %16 : vector<16x16xf32> to vector<1x16x16xf32>
    tpu.vector_store %arg5[%c2, %c1_14, %c1_15], %19 {strides = array<i32>} : memref<3x18x18xf32, #tpu.memory_space<vmem>>, vector<1x16x16xf32>,
    %c0_16 = arith.constant 0 : index
    %c0_17 = arith.constant 0 : index
    %c0_18 = arith.constant 0 : index
    %20 = vector.load %arg5[%c0_16, %c0_17, %c0_18] : memref<3x18x18xf32, #tpu.memory_space<vmem>>, vector<1x18x18xf32>
    %21 = vector.shape_cast %20 : vector<1x18x18xf32> to vector<18x18xf32>
    %c1_19 = arith.constant 1 : index
    %c0_20 = arith.constant 0 : index
    %c0_21 = arith.constant 0 : index
    %22 = vector.load %arg5[%c1_19, %c0_20, %c0_21] : memref<3x18x18xf32, #tpu.memory_space<vmem>>, vector<1x18x18xf32>
    %23 = vector.shape_cast %22 : vector<1x18x18xf32> to vector<18x18xf32>
    %c2_22 = arith.constant 2 : index
    %c0_23 = arith.constant 0 : index
    %c0_24 = arith.constant 0 : index
    %24 = vector.load %arg5[%c2_22, %c0_23, %c0_24] : memref<3x18x18xf32, #tpu.memory_space<vmem>>, vector<1x18x18xf32>
    %25 = vector.shape_cast %24 : vector<1x18x18xf32> to vector<18x18xf32>
    %cst_25 = arith.constant 0.000000e+00 : f32
    %26 = vector.broadcast %cst_25 : f32 to vector<16x16xf32>
    %c0_26 = arith.constant 0 : index
    %27 = memref.load %arg1[%c0_26] : memref<243xf32, #tpu.memory_space<smem>>
    %28 = vector.extract_strided_slice %21 {offsets = [0, 0], sizes = [16, 16], strides = [1, 1]} : vector<18x18xf32> to vector<16x16xf32>
    %29 = vector.broadcast %27 : f32 to vector<16x16xf32>
    %30 = arith.mulf %29, %28 : vector<16x16xf32>
    %31 = arith.addf %26, %30 : vector<16x16xf32>
    %c1_27 = arith.constant 1 : index
    %32 = memref.load %arg1[%c1_27] : memref<243xf32, #tpu.memory_space<smem>>
    %33 = vector.extract_strided_slice %21 {offsets = [0, 1], sizes = [16, 16], strides = [1, 1]} : vector<18x18xf32> to vector<16x16xf32>
    %34 = vector.broadcast %32 : f32 to vector<16x16xf32>
    %35 = arith.mulf %34, %33 : vector<16x16xf32>
    %36 = arith.addf %31, %35 : vector<16x16xf32>
    %c2_28 = arith.constant 2 : index
    %37 = memref.load %arg1[%c2_28] : memref<243xf32, #tpu.memory_space<smem>>
    %38 = vector.extract_strided_slice %21 {offsets = [0, 2], sizes = [16, 16], strides = [1, 1]} : vector<18x18xf32> to vector<16x16xf32>
    %39 = vector.broadcast %37 : f32 to vector<16x16xf32>
    %40 = arith.mulf %39, %38 : vector<16x16xf32>
    %41 = arith.addf %36, %40 : vector<16x16xf32>
    %c3 = arith.constant 3 : index
    %42 = memref.load %arg1[%c3] : memref<243xf32, #tpu.memory_space<smem>>
    %43 = vector.extract_strided_slice %21 {offsets = [1, 0], sizes = [16, 16], strides = [1, 1]} : vector<18x18xf32> to vector<16x16xf32>
    %44 = vector.broadcast %42 : f32 to vector<16x16xf32>
    %45 = arith.mulf %44, %43 : vector<16x16xf32>
    %46 = arith.addf %41, %45 : vector<16x16xf32>
    %c4 = arith.constant 4 : index
    %47 = memref.load %arg1[%c4] : memref<243xf32, #tpu.memory_space<smem>>
    %48 = vector.extract_strided_slice %21 {offsets = [1, 1], sizes = [16, 16], strides = [1, 1]} : vector<18x18xf32> to vector<16x16xf32>
    %49 = vector.broadcast %47 : f32 to vector<16x16xf32>
    %50 = arith.mulf %49, %48 : vector<16x16xf32>
    %51 = arith.addf %46, %50 : vector<16x16xf32>
    %c5 = arith.constant 5 : index
    %52 = memref.load %arg1[%c5] : memref<243xf32, #tpu.memory_space<smem>>
    %53 = vector.extract_strided_slice %21 {offsets = [1, 2], sizes = [16, 16], strides = [1, 1]} : vector<18x18xf32> to vector<16x16xf32>
    %54 = vector.broadcast %52 : f32 to vector<16x16xf32>
    %55 = arith.mulf %54, %53 : vector<16x16xf32>
    %56 = arith.addf %51, %55 : vector<16x16xf32>
    %c6 = arith.constant 6 : index
    %57 = memref.load %arg1[%c6] : memref<243xf32, #tpu.memory_space<smem>>
    %58 = vector.extract_strided_slice %21 {offsets = [2, 0], sizes = [16, 16], strides = [1, 1]} : vector<18x18xf32> to vector<16x16xf32>
    %59 = vector.broadcast %57 : f32 to vector<16x16xf32>
    %60 = arith.mulf %59, %58 : vector<16x16xf32>
    %61 = arith.addf %56, %60 : vector<16x16xf32>
    %c7 = arith.constant 7 : index
    %62 = memref.load %arg1[%c7] : memref<243xf32, #tpu.memory_space<smem>>
    %63 = vector.extract_strided_slice %21 {offsets = [2, 1], sizes = [16, 16], strides = [1, 1]} : vector<18x18xf32> to vector<16x16xf32>
    %64 = vector.broadcast %62 : f32 to vector<16x16xf32>
    %65 = arith.mulf %64, %63 : vector<16x16xf32>
    %66 = arith.addf %61, %65 : vector<16x16xf32>
    %c8 = arith.constant 8 : index
    %67 = memref.load %arg1[%c8] : memref<243xf32, #tpu.memory_space<smem>>
    %68 = vector.extract_strided_slice %21 {offsets = [2, 2], sizes = [16, 16], strides = [1, 1]} : vector<18x18xf32> to vector<16x16xf32>
    %69 = vector.broadcast %67 : f32 to vector<16x16xf32>
    %70 = arith.mulf %69, %68 : vector<16x16xf32>
    %71 = arith.addf %66, %70 : vector<16x16xf32>
    %c9 = arith.constant 9 : index
    %72 = memref.load %arg1[%c9] : memref<243xf32, #tpu.memory_space<smem>>
    %73 = vector.extract_strided_slice %23 {offsets = [0, 0], sizes = [16, 16], strides = [1, 1]} : vector<18x18xf32> to vector<16x16xf32>
    %74 = vector.broadcast %72 : f32 to vector<16x16xf32>
    %75 = arith.mulf %74, %73 : vector<16x16xf32>
    %76 = arith.addf %71, %75 : vector<16x16xf32>
    %c10 = arith.constant 10 : index
    %77 = memref.load %arg1[%c10] : memref<243xf32, #tpu.memory_space<smem>>
    %78 = vector.extract_strided_slice %23 {offsets = [0, 1], sizes = [16, 16], strides = [1, 1]} : vector<18x18xf32> to vector<16x16xf32>
    %79 = vector.broadcast %77 : f32 to vector<16x16xf32>
    %80 = arith.mulf %79, %78 : vector<16x16xf32>
    %81 = arith.addf %76, %80 : vector<16x16xf32>
    %c11 = arith.constant 11 : index
    %82 = memref.load %arg1[%c11] : memref<243xf32, #tpu.memory_space<smem>>
    %83 = vector.extract_strided_slice %23 {offsets = [0, 2], sizes = [16, 16], strides = [1, 1]} : vector<18x18xf32> to vector<16x16xf32>
    %84 = vector.broadcast %82 : f32 to vector<16x16xf32>
    %85 = arith.mulf %84, %83 : vector<16x16xf32>
    %86 = arith.addf %81, %85 : vector<16x16xf32>
    %c12 = arith.constant 12 : index
    %87 = memref.load %arg1[%c12] : memref<243xf32, #tpu.memory_space<smem>>
    %88 = vector.extract_strided_slice %23 {offsets = [1, 0], sizes = [16, 16], strides = [1, 1]} : vector<18x18xf32> to vector<16x16xf32>
    %89 = vector.broadcast %87 : f32 to vector<16x16xf32>
    %90 = arith.mulf %89, %88 : vector<16x16xf32>
    %91 = arith.addf %86, %90 : vector<16x16xf32>
    %c13 = arith.constant 13 : index
    %92 = memref.load %arg1[%c13] : memref<243xf32, #tpu.memory_space<smem>>
    %93 = vector.extract_strided_slice %23 {offsets = [1, 1], sizes = [16, 16], strides = [1, 1]} : vector<18x18xf32> to vector<16x16xf32>
    %94 = vector.broadcast %92 : f32 to vector<16x16xf32>
    %95 = arith.mulf %94, %93 : vector<16x16xf32>
    %96 = arith.addf %91, %95 : vector<16x16xf32>
    %c14 = arith.constant 14 : index
    %97 = memref.load %arg1[%c14] : memref<243xf32, #tpu.memory_space<smem>>
    %98 = vector.extract_strided_slice %23 {offsets = [1, 2], sizes = [16, 16], strides = [1, 1]} : vector<18x18xf32> to vector<16x16xf32>
    %99 = vector.broadcast %97 : f32 to vector<16x16xf32>
    %100 = arith.mulf %99, %98 : vector<16x16xf32>
    %101 = arith.addf %96, %100 : vector<16x16xf32>
    %c15 = arith.constant 15 : index
    %102 = memref.load %arg1[%c15] : memref<243xf32, #tpu.memory_space<smem>>
    %103 = vector.extract_strided_slice %23 {offsets = [2, 0], sizes = [16, 16], strides = [1, 1]} : vector<18x18xf32> to vector<16x16xf32>
    %104 = vector.broadcast %102 : f32 to vector<16x16xf32>
    %105 = arith.mulf %104, %103 : vector<16x16xf32>
    %106 = arith.addf %101, %105 : vector<16x16xf32>
    %c16 = arith.constant 16 : index
    %107 = memref.load %arg1[%c16] : memref<243xf32, #tpu.memory_space<smem>>
    %108 = vector.extract_strided_slice %23 {offsets = [2, 1], sizes = [16, 16], strides = [1, 1]} : vector<18x18xf32> to vector<16x16xf32>
    %109 = vector.broadcast %107 : f32 to vector<16x16xf32>
    %110 = arith.mulf %109, %108 : vector<16x16xf32>
    %111 = arith.addf %106, %110 : vector<16x16xf32>
    %c17 = arith.constant 17 : index
    %112 = memref.load %arg1[%c17] : memref<243xf32, #tpu.memory_space<smem>>
    %113 = vector.extract_strided_slice %23 {offsets = [2, 2], sizes = [16, 16], strides = [1, 1]} : vector<18x18xf32> to vector<16x16xf32>
    %114 = vector.broadcast %112 : f32 to vector<16x16xf32>
    %115 = arith.mulf %114, %113 : vector<16x16xf32>
    %116 = arith.addf %111, %115 : vector<16x16xf32>
    %c18 = arith.constant 18 : index
    %117 = memref.load %arg1[%c18] : memref<243xf32, #tpu.memory_space<smem>>
    %118 = vector.extract_strided_slice %25 {offsets = [0, 0], sizes = [16, 16], strides = [1, 1]} : vector<18x18xf32> to vector<16x16xf32>
    %119 = vector.broadcast %117 : f32 to vector<16x16xf32>
    %120 = arith.mulf %119, %118 : vector<16x16xf32>
    %121 = arith.addf %116, %120 : vector<16x16xf32>
    %c19 = arith.constant 19 : index
    %122 = memref.load %arg1[%c19] : memref<243xf32, #tpu.memory_space<smem>>
    %123 = vector.extract_strided_slice %25 {offsets = [0, 1], sizes = [16, 16], strides = [1, 1]} : vector<18x18xf32> to vector<16x16xf32>
    %124 = vector.broadcast %122 : f32 to vector<16x16xf32>
    %125 = arith.mulf %124, %123 : vector<16x16xf32>
    %126 = arith.addf %121, %125 : vector<16x16xf32>
    %c20 = arith.constant 20 : index
    %127 = memref.load %arg1[%c20] : memref<243xf32, #tpu.memory_space<smem>>
    %128 = vector.extract_strided_slice %25 {offsets = [0, 2], sizes = [16, 16], strides = [1, 1]} : vector<18x18xf32> to vector<16x16xf32>
    %129 = vector.broadcast %127 : f32 to vector<16x16xf32>
    %130 = arith.mulf %129, %128 : vector<16x16xf32>
    %131 = arith.addf %126, %130 : vector<16x16xf32>
    %c21 = arith.constant 21 : index
    %132 = memref.load %arg1[%c21] : memref<243xf32, #tpu.memory_space<smem>>
    %133 = vector.extract_strided_slice %25 {offsets = [1, 0], sizes = [16, 16], strides = [1, 1]} : vector<18x18xf32> to vector<16x16xf32>
    %134 = vector.broadcast %132 : f32 to vector<16x16xf32>
    %135 = arith.mulf %134, %133 : vector<16x16xf32>
    %136 = arith.addf %131, %135 : vector<16x16xf32>
    %c22 = arith.constant 22 : index
    %137 = memref.load %arg1[%c22] : memref<243xf32, #tpu.memory_space<smem>>
    %138 = vector.extract_strided_slice %25 {offsets = [1, 1], sizes = [16, 16], strides = [1, 1]} : vector<18x18xf32> to vector<16x16xf32>
    %139 = vector.broadcast %137 : f32 to vector<16x16xf32>
    %140 = arith.mulf %139, %138 : vector<16x16xf32>
    %141 = arith.addf %136, %140 : vector<16x16xf32>
    %c23 = arith.constant 23 : index
    %142 = memref.load %arg1[%c23] : memref<243xf32, #tpu.memory_space<smem>>
    %143 = vector.extract_strided_slice %25 {offsets = [1, 2], sizes = [16, 16], strides = [1, 1]} : vector<18x18xf32> to vector<16x16xf32>
    %144 = vector.broadcast %142 : f32 to vector<16x16xf32>
    %145 = arith.mulf %144, %143 : vector<16x16xf32>
    %146 = arith.addf %141, %145 : vector<16x16xf32>
    %c24 = arith.constant 24 : index
    %147 = memref.load %arg1[%c24] : memref<243xf32, #tpu.memory_space<smem>>
    %148 = vector.extract_strided_slice %25 {offsets = [2, 0], sizes = [16, 16], strides = [1, 1]} : vector<18x18xf32> to vector<16x16xf32>
    %149 = vector.broadcast %147 : f32 to vector<16x16xf32>
    %150 = arith.mulf %149, %148 : vector<16x16xf32>
    %151 = arith.addf %146, %150 : vector<16x16xf32>
    %c25 = arith.constant 25 : index
    %152 = memref.load %arg1[%c25] : memref<243xf32, #tpu.memory_space<smem>>
    %153 = vector.extract_strided_slice %25 {offsets = [2, 1], sizes = [16, 16], strides = [1, 1]} : vector<18x18xf32> to vector<16x16xf32>
    %154 = vector.broadcast %152 : f32 to vector<16x16xf32>
    %155 = arith.mulf %154, %153 : vector<16x16xf32>
    %156 = arith.addf %151, %155 : vector<16x16xf32>
    %c26 = arith.constant 26 : index
    %157 = memref.load %arg1[%c26] : memref<243xf32, #tpu.memory_space<smem>>
    %158 = vector.extract_strided_slice %25 {offsets = [2, 2], sizes = [16, 16], strides = [1, 1]} : vector<18x18xf32> to vector<16x16xf32>
    %159 = vector.broadcast %157 : f32 to vector<16x16xf32>
    %160 = arith.mulf %159, %158 : vector<16x16xf32>
    %161 = arith.addf %156, %160 : vector<16x16xf32>
    %c0_29 = arith.constant 0 : index
    %c0_30 = arith.constant 0 : index
    %162 = memref.load %arg2[%c0_29, %c0_30] : memref<6x3xf32, #tpu.memory_space<smem>>
    %163 = vector.broadcast %162 : f32 to vector<16x16xf32>
    %164 = arith.mulf %161, %163 : vector<16x16xf32>
    %c1_31 = arith.constant 1 : index
    %c0_32 = arith.constant 0 : index
    %165 = memref.load %arg2[%c1_31, %c0_32] : memref<6x3xf32, #tpu.memory_space<smem>>
    %166 = vector.broadcast %165 : f32 to vector<16x16xf32>
    %167 = arith.addf %164, %166 : vector<16x16xf32>
    %cst_33 = arith.constant 0.000000e+00 : f32
    %168 = vector.broadcast %cst_33 : f32 to vector<16x16xf32>
    %169 = arith.maximumf %167, %168 : vector<16x16xf32>
    %cst_34 = arith.constant 0.000000e+00 : f32
    %170 = vector.broadcast %cst_34 : f32 to vector<16x16xf32>
    %c27 = arith.constant 27 : index
    %171 = memref.load %arg1[%c27] : memref<243xf32, #tpu.memory_space<smem>>
    %172 = vector.extract_strided_slice %21 {offsets = [0, 0], sizes = [16, 16], strides = [1, 1]} : vector<18x18xf32> to vector<16x16xf32>
    %173 = vector.broadcast %171 : f32 to vector<16x16xf32>
    %174 = arith.mulf %173, %172 : vector<16x16xf32>
    %175 = arith.addf %170, %174 : vector<16x16xf32>
    %c28 = arith.constant 28 : index
    %176 = memref.load %arg1[%c28] : memref<243xf32, #tpu.memory_space<smem>>
    %177 = vector.extract_strided_slice %21 {offsets = [0, 1], sizes = [16, 16], strides = [1, 1]} : vector<18x18xf32> to vector<16x16xf32>
    %178 = vector.broadcast %176 : f32 to vector<16x16xf32>
    %179 = arith.mulf %178, %177 : vector<16x16xf32>
    %180 = arith.addf %175, %179 : vector<16x16xf32>
    %c29 = arith.constant 29 : index
    %181 = memref.load %arg1[%c29] : memref<243xf32, #tpu.memory_space<smem>>
    %182 = vector.extract_strided_slice %21 {offsets = [0, 2], sizes = [16, 16], strides = [1, 1]} : vector<18x18xf32> to vector<16x16xf32>
    %183 = vector.broadcast %181 : f32 to vector<16x16xf32>
    %184 = arith.mulf %183, %182 : vector<16x16xf32>
    %185 = arith.addf %180, %184 : vector<16x16xf32>
    %c30 = arith.constant 30 : index
    %186 = memref.load %arg1[%c30] : memref<243xf32, #tpu.memory_space<smem>>
    %187 = vector.extract_strided_slice %21 {offsets = [1, 0], sizes = [16, 16], strides = [1, 1]} : vector<18x18xf32> to vector<16x16xf32>
    %188 = vector.broadcast %186 : f32 to vector<16x16xf32>
    %189 = arith.mulf %188, %187 : vector<16x16xf32>
    %190 = arith.addf %185, %189 : vector<16x16xf32>
    %c31 = arith.constant 31 : index
    %191 = memref.load %arg1[%c31] : memref<243xf32, #tpu.memory_space<smem>>
    %192 = vector.extract_strided_slice %21 {offsets = [1, 1], sizes = [16, 16], strides = [1, 1]} : vector<18x18xf32> to vector<16x16xf32>
    %193 = vector.broadcast %191 : f32 to vector<16x16xf32>
    %194 = arith.mulf %193, %192 : vector<16x16xf32>
    %195 = arith.addf %190, %194 : vector<16x16xf32>
    %c32 = arith.constant 32 : index
    %196 = memref.load %arg1[%c32] : memref<243xf32, #tpu.memory_space<smem>>
    %197 = vector.extract_strided_slice %21 {offsets = [1, 2], sizes = [16, 16], strides = [1, 1]} : vector<18x18xf32> to vector<16x16xf32>
    %198 = vector.broadcast %196 : f32 to vector<16x16xf32>
    %199 = arith.mulf %198, %197 : vector<16x16xf32>
    %200 = arith.addf %195, %199 : vector<16x16xf32>
    %c33 = arith.constant 33 : index
    %201 = memref.load %arg1[%c33] : memref<243xf32, #tpu.memory_space<smem>>
    %202 = vector.extract_strided_slice %21 {offsets = [2, 0], sizes = [16, 16], strides = [1, 1]} : vector<18x18xf32> to vector<16x16xf32>
    %203 = vector.broadcast %201 : f32 to vector<16x16xf32>
    %204 = arith.mulf %203, %202 : vector<16x16xf32>
    %205 = arith.addf %200, %204 : vector<16x16xf32>
    %c34 = arith.constant 34 : index
    %206 = memref.load %arg1[%c34] : memref<243xf32, #tpu.memory_space<smem>>
    %207 = vector.extract_strided_slice %21 {offsets = [2, 1], sizes = [16, 16], strides = [1, 1]} : vector<18x18xf32> to vector<16x16xf32>
    %208 = vector.broadcast %206 : f32 to vector<16x16xf32>
    %209 = arith.mulf %208, %207 : vector<16x16xf32>
    %210 = arith.addf %205, %209 : vector<16x16xf32>
    %c35 = arith.constant 35 : index
    %211 = memref.load %arg1[%c35] : memref<243xf32, #tpu.memory_space<smem>>
    %212 = vector.extract_strided_slice %21 {offsets = [2, 2], sizes = [16, 16], strides = [1, 1]} : vector<18x18xf32> to vector<16x16xf32>
    %213 = vector.broadcast %211 : f32 to vector<16x16xf32>
    %214 = arith.mulf %213, %212 : vector<16x16xf32>
    %215 = arith.addf %210, %214 : vector<16x16xf32>
    %c36 = arith.constant 36 : index
    %216 = memref.load %arg1[%c36] : memref<243xf32, #tpu.memory_space<smem>>
    %217 = vector.extract_strided_slice %23 {offsets = [0, 0], sizes = [16, 16], strides = [1, 1]} : vector<18x18xf32> to vector<16x16xf32>
    %218 = vector.broadcast %216 : f32 to vector<16x16xf32>
    %219 = arith.mulf %218, %217 : vector<16x16xf32>
    %220 = arith.addf %215, %219 : vector<16x16xf32>
    %c37 = arith.constant 37 : index
    %221 = memref.load %arg1[%c37] : memref<243xf32, #tpu.memory_space<smem>>
    %222 = vector.extract_strided_slice %23 {offsets = [0, 1], sizes = [16, 16], strides = [1, 1]} : vector<18x18xf32> to vector<16x16xf32>
    %223 = vector.broadcast %221 : f32 to vector<16x16xf32>
    %224 = arith.mulf %223, %222 : vector<16x16xf32>
    %225 = arith.addf %220, %224 : vector<16x16xf32>
    %c38 = arith.constant 38 : index
    %226 = memref.load %arg1[%c38] : memref<243xf32, #tpu.memory_space<smem>>
    %227 = vector.extract_strided_slice %23 {offsets = [0, 2], sizes = [16, 16], strides = [1, 1]} : vector<18x18xf32> to vector<16x16xf32>
    %228 = vector.broadcast %226 : f32 to vector<16x16xf32>
    %229 = arith.mulf %228, %227 : vector<16x16xf32>
    %230 = arith.addf %225, %229 : vector<16x16xf32>
    %c39 = arith.constant 39 : index
    %231 = memref.load %arg1[%c39] : memref<243xf32, #tpu.memory_space<smem>>
    %232 = vector.extract_strided_slice %23 {offsets = [1, 0], sizes = [16, 16], strides = [1, 1]} : vector<18x18xf32> to vector<16x16xf32>
    %233 = vector.broadcast %231 : f32 to vector<16x16xf32>
    %234 = arith.mulf %233, %232 : vector<16x16xf32>
    %235 = arith.addf %230, %234 : vector<16x16xf32>
    %c40 = arith.constant 40 : index
    %236 = memref.load %arg1[%c40] : memref<243xf32, #tpu.memory_space<smem>>
    %237 = vector.extract_strided_slice %23 {offsets = [1, 1], sizes = [16, 16], strides = [1, 1]} : vector<18x18xf32> to vector<16x16xf32>
    %238 = vector.broadcast %236 : f32 to vector<16x16xf32>
    %239 = arith.mulf %238, %237 : vector<16x16xf32>
    %240 = arith.addf %235, %239 : vector<16x16xf32>
    %c41 = arith.constant 41 : index
    %241 = memref.load %arg1[%c41] : memref<243xf32, #tpu.memory_space<smem>>
    %242 = vector.extract_strided_slice %23 {offsets = [1, 2], sizes = [16, 16], strides = [1, 1]} : vector<18x18xf32> to vector<16x16xf32>
    %243 = vector.broadcast %241 : f32 to vector<16x16xf32>
    %244 = arith.mulf %243, %242 : vector<16x16xf32>
    %245 = arith.addf %240, %244 : vector<16x16xf32>
    %c42 = arith.constant 42 : index
    %246 = memref.load %arg1[%c42] : memref<243xf32, #tpu.memory_space<smem>>
    %247 = vector.extract_strided_slice %23 {offsets = [2, 0], sizes = [16, 16], strides = [1, 1]} : vector<18x18xf32> to vector<16x16xf32>
    %248 = vector.broadcast %246 : f32 to vector<16x16xf32>
    %249 = arith.mulf %248, %247 : vector<16x16xf32>
    %250 = arith.addf %245, %249 : vector<16x16xf32>
    %c43 = arith.constant 43 : index
    %251 = memref.load %arg1[%c43] : memref<243xf32, #tpu.memory_space<smem>>
    %252 = vector.extract_strided_slice %23 {offsets = [2, 1], sizes = [16, 16], strides = [1, 1]} : vector<18x18xf32> to vector<16x16xf32>
    %253 = vector.broadcast %251 : f32 to vector<16x16xf32>
    %254 = arith.mulf %253, %252 : vector<16x16xf32>
    %255 = arith.addf %250, %254 : vector<16x16xf32>
    %c44 = arith.constant 44 : index
    %256 = memref.load %arg1[%c44] : memref<243xf32, #tpu.memory_space<smem>>
    %257 = vector.extract_strided_slice %23 {offsets = [2, 2], sizes = [16, 16], strides = [1, 1]} : vector<18x18xf32> to vector<16x16xf32>
    %258 = vector.broadcast %256 : f32 to vector<16x16xf32>
    %259 = arith.mulf %258, %257 : vector<16x16xf32>
    %260 = arith.addf %255, %259 : vector<16x16xf32>
    %c45 = arith.constant 45 : index
    %261 = memref.load %arg1[%c45] : memref<243xf32, #tpu.memory_space<smem>>
    %262 = vector.extract_strided_slice %25 {offsets = [0, 0], sizes = [16, 16], strides = [1, 1]} : vector<18x18xf32> to vector<16x16xf32>
    %263 = vector.broadcast %261 : f32 to vector<16x16xf32>
    %264 = arith.mulf %263, %262 : vector<16x16xf32>
    %265 = arith.addf %260, %264 : vector<16x16xf32>
    %c46 = arith.constant 46 : index
    %266 = memref.load %arg1[%c46] : memref<243xf32, #tpu.memory_space<smem>>
    %267 = vector.extract_strided_slice %25 {offsets = [0, 1], sizes = [16, 16], strides = [1, 1]} : vector<18x18xf32> to vector<16x16xf32>
    %268 = vector.broadcast %266 : f32 to vector<16x16xf32>
    %269 = arith.mulf %268, %267 : vector<16x16xf32>
    %270 = arith.addf %265, %269 : vector<16x16xf32>
    %c47 = arith.constant 47 : index
    %271 = memref.load %arg1[%c47] : memref<243xf32, #tpu.memory_space<smem>>
    %272 = vector.extract_strided_slice %25 {offsets = [0, 2], sizes = [16, 16], strides = [1, 1]} : vector<18x18xf32> to vector<16x16xf32>
    %273 = vector.broadcast %271 : f32 to vector<16x16xf32>
    %274 = arith.mulf %273, %272 : vector<16x16xf32>
    %275 = arith.addf %270, %274 : vector<16x16xf32>
    %c48 = arith.constant 48 : index
    %276 = memref.load %arg1[%c48] : memref<243xf32, #tpu.memory_space<smem>>
    %277 = vector.extract_strided_slice %25 {offsets = [1, 0], sizes = [16, 16], strides = [1, 1]} : vector<18x18xf32> to vector<16x16xf32>
    %278 = vector.broadcast %276 : f32 to vector<16x16xf32>
    %279 = arith.mulf %278, %277 : vector<16x16xf32>
    %280 = arith.addf %275, %279 : vector<16x16xf32>
    %c49 = arith.constant 49 : index
    %281 = memref.load %arg1[%c49] : memref<243xf32, #tpu.memory_space<smem>>
    %282 = vector.extract_strided_slice %25 {offsets = [1, 1], sizes = [16, 16], strides = [1, 1]} : vector<18x18xf32> to vector<16x16xf32>
    %283 = vector.broadcast %281 : f32 to vector<16x16xf32>
    %284 = arith.mulf %283, %282 : vector<16x16xf32>
    %285 = arith.addf %280, %284 : vector<16x16xf32>
    %c50 = arith.constant 50 : index
    %286 = memref.load %arg1[%c50] : memref<243xf32, #tpu.memory_space<smem>>
    %287 = vector.extract_strided_slice %25 {offsets = [1, 2], sizes = [16, 16], strides = [1, 1]} : vector<18x18xf32> to vector<16x16xf32>
    %288 = vector.broadcast %286 : f32 to vector<16x16xf32>
    %289 = arith.mulf %288, %287 : vector<16x16xf32>
    %290 = arith.addf %285, %289 : vector<16x16xf32>
    %c51 = arith.constant 51 : index
    %291 = memref.load %arg1[%c51] : memref<243xf32, #tpu.memory_space<smem>>
    %292 = vector.extract_strided_slice %25 {offsets = [2, 0], sizes = [16, 16], strides = [1, 1]} : vector<18x18xf32> to vector<16x16xf32>
    %293 = vector.broadcast %291 : f32 to vector<16x16xf32>
    %294 = arith.mulf %293, %292 : vector<16x16xf32>
    %295 = arith.addf %290, %294 : vector<16x16xf32>
    %c52 = arith.constant 52 : index
    %296 = memref.load %arg1[%c52] : memref<243xf32, #tpu.memory_space<smem>>
    %297 = vector.extract_strided_slice %25 {offsets = [2, 1], sizes = [16, 16], strides = [1, 1]} : vector<18x18xf32> to vector<16x16xf32>
    %298 = vector.broadcast %296 : f32 to vector<16x16xf32>
    %299 = arith.mulf %298, %297 : vector<16x16xf32>
    %300 = arith.addf %295, %299 : vector<16x16xf32>
    %c53 = arith.constant 53 : index
    %301 = memref.load %arg1[%c53] : memref<243xf32, #tpu.memory_space<smem>>
    %302 = vector.extract_strided_slice %25 {offsets = [2, 2], sizes = [16, 16], strides = [1, 1]} : vector<18x18xf32> to vector<16x16xf32>
    %303 = vector.broadcast %301 : f32 to vector<16x16xf32>
    %304 = arith.mulf %303, %302 : vector<16x16xf32>
    %305 = arith.addf %300, %304 : vector<16x16xf32>
    %c0_35 = arith.constant 0 : index
    %c1_36 = arith.constant 1 : index
    %306 = memref.load %arg2[%c0_35, %c1_36] : memref<6x3xf32, #tpu.memory_space<smem>>
    %307 = vector.broadcast %306 : f32 to vector<16x16xf32>
    %308 = arith.mulf %305, %307 : vector<16x16xf32>
    %c1_37 = arith.constant 1 : index
    %c1_38 = arith.constant 1 : index
    %309 = memref.load %arg2[%c1_37, %c1_38] : memref<6x3xf32, #tpu.memory_space<smem>>
    %310 = vector.broadcast %309 : f32 to vector<16x16xf32>
    %311 = arith.addf %308, %310 : vector<16x16xf32>
    %cst_39 = arith.constant 0.000000e+00 : f32
    %312 = vector.broadcast %cst_39 : f32 to vector<16x16xf32>
    %313 = arith.maximumf %311, %312 : vector<16x16xf32>
    %cst_40 = arith.constant 0.000000e+00 : f32
    %314 = vector.broadcast %cst_40 : f32 to vector<16x16xf32>
    %c54 = arith.constant 54 : index
    %315 = memref.load %arg1[%c54] : memref<243xf32, #tpu.memory_space<smem>>
    %316 = vector.extract_strided_slice %21 {offsets = [0, 0], sizes = [16, 16], strides = [1, 1]} : vector<18x18xf32> to vector<16x16xf32>
    %317 = vector.broadcast %315 : f32 to vector<16x16xf32>
    %318 = arith.mulf %317, %316 : vector<16x16xf32>
    %319 = arith.addf %314, %318 : vector<16x16xf32>
    %c55 = arith.constant 55 : index
    %320 = memref.load %arg1[%c55] : memref<243xf32, #tpu.memory_space<smem>>
    %321 = vector.extract_strided_slice %21 {offsets = [0, 1], sizes = [16, 16], strides = [1, 1]} : vector<18x18xf32> to vector<16x16xf32>
    %322 = vector.broadcast %320 : f32 to vector<16x16xf32>
    %323 = arith.mulf %322, %321 : vector<16x16xf32>
    %324 = arith.addf %319, %323 : vector<16x16xf32>
    %c56 = arith.constant 56 : index
    %325 = memref.load %arg1[%c56] : memref<243xf32, #tpu.memory_space<smem>>
    %326 = vector.extract_strided_slice %21 {offsets = [0, 2], sizes = [16, 16], strides = [1, 1]} : vector<18x18xf32> to vector<16x16xf32>
    %327 = vector.broadcast %325 : f32 to vector<16x16xf32>
    %328 = arith.mulf %327, %326 : vector<16x16xf32>
    %329 = arith.addf %324, %328 : vector<16x16xf32>
    %c57 = arith.constant 57 : index
    %330 = memref.load %arg1[%c57] : memref<243xf32, #tpu.memory_space<smem>>
    %331 = vector.extract_strided_slice %21 {offsets = [1, 0], sizes = [16, 16], strides = [1, 1]} : vector<18x18xf32> to vector<16x16xf32>
    %332 = vector.broadcast %330 : f32 to vector<16x16xf32>
    %333 = arith.mulf %332, %331 : vector<16x16xf32>
    %334 = arith.addf %329, %333 : vector<16x16xf32>
    %c58 = arith.constant 58 : index
    %335 = memref.load %arg1[%c58] : memref<243xf32, #tpu.memory_space<smem>>
    %336 = vector.extract_strided_slice %21 {offsets = [1, 1], sizes = [16, 16], strides = [1, 1]} : vector<18x18xf32> to vector<16x16xf32>
    %337 = vector.broadcast %335 : f32 to vector<16x16xf32>
    %338 = arith.mulf %337, %336 : vector<16x16xf32>
    %339 = arith.addf %334, %338 : vector<16x16xf32>
    %c59 = arith.constant 59 : index
    %340 = memref.load %arg1[%c59] : memref<243xf32, #tpu.memory_space<smem>>
    %341 = vector.extract_strided_slice %21 {offsets = [1, 2], sizes = [16, 16], strides = [1, 1]} : vector<18x18xf32> to vector<16x16xf32>
    %342 = vector.broadcast %340 : f32 to vector<16x16xf32>
    %343 = arith.mulf %342, %341 : vector<16x16xf32>
    %344 = arith.addf %339, %343 : vector<16x16xf32>
    %c60 = arith.constant 60 : index
    %345 = memref.load %arg1[%c60] : memref<243xf32, #tpu.memory_space<smem>>
    %346 = vector.extract_strided_slice %21 {offsets = [2, 0], sizes = [16, 16], strides = [1, 1]} : vector<18x18xf32> to vector<16x16xf32>
    %347 = vector.broadcast %345 : f32 to vector<16x16xf32>
    %348 = arith.mulf %347, %346 : vector<16x16xf32>
    %349 = arith.addf %344, %348 : vector<16x16xf32>
    %c61 = arith.constant 61 : index
    %350 = memref.load %arg1[%c61] : memref<243xf32, #tpu.memory_space<smem>>
    %351 = vector.extract_strided_slice %21 {offsets = [2, 1], sizes = [16, 16], strides = [1, 1]} : vector<18x18xf32> to vector<16x16xf32>
    %352 = vector.broadcast %350 : f32 to vector<16x16xf32>
    %353 = arith.mulf %352, %351 : vector<16x16xf32>
    %354 = arith.addf %349, %353 : vector<16x16xf32>
    %c62 = arith.constant 62 : index
    %355 = memref.load %arg1[%c62] : memref<243xf32, #tpu.memory_space<smem>>
    %356 = vector.extract_strided_slice %21 {offsets = [2, 2], sizes = [16, 16], strides = [1, 1]} : vector<18x18xf32> to vector<16x16xf32>
    %357 = vector.broadcast %355 : f32 to vector<16x16xf32>
    %358 = arith.mulf %357, %356 : vector<16x16xf32>
    %359 = arith.addf %354, %358 : vector<16x16xf32>
    %c63 = arith.constant 63 : index
    %360 = memref.load %arg1[%c63] : memref<243xf32, #tpu.memory_space<smem>>
    %361 = vector.extract_strided_slice %23 {offsets = [0, 0], sizes = [16, 16], strides = [1, 1]} : vector<18x18xf32> to vector<16x16xf32>
    %362 = vector.broadcast %360 : f32 to vector<16x16xf32>
    %363 = arith.mulf %362, %361 : vector<16x16xf32>
    %364 = arith.addf %359, %363 : vector<16x16xf32>
    %c64 = arith.constant 64 : index
    %365 = memref.load %arg1[%c64] : memref<243xf32, #tpu.memory_space<smem>>
    %366 = vector.extract_strided_slice %23 {offsets = [0, 1], sizes = [16, 16], strides = [1, 1]} : vector<18x18xf32> to vector<16x16xf32>
    %367 = vector.broadcast %365 : f32 to vector<16x16xf32>
    %368 = arith.mulf %367, %366 : vector<16x16xf32>
    %369 = arith.addf %364, %368 : vector<16x16xf32>
    %c65 = arith.constant 65 : index
    %370 = memref.load %arg1[%c65] : memref<243xf32, #tpu.memory_space<smem>>
    %371 = vector.extract_strided_slice %23 {offsets = [0, 2], sizes = [16, 16], strides = [1, 1]} : vector<18x18xf32> to vector<16x16xf32>
    %372 = vector.broadcast %370 : f32 to vector<16x16xf32>
    %373 = arith.mulf %372, %371 : vector<16x16xf32>
    %374 = arith.addf %369, %373 : vector<16x16xf32>
    %c66 = arith.constant 66 : index
    %375 = memref.load %arg1[%c66] : memref<243xf32, #tpu.memory_space<smem>>
    %376 = vector.extract_strided_slice %23 {offsets = [1, 0], sizes = [16, 16], strides = [1, 1]} : vector<18x18xf32> to vector<16x16xf32>
    %377 = vector.broadcast %375 : f32 to vector<16x16xf32>
    %378 = arith.mulf %377, %376 : vector<16x16xf32>
    %379 = arith.addf %374, %378 : vector<16x16xf32>
    %c67 = arith.constant 67 : index
    %380 = memref.load %arg1[%c67] : memref<243xf32, #tpu.memory_space<smem>>
    %381 = vector.extract_strided_slice %23 {offsets = [1, 1], sizes = [16, 16], strides = [1, 1]} : vector<18x18xf32> to vector<16x16xf32>
    %382 = vector.broadcast %380 : f32 to vector<16x16xf32>
    %383 = arith.mulf %382, %381 : vector<16x16xf32>
    %384 = arith.addf %379, %383 : vector<16x16xf32>
    %c68 = arith.constant 68 : index
    %385 = memref.load %arg1[%c68] : memref<243xf32, #tpu.memory_space<smem>>
    %386 = vector.extract_strided_slice %23 {offsets = [1, 2], sizes = [16, 16], strides = [1, 1]} : vector<18x18xf32> to vector<16x16xf32>
    %387 = vector.broadcast %385 : f32 to vector<16x16xf32>
    %388 = arith.mulf %387, %386 : vector<16x16xf32>
    %389 = arith.addf %384, %388 : vector<16x16xf32>
    %c69 = arith.constant 69 : index
    %390 = memref.load %arg1[%c69] : memref<243xf32, #tpu.memory_space<smem>>
    %391 = vector.extract_strided_slice %23 {offsets = [2, 0], sizes = [16, 16], strides = [1, 1]} : vector<18x18xf32> to vector<16x16xf32>
    %392 = vector.broadcast %390 : f32 to vector<16x16xf32>
    %393 = arith.mulf %392, %391 : vector<16x16xf32>
    %394 = arith.addf %389, %393 : vector<16x16xf32>
    %c70 = arith.constant 70 : index
    %395 = memref.load %arg1[%c70] : memref<243xf32, #tpu.memory_space<smem>>
    %396 = vector.extract_strided_slice %23 {offsets = [2, 1], sizes = [16, 16], strides = [1, 1]} : vector<18x18xf32> to vector<16x16xf32>
    %397 = vector.broadcast %395 : f32 to vector<16x16xf32>
    %398 = arith.mulf %397, %396 : vector<16x16xf32>
    %399 = arith.addf %394, %398 : vector<16x16xf32>
    %c71 = arith.constant 71 : index
    %400 = memref.load %arg1[%c71] : memref<243xf32, #tpu.memory_space<smem>>
    %401 = vector.extract_strided_slice %23 {offsets = [2, 2], sizes = [16, 16], strides = [1, 1]} : vector<18x18xf32> to vector<16x16xf32>
    %402 = vector.broadcast %400 : f32 to vector<16x16xf32>
    %403 = arith.mulf %402, %401 : vector<16x16xf32>
    %404 = arith.addf %399, %403 : vector<16x16xf32>
    %c72 = arith.constant 72 : index
    %405 = memref.load %arg1[%c72] : memref<243xf32, #tpu.memory_space<smem>>
    %406 = vector.extract_strided_slice %25 {offsets = [0, 0], sizes = [16, 16], strides = [1, 1]} : vector<18x18xf32> to vector<16x16xf32>
    %407 = vector.broadcast %405 : f32 to vector<16x16xf32>
    %408 = arith.mulf %407, %406 : vector<16x16xf32>
    %409 = arith.addf %404, %408 : vector<16x16xf32>
    %c73 = arith.constant 73 : index
    %410 = memref.load %arg1[%c73] : memref<243xf32, #tpu.memory_space<smem>>
    %411 = vector.extract_strided_slice %25 {offsets = [0, 1], sizes = [16, 16], strides = [1, 1]} : vector<18x18xf32> to vector<16x16xf32>
    %412 = vector.broadcast %410 : f32 to vector<16x16xf32>
    %413 = arith.mulf %412, %411 : vector<16x16xf32>
    %414 = arith.addf %409, %413 : vector<16x16xf32>
    %c74 = arith.constant 74 : index
    %415 = memref.load %arg1[%c74] : memref<243xf32, #tpu.memory_space<smem>>
    %416 = vector.extract_strided_slice %25 {offsets = [0, 2], sizes = [16, 16], strides = [1, 1]} : vector<18x18xf32> to vector<16x16xf32>
    %417 = vector.broadcast %415 : f32 to vector<16x16xf32>
    %418 = arith.mulf %417, %416 : vector<16x16xf32>
    %419 = arith.addf %414, %418 : vector<16x16xf32>
    %c75 = arith.constant 75 : index
    %420 = memref.load %arg1[%c75] : memref<243xf32, #tpu.memory_space<smem>>
    %421 = vector.extract_strided_slice %25 {offsets = [1, 0], sizes = [16, 16], strides = [1, 1]} : vector<18x18xf32> to vector<16x16xf32>
    %422 = vector.broadcast %420 : f32 to vector<16x16xf32>
    %423 = arith.mulf %422, %421 : vector<16x16xf32>
    %424 = arith.addf %419, %423 : vector<16x16xf32>
    %c76 = arith.constant 76 : index
    %425 = memref.load %arg1[%c76] : memref<243xf32, #tpu.memory_space<smem>>
    %426 = vector.extract_strided_slice %25 {offsets = [1, 1], sizes = [16, 16], strides = [1, 1]} : vector<18x18xf32> to vector<16x16xf32>
    %427 = vector.broadcast %425 : f32 to vector<16x16xf32>
    %428 = arith.mulf %427, %426 : vector<16x16xf32>
    %429 = arith.addf %424, %428 : vector<16x16xf32>
    %c77 = arith.constant 77 : index
    %430 = memref.load %arg1[%c77] : memref<243xf32, #tpu.memory_space<smem>>
    %431 = vector.extract_strided_slice %25 {offsets = [1, 2], sizes = [16, 16], strides = [1, 1]} : vector<18x18xf32> to vector<16x16xf32>
    %432 = vector.broadcast %430 : f32 to vector<16x16xf32>
    %433 = arith.mulf %432, %431 : vector<16x16xf32>
    %434 = arith.addf %429, %433 : vector<16x16xf32>
    %c78 = arith.constant 78 : index
    %435 = memref.load %arg1[%c78] : memref<243xf32, #tpu.memory_space<smem>>
    %436 = vector.extract_strided_slice %25 {offsets = [2, 0], sizes = [16, 16], strides = [1, 1]} : vector<18x18xf32> to vector<16x16xf32>
    %437 = vector.broadcast %435 : f32 to vector<16x16xf32>
    %438 = arith.mulf %437, %436 : vector<16x16xf32>
    %439 = arith.addf %434, %438 : vector<16x16xf32>
    %c79 = arith.constant 79 : index
    %440 = memref.load %arg1[%c79] : memref<243xf32, #tpu.memory_space<smem>>
    %441 = vector.extract_strided_slice %25 {offsets = [2, 1], sizes = [16, 16], strides = [1, 1]} : vector<18x18xf32> to vector<16x16xf32>
    %442 = vector.broadcast %440 : f32 to vector<16x16xf32>
    %443 = arith.mulf %442, %441 : vector<16x16xf32>
    %444 = arith.addf %439, %443 : vector<16x16xf32>
    %c80 = arith.constant 80 : index
    %445 = memref.load %arg1[%c80] : memref<243xf32, #tpu.memory_space<smem>>
    %446 = vector.extract_strided_slice %25 {offsets = [2, 2], sizes = [16, 16], strides = [1, 1]} : vector<18x18xf32> to vector<16x16xf32>
    %447 = vector.broadcast %445 : f32 to vector<16x16xf32>
    %448 = arith.mulf %447, %446 : vector<16x16xf32>
    %449 = arith.addf %444, %448 : vector<16x16xf32>
    %c0_41 = arith.constant 0 : index
    %c2_42 = arith.constant 2 : index
    %450 = memref.load %arg2[%c0_41, %c2_42] : memref<6x3xf32, #tpu.memory_space<smem>>
    %451 = vector.broadcast %450 : f32 to vector<16x16xf32>
    %452 = arith.mulf %449, %451 : vector<16x16xf32>
    %c1_43 = arith.constant 1 : index
    %c2_44 = arith.constant 2 : index
    %453 = memref.load %arg2[%c1_43, %c2_44] : memref<6x3xf32, #tpu.memory_space<smem>>
    %454 = vector.broadcast %453 : f32 to vector<16x16xf32>
    %455 = arith.addf %452, %454 : vector<16x16xf32>
    %cst_45 = arith.constant 0.000000e+00 : f32
    %456 = vector.broadcast %cst_45 : f32 to vector<16x16xf32>
    %457 = arith.maximumf %455, %456 : vector<16x16xf32>
    %c0_46 = arith.constant 0 : index
    %c1_47 = arith.constant 1 : index
    %c1_48 = arith.constant 1 : index
    %458 = vector.load %arg6[%c0_46, %c1_47, %c1_48] : memref<3x18x18xf32, #tpu.memory_space<vmem>>, vector<1x16x16xf32>
    %459 = vector.shape_cast %458 : vector<1x16x16xf32> to vector<16x16xf32>
    %460 = vector.shape_cast %169 : vector<16x16xf32> to vector<1x16x16xf32>
    tpu.vector_store %arg6[%c0_46, %c1_47, %c1_48], %460 {strides = array<i32>} : memref<3x18x18xf32, #tpu.memory_space<vmem>>, vector<1x16x16xf32>,
    %c1_49 = arith.constant 1 : index
    %c1_50 = arith.constant 1 : index
    %c1_51 = arith.constant 1 : index
    %461 = vector.load %arg6[%c1_49, %c1_50, %c1_51] : memref<3x18x18xf32, #tpu.memory_space<vmem>>, vector<1x16x16xf32>
    %462 = vector.shape_cast %461 : vector<1x16x16xf32> to vector<16x16xf32>
    %463 = vector.shape_cast %313 : vector<16x16xf32> to vector<1x16x16xf32>
    tpu.vector_store %arg6[%c1_49, %c1_50, %c1_51], %463 {strides = array<i32>} : memref<3x18x18xf32, #tpu.memory_space<vmem>>, vector<1x16x16xf32>,
    %c2_52 = arith.constant 2 : index
    %c1_53 = arith.constant 1 : index
    %c1_54 = arith.constant 1 : index
    %464 = vector.load %arg6[%c2_52, %c1_53, %c1_54] : memref<3x18x18xf32, #tpu.memory_space<vmem>>, vector<1x16x16xf32>
    %465 = vector.shape_cast %464 : vector<1x16x16xf32> to vector<16x16xf32>
    %466 = vector.shape_cast %457 : vector<16x16xf32> to vector<1x16x16xf32>
    tpu.vector_store %arg6[%c2_52, %c1_53, %c1_54], %466 {strides = array<i32>} : memref<3x18x18xf32, #tpu.memory_space<vmem>>, vector<1x16x16xf32>,
    %c0_55 = arith.constant 0 : index
    %c0_56 = arith.constant 0 : index
    %c0_57 = arith.constant 0 : index
    %467 = vector.load %arg6[%c0_55, %c0_56, %c0_57] : memref<3x18x18xf32, #tpu.memory_space<vmem>>, vector<1x18x18xf32>
    %468 = vector.shape_cast %467 : vector<1x18x18xf32> to vector<18x18xf32>
    %c1_58 = arith.constant 1 : index
    %c0_59 = arith.constant 0 : index
    %c0_60 = arith.constant 0 : index
    %469 = vector.load %arg6[%c1_58, %c0_59, %c0_60] : memref<3x18x18xf32, #tpu.memory_space<vmem>>, vector<1x18x18xf32>
    %470 = vector.shape_cast %469 : vector<1x18x18xf32> to vector<18x18xf32>
    %c2_61 = arith.constant 2 : index
    %c0_62 = arith.constant 0 : index
    %c0_63 = arith.constant 0 : index
    %471 = vector.load %arg6[%c2_61, %c0_62, %c0_63] : memref<3x18x18xf32, #tpu.memory_space<vmem>>, vector<1x18x18xf32>
    %472 = vector.shape_cast %471 : vector<1x18x18xf32> to vector<18x18xf32>
    %cst_64 = arith.constant 0.000000e+00 : f32
    %473 = vector.broadcast %cst_64 : f32 to vector<16x16xf32>
    %c81 = arith.constant 81 : index
    %474 = memref.load %arg1[%c81] : memref<243xf32, #tpu.memory_space<smem>>
    %475 = vector.extract_strided_slice %468 {offsets = [0, 0], sizes = [16, 16], strides = [1, 1]} : vector<18x18xf32> to vector<16x16xf32>
    %476 = vector.broadcast %474 : f32 to vector<16x16xf32>
    %477 = arith.mulf %476, %475 : vector<16x16xf32>
    %478 = arith.addf %473, %477 : vector<16x16xf32>
    %c82 = arith.constant 82 : index
    %479 = memref.load %arg1[%c82] : memref<243xf32, #tpu.memory_space<smem>>
    %480 = vector.extract_strided_slice %468 {offsets = [0, 1], sizes = [16, 16], strides = [1, 1]} : vector<18x18xf32> to vector<16x16xf32>
    %481 = vector.broadcast %479 : f32 to vector<16x16xf32>
    %482 = arith.mulf %481, %480 : vector<16x16xf32>
    %483 = arith.addf %478, %482 : vector<16x16xf32>
    %c83 = arith.constant 83 : index
    %484 = memref.load %arg1[%c83] : memref<243xf32, #tpu.memory_space<smem>>
    %485 = vector.extract_strided_slice %468 {offsets = [0, 2], sizes = [16, 16], strides = [1, 1]} : vector<18x18xf32> to vector<16x16xf32>
    %486 = vector.broadcast %484 : f32 to vector<16x16xf32>
    %487 = arith.mulf %486, %485 : vector<16x16xf32>
    %488 = arith.addf %483, %487 : vector<16x16xf32>
    %c84 = arith.constant 84 : index
    %489 = memref.load %arg1[%c84] : memref<243xf32, #tpu.memory_space<smem>>
    %490 = vector.extract_strided_slice %468 {offsets = [1, 0], sizes = [16, 16], strides = [1, 1]} : vector<18x18xf32> to vector<16x16xf32>
    %491 = vector.broadcast %489 : f32 to vector<16x16xf32>
    %492 = arith.mulf %491, %490 : vector<16x16xf32>
    %493 = arith.addf %488, %492 : vector<16x16xf32>
    %c85 = arith.constant 85 : index
    %494 = memref.load %arg1[%c85] : memref<243xf32, #tpu.memory_space<smem>>
    %495 = vector.extract_strided_slice %468 {offsets = [1, 1], sizes = [16, 16], strides = [1, 1]} : vector<18x18xf32> to vector<16x16xf32>
    %496 = vector.broadcast %494 : f32 to vector<16x16xf32>
    %497 = arith.mulf %496, %495 : vector<16x16xf32>
    %498 = arith.addf %493, %497 : vector<16x16xf32>
    %c86 = arith.constant 86 : index
    %499 = memref.load %arg1[%c86] : memref<243xf32, #tpu.memory_space<smem>>
    %500 = vector.extract_strided_slice %468 {offsets = [1, 2], sizes = [16, 16], strides = [1, 1]} : vector<18x18xf32> to vector<16x16xf32>
    %501 = vector.broadcast %499 : f32 to vector<16x16xf32>
    %502 = arith.mulf %501, %500 : vector<16x16xf32>
    %503 = arith.addf %498, %502 : vector<16x16xf32>
    %c87 = arith.constant 87 : index
    %504 = memref.load %arg1[%c87] : memref<243xf32, #tpu.memory_space<smem>>
    %505 = vector.extract_strided_slice %468 {offsets = [2, 0], sizes = [16, 16], strides = [1, 1]} : vector<18x18xf32> to vector<16x16xf32>
    %506 = vector.broadcast %504 : f32 to vector<16x16xf32>
    %507 = arith.mulf %506, %505 : vector<16x16xf32>
    %508 = arith.addf %503, %507 : vector<16x16xf32>
    %c88 = arith.constant 88 : index
    %509 = memref.load %arg1[%c88] : memref<243xf32, #tpu.memory_space<smem>>
    %510 = vector.extract_strided_slice %468 {offsets = [2, 1], sizes = [16, 16], strides = [1, 1]} : vector<18x18xf32> to vector<16x16xf32>
    %511 = vector.broadcast %509 : f32 to vector<16x16xf32>
    %512 = arith.mulf %511, %510 : vector<16x16xf32>
    %513 = arith.addf %508, %512 : vector<16x16xf32>
    %c89 = arith.constant 89 : index
    %514 = memref.load %arg1[%c89] : memref<243xf32, #tpu.memory_space<smem>>
    %515 = vector.extract_strided_slice %468 {offsets = [2, 2], sizes = [16, 16], strides = [1, 1]} : vector<18x18xf32> to vector<16x16xf32>
    %516 = vector.broadcast %514 : f32 to vector<16x16xf32>
    %517 = arith.mulf %516, %515 : vector<16x16xf32>
    %518 = arith.addf %513, %517 : vector<16x16xf32>
    %c90 = arith.constant 90 : index
    %519 = memref.load %arg1[%c90] : memref<243xf32, #tpu.memory_space<smem>>
    %520 = vector.extract_strided_slice %470 {offsets = [0, 0], sizes = [16, 16], strides = [1, 1]} : vector<18x18xf32> to vector<16x16xf32>
    %521 = vector.broadcast %519 : f32 to vector<16x16xf32>
    %522 = arith.mulf %521, %520 : vector<16x16xf32>
    %523 = arith.addf %518, %522 : vector<16x16xf32>
    %c91 = arith.constant 91 : index
    %524 = memref.load %arg1[%c91] : memref<243xf32, #tpu.memory_space<smem>>
    %525 = vector.extract_strided_slice %470 {offsets = [0, 1], sizes = [16, 16], strides = [1, 1]} : vector<18x18xf32> to vector<16x16xf32>
    %526 = vector.broadcast %524 : f32 to vector<16x16xf32>
    %527 = arith.mulf %526, %525 : vector<16x16xf32>
    %528 = arith.addf %523, %527 : vector<16x16xf32>
    %c92 = arith.constant 92 : index
    %529 = memref.load %arg1[%c92] : memref<243xf32, #tpu.memory_space<smem>>
    %530 = vector.extract_strided_slice %470 {offsets = [0, 2], sizes = [16, 16], strides = [1, 1]} : vector<18x18xf32> to vector<16x16xf32>
    %531 = vector.broadcast %529 : f32 to vector<16x16xf32>
    %532 = arith.mulf %531, %530 : vector<16x16xf32>
    %533 = arith.addf %528, %532 : vector<16x16xf32>
    %c93 = arith.constant 93 : index
    %534 = memref.load %arg1[%c93] : memref<243xf32, #tpu.memory_space<smem>>
    %535 = vector.extract_strided_slice %470 {offsets = [1, 0], sizes = [16, 16], strides = [1, 1]} : vector<18x18xf32> to vector<16x16xf32>
    %536 = vector.broadcast %534 : f32 to vector<16x16xf32>
    %537 = arith.mulf %536, %535 : vector<16x16xf32>
    %538 = arith.addf %533, %537 : vector<16x16xf32>
    %c94 = arith.constant 94 : index
    %539 = memref.load %arg1[%c94] : memref<243xf32, #tpu.memory_space<smem>>
    %540 = vector.extract_strided_slice %470 {offsets = [1, 1], sizes = [16, 16], strides = [1, 1]} : vector<18x18xf32> to vector<16x16xf32>
    %541 = vector.broadcast %539 : f32 to vector<16x16xf32>
    %542 = arith.mulf %541, %540 : vector<16x16xf32>
    %543 = arith.addf %538, %542 : vector<16x16xf32>
    %c95 = arith.constant 95 : index
    %544 = memref.load %arg1[%c95] : memref<243xf32, #tpu.memory_space<smem>>
    %545 = vector.extract_strided_slice %470 {offsets = [1, 2], sizes = [16, 16], strides = [1, 1]} : vector<18x18xf32> to vector<16x16xf32>
    %546 = vector.broadcast %544 : f32 to vector<16x16xf32>
    %547 = arith.mulf %546, %545 : vector<16x16xf32>
    %548 = arith.addf %543, %547 : vector<16x16xf32>
    %c96 = arith.constant 96 : index
    %549 = memref.load %arg1[%c96] : memref<243xf32, #tpu.memory_space<smem>>
    %550 = vector.extract_strided_slice %470 {offsets = [2, 0], sizes = [16, 16], strides = [1, 1]} : vector<18x18xf32> to vector<16x16xf32>
    %551 = vector.broadcast %549 : f32 to vector<16x16xf32>
    %552 = arith.mulf %551, %550 : vector<16x16xf32>
    %553 = arith.addf %548, %552 : vector<16x16xf32>
    %c97 = arith.constant 97 : index
    %554 = memref.load %arg1[%c97] : memref<243xf32, #tpu.memory_space<smem>>
    %555 = vector.extract_strided_slice %470 {offsets = [2, 1], sizes = [16, 16], strides = [1, 1]} : vector<18x18xf32> to vector<16x16xf32>
    %556 = vector.broadcast %554 : f32 to vector<16x16xf32>
    %557 = arith.mulf %556, %555 : vector<16x16xf32>
    %558 = arith.addf %553, %557 : vector<16x16xf32>
    %c98 = arith.constant 98 : index
    %559 = memref.load %arg1[%c98] : memref<243xf32, #tpu.memory_space<smem>>
    %560 = vector.extract_strided_slice %470 {offsets = [2, 2], sizes = [16, 16], strides = [1, 1]} : vector<18x18xf32> to vector<16x16xf32>
    %561 = vector.broadcast %559 : f32 to vector<16x16xf32>
    %562 = arith.mulf %561, %560 : vector<16x16xf32>
    %563 = arith.addf %558, %562 : vector<16x16xf32>
    %c99 = arith.constant 99 : index
    %564 = memref.load %arg1[%c99] : memref<243xf32, #tpu.memory_space<smem>>
    %565 = vector.extract_strided_slice %472 {offsets = [0, 0], sizes = [16, 16], strides = [1, 1]} : vector<18x18xf32> to vector<16x16xf32>
    %566 = vector.broadcast %564 : f32 to vector<16x16xf32>
    %567 = arith.mulf %566, %565 : vector<16x16xf32>
    %568 = arith.addf %563, %567 : vector<16x16xf32>
    %c100 = arith.constant 100 : index
    %569 = memref.load %arg1[%c100] : memref<243xf32, #tpu.memory_space<smem>>
    %570 = vector.extract_strided_slice %472 {offsets = [0, 1], sizes = [16, 16], strides = [1, 1]} : vector<18x18xf32> to vector<16x16xf32>
    %571 = vector.broadcast %569 : f32 to vector<16x16xf32>
    %572 = arith.mulf %571, %570 : vector<16x16xf32>
    %573 = arith.addf %568, %572 : vector<16x16xf32>
    %c101 = arith.constant 101 : index
    %574 = memref.load %arg1[%c101] : memref<243xf32, #tpu.memory_space<smem>>
    %575 = vector.extract_strided_slice %472 {offsets = [0, 2], sizes = [16, 16], strides = [1, 1]} : vector<18x18xf32> to vector<16x16xf32>
    %576 = vector.broadcast %574 : f32 to vector<16x16xf32>
    %577 = arith.mulf %576, %575 : vector<16x16xf32>
    %578 = arith.addf %573, %577 : vector<16x16xf32>
    %c102 = arith.constant 102 : index
    %579 = memref.load %arg1[%c102] : memref<243xf32, #tpu.memory_space<smem>>
    %580 = vector.extract_strided_slice %472 {offsets = [1, 0], sizes = [16, 16], strides = [1, 1]} : vector<18x18xf32> to vector<16x16xf32>
    %581 = vector.broadcast %579 : f32 to vector<16x16xf32>
    %582 = arith.mulf %581, %580 : vector<16x16xf32>
    %583 = arith.addf %578, %582 : vector<16x16xf32>
    %c103 = arith.constant 103 : index
    %584 = memref.load %arg1[%c103] : memref<243xf32, #tpu.memory_space<smem>>
    %585 = vector.extract_strided_slice %472 {offsets = [1, 1], sizes = [16, 16], strides = [1, 1]} : vector<18x18xf32> to vector<16x16xf32>
    %586 = vector.broadcast %584 : f32 to vector<16x16xf32>
    %587 = arith.mulf %586, %585 : vector<16x16xf32>
    %588 = arith.addf %583, %587 : vector<16x16xf32>
    %c104 = arith.constant 104 : index
    %589 = memref.load %arg1[%c104] : memref<243xf32, #tpu.memory_space<smem>>
    %590 = vector.extract_strided_slice %472 {offsets = [1, 2], sizes = [16, 16], strides = [1, 1]} : vector<18x18xf32> to vector<16x16xf32>
    %591 = vector.broadcast %589 : f32 to vector<16x16xf32>
    %592 = arith.mulf %591, %590 : vector<16x16xf32>
    %593 = arith.addf %588, %592 : vector<16x16xf32>
    %c105 = arith.constant 105 : index
    %594 = memref.load %arg1[%c105] : memref<243xf32, #tpu.memory_space<smem>>
    %595 = vector.extract_strided_slice %472 {offsets = [2, 0], sizes = [16, 16], strides = [1, 1]} : vector<18x18xf32> to vector<16x16xf32>
    %596 = vector.broadcast %594 : f32 to vector<16x16xf32>
    %597 = arith.mulf %596, %595 : vector<16x16xf32>
    %598 = arith.addf %593, %597 : vector<16x16xf32>
    %c106 = arith.constant 106 : index
    %599 = memref.load %arg1[%c106] : memref<243xf32, #tpu.memory_space<smem>>
    %600 = vector.extract_strided_slice %472 {offsets = [2, 1], sizes = [16, 16], strides = [1, 1]} : vector<18x18xf32> to vector<16x16xf32>
    %601 = vector.broadcast %599 : f32 to vector<16x16xf32>
    %602 = arith.mulf %601, %600 : vector<16x16xf32>
    %603 = arith.addf %598, %602 : vector<16x16xf32>
    %c107 = arith.constant 107 : index
    %604 = memref.load %arg1[%c107] : memref<243xf32, #tpu.memory_space<smem>>
    %605 = vector.extract_strided_slice %472 {offsets = [2, 2], sizes = [16, 16], strides = [1, 1]} : vector<18x18xf32> to vector<16x16xf32>
    %606 = vector.broadcast %604 : f32 to vector<16x16xf32>
    %607 = arith.mulf %606, %605 : vector<16x16xf32>
    %608 = arith.addf %603, %607 : vector<16x16xf32>
    %c2_65 = arith.constant 2 : index
    %c0_66 = arith.constant 0 : index
    %609 = memref.load %arg2[%c2_65, %c0_66] : memref<6x3xf32, #tpu.memory_space<smem>>
    %610 = vector.broadcast %609 : f32 to vector<16x16xf32>
    %611 = arith.mulf %608, %610 : vector<16x16xf32>
    %c3_67 = arith.constant 3 : index
    %c0_68 = arith.constant 0 : index
    %612 = memref.load %arg2[%c3_67, %c0_68] : memref<6x3xf32, #tpu.memory_space<smem>>
    %613 = vector.broadcast %612 : f32 to vector<16x16xf32>
    %614 = arith.addf %611, %613 : vector<16x16xf32>
    %cst_69 = arith.constant 0.000000e+00 : f32
    %615 = vector.broadcast %cst_69 : f32 to vector<16x16xf32>
    %616 = arith.maximumf %614, %615 : vector<16x16xf32>
    %cst_70 = arith.constant 0.000000e+00 : f32
    %617 = vector.broadcast %cst_70 : f32 to vector<16x16xf32>
    %c108 = arith.constant 108 : index
    %618 = memref.load %arg1[%c108] : memref<243xf32, #tpu.memory_space<smem>>
    %619 = vector.extract_strided_slice %468 {offsets = [0, 0], sizes = [16, 16], strides = [1, 1]} : vector<18x18xf32> to vector<16x16xf32>
    %620 = vector.broadcast %618 : f32 to vector<16x16xf32>
    %621 = arith.mulf %620, %619 : vector<16x16xf32>
    %622 = arith.addf %617, %621 : vector<16x16xf32>
    %c109 = arith.constant 109 : index
    %623 = memref.load %arg1[%c109] : memref<243xf32, #tpu.memory_space<smem>>
    %624 = vector.extract_strided_slice %468 {offsets = [0, 1], sizes = [16, 16], strides = [1, 1]} : vector<18x18xf32> to vector<16x16xf32>
    %625 = vector.broadcast %623 : f32 to vector<16x16xf32>
    %626 = arith.mulf %625, %624 : vector<16x16xf32>
    %627 = arith.addf %622, %626 : vector<16x16xf32>
    %c110 = arith.constant 110 : index
    %628 = memref.load %arg1[%c110] : memref<243xf32, #tpu.memory_space<smem>>
    %629 = vector.extract_strided_slice %468 {offsets = [0, 2], sizes = [16, 16], strides = [1, 1]} : vector<18x18xf32> to vector<16x16xf32>
    %630 = vector.broadcast %628 : f32 to vector<16x16xf32>
    %631 = arith.mulf %630, %629 : vector<16x16xf32>
    %632 = arith.addf %627, %631 : vector<16x16xf32>
    %c111 = arith.constant 111 : index
    %633 = memref.load %arg1[%c111] : memref<243xf32, #tpu.memory_space<smem>>
    %634 = vector.extract_strided_slice %468 {offsets = [1, 0], sizes = [16, 16], strides = [1, 1]} : vector<18x18xf32> to vector<16x16xf32>
    %635 = vector.broadcast %633 : f32 to vector<16x16xf32>
    %636 = arith.mulf %635, %634 : vector<16x16xf32>
    %637 = arith.addf %632, %636 : vector<16x16xf32>
    %c112 = arith.constant 112 : index
    %638 = memref.load %arg1[%c112] : memref<243xf32, #tpu.memory_space<smem>>
    %639 = vector.extract_strided_slice %468 {offsets = [1, 1], sizes = [16, 16], strides = [1, 1]} : vector<18x18xf32> to vector<16x16xf32>
    %640 = vector.broadcast %638 : f32 to vector<16x16xf32>
    %641 = arith.mulf %640, %639 : vector<16x16xf32>
    %642 = arith.addf %637, %641 : vector<16x16xf32>
    %c113 = arith.constant 113 : index
    %643 = memref.load %arg1[%c113] : memref<243xf32, #tpu.memory_space<smem>>
    %644 = vector.extract_strided_slice %468 {offsets = [1, 2], sizes = [16, 16], strides = [1, 1]} : vector<18x18xf32> to vector<16x16xf32>
    %645 = vector.broadcast %643 : f32 to vector<16x16xf32>
    %646 = arith.mulf %645, %644 : vector<16x16xf32>
    %647 = arith.addf %642, %646 : vector<16x16xf32>
    %c114 = arith.constant 114 : index
    %648 = memref.load %arg1[%c114] : memref<243xf32, #tpu.memory_space<smem>>
    %649 = vector.extract_strided_slice %468 {offsets = [2, 0], sizes = [16, 16], strides = [1, 1]} : vector<18x18xf32> to vector<16x16xf32>
    %650 = vector.broadcast %648 : f32 to vector<16x16xf32>
    %651 = arith.mulf %650, %649 : vector<16x16xf32>
    %652 = arith.addf %647, %651 : vector<16x16xf32>
    %c115 = arith.constant 115 : index
    %653 = memref.load %arg1[%c115] : memref<243xf32, #tpu.memory_space<smem>>
    %654 = vector.extract_strided_slice %468 {offsets = [2, 1], sizes = [16, 16], strides = [1, 1]} : vector<18x18xf32> to vector<16x16xf32>
    %655 = vector.broadcast %653 : f32 to vector<16x16xf32>
    %656 = arith.mulf %655, %654 : vector<16x16xf32>
    %657 = arith.addf %652, %656 : vector<16x16xf32>
    %c116 = arith.constant 116 : index
    %658 = memref.load %arg1[%c116] : memref<243xf32, #tpu.memory_space<smem>>
    %659 = vector.extract_strided_slice %468 {offsets = [2, 2], sizes = [16, 16], strides = [1, 1]} : vector<18x18xf32> to vector<16x16xf32>
    %660 = vector.broadcast %658 : f32 to vector<16x16xf32>
    %661 = arith.mulf %660, %659 : vector<16x16xf32>
    %662 = arith.addf %657, %661 : vector<16x16xf32>
    %c117 = arith.constant 117 : index
    %663 = memref.load %arg1[%c117] : memref<243xf32, #tpu.memory_space<smem>>
    %664 = vector.extract_strided_slice %470 {offsets = [0, 0], sizes = [16, 16], strides = [1, 1]} : vector<18x18xf32> to vector<16x16xf32>
    %665 = vector.broadcast %663 : f32 to vector<16x16xf32>
    %666 = arith.mulf %665, %664 : vector<16x16xf32>
    %667 = arith.addf %662, %666 : vector<16x16xf32>
    %c118 = arith.constant 118 : index
    %668 = memref.load %arg1[%c118] : memref<243xf32, #tpu.memory_space<smem>>
    %669 = vector.extract_strided_slice %470 {offsets = [0, 1], sizes = [16, 16], strides = [1, 1]} : vector<18x18xf32> to vector<16x16xf32>
    %670 = vector.broadcast %668 : f32 to vector<16x16xf32>
    %671 = arith.mulf %670, %669 : vector<16x16xf32>
    %672 = arith.addf %667, %671 : vector<16x16xf32>
    %c119 = arith.constant 119 : index
    %673 = memref.load %arg1[%c119] : memref<243xf32, #tpu.memory_space<smem>>
    %674 = vector.extract_strided_slice %470 {offsets = [0, 2], sizes = [16, 16], strides = [1, 1]} : vector<18x18xf32> to vector<16x16xf32>
    %675 = vector.broadcast %673 : f32 to vector<16x16xf32>
    %676 = arith.mulf %675, %674 : vector<16x16xf32>
    %677 = arith.addf %672, %676 : vector<16x16xf32>
    %c120 = arith.constant 120 : index
    %678 = memref.load %arg1[%c120] : memref<243xf32, #tpu.memory_space<smem>>
    %679 = vector.extract_strided_slice %470 {offsets = [1, 0], sizes = [16, 16], strides = [1, 1]} : vector<18x18xf32> to vector<16x16xf32>
    %680 = vector.broadcast %678 : f32 to vector<16x16xf32>
    %681 = arith.mulf %680, %679 : vector<16x16xf32>
    %682 = arith.addf %677, %681 : vector<16x16xf32>
    %c121 = arith.constant 121 : index
    %683 = memref.load %arg1[%c121] : memref<243xf32, #tpu.memory_space<smem>>
    %684 = vector.extract_strided_slice %470 {offsets = [1, 1], sizes = [16, 16], strides = [1, 1]} : vector<18x18xf32> to vector<16x16xf32>
    %685 = vector.broadcast %683 : f32 to vector<16x16xf32>
    %686 = arith.mulf %685, %684 : vector<16x16xf32>
    %687 = arith.addf %682, %686 : vector<16x16xf32>
    %c122 = arith.constant 122 : index
    %688 = memref.load %arg1[%c122] : memref<243xf32, #tpu.memory_space<smem>>
    %689 = vector.extract_strided_slice %470 {offsets = [1, 2], sizes = [16, 16], strides = [1, 1]} : vector<18x18xf32> to vector<16x16xf32>
    %690 = vector.broadcast %688 : f32 to vector<16x16xf32>
    %691 = arith.mulf %690, %689 : vector<16x16xf32>
    %692 = arith.addf %687, %691 : vector<16x16xf32>
    %c123 = arith.constant 123 : index
    %693 = memref.load %arg1[%c123] : memref<243xf32, #tpu.memory_space<smem>>
    %694 = vector.extract_strided_slice %470 {offsets = [2, 0], sizes = [16, 16], strides = [1, 1]} : vector<18x18xf32> to vector<16x16xf32>
    %695 = vector.broadcast %693 : f32 to vector<16x16xf32>
    %696 = arith.mulf %695, %694 : vector<16x16xf32>
    %697 = arith.addf %692, %696 : vector<16x16xf32>
    %c124 = arith.constant 124 : index
    %698 = memref.load %arg1[%c124] : memref<243xf32, #tpu.memory_space<smem>>
    %699 = vector.extract_strided_slice %470 {offsets = [2, 1], sizes = [16, 16], strides = [1, 1]} : vector<18x18xf32> to vector<16x16xf32>
    %700 = vector.broadcast %698 : f32 to vector<16x16xf32>
    %701 = arith.mulf %700, %699 : vector<16x16xf32>
    %702 = arith.addf %697, %701 : vector<16x16xf32>
    %c125 = arith.constant 125 : index
    %703 = memref.load %arg1[%c125] : memref<243xf32, #tpu.memory_space<smem>>
    %704 = vector.extract_strided_slice %470 {offsets = [2, 2], sizes = [16, 16], strides = [1, 1]} : vector<18x18xf32> to vector<16x16xf32>
    %705 = vector.broadcast %703 : f32 to vector<16x16xf32>
    %706 = arith.mulf %705, %704 : vector<16x16xf32>
    %707 = arith.addf %702, %706 : vector<16x16xf32>
    %c126 = arith.constant 126 : index
    %708 = memref.load %arg1[%c126] : memref<243xf32, #tpu.memory_space<smem>>
    %709 = vector.extract_strided_slice %472 {offsets = [0, 0], sizes = [16, 16], strides = [1, 1]} : vector<18x18xf32> to vector<16x16xf32>
    %710 = vector.broadcast %708 : f32 to vector<16x16xf32>
    %711 = arith.mulf %710, %709 : vector<16x16xf32>
    %712 = arith.addf %707, %711 : vector<16x16xf32>
    %c127 = arith.constant 127 : index
    %713 = memref.load %arg1[%c127] : memref<243xf32, #tpu.memory_space<smem>>
    %714 = vector.extract_strided_slice %472 {offsets = [0, 1], sizes = [16, 16], strides = [1, 1]} : vector<18x18xf32> to vector<16x16xf32>
    %715 = vector.broadcast %713 : f32 to vector<16x16xf32>
    %716 = arith.mulf %715, %714 : vector<16x16xf32>
    %717 = arith.addf %712, %716 : vector<16x16xf32>
    %c128 = arith.constant 128 : index
    %718 = memref.load %arg1[%c128] : memref<243xf32, #tpu.memory_space<smem>>
    %719 = vector.extract_strided_slice %472 {offsets = [0, 2], sizes = [16, 16], strides = [1, 1]} : vector<18x18xf32> to vector<16x16xf32>
    %720 = vector.broadcast %718 : f32 to vector<16x16xf32>
    %721 = arith.mulf %720, %719 : vector<16x16xf32>
    %722 = arith.addf %717, %721 : vector<16x16xf32>
    %c129 = arith.constant 129 : index
    %723 = memref.load %arg1[%c129] : memref<243xf32, #tpu.memory_space<smem>>
    %724 = vector.extract_strided_slice %472 {offsets = [1, 0], sizes = [16, 16], strides = [1, 1]} : vector<18x18xf32> to vector<16x16xf32>
    %725 = vector.broadcast %723 : f32 to vector<16x16xf32>
    %726 = arith.mulf %725, %724 : vector<16x16xf32>
    %727 = arith.addf %722, %726 : vector<16x16xf32>
    %c130 = arith.constant 130 : index
    %728 = memref.load %arg1[%c130] : memref<243xf32, #tpu.memory_space<smem>>
    %729 = vector.extract_strided_slice %472 {offsets = [1, 1], sizes = [16, 16], strides = [1, 1]} : vector<18x18xf32> to vector<16x16xf32>
    %730 = vector.broadcast %728 : f32 to vector<16x16xf32>
    %731 = arith.mulf %730, %729 : vector<16x16xf32>
    %732 = arith.addf %727, %731 : vector<16x16xf32>
    %c131 = arith.constant 131 : index
    %733 = memref.load %arg1[%c131] : memref<243xf32, #tpu.memory_space<smem>>
    %734 = vector.extract_strided_slice %472 {offsets = [1, 2], sizes = [16, 16], strides = [1, 1]} : vector<18x18xf32> to vector<16x16xf32>
    %735 = vector.broadcast %733 : f32 to vector<16x16xf32>
    %736 = arith.mulf %735, %734 : vector<16x16xf32>
    %737 = arith.addf %732, %736 : vector<16x16xf32>
    %c132 = arith.constant 132 : index
    %738 = memref.load %arg1[%c132] : memref<243xf32, #tpu.memory_space<smem>>
    %739 = vector.extract_strided_slice %472 {offsets = [2, 0], sizes = [16, 16], strides = [1, 1]} : vector<18x18xf32> to vector<16x16xf32>
    %740 = vector.broadcast %738 : f32 to vector<16x16xf32>
    %741 = arith.mulf %740, %739 : vector<16x16xf32>
    %742 = arith.addf %737, %741 : vector<16x16xf32>
    %c133 = arith.constant 133 : index
    %743 = memref.load %arg1[%c133] : memref<243xf32, #tpu.memory_space<smem>>
    %744 = vector.extract_strided_slice %472 {offsets = [2, 1], sizes = [16, 16], strides = [1, 1]} : vector<18x18xf32> to vector<16x16xf32>
    %745 = vector.broadcast %743 : f32 to vector<16x16xf32>
    %746 = arith.mulf %745, %744 : vector<16x16xf32>
    %747 = arith.addf %742, %746 : vector<16x16xf32>
    %c134 = arith.constant 134 : index
    %748 = memref.load %arg1[%c134] : memref<243xf32, #tpu.memory_space<smem>>
    %749 = vector.extract_strided_slice %472 {offsets = [2, 2], sizes = [16, 16], strides = [1, 1]} : vector<18x18xf32> to vector<16x16xf32>
    %750 = vector.broadcast %748 : f32 to vector<16x16xf32>
    %751 = arith.mulf %750, %749 : vector<16x16xf32>
    %752 = arith.addf %747, %751 : vector<16x16xf32>
    %c2_71 = arith.constant 2 : index
    %c1_72 = arith.constant 1 : index
    %753 = memref.load %arg2[%c2_71, %c1_72] : memref<6x3xf32, #tpu.memory_space<smem>>
    %754 = vector.broadcast %753 : f32 to vector<16x16xf32>
    %755 = arith.mulf %752, %754 : vector<16x16xf32>
    %c3_73 = arith.constant 3 : index
    %c1_74 = arith.constant 1 : index
    %756 = memref.load %arg2[%c3_73, %c1_74] : memref<6x3xf32, #tpu.memory_space<smem>>
    %757 = vector.broadcast %756 : f32 to vector<16x16xf32>
    %758 = arith.addf %755, %757 : vector<16x16xf32>
    %cst_75 = arith.constant 0.000000e+00 : f32
    %759 = vector.broadcast %cst_75 : f32 to vector<16x16xf32>
    %760 = arith.maximumf %758, %759 : vector<16x16xf32>
    %cst_76 = arith.constant 0.000000e+00 : f32
    %761 = vector.broadcast %cst_76 : f32 to vector<16x16xf32>
    %c135 = arith.constant 135 : index
    %762 = memref.load %arg1[%c135] : memref<243xf32, #tpu.memory_space<smem>>
    %763 = vector.extract_strided_slice %468 {offsets = [0, 0], sizes = [16, 16], strides = [1, 1]} : vector<18x18xf32> to vector<16x16xf32>
    %764 = vector.broadcast %762 : f32 to vector<16x16xf32>
    %765 = arith.mulf %764, %763 : vector<16x16xf32>
    %766 = arith.addf %761, %765 : vector<16x16xf32>
    %c136 = arith.constant 136 : index
    %767 = memref.load %arg1[%c136] : memref<243xf32, #tpu.memory_space<smem>>
    %768 = vector.extract_strided_slice %468 {offsets = [0, 1], sizes = [16, 16], strides = [1, 1]} : vector<18x18xf32> to vector<16x16xf32>
    %769 = vector.broadcast %767 : f32 to vector<16x16xf32>
    %770 = arith.mulf %769, %768 : vector<16x16xf32>
    %771 = arith.addf %766, %770 : vector<16x16xf32>
    %c137 = arith.constant 137 : index
    %772 = memref.load %arg1[%c137] : memref<243xf32, #tpu.memory_space<smem>>
    %773 = vector.extract_strided_slice %468 {offsets = [0, 2], sizes = [16, 16], strides = [1, 1]} : vector<18x18xf32> to vector<16x16xf32>
    %774 = vector.broadcast %772 : f32 to vector<16x16xf32>
    %775 = arith.mulf %774, %773 : vector<16x16xf32>
    %776 = arith.addf %771, %775 : vector<16x16xf32>
    %c138 = arith.constant 138 : index
    %777 = memref.load %arg1[%c138] : memref<243xf32, #tpu.memory_space<smem>>
    %778 = vector.extract_strided_slice %468 {offsets = [1, 0], sizes = [16, 16], strides = [1, 1]} : vector<18x18xf32> to vector<16x16xf32>
    %779 = vector.broadcast %777 : f32 to vector<16x16xf32>
    %780 = arith.mulf %779, %778 : vector<16x16xf32>
    %781 = arith.addf %776, %780 : vector<16x16xf32>
    %c139 = arith.constant 139 : index
    %782 = memref.load %arg1[%c139] : memref<243xf32, #tpu.memory_space<smem>>
    %783 = vector.extract_strided_slice %468 {offsets = [1, 1], sizes = [16, 16], strides = [1, 1]} : vector<18x18xf32> to vector<16x16xf32>
    %784 = vector.broadcast %782 : f32 to vector<16x16xf32>
    %785 = arith.mulf %784, %783 : vector<16x16xf32>
    %786 = arith.addf %781, %785 : vector<16x16xf32>
    %c140 = arith.constant 140 : index
    %787 = memref.load %arg1[%c140] : memref<243xf32, #tpu.memory_space<smem>>
    %788 = vector.extract_strided_slice %468 {offsets = [1, 2], sizes = [16, 16], strides = [1, 1]} : vector<18x18xf32> to vector<16x16xf32>
    %789 = vector.broadcast %787 : f32 to vector<16x16xf32>
    %790 = arith.mulf %789, %788 : vector<16x16xf32>
    %791 = arith.addf %786, %790 : vector<16x16xf32>
    %c141 = arith.constant 141 : index
    %792 = memref.load %arg1[%c141] : memref<243xf32, #tpu.memory_space<smem>>
    %793 = vector.extract_strided_slice %468 {offsets = [2, 0], sizes = [16, 16], strides = [1, 1]} : vector<18x18xf32> to vector<16x16xf32>
    %794 = vector.broadcast %792 : f32 to vector<16x16xf32>
    %795 = arith.mulf %794, %793 : vector<16x16xf32>
    %796 = arith.addf %791, %795 : vector<16x16xf32>
    %c142 = arith.constant 142 : index
    %797 = memref.load %arg1[%c142] : memref<243xf32, #tpu.memory_space<smem>>
    %798 = vector.extract_strided_slice %468 {offsets = [2, 1], sizes = [16, 16], strides = [1, 1]} : vector<18x18xf32> to vector<16x16xf32>
    %799 = vector.broadcast %797 : f32 to vector<16x16xf32>
    %800 = arith.mulf %799, %798 : vector<16x16xf32>
    %801 = arith.addf %796, %800 : vector<16x16xf32>
    %c143 = arith.constant 143 : index
    %802 = memref.load %arg1[%c143] : memref<243xf32, #tpu.memory_space<smem>>
    %803 = vector.extract_strided_slice %468 {offsets = [2, 2], sizes = [16, 16], strides = [1, 1]} : vector<18x18xf32> to vector<16x16xf32>
    %804 = vector.broadcast %802 : f32 to vector<16x16xf32>
    %805 = arith.mulf %804, %803 : vector<16x16xf32>
    %806 = arith.addf %801, %805 : vector<16x16xf32>
    %c144 = arith.constant 144 : index
    %807 = memref.load %arg1[%c144] : memref<243xf32, #tpu.memory_space<smem>>
    %808 = vector.extract_strided_slice %470 {offsets = [0, 0], sizes = [16, 16], strides = [1, 1]} : vector<18x18xf32> to vector<16x16xf32>
    %809 = vector.broadcast %807 : f32 to vector<16x16xf32>
    %810 = arith.mulf %809, %808 : vector<16x16xf32>
    %811 = arith.addf %806, %810 : vector<16x16xf32>
    %c145 = arith.constant 145 : index
    %812 = memref.load %arg1[%c145] : memref<243xf32, #tpu.memory_space<smem>>
    %813 = vector.extract_strided_slice %470 {offsets = [0, 1], sizes = [16, 16], strides = [1, 1]} : vector<18x18xf32> to vector<16x16xf32>
    %814 = vector.broadcast %812 : f32 to vector<16x16xf32>
    %815 = arith.mulf %814, %813 : vector<16x16xf32>
    %816 = arith.addf %811, %815 : vector<16x16xf32>
    %c146 = arith.constant 146 : index
    %817 = memref.load %arg1[%c146] : memref<243xf32, #tpu.memory_space<smem>>
    %818 = vector.extract_strided_slice %470 {offsets = [0, 2], sizes = [16, 16], strides = [1, 1]} : vector<18x18xf32> to vector<16x16xf32>
    %819 = vector.broadcast %817 : f32 to vector<16x16xf32>
    %820 = arith.mulf %819, %818 : vector<16x16xf32>
    %821 = arith.addf %816, %820 : vector<16x16xf32>
    %c147 = arith.constant 147 : index
    %822 = memref.load %arg1[%c147] : memref<243xf32, #tpu.memory_space<smem>>
    %823 = vector.extract_strided_slice %470 {offsets = [1, 0], sizes = [16, 16], strides = [1, 1]} : vector<18x18xf32> to vector<16x16xf32>
    %824 = vector.broadcast %822 : f32 to vector<16x16xf32>
    %825 = arith.mulf %824, %823 : vector<16x16xf32>
    %826 = arith.addf %821, %825 : vector<16x16xf32>
    %c148 = arith.constant 148 : index
    %827 = memref.load %arg1[%c148] : memref<243xf32, #tpu.memory_space<smem>>
    %828 = vector.extract_strided_slice %470 {offsets = [1, 1], sizes = [16, 16], strides = [1, 1]} : vector<18x18xf32> to vector<16x16xf32>
    %829 = vector.broadcast %827 : f32 to vector<16x16xf32>
    %830 = arith.mulf %829, %828 : vector<16x16xf32>
    %831 = arith.addf %826, %830 : vector<16x16xf32>
    %c149 = arith.constant 149 : index
    %832 = memref.load %arg1[%c149] : memref<243xf32, #tpu.memory_space<smem>>
    %833 = vector.extract_strided_slice %470 {offsets = [1, 2], sizes = [16, 16], strides = [1, 1]} : vector<18x18xf32> to vector<16x16xf32>
    %834 = vector.broadcast %832 : f32 to vector<16x16xf32>
    %835 = arith.mulf %834, %833 : vector<16x16xf32>
    %836 = arith.addf %831, %835 : vector<16x16xf32>
    %c150 = arith.constant 150 : index
    %837 = memref.load %arg1[%c150] : memref<243xf32, #tpu.memory_space<smem>>
    %838 = vector.extract_strided_slice %470 {offsets = [2, 0], sizes = [16, 16], strides = [1, 1]} : vector<18x18xf32> to vector<16x16xf32>
    %839 = vector.broadcast %837 : f32 to vector<16x16xf32>
    %840 = arith.mulf %839, %838 : vector<16x16xf32>
    %841 = arith.addf %836, %840 : vector<16x16xf32>
    %c151 = arith.constant 151 : index
    %842 = memref.load %arg1[%c151] : memref<243xf32, #tpu.memory_space<smem>>
    %843 = vector.extract_strided_slice %470 {offsets = [2, 1], sizes = [16, 16], strides = [1, 1]} : vector<18x18xf32> to vector<16x16xf32>
    %844 = vector.broadcast %842 : f32 to vector<16x16xf32>
    %845 = arith.mulf %844, %843 : vector<16x16xf32>
    %846 = arith.addf %841, %845 : vector<16x16xf32>
    %c152 = arith.constant 152 : index
    %847 = memref.load %arg1[%c152] : memref<243xf32, #tpu.memory_space<smem>>
    %848 = vector.extract_strided_slice %470 {offsets = [2, 2], sizes = [16, 16], strides = [1, 1]} : vector<18x18xf32> to vector<16x16xf32>
    %849 = vector.broadcast %847 : f32 to vector<16x16xf32>
    %850 = arith.mulf %849, %848 : vector<16x16xf32>
    %851 = arith.addf %846, %850 : vector<16x16xf32>
    %c153 = arith.constant 153 : index
    %852 = memref.load %arg1[%c153] : memref<243xf32, #tpu.memory_space<smem>>
    %853 = vector.extract_strided_slice %472 {offsets = [0, 0], sizes = [16, 16], strides = [1, 1]} : vector<18x18xf32> to vector<16x16xf32>
    %854 = vector.broadcast %852 : f32 to vector<16x16xf32>
    %855 = arith.mulf %854, %853 : vector<16x16xf32>
    %856 = arith.addf %851, %855 : vector<16x16xf32>
    %c154 = arith.constant 154 : index
    %857 = memref.load %arg1[%c154] : memref<243xf32, #tpu.memory_space<smem>>
    %858 = vector.extract_strided_slice %472 {offsets = [0, 1], sizes = [16, 16], strides = [1, 1]} : vector<18x18xf32> to vector<16x16xf32>
    %859 = vector.broadcast %857 : f32 to vector<16x16xf32>
    %860 = arith.mulf %859, %858 : vector<16x16xf32>
    %861 = arith.addf %856, %860 : vector<16x16xf32>
    %c155 = arith.constant 155 : index
    %862 = memref.load %arg1[%c155] : memref<243xf32, #tpu.memory_space<smem>>
    %863 = vector.extract_strided_slice %472 {offsets = [0, 2], sizes = [16, 16], strides = [1, 1]} : vector<18x18xf32> to vector<16x16xf32>
    %864 = vector.broadcast %862 : f32 to vector<16x16xf32>
    %865 = arith.mulf %864, %863 : vector<16x16xf32>
    %866 = arith.addf %861, %865 : vector<16x16xf32>
    %c156 = arith.constant 156 : index
    %867 = memref.load %arg1[%c156] : memref<243xf32, #tpu.memory_space<smem>>
    %868 = vector.extract_strided_slice %472 {offsets = [1, 0], sizes = [16, 16], strides = [1, 1]} : vector<18x18xf32> to vector<16x16xf32>
    %869 = vector.broadcast %867 : f32 to vector<16x16xf32>
    %870 = arith.mulf %869, %868 : vector<16x16xf32>
    %871 = arith.addf %866, %870 : vector<16x16xf32>
    %c157 = arith.constant 157 : index
    %872 = memref.load %arg1[%c157] : memref<243xf32, #tpu.memory_space<smem>>
    %873 = vector.extract_strided_slice %472 {offsets = [1, 1], sizes = [16, 16], strides = [1, 1]} : vector<18x18xf32> to vector<16x16xf32>
    %874 = vector.broadcast %872 : f32 to vector<16x16xf32>
    %875 = arith.mulf %874, %873 : vector<16x16xf32>
    %876 = arith.addf %871, %875 : vector<16x16xf32>
    %c158 = arith.constant 158 : index
    %877 = memref.load %arg1[%c158] : memref<243xf32, #tpu.memory_space<smem>>
    %878 = vector.extract_strided_slice %472 {offsets = [1, 2], sizes = [16, 16], strides = [1, 1]} : vector<18x18xf32> to vector<16x16xf32>
    %879 = vector.broadcast %877 : f32 to vector<16x16xf32>
    %880 = arith.mulf %879, %878 : vector<16x16xf32>
    %881 = arith.addf %876, %880 : vector<16x16xf32>
    %c159 = arith.constant 159 : index
    %882 = memref.load %arg1[%c159] : memref<243xf32, #tpu.memory_space<smem>>
    %883 = vector.extract_strided_slice %472 {offsets = [2, 0], sizes = [16, 16], strides = [1, 1]} : vector<18x18xf32> to vector<16x16xf32>
    %884 = vector.broadcast %882 : f32 to vector<16x16xf32>
    %885 = arith.mulf %884, %883 : vector<16x16xf32>
    %886 = arith.addf %881, %885 : vector<16x16xf32>
    %c160 = arith.constant 160 : index
    %887 = memref.load %arg1[%c160] : memref<243xf32, #tpu.memory_space<smem>>
    %888 = vector.extract_strided_slice %472 {offsets = [2, 1], sizes = [16, 16], strides = [1, 1]} : vector<18x18xf32> to vector<16x16xf32>
    %889 = vector.broadcast %887 : f32 to vector<16x16xf32>
    %890 = arith.mulf %889, %888 : vector<16x16xf32>
    %891 = arith.addf %886, %890 : vector<16x16xf32>
    %c161 = arith.constant 161 : index
    %892 = memref.load %arg1[%c161] : memref<243xf32, #tpu.memory_space<smem>>
    %893 = vector.extract_strided_slice %472 {offsets = [2, 2], sizes = [16, 16], strides = [1, 1]} : vector<18x18xf32> to vector<16x16xf32>
    %894 = vector.broadcast %892 : f32 to vector<16x16xf32>
    %895 = arith.mulf %894, %893 : vector<16x16xf32>
    %896 = arith.addf %891, %895 : vector<16x16xf32>
    %c2_77 = arith.constant 2 : index
    %c2_78 = arith.constant 2 : index
    %897 = memref.load %arg2[%c2_77, %c2_78] : memref<6x3xf32, #tpu.memory_space<smem>>
    %898 = vector.broadcast %897 : f32 to vector<16x16xf32>
    %899 = arith.mulf %896, %898 : vector<16x16xf32>
    %c3_79 = arith.constant 3 : index
    %c2_80 = arith.constant 2 : index
    %900 = memref.load %arg2[%c3_79, %c2_80] : memref<6x3xf32, #tpu.memory_space<smem>>
    %901 = vector.broadcast %900 : f32 to vector<16x16xf32>
    %902 = arith.addf %899, %901 : vector<16x16xf32>
    %cst_81 = arith.constant 0.000000e+00 : f32
    %903 = vector.broadcast %cst_81 : f32 to vector<16x16xf32>
    %904 = arith.maximumf %902, %903 : vector<16x16xf32>
    %c0_82 = arith.constant 0 : index
    %c1_83 = arith.constant 1 : index
    %c1_84 = arith.constant 1 : index
    %905 = vector.load %arg6[%c0_82, %c1_83, %c1_84] : memref<3x18x18xf32, #tpu.memory_space<vmem>>, vector<1x16x16xf32>
    %906 = vector.shape_cast %905 : vector<1x16x16xf32> to vector<16x16xf32>
    %907 = arith.addf %906, %616 : vector<16x16xf32>
    %c0_85 = arith.constant 0 : index
    %c1_86 = arith.constant 1 : index
    %c1_87 = arith.constant 1 : index
    %908 = vector.load %arg5[%c0_85, %c1_86, %c1_87] : memref<3x18x18xf32, #tpu.memory_space<vmem>>, vector<1x16x16xf32>
    %909 = vector.shape_cast %908 : vector<1x16x16xf32> to vector<16x16xf32>
    %910 = vector.shape_cast %907 : vector<16x16xf32> to vector<1x16x16xf32>
    tpu.vector_store %arg5[%c0_85, %c1_86, %c1_87], %910 {strides = array<i32>} : memref<3x18x18xf32, #tpu.memory_space<vmem>>, vector<1x16x16xf32>,
    %c1_88 = arith.constant 1 : index
    %c1_89 = arith.constant 1 : index
    %c1_90 = arith.constant 1 : index
    %911 = vector.load %arg6[%c1_88, %c1_89, %c1_90] : memref<3x18x18xf32, #tpu.memory_space<vmem>>, vector<1x16x16xf32>
    %912 = vector.shape_cast %911 : vector<1x16x16xf32> to vector<16x16xf32>
    %913 = arith.addf %912, %760 : vector<16x16xf32>
    %c1_91 = arith.constant 1 : index
    %c1_92 = arith.constant 1 : index
    %c1_93 = arith.constant 1 : index
    %914 = vector.load %arg5[%c1_91, %c1_92, %c1_93] : memref<3x18x18xf32, #tpu.memory_space<vmem>>, vector<1x16x16xf32>
    %915 = vector.shape_cast %914 : vector<1x16x16xf32> to vector<16x16xf32>
    %916 = vector.shape_cast %913 : vector<16x16xf32> to vector<1x16x16xf32>
    tpu.vector_store %arg5[%c1_91, %c1_92, %c1_93], %916 {strides = array<i32>} : memref<3x18x18xf32, #tpu.memory_space<vmem>>, vector<1x16x16xf32>,
    %c2_94 = arith.constant 2 : index
    %c1_95 = arith.constant 1 : index
    %c1_96 = arith.constant 1 : index
    %917 = vector.load %arg6[%c2_94, %c1_95, %c1_96] : memref<3x18x18xf32, #tpu.memory_space<vmem>>, vector<1x16x16xf32>
    %918 = vector.shape_cast %917 : vector<1x16x16xf32> to vector<16x16xf32>
    %919 = arith.addf %918, %904 : vector<16x16xf32>
    %c2_97 = arith.constant 2 : index
    %c1_98 = arith.constant 1 : index
    %c1_99 = arith.constant 1 : index
    %920 = vector.load %arg5[%c2_97, %c1_98, %c1_99] : memref<3x18x18xf32, #tpu.memory_space<vmem>>, vector<1x16x16xf32>
    %921 = vector.shape_cast %920 : vector<1x16x16xf32> to vector<16x16xf32>
    %922 = vector.shape_cast %919 : vector<16x16xf32> to vector<1x16x16xf32>
    tpu.vector_store %arg5[%c2_97, %c1_98, %c1_99], %922 {strides = array<i32>} : memref<3x18x18xf32, #tpu.memory_space<vmem>>, vector<1x16x16xf32>,
    %c0_100 = arith.constant 0 : index
    %c0_101 = arith.constant 0 : index
    %c0_102 = arith.constant 0 : index
    %923 = vector.load %arg5[%c0_100, %c0_101, %c0_102] : memref<3x18x18xf32, #tpu.memory_space<vmem>>, vector<1x18x18xf32>
    %924 = vector.shape_cast %923 : vector<1x18x18xf32> to vector<18x18xf32>
    %c1_103 = arith.constant 1 : index
    %c0_104 = arith.constant 0 : index
    %c0_105 = arith.constant 0 : index
    %925 = vector.load %arg5[%c1_103, %c0_104, %c0_105] : memref<3x18x18xf32, #tpu.memory_space<vmem>>, vector<1x18x18xf32>
    %926 = vector.shape_cast %925 : vector<1x18x18xf32> to vector<18x18xf32>
    %c2_106 = arith.constant 2 : index
    %c0_107 = arith.constant 0 : index
    %c0_108 = arith.constant 0 : index
    %927 = vector.load %arg5[%c2_106, %c0_107, %c0_108] : memref<3x18x18xf32, #tpu.memory_space<vmem>>, vector<1x18x18xf32>
    %928 = vector.shape_cast %927 : vector<1x18x18xf32> to vector<18x18xf32>
    %cst_109 = arith.constant 0.000000e+00 : f32
    %929 = vector.broadcast %cst_109 : f32 to vector<16x16xf32>
    %c162 = arith.constant 162 : index
    %930 = memref.load %arg1[%c162] : memref<243xf32, #tpu.memory_space<smem>>
    %931 = vector.extract_strided_slice %924 {offsets = [0, 0], sizes = [16, 16], strides = [1, 1]} : vector<18x18xf32> to vector<16x16xf32>
    %932 = vector.broadcast %930 : f32 to vector<16x16xf32>
    %933 = arith.mulf %932, %931 : vector<16x16xf32>
    %934 = arith.addf %929, %933 : vector<16x16xf32>
    %c163 = arith.constant 163 : index
    %935 = memref.load %arg1[%c163] : memref<243xf32, #tpu.memory_space<smem>>
    %936 = vector.extract_strided_slice %924 {offsets = [0, 1], sizes = [16, 16], strides = [1, 1]} : vector<18x18xf32> to vector<16x16xf32>
    %937 = vector.broadcast %935 : f32 to vector<16x16xf32>
    %938 = arith.mulf %937, %936 : vector<16x16xf32>
    %939 = arith.addf %934, %938 : vector<16x16xf32>
    %c164 = arith.constant 164 : index
    %940 = memref.load %arg1[%c164] : memref<243xf32, #tpu.memory_space<smem>>
    %941 = vector.extract_strided_slice %924 {offsets = [0, 2], sizes = [16, 16], strides = [1, 1]} : vector<18x18xf32> to vector<16x16xf32>
    %942 = vector.broadcast %940 : f32 to vector<16x16xf32>
    %943 = arith.mulf %942, %941 : vector<16x16xf32>
    %944 = arith.addf %939, %943 : vector<16x16xf32>
    %c165 = arith.constant 165 : index
    %945 = memref.load %arg1[%c165] : memref<243xf32, #tpu.memory_space<smem>>
    %946 = vector.extract_strided_slice %924 {offsets = [1, 0], sizes = [16, 16], strides = [1, 1]} : vector<18x18xf32> to vector<16x16xf32>
    %947 = vector.broadcast %945 : f32 to vector<16x16xf32>
    %948 = arith.mulf %947, %946 : vector<16x16xf32>
    %949 = arith.addf %944, %948 : vector<16x16xf32>
    %c166 = arith.constant 166 : index
    %950 = memref.load %arg1[%c166] : memref<243xf32, #tpu.memory_space<smem>>
    %951 = vector.extract_strided_slice %924 {offsets = [1, 1], sizes = [16, 16], strides = [1, 1]} : vector<18x18xf32> to vector<16x16xf32>
    %952 = vector.broadcast %950 : f32 to vector<16x16xf32>
    %953 = arith.mulf %952, %951 : vector<16x16xf32>
    %954 = arith.addf %949, %953 : vector<16x16xf32>
    %c167 = arith.constant 167 : index
    %955 = memref.load %arg1[%c167] : memref<243xf32, #tpu.memory_space<smem>>
    %956 = vector.extract_strided_slice %924 {offsets = [1, 2], sizes = [16, 16], strides = [1, 1]} : vector<18x18xf32> to vector<16x16xf32>
    %957 = vector.broadcast %955 : f32 to vector<16x16xf32>
    %958 = arith.mulf %957, %956 : vector<16x16xf32>
    %959 = arith.addf %954, %958 : vector<16x16xf32>
    %c168 = arith.constant 168 : index
    %960 = memref.load %arg1[%c168] : memref<243xf32, #tpu.memory_space<smem>>
    %961 = vector.extract_strided_slice %924 {offsets = [2, 0], sizes = [16, 16], strides = [1, 1]} : vector<18x18xf32> to vector<16x16xf32>
    %962 = vector.broadcast %960 : f32 to vector<16x16xf32>
    %963 = arith.mulf %962, %961 : vector<16x16xf32>
    %964 = arith.addf %959, %963 : vector<16x16xf32>
    %c169 = arith.constant 169 : index
    %965 = memref.load %arg1[%c169] : memref<243xf32, #tpu.memory_space<smem>>
    %966 = vector.extract_strided_slice %924 {offsets = [2, 1], sizes = [16, 16], strides = [1, 1]} : vector<18x18xf32> to vector<16x16xf32>
    %967 = vector.broadcast %965 : f32 to vector<16x16xf32>
    %968 = arith.mulf %967, %966 : vector<16x16xf32>
    %969 = arith.addf %964, %968 : vector<16x16xf32>
    %c170 = arith.constant 170 : index
    %970 = memref.load %arg1[%c170] : memref<243xf32, #tpu.memory_space<smem>>
    %971 = vector.extract_strided_slice %924 {offsets = [2, 2], sizes = [16, 16], strides = [1, 1]} : vector<18x18xf32> to vector<16x16xf32>
    %972 = vector.broadcast %970 : f32 to vector<16x16xf32>
    %973 = arith.mulf %972, %971 : vector<16x16xf32>
    %974 = arith.addf %969, %973 : vector<16x16xf32>
    %c171 = arith.constant 171 : index
    %975 = memref.load %arg1[%c171] : memref<243xf32, #tpu.memory_space<smem>>
    %976 = vector.extract_strided_slice %926 {offsets = [0, 0], sizes = [16, 16], strides = [1, 1]} : vector<18x18xf32> to vector<16x16xf32>
    %977 = vector.broadcast %975 : f32 to vector<16x16xf32>
    %978 = arith.mulf %977, %976 : vector<16x16xf32>
    %979 = arith.addf %974, %978 : vector<16x16xf32>
    %c172 = arith.constant 172 : index
    %980 = memref.load %arg1[%c172] : memref<243xf32, #tpu.memory_space<smem>>
    %981 = vector.extract_strided_slice %926 {offsets = [0, 1], sizes = [16, 16], strides = [1, 1]} : vector<18x18xf32> to vector<16x16xf32>
    %982 = vector.broadcast %980 : f32 to vector<16x16xf32>
    %983 = arith.mulf %982, %981 : vector<16x16xf32>
    %984 = arith.addf %979, %983 : vector<16x16xf32>
    %c173 = arith.constant 173 : index
    %985 = memref.load %arg1[%c173] : memref<243xf32, #tpu.memory_space<smem>>
    %986 = vector.extract_strided_slice %926 {offsets = [0, 2], sizes = [16, 16], strides = [1, 1]} : vector<18x18xf32> to vector<16x16xf32>
    %987 = vector.broadcast %985 : f32 to vector<16x16xf32>
    %988 = arith.mulf %987, %986 : vector<16x16xf32>
    %989 = arith.addf %984, %988 : vector<16x16xf32>
    %c174 = arith.constant 174 : index
    %990 = memref.load %arg1[%c174] : memref<243xf32, #tpu.memory_space<smem>>
    %991 = vector.extract_strided_slice %926 {offsets = [1, 0], sizes = [16, 16], strides = [1, 1]} : vector<18x18xf32> to vector<16x16xf32>
    %992 = vector.broadcast %990 : f32 to vector<16x16xf32>
    %993 = arith.mulf %992, %991 : vector<16x16xf32>
    %994 = arith.addf %989, %993 : vector<16x16xf32>
    %c175 = arith.constant 175 : index
    %995 = memref.load %arg1[%c175] : memref<243xf32, #tpu.memory_space<smem>>
    %996 = vector.extract_strided_slice %926 {offsets = [1, 1], sizes = [16, 16], strides = [1, 1]} : vector<18x18xf32> to vector<16x16xf32>
    %997 = vector.broadcast %995 : f32 to vector<16x16xf32>
    %998 = arith.mulf %997, %996 : vector<16x16xf32>
    %999 = arith.addf %994, %998 : vector<16x16xf32>
    %c176 = arith.constant 176 : index
    %1000 = memref.load %arg1[%c176] : memref<243xf32, #tpu.memory_space<smem>>
    %1001 = vector.extract_strided_slice %926 {offsets = [1, 2], sizes = [16, 16], strides = [1, 1]} : vector<18x18xf32> to vector<16x16xf32>
    %1002 = vector.broadcast %1000 : f32 to vector<16x16xf32>
    %1003 = arith.mulf %1002, %1001 : vector<16x16xf32>
    %1004 = arith.addf %999, %1003 : vector<16x16xf32>
    %c177 = arith.constant 177 : index
    %1005 = memref.load %arg1[%c177] : memref<243xf32, #tpu.memory_space<smem>>
    %1006 = vector.extract_strided_slice %926 {offsets = [2, 0], sizes = [16, 16], strides = [1, 1]} : vector<18x18xf32> to vector<16x16xf32>
    %1007 = vector.broadcast %1005 : f32 to vector<16x16xf32>
    %1008 = arith.mulf %1007, %1006 : vector<16x16xf32>
    %1009 = arith.addf %1004, %1008 : vector<16x16xf32>
    %c178 = arith.constant 178 : index
    %1010 = memref.load %arg1[%c178] : memref<243xf32, #tpu.memory_space<smem>>
    %1011 = vector.extract_strided_slice %926 {offsets = [2, 1], sizes = [16, 16], strides = [1, 1]} : vector<18x18xf32> to vector<16x16xf32>
    %1012 = vector.broadcast %1010 : f32 to vector<16x16xf32>
    %1013 = arith.mulf %1012, %1011 : vector<16x16xf32>
    %1014 = arith.addf %1009, %1013 : vector<16x16xf32>
    %c179 = arith.constant 179 : index
    %1015 = memref.load %arg1[%c179] : memref<243xf32, #tpu.memory_space<smem>>
    %1016 = vector.extract_strided_slice %926 {offsets = [2, 2], sizes = [16, 16], strides = [1, 1]} : vector<18x18xf32> to vector<16x16xf32>
    %1017 = vector.broadcast %1015 : f32 to vector<16x16xf32>
    %1018 = arith.mulf %1017, %1016 : vector<16x16xf32>
    %1019 = arith.addf %1014, %1018 : vector<16x16xf32>
    %c180 = arith.constant 180 : index
    %1020 = memref.load %arg1[%c180] : memref<243xf32, #tpu.memory_space<smem>>
    %1021 = vector.extract_strided_slice %928 {offsets = [0, 0], sizes = [16, 16], strides = [1, 1]} : vector<18x18xf32> to vector<16x16xf32>
    %1022 = vector.broadcast %1020 : f32 to vector<16x16xf32>
    %1023 = arith.mulf %1022, %1021 : vector<16x16xf32>
    %1024 = arith.addf %1019, %1023 : vector<16x16xf32>
    %c181 = arith.constant 181 : index
    %1025 = memref.load %arg1[%c181] : memref<243xf32, #tpu.memory_space<smem>>
    %1026 = vector.extract_strided_slice %928 {offsets = [0, 1], sizes = [16, 16], strides = [1, 1]} : vector<18x18xf32> to vector<16x16xf32>
    %1027 = vector.broadcast %1025 : f32 to vector<16x16xf32>
    %1028 = arith.mulf %1027, %1026 : vector<16x16xf32>
    %1029 = arith.addf %1024, %1028 : vector<16x16xf32>
    %c182 = arith.constant 182 : index
    %1030 = memref.load %arg1[%c182] : memref<243xf32, #tpu.memory_space<smem>>
    %1031 = vector.extract_strided_slice %928 {offsets = [0, 2], sizes = [16, 16], strides = [1, 1]} : vector<18x18xf32> to vector<16x16xf32>
    %1032 = vector.broadcast %1030 : f32 to vector<16x16xf32>
    %1033 = arith.mulf %1032, %1031 : vector<16x16xf32>
    %1034 = arith.addf %1029, %1033 : vector<16x16xf32>
    %c183 = arith.constant 183 : index
    %1035 = memref.load %arg1[%c183] : memref<243xf32, #tpu.memory_space<smem>>
    %1036 = vector.extract_strided_slice %928 {offsets = [1, 0], sizes = [16, 16], strides = [1, 1]} : vector<18x18xf32> to vector<16x16xf32>
    %1037 = vector.broadcast %1035 : f32 to vector<16x16xf32>
    %1038 = arith.mulf %1037, %1036 : vector<16x16xf32>
    %1039 = arith.addf %1034, %1038 : vector<16x16xf32>
    %c184 = arith.constant 184 : index
    %1040 = memref.load %arg1[%c184] : memref<243xf32, #tpu.memory_space<smem>>
    %1041 = vector.extract_strided_slice %928 {offsets = [1, 1], sizes = [16, 16], strides = [1, 1]} : vector<18x18xf32> to vector<16x16xf32>
    %1042 = vector.broadcast %1040 : f32 to vector<16x16xf32>
    %1043 = arith.mulf %1042, %1041 : vector<16x16xf32>
    %1044 = arith.addf %1039, %1043 : vector<16x16xf32>
    %c185 = arith.constant 185 : index
    %1045 = memref.load %arg1[%c185] : memref<243xf32, #tpu.memory_space<smem>>
    %1046 = vector.extract_strided_slice %928 {offsets = [1, 2], sizes = [16, 16], strides = [1, 1]} : vector<18x18xf32> to vector<16x16xf32>
    %1047 = vector.broadcast %1045 : f32 to vector<16x16xf32>
    %1048 = arith.mulf %1047, %1046 : vector<16x16xf32>
    %1049 = arith.addf %1044, %1048 : vector<16x16xf32>
    %c186 = arith.constant 186 : index
    %1050 = memref.load %arg1[%c186] : memref<243xf32, #tpu.memory_space<smem>>
    %1051 = vector.extract_strided_slice %928 {offsets = [2, 0], sizes = [16, 16], strides = [1, 1]} : vector<18x18xf32> to vector<16x16xf32>
    %1052 = vector.broadcast %1050 : f32 to vector<16x16xf32>
    %1053 = arith.mulf %1052, %1051 : vector<16x16xf32>
    %1054 = arith.addf %1049, %1053 : vector<16x16xf32>
    %c187 = arith.constant 187 : index
    %1055 = memref.load %arg1[%c187] : memref<243xf32, #tpu.memory_space<smem>>
    %1056 = vector.extract_strided_slice %928 {offsets = [2, 1], sizes = [16, 16], strides = [1, 1]} : vector<18x18xf32> to vector<16x16xf32>
    %1057 = vector.broadcast %1055 : f32 to vector<16x16xf32>
    %1058 = arith.mulf %1057, %1056 : vector<16x16xf32>
    %1059 = arith.addf %1054, %1058 : vector<16x16xf32>
    %c188 = arith.constant 188 : index
    %1060 = memref.load %arg1[%c188] : memref<243xf32, #tpu.memory_space<smem>>
    %1061 = vector.extract_strided_slice %928 {offsets = [2, 2], sizes = [16, 16], strides = [1, 1]} : vector<18x18xf32> to vector<16x16xf32>
    %1062 = vector.broadcast %1060 : f32 to vector<16x16xf32>
    %1063 = arith.mulf %1062, %1061 : vector<16x16xf32>
    %1064 = arith.addf %1059, %1063 : vector<16x16xf32>
    %c4_110 = arith.constant 4 : index
    %c0_111 = arith.constant 0 : index
    %1065 = memref.load %arg2[%c4_110, %c0_111] : memref<6x3xf32, #tpu.memory_space<smem>>
    %1066 = vector.broadcast %1065 : f32 to vector<16x16xf32>
    %1067 = arith.mulf %1064, %1066 : vector<16x16xf32>
    %c5_112 = arith.constant 5 : index
    %c0_113 = arith.constant 0 : index
    %1068 = memref.load %arg2[%c5_112, %c0_113] : memref<6x3xf32, #tpu.memory_space<smem>>
    %1069 = vector.broadcast %1068 : f32 to vector<16x16xf32>
    %1070 = arith.addf %1067, %1069 : vector<16x16xf32>
    %1071 = arith.negf %1070 : vector<16x16xf32>
    %1072 = math.exp %1071 : vector<16x16xf32>
    %cst_114 = arith.constant 1.000000e+00 : f32
    %1073 = vector.broadcast %cst_114 : f32 to vector<16x16xf32>
    %1074 = arith.addf %1073, %1072 : vector<16x16xf32>
    %1075 = arith.divf %1073, %1074 : vector<16x16xf32>
    %cst_115 = arith.constant 0.000000e+00 : f32
    %1076 = vector.broadcast %cst_115 : f32 to vector<16x16xf32>
    %c189 = arith.constant 189 : index
    %1077 = memref.load %arg1[%c189] : memref<243xf32, #tpu.memory_space<smem>>
    %1078 = vector.extract_strided_slice %924 {offsets = [0, 0], sizes = [16, 16], strides = [1, 1]} : vector<18x18xf32> to vector<16x16xf32>
    %1079 = vector.broadcast %1077 : f32 to vector<16x16xf32>
    %1080 = arith.mulf %1079, %1078 : vector<16x16xf32>
    %1081 = arith.addf %1076, %1080 : vector<16x16xf32>
    %c190 = arith.constant 190 : index
    %1082 = memref.load %arg1[%c190] : memref<243xf32, #tpu.memory_space<smem>>
    %1083 = vector.extract_strided_slice %924 {offsets = [0, 1], sizes = [16, 16], strides = [1, 1]} : vector<18x18xf32> to vector<16x16xf32>
    %1084 = vector.broadcast %1082 : f32 to vector<16x16xf32>
    %1085 = arith.mulf %1084, %1083 : vector<16x16xf32>
    %1086 = arith.addf %1081, %1085 : vector<16x16xf32>
    %c191 = arith.constant 191 : index
    %1087 = memref.load %arg1[%c191] : memref<243xf32, #tpu.memory_space<smem>>
    %1088 = vector.extract_strided_slice %924 {offsets = [0, 2], sizes = [16, 16], strides = [1, 1]} : vector<18x18xf32> to vector<16x16xf32>
    %1089 = vector.broadcast %1087 : f32 to vector<16x16xf32>
    %1090 = arith.mulf %1089, %1088 : vector<16x16xf32>
    %1091 = arith.addf %1086, %1090 : vector<16x16xf32>
    %c192 = arith.constant 192 : index
    %1092 = memref.load %arg1[%c192] : memref<243xf32, #tpu.memory_space<smem>>
    %1093 = vector.extract_strided_slice %924 {offsets = [1, 0], sizes = [16, 16], strides = [1, 1]} : vector<18x18xf32> to vector<16x16xf32>
    %1094 = vector.broadcast %1092 : f32 to vector<16x16xf32>
    %1095 = arith.mulf %1094, %1093 : vector<16x16xf32>
    %1096 = arith.addf %1091, %1095 : vector<16x16xf32>
    %c193 = arith.constant 193 : index
    %1097 = memref.load %arg1[%c193] : memref<243xf32, #tpu.memory_space<smem>>
    %1098 = vector.extract_strided_slice %924 {offsets = [1, 1], sizes = [16, 16], strides = [1, 1]} : vector<18x18xf32> to vector<16x16xf32>
    %1099 = vector.broadcast %1097 : f32 to vector<16x16xf32>
    %1100 = arith.mulf %1099, %1098 : vector<16x16xf32>
    %1101 = arith.addf %1096, %1100 : vector<16x16xf32>
    %c194 = arith.constant 194 : index
    %1102 = memref.load %arg1[%c194] : memref<243xf32, #tpu.memory_space<smem>>
    %1103 = vector.extract_strided_slice %924 {offsets = [1, 2], sizes = [16, 16], strides = [1, 1]} : vector<18x18xf32> to vector<16x16xf32>
    %1104 = vector.broadcast %1102 : f32 to vector<16x16xf32>
    %1105 = arith.mulf %1104, %1103 : vector<16x16xf32>
    %1106 = arith.addf %1101, %1105 : vector<16x16xf32>
    %c195 = arith.constant 195 : index
    %1107 = memref.load %arg1[%c195] : memref<243xf32, #tpu.memory_space<smem>>
    %1108 = vector.extract_strided_slice %924 {offsets = [2, 0], sizes = [16, 16], strides = [1, 1]} : vector<18x18xf32> to vector<16x16xf32>
    %1109 = vector.broadcast %1107 : f32 to vector<16x16xf32>
    %1110 = arith.mulf %1109, %1108 : vector<16x16xf32>
    %1111 = arith.addf %1106, %1110 : vector<16x16xf32>
    %c196 = arith.constant 196 : index
    %1112 = memref.load %arg1[%c196] : memref<243xf32, #tpu.memory_space<smem>>
    %1113 = vector.extract_strided_slice %924 {offsets = [2, 1], sizes = [16, 16], strides = [1, 1]} : vector<18x18xf32> to vector<16x16xf32>
    %1114 = vector.broadcast %1112 : f32 to vector<16x16xf32>
    %1115 = arith.mulf %1114, %1113 : vector<16x16xf32>
    %1116 = arith.addf %1111, %1115 : vector<16x16xf32>
    %c197 = arith.constant 197 : index
    %1117 = memref.load %arg1[%c197] : memref<243xf32, #tpu.memory_space<smem>>
    %1118 = vector.extract_strided_slice %924 {offsets = [2, 2], sizes = [16, 16], strides = [1, 1]} : vector<18x18xf32> to vector<16x16xf32>
    %1119 = vector.broadcast %1117 : f32 to vector<16x16xf32>
    %1120 = arith.mulf %1119, %1118 : vector<16x16xf32>
    %1121 = arith.addf %1116, %1120 : vector<16x16xf32>
    %c198 = arith.constant 198 : index
    %1122 = memref.load %arg1[%c198] : memref<243xf32, #tpu.memory_space<smem>>
    %1123 = vector.extract_strided_slice %926 {offsets = [0, 0], sizes = [16, 16], strides = [1, 1]} : vector<18x18xf32> to vector<16x16xf32>
    %1124 = vector.broadcast %1122 : f32 to vector<16x16xf32>
    %1125 = arith.mulf %1124, %1123 : vector<16x16xf32>
    %1126 = arith.addf %1121, %1125 : vector<16x16xf32>
    %c199 = arith.constant 199 : index
    %1127 = memref.load %arg1[%c199] : memref<243xf32, #tpu.memory_space<smem>>
    %1128 = vector.extract_strided_slice %926 {offsets = [0, 1], sizes = [16, 16], strides = [1, 1]} : vector<18x18xf32> to vector<16x16xf32>
    %1129 = vector.broadcast %1127 : f32 to vector<16x16xf32>
    %1130 = arith.mulf %1129, %1128 : vector<16x16xf32>
    %1131 = arith.addf %1126, %1130 : vector<16x16xf32>
    %c200 = arith.constant 200 : index
    %1132 = memref.load %arg1[%c200] : memref<243xf32, #tpu.memory_space<smem>>
    %1133 = vector.extract_strided_slice %926 {offsets = [0, 2], sizes = [16, 16], strides = [1, 1]} : vector<18x18xf32> to vector<16x16xf32>
    %1134 = vector.broadcast %1132 : f32 to vector<16x16xf32>
    %1135 = arith.mulf %1134, %1133 : vector<16x16xf32>
    %1136 = arith.addf %1131, %1135 : vector<16x16xf32>
    %c201 = arith.constant 201 : index
    %1137 = memref.load %arg1[%c201] : memref<243xf32, #tpu.memory_space<smem>>
    %1138 = vector.extract_strided_slice %926 {offsets = [1, 0], sizes = [16, 16], strides = [1, 1]} : vector<18x18xf32> to vector<16x16xf32>
    %1139 = vector.broadcast %1137 : f32 to vector<16x16xf32>
    %1140 = arith.mulf %1139, %1138 : vector<16x16xf32>
    %1141 = arith.addf %1136, %1140 : vector<16x16xf32>
    %c202 = arith.constant 202 : index
    %1142 = memref.load %arg1[%c202] : memref<243xf32, #tpu.memory_space<smem>>
    %1143 = vector.extract_strided_slice %926 {offsets = [1, 1], sizes = [16, 16], strides = [1, 1]} : vector<18x18xf32> to vector<16x16xf32>
    %1144 = vector.broadcast %1142 : f32 to vector<16x16xf32>
    %1145 = arith.mulf %1144, %1143 : vector<16x16xf32>
    %1146 = arith.addf %1141, %1145 : vector<16x16xf32>
    %c203 = arith.constant 203 : index
    %1147 = memref.load %arg1[%c203] : memref<243xf32, #tpu.memory_space<smem>>
    %1148 = vector.extract_strided_slice %926 {offsets = [1, 2], sizes = [16, 16], strides = [1, 1]} : vector<18x18xf32> to vector<16x16xf32>
    %1149 = vector.broadcast %1147 : f32 to vector<16x16xf32>
    %1150 = arith.mulf %1149, %1148 : vector<16x16xf32>
    %1151 = arith.addf %1146, %1150 : vector<16x16xf32>
    %c204 = arith.constant 204 : index
    %1152 = memref.load %arg1[%c204] : memref<243xf32, #tpu.memory_space<smem>>
    %1153 = vector.extract_strided_slice %926 {offsets = [2, 0], sizes = [16, 16], strides = [1, 1]} : vector<18x18xf32> to vector<16x16xf32>
    %1154 = vector.broadcast %1152 : f32 to vector<16x16xf32>
    %1155 = arith.mulf %1154, %1153 : vector<16x16xf32>
    %1156 = arith.addf %1151, %1155 : vector<16x16xf32>
    %c205 = arith.constant 205 : index
    %1157 = memref.load %arg1[%c205] : memref<243xf32, #tpu.memory_space<smem>>
    %1158 = vector.extract_strided_slice %926 {offsets = [2, 1], sizes = [16, 16], strides = [1, 1]} : vector<18x18xf32> to vector<16x16xf32>
    %1159 = vector.broadcast %1157 : f32 to vector<16x16xf32>
    %1160 = arith.mulf %1159, %1158 : vector<16x16xf32>
    %1161 = arith.addf %1156, %1160 : vector<16x16xf32>
    %c206 = arith.constant 206 : index
    %1162 = memref.load %arg1[%c206] : memref<243xf32, #tpu.memory_space<smem>>
    %1163 = vector.extract_strided_slice %926 {offsets = [2, 2], sizes = [16, 16], strides = [1, 1]} : vector<18x18xf32> to vector<16x16xf32>
    %1164 = vector.broadcast %1162 : f32 to vector<16x16xf32>
    %1165 = arith.mulf %1164, %1163 : vector<16x16xf32>
    %1166 = arith.addf %1161, %1165 : vector<16x16xf32>
    %c207 = arith.constant 207 : index
    %1167 = memref.load %arg1[%c207] : memref<243xf32, #tpu.memory_space<smem>>
    %1168 = vector.extract_strided_slice %928 {offsets = [0, 0], sizes = [16, 16], strides = [1, 1]} : vector<18x18xf32> to vector<16x16xf32>
    %1169 = vector.broadcast %1167 : f32 to vector<16x16xf32>
    %1170 = arith.mulf %1169, %1168 : vector<16x16xf32>
    %1171 = arith.addf %1166, %1170 : vector<16x16xf32>
    %c208 = arith.constant 208 : index
    %1172 = memref.load %arg1[%c208] : memref<243xf32, #tpu.memory_space<smem>>
    %1173 = vector.extract_strided_slice %928 {offsets = [0, 1], sizes = [16, 16], strides = [1, 1]} : vector<18x18xf32> to vector<16x16xf32>
    %1174 = vector.broadcast %1172 : f32 to vector<16x16xf32>
    %1175 = arith.mulf %1174, %1173 : vector<16x16xf32>
    %1176 = arith.addf %1171, %1175 : vector<16x16xf32>
    %c209 = arith.constant 209 : index
    %1177 = memref.load %arg1[%c209] : memref<243xf32, #tpu.memory_space<smem>>
    %1178 = vector.extract_strided_slice %928 {offsets = [0, 2], sizes = [16, 16], strides = [1, 1]} : vector<18x18xf32> to vector<16x16xf32>
    %1179 = vector.broadcast %1177 : f32 to vector<16x16xf32>
    %1180 = arith.mulf %1179, %1178 : vector<16x16xf32>
    %1181 = arith.addf %1176, %1180 : vector<16x16xf32>
    %c210 = arith.constant 210 : index
    %1182 = memref.load %arg1[%c210] : memref<243xf32, #tpu.memory_space<smem>>
    %1183 = vector.extract_strided_slice %928 {offsets = [1, 0], sizes = [16, 16], strides = [1, 1]} : vector<18x18xf32> to vector<16x16xf32>
    %1184 = vector.broadcast %1182 : f32 to vector<16x16xf32>
    %1185 = arith.mulf %1184, %1183 : vector<16x16xf32>
    %1186 = arith.addf %1181, %1185 : vector<16x16xf32>
    %c211 = arith.constant 211 : index
    %1187 = memref.load %arg1[%c211] : memref<243xf32, #tpu.memory_space<smem>>
    %1188 = vector.extract_strided_slice %928 {offsets = [1, 1], sizes = [16, 16], strides = [1, 1]} : vector<18x18xf32> to vector<16x16xf32>
    %1189 = vector.broadcast %1187 : f32 to vector<16x16xf32>
    %1190 = arith.mulf %1189, %1188 : vector<16x16xf32>
    %1191 = arith.addf %1186, %1190 : vector<16x16xf32>
    %c212 = arith.constant 212 : index
    %1192 = memref.load %arg1[%c212] : memref<243xf32, #tpu.memory_space<smem>>
    %1193 = vector.extract_strided_slice %928 {offsets = [1, 2], sizes = [16, 16], strides = [1, 1]} : vector<18x18xf32> to vector<16x16xf32>
    %1194 = vector.broadcast %1192 : f32 to vector<16x16xf32>
    %1195 = arith.mulf %1194, %1193 : vector<16x16xf32>
    %1196 = arith.addf %1191, %1195 : vector<16x16xf32>
    %c213 = arith.constant 213 : index
    %1197 = memref.load %arg1[%c213] : memref<243xf32, #tpu.memory_space<smem>>
    %1198 = vector.extract_strided_slice %928 {offsets = [2, 0], sizes = [16, 16], strides = [1, 1]} : vector<18x18xf32> to vector<16x16xf32>
    %1199 = vector.broadcast %1197 : f32 to vector<16x16xf32>
    %1200 = arith.mulf %1199, %1198 : vector<16x16xf32>
    %1201 = arith.addf %1196, %1200 : vector<16x16xf32>
    %c214 = arith.constant 214 : index
    %1202 = memref.load %arg1[%c214] : memref<243xf32, #tpu.memory_space<smem>>
    %1203 = vector.extract_strided_slice %928 {offsets = [2, 1], sizes = [16, 16], strides = [1, 1]} : vector<18x18xf32> to vector<16x16xf32>
    %1204 = vector.broadcast %1202 : f32 to vector<16x16xf32>
    %1205 = arith.mulf %1204, %1203 : vector<16x16xf32>
    %1206 = arith.addf %1201, %1205 : vector<16x16xf32>
    %c215 = arith.constant 215 : index
    %1207 = memref.load %arg1[%c215] : memref<243xf32, #tpu.memory_space<smem>>
    %1208 = vector.extract_strided_slice %928 {offsets = [2, 2], sizes = [16, 16], strides = [1, 1]} : vector<18x18xf32> to vector<16x16xf32>
    %1209 = vector.broadcast %1207 : f32 to vector<16x16xf32>
    %1210 = arith.mulf %1209, %1208 : vector<16x16xf32>
    %1211 = arith.addf %1206, %1210 : vector<16x16xf32>
    %c4_116 = arith.constant 4 : index
    %c1_117 = arith.constant 1 : index
    %1212 = memref.load %arg2[%c4_116, %c1_117] : memref<6x3xf32, #tpu.memory_space<smem>>
    %1213 = vector.broadcast %1212 : f32 to vector<16x16xf32>
    %1214 = arith.mulf %1211, %1213 : vector<16x16xf32>
    %c5_118 = arith.constant 5 : index
    %c1_119 = arith.constant 1 : index
    %1215 = memref.load %arg2[%c5_118, %c1_119] : memref<6x3xf32, #tpu.memory_space<smem>>
    %1216 = vector.broadcast %1215 : f32 to vector<16x16xf32>
    %1217 = arith.addf %1214, %1216 : vector<16x16xf32>
    %1218 = arith.negf %1217 : vector<16x16xf32>
    %1219 = math.exp %1218 : vector<16x16xf32>
    %cst_120 = arith.constant 1.000000e+00 : f32
    %1220 = vector.broadcast %cst_120 : f32 to vector<16x16xf32>
    %1221 = arith.addf %1220, %1219 : vector<16x16xf32>
    %1222 = arith.divf %1220, %1221 : vector<16x16xf32>
    %cst_121 = arith.constant 0.000000e+00 : f32
    %1223 = vector.broadcast %cst_121 : f32 to vector<16x16xf32>
    %c216 = arith.constant 216 : index
    %1224 = memref.load %arg1[%c216] : memref<243xf32, #tpu.memory_space<smem>>
    %1225 = vector.extract_strided_slice %924 {offsets = [0, 0], sizes = [16, 16], strides = [1, 1]} : vector<18x18xf32> to vector<16x16xf32>
    %1226 = vector.broadcast %1224 : f32 to vector<16x16xf32>
    %1227 = arith.mulf %1226, %1225 : vector<16x16xf32>
    %1228 = arith.addf %1223, %1227 : vector<16x16xf32>
    %c217 = arith.constant 217 : index
    %1229 = memref.load %arg1[%c217] : memref<243xf32, #tpu.memory_space<smem>>
    %1230 = vector.extract_strided_slice %924 {offsets = [0, 1], sizes = [16, 16], strides = [1, 1]} : vector<18x18xf32> to vector<16x16xf32>
    %1231 = vector.broadcast %1229 : f32 to vector<16x16xf32>
    %1232 = arith.mulf %1231, %1230 : vector<16x16xf32>
    %1233 = arith.addf %1228, %1232 : vector<16x16xf32>
    %c218 = arith.constant 218 : index
    %1234 = memref.load %arg1[%c218] : memref<243xf32, #tpu.memory_space<smem>>
    %1235 = vector.extract_strided_slice %924 {offsets = [0, 2], sizes = [16, 16], strides = [1, 1]} : vector<18x18xf32> to vector<16x16xf32>
    %1236 = vector.broadcast %1234 : f32 to vector<16x16xf32>
    %1237 = arith.mulf %1236, %1235 : vector<16x16xf32>
    %1238 = arith.addf %1233, %1237 : vector<16x16xf32>
    %c219 = arith.constant 219 : index
    %1239 = memref.load %arg1[%c219] : memref<243xf32, #tpu.memory_space<smem>>
    %1240 = vector.extract_strided_slice %924 {offsets = [1, 0], sizes = [16, 16], strides = [1, 1]} : vector<18x18xf32> to vector<16x16xf32>
    %1241 = vector.broadcast %1239 : f32 to vector<16x16xf32>
    %1242 = arith.mulf %1241, %1240 : vector<16x16xf32>
    %1243 = arith.addf %1238, %1242 : vector<16x16xf32>
    %c220 = arith.constant 220 : index
    %1244 = memref.load %arg1[%c220] : memref<243xf32, #tpu.memory_space<smem>>
    %1245 = vector.extract_strided_slice %924 {offsets = [1, 1], sizes = [16, 16], strides = [1, 1]} : vector<18x18xf32> to vector<16x16xf32>
    %1246 = vector.broadcast %1244 : f32 to vector<16x16xf32>
    %1247 = arith.mulf %1246, %1245 : vector<16x16xf32>
    %1248 = arith.addf %1243, %1247 : vector<16x16xf32>
    %c221 = arith.constant 221 : index
    %1249 = memref.load %arg1[%c221] : memref<243xf32, #tpu.memory_space<smem>>
    %1250 = vector.extract_strided_slice %924 {offsets = [1, 2], sizes = [16, 16], strides = [1, 1]} : vector<18x18xf32> to vector<16x16xf32>
    %1251 = vector.broadcast %1249 : f32 to vector<16x16xf32>
    %1252 = arith.mulf %1251, %1250 : vector<16x16xf32>
    %1253 = arith.addf %1248, %1252 : vector<16x16xf32>
    %c222 = arith.constant 222 : index
    %1254 = memref.load %arg1[%c222] : memref<243xf32, #tpu.memory_space<smem>>
    %1255 = vector.extract_strided_slice %924 {offsets = [2, 0], sizes = [16, 16], strides = [1, 1]} : vector<18x18xf32> to vector<16x16xf32>
    %1256 = vector.broadcast %1254 : f32 to vector<16x16xf32>
    %1257 = arith.mulf %1256, %1255 : vector<16x16xf32>
    %1258 = arith.addf %1253, %1257 : vector<16x16xf32>
    %c223 = arith.constant 223 : index
    %1259 = memref.load %arg1[%c223] : memref<243xf32, #tpu.memory_space<smem>>
    %1260 = vector.extract_strided_slice %924 {offsets = [2, 1], sizes = [16, 16], strides = [1, 1]} : vector<18x18xf32> to vector<16x16xf32>
    %1261 = vector.broadcast %1259 : f32 to vector<16x16xf32>
    %1262 = arith.mulf %1261, %1260 : vector<16x16xf32>
    %1263 = arith.addf %1258, %1262 : vector<16x16xf32>
    %c224 = arith.constant 224 : index
    %1264 = memref.load %arg1[%c224] : memref<243xf32, #tpu.memory_space<smem>>
    %1265 = vector.extract_strided_slice %924 {offsets = [2, 2], sizes = [16, 16], strides = [1, 1]} : vector<18x18xf32> to vector<16x16xf32>
    %1266 = vector.broadcast %1264 : f32 to vector<16x16xf32>
    %1267 = arith.mulf %1266, %1265 : vector<16x16xf32>
    %1268 = arith.addf %1263, %1267 : vector<16x16xf32>
    %c225 = arith.constant 225 : index
    %1269 = memref.load %arg1[%c225] : memref<243xf32, #tpu.memory_space<smem>>
    %1270 = vector.extract_strided_slice %926 {offsets = [0, 0], sizes = [16, 16], strides = [1, 1]} : vector<18x18xf32> to vector<16x16xf32>
    %1271 = vector.broadcast %1269 : f32 to vector<16x16xf32>
    %1272 = arith.mulf %1271, %1270 : vector<16x16xf32>
    %1273 = arith.addf %1268, %1272 : vector<16x16xf32>
    %c226 = arith.constant 226 : index
    %1274 = memref.load %arg1[%c226] : memref<243xf32, #tpu.memory_space<smem>>
    %1275 = vector.extract_strided_slice %926 {offsets = [0, 1], sizes = [16, 16], strides = [1, 1]} : vector<18x18xf32> to vector<16x16xf32>
    %1276 = vector.broadcast %1274 : f32 to vector<16x16xf32>
    %1277 = arith.mulf %1276, %1275 : vector<16x16xf32>
    %1278 = arith.addf %1273, %1277 : vector<16x16xf32>
    %c227 = arith.constant 227 : index
    %1279 = memref.load %arg1[%c227] : memref<243xf32, #tpu.memory_space<smem>>
    %1280 = vector.extract_strided_slice %926 {offsets = [0, 2], sizes = [16, 16], strides = [1, 1]} : vector<18x18xf32> to vector<16x16xf32>
    %1281 = vector.broadcast %1279 : f32 to vector<16x16xf32>
    %1282 = arith.mulf %1281, %1280 : vector<16x16xf32>
    %1283 = arith.addf %1278, %1282 : vector<16x16xf32>
    %c228 = arith.constant 228 : index
    %1284 = memref.load %arg1[%c228] : memref<243xf32, #tpu.memory_space<smem>>
    %1285 = vector.extract_strided_slice %926 {offsets = [1, 0], sizes = [16, 16], strides = [1, 1]} : vector<18x18xf32> to vector<16x16xf32>
    %1286 = vector.broadcast %1284 : f32 to vector<16x16xf32>
    %1287 = arith.mulf %1286, %1285 : vector<16x16xf32>
    %1288 = arith.addf %1283, %1287 : vector<16x16xf32>
    %c229 = arith.constant 229 : index
    %1289 = memref.load %arg1[%c229] : memref<243xf32, #tpu.memory_space<smem>>
    %1290 = vector.extract_strided_slice %926 {offsets = [1, 1], sizes = [16, 16], strides = [1, 1]} : vector<18x18xf32> to vector<16x16xf32>
    %1291 = vector.broadcast %1289 : f32 to vector<16x16xf32>
    %1292 = arith.mulf %1291, %1290 : vector<16x16xf32>
    %1293 = arith.addf %1288, %1292 : vector<16x16xf32>
    %c230 = arith.constant 230 : index
    %1294 = memref.load %arg1[%c230] : memref<243xf32, #tpu.memory_space<smem>>
    %1295 = vector.extract_strided_slice %926 {offsets = [1, 2], sizes = [16, 16], strides = [1, 1]} : vector<18x18xf32> to vector<16x16xf32>
    %1296 = vector.broadcast %1294 : f32 to vector<16x16xf32>
    %1297 = arith.mulf %1296, %1295 : vector<16x16xf32>
    %1298 = arith.addf %1293, %1297 : vector<16x16xf32>
    %c231 = arith.constant 231 : index
    %1299 = memref.load %arg1[%c231] : memref<243xf32, #tpu.memory_space<smem>>
    %1300 = vector.extract_strided_slice %926 {offsets = [2, 0], sizes = [16, 16], strides = [1, 1]} : vector<18x18xf32> to vector<16x16xf32>
    %1301 = vector.broadcast %1299 : f32 to vector<16x16xf32>
    %1302 = arith.mulf %1301, %1300 : vector<16x16xf32>
    %1303 = arith.addf %1298, %1302 : vector<16x16xf32>
    %c232 = arith.constant 232 : index
    %1304 = memref.load %arg1[%c232] : memref<243xf32, #tpu.memory_space<smem>>
    %1305 = vector.extract_strided_slice %926 {offsets = [2, 1], sizes = [16, 16], strides = [1, 1]} : vector<18x18xf32> to vector<16x16xf32>
    %1306 = vector.broadcast %1304 : f32 to vector<16x16xf32>
    %1307 = arith.mulf %1306, %1305 : vector<16x16xf32>
    %1308 = arith.addf %1303, %1307 : vector<16x16xf32>
    %c233 = arith.constant 233 : index
    %1309 = memref.load %arg1[%c233] : memref<243xf32, #tpu.memory_space<smem>>
    %1310 = vector.extract_strided_slice %926 {offsets = [2, 2], sizes = [16, 16], strides = [1, 1]} : vector<18x18xf32> to vector<16x16xf32>
    %1311 = vector.broadcast %1309 : f32 to vector<16x16xf32>
    %1312 = arith.mulf %1311, %1310 : vector<16x16xf32>
    %1313 = arith.addf %1308, %1312 : vector<16x16xf32>
    %c234 = arith.constant 234 : index
    %1314 = memref.load %arg1[%c234] : memref<243xf32, #tpu.memory_space<smem>>
    %1315 = vector.extract_strided_slice %928 {offsets = [0, 0], sizes = [16, 16], strides = [1, 1]} : vector<18x18xf32> to vector<16x16xf32>
    %1316 = vector.broadcast %1314 : f32 to vector<16x16xf32>
    %1317 = arith.mulf %1316, %1315 : vector<16x16xf32>
    %1318 = arith.addf %1313, %1317 : vector<16x16xf32>
    %c235 = arith.constant 235 : index
    %1319 = memref.load %arg1[%c235] : memref<243xf32, #tpu.memory_space<smem>>
    %1320 = vector.extract_strided_slice %928 {offsets = [0, 1], sizes = [16, 16], strides = [1, 1]} : vector<18x18xf32> to vector<16x16xf32>
    %1321 = vector.broadcast %1319 : f32 to vector<16x16xf32>
    %1322 = arith.mulf %1321, %1320 : vector<16x16xf32>
    %1323 = arith.addf %1318, %1322 : vector<16x16xf32>
    %c236 = arith.constant 236 : index
    %1324 = memref.load %arg1[%c236] : memref<243xf32, #tpu.memory_space<smem>>
    %1325 = vector.extract_strided_slice %928 {offsets = [0, 2], sizes = [16, 16], strides = [1, 1]} : vector<18x18xf32> to vector<16x16xf32>
    %1326 = vector.broadcast %1324 : f32 to vector<16x16xf32>
    %1327 = arith.mulf %1326, %1325 : vector<16x16xf32>
    %1328 = arith.addf %1323, %1327 : vector<16x16xf32>
    %c237 = arith.constant 237 : index
    %1329 = memref.load %arg1[%c237] : memref<243xf32, #tpu.memory_space<smem>>
    %1330 = vector.extract_strided_slice %928 {offsets = [1, 0], sizes = [16, 16], strides = [1, 1]} : vector<18x18xf32> to vector<16x16xf32>
    %1331 = vector.broadcast %1329 : f32 to vector<16x16xf32>
    %1332 = arith.mulf %1331, %1330 : vector<16x16xf32>
    %1333 = arith.addf %1328, %1332 : vector<16x16xf32>
    %c238 = arith.constant 238 : index
    %1334 = memref.load %arg1[%c238] : memref<243xf32, #tpu.memory_space<smem>>
    %1335 = vector.extract_strided_slice %928 {offsets = [1, 1], sizes = [16, 16], strides = [1, 1]} : vector<18x18xf32> to vector<16x16xf32>
    %1336 = vector.broadcast %1334 : f32 to vector<16x16xf32>
    %1337 = arith.mulf %1336, %1335 : vector<16x16xf32>
    %1338 = arith.addf %1333, %1337 : vector<16x16xf32>
    %c239 = arith.constant 239 : index
    %1339 = memref.load %arg1[%c239] : memref<243xf32, #tpu.memory_space<smem>>
    %1340 = vector.extract_strided_slice %928 {offsets = [1, 2], sizes = [16, 16], strides = [1, 1]} : vector<18x18xf32> to vector<16x16xf32>
    %1341 = vector.broadcast %1339 : f32 to vector<16x16xf32>
    %1342 = arith.mulf %1341, %1340 : vector<16x16xf32>
    %1343 = arith.addf %1338, %1342 : vector<16x16xf32>
    %c240 = arith.constant 240 : index
    %1344 = memref.load %arg1[%c240] : memref<243xf32, #tpu.memory_space<smem>>
    %1345 = vector.extract_strided_slice %928 {offsets = [2, 0], sizes = [16, 16], strides = [1, 1]} : vector<18x18xf32> to vector<16x16xf32>
    %1346 = vector.broadcast %1344 : f32 to vector<16x16xf32>
    %1347 = arith.mulf %1346, %1345 : vector<16x16xf32>
    %1348 = arith.addf %1343, %1347 : vector<16x16xf32>
    %c241 = arith.constant 241 : index
    %1349 = memref.load %arg1[%c241] : memref<243xf32, #tpu.memory_space<smem>>
    %1350 = vector.extract_strided_slice %928 {offsets = [2, 1], sizes = [16, 16], strides = [1, 1]} : vector<18x18xf32> to vector<16x16xf32>
    %1351 = vector.broadcast %1349 : f32 to vector<16x16xf32>
    %1352 = arith.mulf %1351, %1350 : vector<16x16xf32>
    %1353 = arith.addf %1348, %1352 : vector<16x16xf32>
    %c242 = arith.constant 242 : index
    %1354 = memref.load %arg1[%c242] : memref<243xf32, #tpu.memory_space<smem>>
    %1355 = vector.extract_strided_slice %928 {offsets = [2, 2], sizes = [16, 16], strides = [1, 1]} : vector<18x18xf32> to vector<16x16xf32>
    %1356 = vector.broadcast %1354 : f32 to vector<16x16xf32>
    %1357 = arith.mulf %1356, %1355 : vector<16x16xf32>
    %1358 = arith.addf %1353, %1357 : vector<16x16xf32>
    %c4_122 = arith.constant 4 : index
    %c2_123 = arith.constant 2 : index
    %1359 = memref.load %arg2[%c4_122, %c2_123] : memref<6x3xf32, #tpu.memory_space<smem>>
    %1360 = vector.broadcast %1359 : f32 to vector<16x16xf32>
    %1361 = arith.mulf %1358, %1360 : vector<16x16xf32>
    %c5_124 = arith.constant 5 : index
    %c2_125 = arith.constant 2 : index
    %1362 = memref.load %arg2[%c5_124, %c2_125] : memref<6x3xf32, #tpu.memory_space<smem>>
    %1363 = vector.broadcast %1362 : f32 to vector<16x16xf32>
    %1364 = arith.addf %1361, %1363 : vector<16x16xf32>
    %1365 = arith.negf %1364 : vector<16x16xf32>
    %1366 = math.exp %1365 : vector<16x16xf32>
    %cst_126 = arith.constant 1.000000e+00 : f32
    %1367 = vector.broadcast %cst_126 : f32 to vector<16x16xf32>
    %1368 = arith.addf %1367, %1366 : vector<16x16xf32>
    %1369 = arith.divf %1367, %1368 : vector<16x16xf32>
    %1370 = vector.extract_strided_slice %4 {offsets = [0, 0, 0], sizes = [1, 16, 16], strides = [1, 1, 1]} : vector<3x16x16xf32> to vector<1x16x16xf32>
    %1371 = vector.shape_cast %1370 : vector<1x16x16xf32> to vector<16x16xf32>
    %1372 = arith.addf %1075, %1371 : vector<16x16xf32>
    %cst_127 = arith.constant 9.99999974E-5 : f32
    %cst_128 = arith.constant 1.000000e+00 : f32
    %1373 = vector.broadcast %cst_127 : f32 to vector<16x16xf32>
    %1374 = arith.maximumf %1373, %1372 : vector<16x16xf32>
    %1375 = vector.broadcast %cst_128 : f32 to vector<16x16xf32>
    %1376 = arith.minimumf %1375, %1374 : vector<16x16xf32>
    %1377 = vector.extract_strided_slice %4 {offsets = [0, 0, 0], sizes = [1, 16, 16], strides = [1, 1, 1]} : vector<3x16x16xf32> to vector<1x16x16xf32>
    %1378 = vector.shape_cast %1377 : vector<1x16x16xf32> to vector<16x16xf32>
    %1379 = arith.divf %1378, %1376 : vector<16x16xf32>
    %cst_129 = arith.constant 0.000000e+00 : f32
    %cst_130 = arith.constant 1.000000e+00 : f32
    %1380 = vector.broadcast %cst_129 : f32 to vector<16x16xf32>
    %1381 = arith.maximumf %1380, %1379 : vector<16x16xf32>
    %1382 = vector.broadcast %cst_130 : f32 to vector<16x16xf32>
    %1383 = arith.minimumf %1382, %1381 : vector<16x16xf32>
    %c0_131 = arith.constant 0 : index
    %c0_132 = arith.constant 0 : index
    %c0_133 = arith.constant 0 : index
    %c0_134 = arith.constant 0 : index
    %1384 = vector.load %arg4[%c0_131, %c0_132, %c0_133, %c0_134] : memref<1x3x16x16xf32, #tpu.memory_space<vmem>>, vector<1x1x16x16xf32>
    %1385 = vector.shape_cast %1384 : vector<1x1x16x16xf32> to vector<16x16xf32>
    %1386 = vector.shape_cast %1383 : vector<16x16xf32> to vector<1x1x16x16xf32>
    tpu.vector_store %arg4[%c0_131, %c0_132, %c0_133, %c0_134], %1386 {strides = array<i32>} : memref<1x3x16x16xf32, #tpu.memory_space<vmem>>, vector<1x1x16x16xf32>,
    %1387 = vector.extract_strided_slice %4 {offsets = [1, 0, 0], sizes = [1, 16, 16], strides = [1, 1, 1]} : vector<3x16x16xf32> to vector<1x16x16xf32>
    %1388 = vector.shape_cast %1387 : vector<1x16x16xf32> to vector<16x16xf32>
    %1389 = arith.addf %1222, %1388 : vector<16x16xf32>
    %cst_135 = arith.constant 9.99999974E-5 : f32
    %cst_136 = arith.constant 1.000000e+00 : f32
    %1390 = vector.broadcast %cst_135 : f32 to vector<16x16xf32>
    %1391 = arith.maximumf %1390, %1389 : vector<16x16xf32>
    %1392 = vector.broadcast %cst_136 : f32 to vector<16x16xf32>
    %1393 = arith.minimumf %1392, %1391 : vector<16x16xf32>
    %1394 = vector.extract_strided_slice %4 {offsets = [1, 0, 0], sizes = [1, 16, 16], strides = [1, 1, 1]} : vector<3x16x16xf32> to vector<1x16x16xf32>
    %1395 = vector.shape_cast %1394 : vector<1x16x16xf32> to vector<16x16xf32>
    %1396 = arith.divf %1395, %1393 : vector<16x16xf32>
    %cst_137 = arith.constant 0.000000e+00 : f32
    %cst_138 = arith.constant 1.000000e+00 : f32
    %1397 = vector.broadcast %cst_137 : f32 to vector<16x16xf32>
    %1398 = arith.maximumf %1397, %1396 : vector<16x16xf32>
    %1399 = vector.broadcast %cst_138 : f32 to vector<16x16xf32>
    %1400 = arith.minimumf %1399, %1398 : vector<16x16xf32>
    %c0_139 = arith.constant 0 : index
    %c1_140 = arith.constant 1 : index
    %c0_141 = arith.constant 0 : index
    %c0_142 = arith.constant 0 : index
    %1401 = vector.load %arg4[%c0_139, %c1_140, %c0_141, %c0_142] : memref<1x3x16x16xf32, #tpu.memory_space<vmem>>, vector<1x1x16x16xf32>
    %1402 = vector.shape_cast %1401 : vector<1x1x16x16xf32> to vector<16x16xf32>
    %1403 = vector.shape_cast %1400 : vector<16x16xf32> to vector<1x1x16x16xf32>
    tpu.vector_store %arg4[%c0_139, %c1_140, %c0_141, %c0_142], %1403 {strides = array<i32>} : memref<1x3x16x16xf32, #tpu.memory_space<vmem>>, vector<1x1x16x16xf32>,
    %1404 = vector.extract_strided_slice %4 {offsets = [2, 0, 0], sizes = [1, 16, 16], strides = [1, 1, 1]} : vector<3x16x16xf32> to vector<1x16x16xf32>
    %1405 = vector.shape_cast %1404 : vector<1x16x16xf32> to vector<16x16xf32>
    %1406 = arith.addf %1369, %1405 : vector<16x16xf32>
    %cst_143 = arith.constant 9.99999974E-5 : f32
    %cst_144 = arith.constant 1.000000e+00 : f32
    %1407 = vector.broadcast %cst_143 : f32 to vector<16x16xf32>
    %1408 = arith.maximumf %1407, %1406 : vector<16x16xf32>
    %1409 = vector.broadcast %cst_144 : f32 to vector<16x16xf32>
    %1410 = arith.minimumf %1409, %1408 : vector<16x16xf32>
    %1411 = vector.extract_strided_slice %4 {offsets = [2, 0, 0], sizes = [1, 16, 16], strides = [1, 1, 1]} : vector<3x16x16xf32> to vector<1x16x16xf32>
    %1412 = vector.shape_cast %1411 : vector<1x16x16xf32> to vector<16x16xf32>
    %1413 = arith.divf %1412, %1410 : vector<16x16xf32>
    %cst_145 = arith.constant 0.000000e+00 : f32
    %cst_146 = arith.constant 1.000000e+00 : f32
    %1414 = vector.broadcast %cst_145 : f32 to vector<16x16xf32>
    %1415 = arith.maximumf %1414, %1413 : vector<16x16xf32>
    %1416 = vector.broadcast %cst_146 : f32 to vector<16x16xf32>
    %1417 = arith.minimumf %1416, %1415 : vector<16x16xf32>
    %c0_147 = arith.constant 0 : index
    %c2_148 = arith.constant 2 : index
    %c0_149 = arith.constant 0 : index
    %c0_150 = arith.constant 0 : index
    %1418 = vector.load %arg4[%c0_147, %c2_148, %c0_149, %c0_150] : memref<1x3x16x16xf32, #tpu.memory_space<vmem>>, vector<1x1x16x16xf32>
    %1419 = vector.shape_cast %1418 : vector<1x1x16x16xf32> to vector<16x16xf32>
    %1420 = vector.shape_cast %1417 : vector<16x16xf32> to vector<1x1x16x16xf32>
    tpu.vector_store %arg4[%c0_147, %c2_148, %c0_149, %c0_150], %1420 {strides = array<i32>} : memref<1x3x16x16xf32, #tpu.memory_space<vmem>>, vector<1x1x16x16xf32>,
    return
  }
  func.func @transform_0(%arg0: i32) -> i32 {
    %c0_i32 = arith.constant 0 : i32
    %c0_i32_0 = arith.constant 0 : i32
    return %c0_i32 : i32
  }
  func.func @transform_1(%arg0: i32) -> (i32, i32) {
    %c0_i32 = arith.constant 0 : i32
    %c0_i32_0 = arith.constant 0 : i32
    %c0_i32_1 = arith.constant 0 : i32
    return %c0_i32, %c0_i32_0 : i32, i32
  }
  func.func @transform_2(%arg0: i32) -> (i32, i32, i32, i32) {
    %c0_i32 = arith.constant 0 : i32
    %c0_i32_0 = arith.constant 0 : i32
    %c0_i32_1 = arith.constant 0 : i32
    %c0_i32_2 = arith.constant 0 : i32
    return %arg0, %c0_i32, %c0_i32_0, %c0_i32_1 : i32, i32, i32, i32
  }
  func.func @transform_3(%arg0: i32) -> (i32, i32, i32, i32) {
    %c0_i32 = arith.constant 0 : i32
    %c0_i32_0 = arith.constant 0 : i32
    %c0_i32_1 = arith.constant 0 : i32
    %c0_i32_2 = arith.constant 0 : i32
    return %arg0, %c0_i32, %c0_i32_0, %c0_i32_1 : i32, i32, i32, i32
  }
}

</mosaic_0001>

<bundles_post_ra>
// kernel: network_forward.1
= control target key start
LH: loop header
LB: loop body
LE: loop exit
PB: predicated region body
PF: predicated region fallthrough
CT: control target
= control target key end

     0   :  { %8 = vsyncpa [#allocation6], 0  ;;  %s8786_s0 = inlined_call_operand.vmem [shape: f32[243], index: 0, kind: input, shape index: {}]   ;;  %s8787_s1 = inlined_call_operand.vmem [shape: f32[6,3], index: 1, kind: input, shape index: {}]   ;;  %s8788_s2 = inlined_call_operand.hbm [shape: f32[2,3,16,16], index: 2, kind: input, shape index: {}]   ;;  %s8789_s3 = inlined_call_operand.vmem [shape: f32[2,3,16,16], index: 3, kind: output, shape index: {}]  }
   0x1   :  { %9 = vsyncpa [#allocation8], 0 }
   0x2   :  { %10 = vsyncpa [#allocation5], 0 }
   0x3   :  { %12 = vsyncpa [#allocation5 + $0x1], 0  ;;  %s5292_s12 = smov 0   ;;  %s5294_s13 = smov 0  }
   0x4   :  { %s5296_s14 = smov 0   ;;  %s5298_s15 = smov 0  }
   0x5 LB: > { %s5311_s16 = sadd.s32 4294967295, %s5261_s15   ;;  %s5314_s17 = sadd.s32 1, %s5261_s15   ;;  %s5261_s15 = sphi %s5298_s15, %s9238_s15   ;;  %s5257_s14 = sphi %s5296_s14, %s9237_s14   ;;  %s5253_s13 = sphi %s5294_s13, %s9236_s13   ;;  %s5249_s12 = sphi %s5292_s12, %s9235_s12  }
   0x6   : > { %s64_s18 = ssub.s32 %s5261_s15, %s5314_s17  ;;  %s67_s19 = sadd.s32 1, %s5257_s14 }
   0x7   : > { %p65_p0 = scmp.eq.s32.totalorder %s64_s18, 0  ;;  %p74_p1 = scmp.ne.s32.totalorder %s5257_s14, %s5253_s13 }
   0x8   : > { %p75_p2 = scmp.eq.s32.totalorder %s5261_s15, 0  ;;  %p80_p3 = scmp.ne.s32.totalorder %s5253_s13, %s5249_s12 }
   0x9   : > { %s5324_s20 = scalar_select %p65_p0, %s5257_s14, %s67_s19  }
   0xa   : > { %p5326_p4 = por %p75_p2, %p74_p1  ;;  %p8790_p5 = scmp.eq.s32.totalorder %s5311_s16, 0 }
   0xb   : > { %p4745_p6 = scmp.ge.s32.totalorder %s5261_s15, 1  ;;  %p117_p7 = scmp.lt.s32.totalorder %s5261_s15, 3 }
   0xc   : > { %p5335_p8 = por %p8790_p5, %p80_p3  ;;  %s130_s26 = sshll.u32 %s8786_s0, 4  ;;  %s131_s26 = int_to_ptr.vmem [resolvable:$true] %s130_s26 }
   0xd   : > { %p5339_p9 = pnand %p4745_p6, %p117_p7  ;;  %p5052_p11 = scmp.lt.s32.totalorder %s5261_s15, 2 }
   0xe   : > { %s8892_s22 = scalar_select %p5335_p8, 1, 0 }
   0xf   : > { %s8893_s23 = scalar_select %p5339_p9, 1, 0 }
  0x10   : > { %p5039_p10 = pneg %p5339_p9  ;;  %s141_s29 = sshll.u32 %s8787_s1, 4  ;;  %s142_s29 = int_to_ptr.vmem [resolvable:$true] %s141_s29 }
  0x11   : > { %p5360_p13 = pnand %p5052_p11, %p5326_p4  ;;  %s152_s5 = sand.u32 1, %s5257_s14  }
  0x12   : > { %p5354_p12 = pnand %p5039_p10, %p8790_p5  ;;  %s5159_s6 = scalar_lea.vmem %s131_s26, 32 }
  0x13   : > { %s8895_s4 = scalar_select %p5360_p13, 1, 0 }
  0x14   : > { %p5160_p0 = scmp.ne.s32.totalorder %s131_s26, %s5159_s6  ;;  %p5161_p1 = pneg %p5354_p12 }
  0x15   : > { %p5167_p6 = scmp.lt.s32.totalorder %s131_s26, %s131_s26  ;;  %p5168_p7 = scmp.lt.s32.totalorder %s5159_s6, %s5159_s6 }
  0x16   : > { %p5162_p2 = pnand %p5161_p1, %p5160_p0 }
  0x17   : > { %p5169_p10 = por %p5168_p7, %p5167_p6 }
  0x18   : > { %p5163_p3 = pneg %p5162_p2 }
  0x1a   : > { %p5170_p5 = pnand %p5169_p10, %p5163_p3 }
  0x1c   : > { %5173 = shalt.err (!%p5170_p5)
}
  0x1d   : > { %s5263_s7 = smov [#allocation4]   ;;  %s5174_s8 = scalar_lea.vmem %s142_s29, 128 }
  0x1e   : > { %5042 = dma.vmem_to_smem (!%p5354_p12), %s131_s26, 32, %s5263_s7, [#allocation6]  }
  0x1f   : > { %p5175_p4 = scmp.ne.s32.totalorder %s142_s29, %s5174_s8  ;;  %p5182_p9 = scmp.lt.s32.totalorder %s142_s29, %s142_s29 }
  0x20   : > { %p5183_p13 = scmp.lt.s32.totalorder %s5174_s8, %s5174_s8 }
  0x21   : > { %p5177_p11 = pnand %p5175_p4, %p5161_p1 }
  0x22   : > { %p5184_p0 = por %p5183_p13, %p5182_p9 }
  0x23   : > { %p5178_p8 = pneg %p5177_p11 }
  0x25   : > { %p5185_p2 = pnand %p5184_p0, %p5178_p8 }
  0x27   : > { %5188 = shalt.err (!%p5185_p2)
}
  0x28   : > { %s5264_s9 = smov [#allocation7]   ;;  %s5025_s10 = smul.u32 48, %s152_s5 }
  0x29   : > { %5045 = dma.vmem_to_smem (!%p5354_p12), %s142_s29, 128, %s5264_s9, [#allocation8]  }
  0x2a   : > { %s5026_s11 = smul.u32 768, %s5261_s15  ;;  %s156_s21 = scalar_lea.vmem [#allocation9], %s5025_s10 }
  0x2b   : > { %s163_s24 = sshll.u32 %s156_s21, 4  ;;  %s5383_s25 = scalar_lea.sflag [#allocation5], %s152_s5  ;;  %s5379_s24 = int_to_ptr.vmem [resolvable:$true] %s163_s24 }
  0x2c   : > { %s5377_s19 = scalar_lea.hbm %s8788_s2, %s5026_s11  ;;  %p8896_p8 = scmp.ne.s32.totalorder %s8895_s4, 0 }
  0x2d   : > { %s5189_s26 = scalar_lea.hbm %s5377_s19, 768  ;;  %s5194_s28 = scalar_lea.hbm %s8788_s2, 1536 }
  0x2e   : > { %p5190_p5 = scmp.ne.s32.totalorder %s5377_s19, %s5189_s26  ;;  %p5191_p9 = pneg %p8896_p8 }
  0x2f   : > { %p5195_p1 = scmp.lt.u32.totalorder %s5377_s19, %s8788_s2  ;;  %p5196_p3 = scmp.lt.u32.totalorder %s5194_s28, %s5189_s26 }
  0x30   : > { %p5192_p12 = pnand %p5191_p9, %p5190_p5  ;;  %p5198_p7 = scmp.lt.u32.totalorder %s5189_s26, %s5377_s19 }
  0x31   : > { %p5197_p6 = por %p5196_p3, %p5195_p1 }
  0x32   : > { %p5193_p13 = pneg %p5192_p12 }
  0x33   : > { %p5199_p10 = por %p5198_p7, %p5197_p6 }
  0x35   : > { %p5200_p4 = pnand %p5199_p10, %p5193_p13 }
  0x37   : > { %5203 = shalt.err (!%p5200_p4)
}
  0x38   : > { %s5204_s5 = scalar_lea.vmem %s5379_s24, 768  ;;  %s5265_s6 = smov [#allocation9]  }
  0x39   : > { %p5205_p11 = scmp.ne.s32.totalorder %s5379_s24, %s5204_s5  ;;  %s5209_s7 = sshll.u32 %s5265_s6, 4  ;;  %s5210_s7 = int_to_ptr.vmem [resolvable:$false] %s5209_s7 }
  0x3a   : > { %s5211_s8 = scalar_lea.vmem %s5210_s7, 1536  ;;  %p5212_p5 = scmp.lt.s32.totalorder %s5379_s24, %s5210_s7 }
  0x3b   : > { %p5207_p0 = pnand %p5205_p11, %p5191_p9  ;;  %p5213_p12 = scmp.lt.s32.totalorder %s5211_s8, %s5204_s5 }
  0x3d   : > { %p5208_p2 = pneg %p5207_p0  ;;  %p5214_p1 = por %p5213_p12, %p5212_p5 }
  0x3f   : > { %p5215_p3 = pnand %p5214_p1, %p5208_p2 }
  0x41   : > { %5218 = shalt.err (!%p5215_p3)
}
  0x42   : > { %s5266_s9 = smov 128   ;;  %s5267_s10 = smov 8  }
  0x43   : > { %5049 = dma.hbm_to_vmem [thread:$0]  (!%p8896_p8), %s5377_s19, 768, %s5379_s24, %s5383_s25, %s5266_s9, %s5266_s9, %s5267_s10  }
  0x44   : > { %p8897_p9 = scmp.ne.s32.totalorder %s8893_s23, 0 }
  0x46   : > { %175 = sbr.rel (%p8897_p9) target bundleno = 1494 (0x5d6), region = 32 }
  0x4d   : > { %p8898_p13 = scmp.eq.s32.totalorder %s5311_s16, 0 }
  0x4f   : > { %5236 = dma.done.wait (%p8898_p13), [#allocation6], 32   ;;  %p8899_p6 = pmov %p8898_p13 }
  0x51   : > { %5238 = vsyncadd (%p8899_p6), [#allocation6], 4294967264  ;;  %p8900_p7 = pmov %p8899_p6 }
  0x52   : > { %p8901_p10 = pmov %p8899_p6 }
  0x53   : > { %5240 = dma.done.wait (%p8900_p7), [#allocation8], 128  }
  0x54   : > { %5242 = vsyncadd (%p8901_p10), [#allocation8], 4294967168  ;;  %s185_s11 = sand.u32 1, %s5253_s13   ;;  %p8902_p8 = scmp.ne.s32.totalorder %s8892_s22, 0 }
  0x55   : > { %s5027_s4 = smul.u32 48, %s185_s11  ;;  %s186_s12 = scalar_lea.sflag [#allocation5], %s185_s11 }
  0x57   : > { %s5422_s18 = scalar_lea.vmem [#allocation9], %s5027_s4 }
  0x58   : > { %5244 = dma.done.wait (%p8902_p8), %s186_s12, 768  }
  0x59   : > { %5246 = vsyncadd (%p8902_p8), %s186_s12, 4294966528 }
  0x5a   : > { %194 = sfence }
  0x5b   : > { %v238_v0 = vld [vmem:[%s5422_s18] sm:$0xff]  ;;  %v240_v1 = vld [vmem:[%s5422_s18 + $0x10] sm:$0xff]  ;;  %vm218_vm0 = vcmask 146432   ;;  %s5268_s23 = smov 1   ;;  %vm221_vm1 = vcmask 140288   ;;  %v239_v2 = vld [vmem:[%s5422_s18 + $0x8] sm:$0xff] }
  0x5c   : > { %246 = vrot.lane.b32.xlu0 %v238_v0, %s5268_s23  ;;  %257 = vrot.lane.b32.xlu1 %v240_v1, %s5268_s23  ;;  %v241_v3 = vld [vmem:[%s5422_s18 + $0x18] sm:$0xff]  ;;  %v5269_v4 = vmov 0.0   ;;  %v242_v5 = vld [vmem:[%s5422_s18 + $0x20] sm:$0xff]  ;;  %vm252_vm2 = vcmask 138248   ;;  %s4754_s22 = sld [smem:[#allocation4 + $0x1]]  ;;  %s4755_s19 = sld [smem:[#allocation4 + $0x2]] }
  0x5d   : > { %219 = vst.msk [vmem:[#allocation2] sm:$0xff] %vm218_vm0, %v5269_v4  ;;  %220 = vst.msk [vmem:[#allocation2 + $0x8] sm:$0xff] %vm218_vm0, %v5269_v4  ;;  %v243_v6 = vld [vmem:[%s5422_s18 + $0x28] sm:$0xff]  ;;  %s5460_s21 = sld [smem:[#allocation4 + $0xa]]  ;;  %s4764_s24 = sld [smem:[#allocation4 + $0xb]]  ;;  %vm328_vm3 = vcmask 1046528  }
  0x5e   : > { %223 = vst.msk [vmem:[#allocation2 + $0x18] sm:$0xff] %vm218_vm0, %v5269_v4  ;;  %224 = vst.msk [vmem:[#allocation2 + $0x20] sm:$0xff] %vm218_vm0, %v5269_v4  ;;  %s5270_s25 = smov 127   ;;  %s4772_s26 = sld [smem:[#allocation4 + $0x13]]  ;;  %vm388_vm4 = vcmask 1045504   ;;  %vm4618_vm5 = vcmask 130048  }
  0x5f   : > { %226 = vst.msk [vmem:[#allocation2 + $0x30] sm:$0xff] %vm218_vm0, %v5269_v4  ;;  %227 = vst.msk [vmem:[#allocation2 + $0x38] sm:$0xff] %vm218_vm0, %v5269_v4  ;;  %s5271_s15 = smov 126   ;;  %s4773_s27 = sld [smem:[#allocation4 + $0x14]] }
  0x60   : > { %229 = vst.msk [vmem:[#allocation3] sm:$0xff] %vm218_vm0, %v5269_v4  ;;  %230 = vst.msk [vmem:[#allocation3 + $0x8] sm:$0xff] %vm218_vm0, %v5269_v4  ;;  %248 = vrot.lane.b32.xlu0 %v239_v2, %s5268_s23  ;;  %259 = vrot.lane.b32.xlu1 %v241_v3, %s5268_s23  ;;  %s4782_s28 = sld [smem:[#allocation4 + $0x1c]]  ;;  %s4783_s29 = sld [smem:[#allocation4 + $0x1d]] }
  0x61   : > { %232 = vst.msk [vmem:[#allocation3 + $0x18] sm:$0xff] %vm218_vm0, %v5269_v4  ;;  %233 = vst.msk [vmem:[#allocation3 + $0x20] sm:$0xff] %vm218_vm0, %v5269_v4  ;;  %s4791_s30 = sld [smem:[#allocation4 + $0x25]]  ;;  %s4757_s5 = sld [smem:[#allocation4 + $0x4]] }
  0x62   : > { %235 = vst.msk [vmem:[#allocation3 + $0x30] sm:$0xff] %vm218_vm0, %v5269_v4  ;;  %236 = vst.msk [vmem:[#allocation3 + $0x38] sm:$0xff] %vm218_vm0, %v5269_v4  ;;  %v293_v11 = vstv %s4754_s22  ;;  %v307_v16 = vstv %s4755_s19  ;;  %s5503_s6 = sld [smem:[#allocation4 + $0x26]]  ;;  %s4758_s7 = sld [smem:[#allocation4 + $0x5]] }
  0x63   : > { %222 = vst.msk [vmem:[#allocation2 + $0x10] sm:$0x3] %vm221_vm1, %v5269_v4  ;;  %225 = vst.msk [vmem:[#allocation2 + $0x28] sm:$0x3] %vm221_vm1, %v5269_v4  ;;  %v447_v19 = vstv %s5460_s21  ;;  %v461_v25 = vstv %s4764_s24  ;;  %s4760_s8 = sld [smem:[#allocation4 + $0x7]]  ;;  %s4761_s9 = sld [smem:[#allocation4 + $0x8]] }
  0x64   : > { %228 = vst.msk [vmem:[#allocation2 + $0x40] sm:$0x3] %vm221_vm1, %v5269_v4  ;;  %231 = vst.msk [vmem:[#allocation3 + $0x10] sm:$0x3] %vm221_vm1, %v5269_v4  ;;  %268 = vrot.lane.b32.xlu0 %v242_v5, %s5268_s23  ;;  %270 = vrot.lane.b32.xlu1 %v243_v6, %s5268_s23  ;;  %v599_v27 = vstv %s4772_s26  ;;  %s4766_s10 = sld [smem:[#allocation4 + $0xd]]  ;;  %s4767_s11 = sld [smem:[#allocation4 + $0xe]] }
  0x65   : > { %234 = vst.msk [vmem:[#allocation3 + $0x28] sm:$0x3] %vm221_vm1, %v5269_v4  ;;  %237 = vst.msk [vmem:[#allocation3 + $0x40] sm:$0x3] %vm221_vm1, %v5269_v4  ;;  %v613_v32 = vstv %s4773_s27  ;;  %s4769_s4 = sld [smem:[#allocation4 + $0x10]]  ;;  %s4770_s12 = sld [smem:[#allocation4 + $0x11]] }
  0x66   : > { %v761_v36 = vstv %s4782_s28  ;;  %v775_v39 = vstv %s4783_s29  ;;  %s4775_s22 = sld [smem:[#allocation4 + $0x16]]  ;;  %s4776_s19 = sld [smem:[#allocation4 + $0x17]] }
  0x67   : > { %v913_v42 = vstv %s4791_s30  ;;  %v339_v45 = vstv %s4757_s5  ;;  %s4778_s21 = sld [smem:[#allocation4 + $0x19]]  ;;  %s4779_s24 = sld [smem:[#allocation4 + $0x1a]] }
  0x68   : > { %v927_v46 = vstv %s5503_s6  ;;  %v360_v52 = vstv %s4758_s7  ;;  %s4785_s26 = sld [smem:[#allocation4 + $0x1f]]  ;;  %s4786_s27 = sld [smem:[#allocation4 + $0x20]] }
  0x69   : > { %v399_v58 = vstv %s4760_s8  ;;  %v420_v5 = vstv %s4761_s9  ;;  %s4788_s28 = sld [smem:[#allocation4 + $0x22]]  ;;  %s4789_s29 = sld [smem:[#allocation4 + $0x23]] }
  0x6a   : > { %v492_v6 = vstv %s4766_s10  ;;  %s4794_s30 = sld [smem:[#allocation4 + $0x28]]  ;;  %s4795_s5 = sld [smem:[#allocation4 + $0x29]] }
  0x6b   : > { %s4797_s6 = sld [smem:[#allocation4 + $0x2b]]  ;;  %s4798_s7 = sld [smem:[#allocation4 + $0x2c]] }
  0x6c   : > { %s5655_s8 = sld [smem:[#allocation4 + $0x2e]]  ;;  %s4803_s9 = sld [smem:[#allocation4 + $0x31]] }
  0x6d   : > { %s5662_s10 = sld [smem:[#allocation4 + $0x2f]]  ;;  %p213_p4 = scmp.lt.s32.totalorder %s5311_s16, 1 }
  0x6f   : > { %s9240_s16 = smov (!%p213_p4, %s5311_s16), 1 }
  0xce   : > { %v247_v7 = vpop.permute.xlu0 %246  ;;  %v258_v8 = vpop.permute.xlu1 %257 }
  0xcf   : > { %253 = vst.msk [vmem:[#allocation2 + $0x1] sm:$0xff] %vm252_vm2, %v247_v7  ;;  %264 = vst.msk [vmem:[#allocation2 + $0x19] sm:$0xff] %vm252_vm2, %v258_v8 }
  0xd2   : > { %v249_v9 = vpop.permute.xlu0 %248  ;;  %v260_v10 = vpop.permute.xlu1 %259 }
  0xd3   : > { %254 = vst.msk [vmem:[#allocation2 + $0x9] sm:$0xff] %vm252_vm2, %v249_v9  ;;  %265 = vst.msk [vmem:[#allocation2 + $0x21] sm:$0xff] %vm252_vm2, %v260_v10 }
  0xd6   : > { %v5464_v12 = vld [vmem:[#allocation2] sm:$0xff]  ;;  %v269_v13 = vpop.permute.xlu0 %268  ;;  %v271_v14 = vpop.permute.xlu1 %270  ;;  %v5470_v17 = vld [vmem:[#allocation2 + $0x18] sm:$0xff] }
  0xd7   : > { %v294_v15 = vmul.f32 %v293_v11, %v5464_v12  ;;  %275 = vst.msk [vmem:[#allocation2 + $0x31] sm:$0xff] %vm252_vm2, %v269_v13  ;;  %276 = vst.msk [vmem:[#allocation2 + $0x39] sm:$0xff] %vm252_vm2, %v271_v14  ;;  %v308_v21 = vmul.f32 %v307_v16, %v5464_v12  ;;  %v448_v22 = vmul.f32 %v447_v19, %v5470_v17 }
  0xd8   : > { %v462_v29 = vmul.f32 %v461_v25, %v5470_v17  ;;  %v762_v38 = vmul.f32 %v761_v36, %v5464_v12  ;;  %v776_v41 = vmul.f32 %v775_v39, %v5464_v12  ;;  %v914_v44 = vmul.f32 %v913_v42, %v5470_v17 }
  0xd9   : > { %298 = vrot.lane.b32.xlu0 %v294_v15, %s5270_s25  ;;  %v340_v49 = vmul.f32 %v339_v45, %v5464_v12  ;;  %v928_v51 = vmul.f32 %v927_v46, %v5470_v17  ;;  %v361_v57 = vmul.f32 %v360_v52, %v5464_v12  ;;  %v400_v1 = vmul.f32 %v399_v58, %v5464_v12 }
  0xda   : > { %v5472_v18 = vld [vmem:[#allocation2 + $0x8] sm:$0xff]  ;;  %v5481_v24 = vld [vmem:[#allocation2 + $0x20] sm:$0xff]  ;;  %v5515_v48 = vld [vmem:[#allocation2 + $0x10] sm:$0x3]  ;;  %v421_v13 = vmul.f32 %v420_v5, %v5464_v12 }
  0xdb   : > { %v295_v20 = vmul.f32 %v293_v11, %v5472_v18  ;;  %v309_v23 = vmul.f32 %v307_v16, %v5472_v18  ;;  %v449_v28 = vmul.f32 %v447_v19, %v5481_v24  ;;  %v463_v33 = vmul.f32 %v461_v25, %v5481_v24 }
  0xdc   : > { %v763_v40 = vmul.f32 %v761_v36, %v5472_v18  ;;  %v777_v43 = vmul.f32 %v775_v39, %v5472_v18  ;;  %v341_v47 = vmul.f32 %v339_v45, %v5472_v18  ;;  %v915_v50 = vmul.f32 %v913_v42, %v5481_v24 }
  0xdd   : > { %300 = vrot.lane.b32.xlu1 %v295_v20, %s5270_s25  ;;  %312 = vrot.lane.b32.xlu0 %v308_v21, %s5271_s15  ;;  %v342_v54 = vmul.f32 %v339_v45, %v5515_v48  ;;  %v362_v55 = vmul.f32 %v360_v52, %v5472_v18  ;;  %v346_v56 = vrot.slane %v340_v49, 1  ;;  %v929_v59 = vmul.f32 %v927_v46, %v5481_v24  ;;  %v5544_v20 = vld [vmem:[#allocation2 + $0x28] sm:$0x3] }
  0xde   : > { %v5485_v26 = vld [vmem:[#allocation2 + $0x30] sm:$0xff]  ;;  %v5492_v31 = vld [vmem:[#allocation2 + $0x38] sm:$0xff]  ;;  %v347_v53 = vrot.slane %v341_v47, 1  ;;  %v363_v60 = vmul.f32 %v360_v52, %v5515_v48  ;;  %v401_v61 = vmul.f32 %v399_v58, %v5472_v18  ;;  %v367_v2 = vrot.slane %v361_v57, 1 }
  0xdf   : > { %v600_v30 = vmul.f32 %v599_v27, %v5485_v26  ;;  %v601_v34 = vmul.f32 %v599_v27, %v5492_v31  ;;  %v614_v35 = vmul.f32 %v613_v32, %v5485_v26  ;;  %v615_v37 = vmul.f32 %v613_v32, %v5492_v31 }
  0xe0   : > { %v348_v62 = vsel %vm328_vm3, %v346_v56, %v347_v53  ;;  %v349_v63 = vrot.slane %v342_v54, 1  ;;  %v368_v0 = vrot.slane %v362_v55, 1  ;;  %v370_v3 = vrot.slane %v363_v60, 1 }
  0xe1   : > { %314 = vrot.lane.b32.xlu1 %v309_v23, %s5271_s15  ;;  %452 = vrot.lane.b32.xlu0 %v448_v22, %s5270_s25  ;;  %v407_v4 = vrot.slane %v401_v61, 2  ;;  %v402_v9 = vmul.f32 %v399_v58, %v5515_v48  ;;  %v422_v10 = vmul.f32 %v420_v5, %v5472_v18  ;;  %v406_v11 = vrot.slane %v400_v1, 2  ;;  %v5573_v61 = vld [vmem:[#allocation2 + $0x40] sm:$0x3] }
  0xe2   : > { %v350_v7 = vsel %vm328_vm3, %v347_v53, %v349_v63  ;;  %v369_v8 = vsel %vm328_vm3, %v367_v2, %v368_v0  ;;  %v371_v14 = vsel %vm328_vm3, %v368_v0, %v370_v3  ;;  %v493_v16 = vmul.f32 %v492_v6, %v5470_v17 }
  0xe3   : > { %v408_v15 = vsel %vm388_vm4, %v406_v11, %v407_v4  ;;  %v513_v19 = vstv %s4767_s11  ;;  %v409_v21 = vrot.slane %v402_v9, 2  ;;  %v428_v22 = vrot.slane %v422_v10, 2  ;;  %s4804_s11 = sld [smem:[#allocation4 + $0x32]] }
  0xe4   : > { %v423_v23 = vmul.f32 %v420_v5, %v5515_v48  ;;  %v494_v25 = vmul.f32 %v492_v6, %v5481_v24  ;;  %v427_v27 = vrot.slane %v421_v13, 2  ;;  %v514_v32 = vmul.f32 %v513_v19, %v5470_v17 }
  0xe5   : > { %454 = vrot.lane.b32.xlu1 %v449_v28, %s5270_s25  ;;  %466 = vrot.lane.b32.xlu0 %v462_v29, %s5271_s15  ;;  %v551_v28 = vstv %s4769_s4  ;;  %v499_v29 = vrot.slane %v493_v16, 1  ;;  %v516_v45 = vmul.f32 %v513_v19, %v5544_v20  ;;  %v644_v47 = vstv %s4775_s22  ;;  %s4806_s4 = sld [smem:[#allocation4 + $0x34]]  ;;  %s5711_s22 = sld [smem:[#allocation4]] }
  0xe6   : > { %v430_v36 = vrot.slane %v423_v23, 2  ;;  %v552_v42 = vmul.f32 %v551_v28, %v5470_v17  ;;  %v553_v46 = vmul.f32 %v551_v28, %v5481_v24  ;;  %v645_v60 = vmul.f32 %v644_v47, %v5485_v26 }
  0xe7   : > { %v523_v54 = vrot.slane %v516_v45, 1  ;;  %v646_v1 = vmul.f32 %v644_v47, %v5492_v31  ;;  %v665_v2 = vstv %s4776_s19  ;;  %v703_v3 = vstv %s4778_s21  ;;  %s5717_s19 = sld [smem:[#allocation4 + $0x37]]  ;;  %s5721_s21 = sld [smem:[#allocation4 + $0x1b]] }
  0xe8   : > { %v559_v55 = vrot.slane %v553_v46, 2  ;;  %v666_v10 = vmul.f32 %v665_v2, %v5485_v26  ;;  %v667_v11 = vmul.f32 %v665_v2, %v5492_v31  ;;  %v704_v16 = vmul.f32 %v703_v3, %v5485_v26 }
  0xe9   : > { %468 = vrot.lane.b32.xlu1 %v463_v33, %s5271_s15  ;;  %604 = vrot.lane.b32.xlu0 %v600_v30, %s5270_s25  ;;  %v495_v30 = vmul.f32 %v492_v6, %v5544_v20  ;;  %v515_v33 = vmul.f32 %v513_v19, %v5481_v24  ;;  %v651_v6 = vrot.slane %v645_v60, 1  ;;  %v652_v9 = vrot.slane %v646_v1, 1 }
  0xea   : > { %v705_v23 = vmul.f32 %v703_v3, %v5492_v31 }
  0xeb   : > { %v502_v39 = vrot.slane %v495_v30, 1  ;;  %v653_v19 = vsel %vm328_vm3, %v651_v6, %v652_v9  ;;  %v706_v30 = vmul.f32 %v703_v3, %v5573_v61  ;;  %v886_v3 = vstv %s4789_s29  ;;  %s5737_s29 = sld [smem:[#allocation4 + $0x3d]] }
  0xed   : > { %606 = vrot.lane.b32.xlu1 %v601_v34, %s5270_s25  ;;  %618 = vrot.lane.b32.xlu0 %v614_v35, %s5271_s15  ;;  %v410_v34 = vsel %vm388_vm4, %v407_v4, %v409_v21  ;;  %v429_v35 = vsel %vm388_vm4, %v427_v27, %v428_v22  ;;  %v672_v21 = vrot.slane %v666_v10, 1  ;;  %v887_v10 = vmul.f32 %v886_v3, %v5464_v12 }
  0xf1   : > { %620 = vrot.lane.b32.xlu1 %v615_v37, %s5271_s15  ;;  %766 = vrot.lane.b32.xlu0 %v762_v38, %s5270_s25  ;;  %v500_v37 = vrot.slane %v494_v25, 1  ;;  %v572_v38 = vstv %s4770_s12  ;;  %v724_v25 = vstv %s4779_s24  ;;  %s4807_s12 = sld [smem:[#allocation4 + $0x35]]  ;;  %s5723_s24 = sld [smem:[#allocation4 + $0x38]] }
  0xf2   : > { %v573_v52 = vmul.f32 %v572_v38, %v5470_v17  ;;  %v574_v56 = vmul.f32 %v572_v38, %v5481_v24 }
  0xf3   : > { %v503_v49 = vsel %vm328_vm3, %v500_v37, %v502_v39  ;;  %v806_v39 = vstv %s4785_s26  ;;  %s5725_s26 = sld [smem:[#allocation4 + $0x3a]] }
  0xf4   : > { %v579_v58 = vrot.slane %v573_v52, 2  ;;  %v580_v0 = vrot.slane %v574_v56, 2  ;;  %v809_v46 = vmul.f32 %v806_v39, %v5515_v48 }
  0xf5   : > { %768 = vrot.lane.b32.xlu1 %v763_v40, %s5270_s25  ;;  %780 = vrot.lane.b32.xlu0 %v776_v41, %s5271_s15  ;;  %v520_v40 = vrot.slane %v514_v32, 1  ;;  %v521_v41 = vrot.slane %v515_v33, 1  ;;  %v711_v33 = vrot.slane %v705_v23, 2  ;;  %v893_v23 = vrot.slane %v887_v10, 2 }
  0xf7   : > { %v522_v53 = vsel %vm328_vm3, %v520_v40, %v521_v41 }
  0xf9   : > { %782 = vrot.lane.b32.xlu1 %v777_v43, %s5271_s15  ;;  %918 = vrot.lane.b32.xlu0 %v914_v44, %s5270_s25  ;;  %v431_v43 = vsel %vm388_vm4, %v428_v22, %v430_v36  ;;  %v501_v44 = vsel %vm328_vm3, %v499_v29, %v500_v37  ;;  %v673_v22 = vrot.slane %v667_v11, 1  ;;  %v710_v29 = vrot.slane %v704_v16, 2 }
  0xfa   : > { %v713_v37 = vrot.slane %v706_v30, 2 }
  0xfb   : > { %v674_v32 = vsel %vm328_vm3, %v672_v21, %v673_v22  ;;  %v712_v40 = vsel %vm388_vm4, %v710_v29, %v711_v33 }
  0xfd   : > { %920 = vrot.lane.b32.xlu1 %v915_v50, %s5270_s25  ;;  %932 = vrot.lane.b32.xlu0 %v928_v51, %s5271_s15  ;;  %v558_v50 = vrot.slane %v552_v42, 2  ;;  %v554_v51 = vmul.f32 %v551_v28, %v5544_v20 }
  0xff   : > { %v561_v57 = vrot.slane %v554_v51, 2  ;;  %v560_v63 = vsel %vm388_vm4, %v558_v50, %v559_v55 }
 0x101   : > { %934 = vrot.lane.b32.xlu1 %v929_v59, %s5271_s15  ;;  %351 = vrot.lane.b32.xlu0 %v348_v62, %s5270_s25  ;;  %v575_v59 = vmul.f32 %v572_v38, %v5544_v20  ;;  %v524_v62 = vsel %vm328_vm3, %v521_v41, %v523_v54  ;;  %v562_v4 = vsel %vm388_vm4, %v559_v55, %v561_v57  ;;  %v865_v57 = vstv %s4788_s28  ;;  %s5735_s28 = sld [smem:[#allocation4 + $0x3b]] }
 0x102   : > { %v727_v38 = vmul.f32 %v724_v25, %v5573_v61 }
 0x103   : > { %v582_v5 = vrot.slane %v575_v59, 2  ;;  %v816_v59 = vrot.slane %v809_v46, 1 }
 0x104   : > { %v734_v45 = vrot.slane %v727_v38, 2 }
 0x105   : > { %353 = vrot.lane.b32.xlu1 %v350_v7, %s5270_s25  ;;  %372 = vrot.lane.b32.xlu0 %v369_v8, %s5271_s15  ;;  %v647_v7 = vmul.f32 %v644_v47, %v5573_v61  ;;  %v581_v8 = vsel %vm388_vm4, %v579_v58, %v580_v0  ;;  %v583_v13 = vsel %vm388_vm4, %v580_v0, %v582_v5  ;;  %v827_v47 = vstv %s4786_s27  ;;  %s5727_s27 = sld [smem:[#allocation4 + $0x3]] }
 0x106   : > { %v829_v52 = vmul.f32 %v827_v47, %v5472_v18  ;;  %v828_v54 = vmul.f32 %v827_v47, %v5464_v12  ;;  %v830_v56 = vmul.f32 %v827_v47, %v5515_v48  ;;  %v866_v0 = vmul.f32 %v865_v57, %v5464_v12 }
 0x108   : > { %v835_v60 = vrot.slane %v829_v52, 1  ;;  %v837_v1 = vrot.slane %v830_v56, 1 }
 0x109   : > { %374 = vrot.lane.b32.xlu1 %v371_v14, %s5271_s15  ;;  %411 = vrot.lane.b32.xlu0 %v408_v15, %s5270_s25  ;;  %v654_v14 = vrot.slane %v647_v7, 1  ;;  %v668_v15 = vmul.f32 %v665_v2, %v5573_v61  ;;  %v868_v2 = vmul.f32 %v865_v57, %v5515_v48  ;;  %v888_v7 = vmul.f32 %v886_v3, %v5472_v18 }
 0x10a   : > { %v838_v11 = vsel %vm328_vm3, %v835_v60, %v837_v1 }
 0x10b   : > { %v655_v27 = vsel %vm328_vm3, %v652_v9, %v654_v14  ;;  %v675_v28 = vrot.slane %v668_v15, 1  ;;  %v872_v9 = vrot.slane %v866_v0, 2  ;;  %v889_v14 = vmul.f32 %v886_v3, %v5515_v48 }
 0x10c   : > { %v979_v15 = vstv %s4795_s5  ;;  %v1110_v0 = vstv %s4803_s9  ;;  %s5744_s5 = sld [smem:[#allocation4 + $0x3e]]  ;;  %s5756_s9 = sld [smem:[#allocation4 + $0x41]] }
 0x10d   : > { %413 = vrot.lane.b32.xlu1 %v410_v34, %s5270_s25  ;;  %432 = vrot.lane.b32.xlu0 %v429_v35, %s5271_s15  ;;  %v725_v34 = vmul.f32 %v724_v25, %v5485_v26  ;;  %v726_v35 = vmul.f32 %v724_v25, %v5492_v31  ;;  %v676_v36 = vsel %vm328_vm3, %v673_v22, %v675_v28 }
 0x10e   : > { %v980_v28 = vmul.f32 %v979_v15, %v5470_v17  ;;  %v981_v29 = vmul.f32 %v979_v15, %v5481_v24 }
 0x10f   : > { %v731_v41 = vrot.slane %v725_v34, 2  ;;  %v732_v42 = vrot.slane %v726_v35, 2  ;;  %v1017_v35 = vstv %s4797_s6  ;;  %s5746_s6 = sld [smem:[#allocation4 + $0x9]] }
 0x110   : > { %v987_v38 = vrot.slane %v981_v29, 1 }
 0x111   : > { %434 = vrot.lane.b32.xlu1 %v431_v43, %s5271_s15  ;;  %504 = vrot.lane.b32.xlu0 %v501_v44, %s5270_s25  ;;  %v808_v43 = vmul.f32 %v806_v39, %v5472_v18  ;;  %v807_v44 = vmul.f32 %v806_v39, %v5464_v12  ;;  %v733_v50 = vsel %vm388_vm4, %v731_v41, %v732_v42 }
 0x112   : > { %v735_v55 = vsel %vm388_vm4, %v732_v42, %v734_v45  ;;  %v982_v39 = vmul.f32 %v979_v15, %v5544_v20  ;;  %v1018_v42 = vmul.f32 %v1017_v35, %v5470_v17  ;;  %v1169_v15 = vstv %s4806_s4  ;;  %s5767_s4 = sld [smem:[#allocation4 + $0x44]] }
 0x113   : > { %v814_v51 = vrot.slane %v808_v43, 1  ;;  %v1019_v43 = vmul.f32 %v1017_v35, %v5481_v24 }
 0x114   : > { %v989_v47 = vrot.slane %v982_v39, 1 }
 0x115   : > { %506 = vrot.lane.b32.xlu1 %v503_v49, %s5270_s25  ;;  %525 = vrot.lane.b32.xlu0 %v522_v53, %s5271_s15  ;;  %v714_v49 = vsel %vm388_vm4, %v711_v33, %v713_v37  ;;  %v813_v53 = vrot.slane %v807_v44, 1  ;;  %v986_v37 = vrot.slane %v980_v28, 1  ;;  %v1038_v44 = vstv %s4798_s7  ;;  %s5748_s7 = sld [smem:[#allocation4 + $0x40]] }
 0x116   : > { %v1039_v52 = vmul.f32 %v1038_v44, %v5470_v17 }
 0x117   : > { %v815_v58 = vsel %vm328_vm3, %v813_v53, %v814_v51  ;;  %v988_v46 = vsel %vm328_vm3, %v986_v37, %v987_v38  ;;  %v1040_v53 = vmul.f32 %v1038_v44, %v5481_v24 }
 0x119   : > { %527 = vrot.lane.b32.xlu1 %v524_v62, %s5271_s15  ;;  %563 = vrot.lane.b32.xlu0 %v560_v63, %s5270_s25  ;;  %v867_v62 = vmul.f32 %v865_v57, %v5472_v18  ;;  %v834_v63 = vrot.slane %v828_v54, 1  ;;  %v990_v54 = vsel %vm328_vm3, %v987_v38, %v989_v47  ;;  %v1045_v57 = vrot.slane %v1039_v52, 2 }
 0x11b   : > { %v836_v5 = vsel %vm328_vm3, %v834_v63, %v835_v60  ;;  %v873_v6 = vrot.slane %v867_v62, 2  ;;  %v1065_v63 = vstv %s5655_s8  ;;  %s5750_s8 = sld [smem:[#allocation4 + $0xc]] }
 0x11c   : > { %v1066_v3 = vmul.f32 %v1065_v63, %v5485_v26 }
 0x11d   : > { %565 = vrot.lane.b32.xlu1 %v562_v4, %s5270_s25  ;;  %584 = vrot.lane.b32.xlu0 %v581_v8, %s5271_s15  ;;  %v817_v4 = vsel %vm328_vm3, %v814_v51, %v816_v59  ;;  %v958_v8 = vstv %s4794_s30  ;;  %v874_v16 = vsel %vm388_vm4, %v872_v9, %v873_v6  ;;  %v1025_v51 = vrot.slane %v1019_v43, 2  ;;  %s5740_s30 = sld [smem:[#allocation4 + $0x6]] }
 0x11e   : > { %v959_v21 = vmul.f32 %v958_v8, %v5470_v17  ;;  %v960_v22 = vmul.f32 %v958_v8, %v5481_v24  ;;  %v1041_v59 = vmul.f32 %v1038_v44, %v5544_v20  ;;  %v1172_v44 = vmul.f32 %v1169_v15, %v5573_v61 }
 0x120   : > { %v965_v33 = vrot.slane %v959_v21, 1  ;;  %v966_v34 = vrot.slane %v960_v22, 1  ;;  %v1048_v62 = vrot.slane %v1041_v59, 2  ;;  %v1227_v59 = vstv %s5717_s19  ;;  %s5834_s19 = sld [smem:[#allocation4 + $0x47]] }
 0x121   : > { %586 = vrot.lane.b32.xlu1 %v583_v13, %s5271_s15  ;;  %656 = vrot.lane.b32.xlu0 %v653_v19, %s5270_s25  ;;  %v875_v13 = vrot.slane %v868_v2, 2  ;;  %v894_v19 = vrot.slane %v888_v7, 2  ;;  %v1112_v7 = vmul.f32 %v1110_v0, %v5492_v31 }
 0x122   : > { %v967_v41 = vsel %vm328_vm3, %v965_v33, %v966_v34 }
 0x123   : > { %v876_v25 = vsel %vm388_vm4, %v873_v6, %v875_v13  ;;  %v895_v30 = vsel %vm388_vm4, %v893_v23, %v894_v19  ;;  %v1111_v6 = vmul.f32 %v1110_v0, %v5485_v26 }
 0x125   : > { %658 = vrot.lane.b32.xlu1 %v655_v27, %s5270_s25  ;;  %677 = vrot.lane.b32.xlu0 %v674_v32, %s5271_s15  ;;  %v961_v27 = vmul.f32 %v958_v8, %v5544_v20  ;;  %v896_v32 = vrot.slane %v889_v14, 2  ;;  %v1131_v8 = vstv %s4804_s11  ;;  %v1113_v14 = vmul.f32 %v1110_v0, %v5573_v61  ;;  %s5765_s11 = sld [smem:[#allocation4 + $0xf]] }
 0x126   : > { %v1132_v21 = vmul.f32 %v1131_v8, %v5485_v26  ;;  %v1133_v22 = vmul.f32 %v1131_v8, %v5492_v31  ;;  %v1134_v29 = vmul.f32 %v1131_v8, %v5573_v61 }
 0x127   : > { %v1120_v28 = vrot.slane %v1113_v14, 1 }
 0x129   : > { %679 = vrot.lane.b32.xlu1 %v676_v36, %s5271_s15  ;;  %715 = vrot.lane.b32.xlu0 %v712_v40, %s5270_s25  ;;  %v968_v36 = vrot.slane %v961_v27, 1  ;;  %v897_v40 = vsel %vm388_vm4, %v894_v19, %v896_v32  ;;  %v1118_v19 = vrot.slane %v1112_v7, 1  ;;  %v1171_v32 = vmul.f32 %v1169_v15, %v5492_v31 }
 0x12b   : > { %v969_v45 = vsel %vm328_vm3, %v966_v34, %v968_v36  ;;  %v1138_v34 = vrot.slane %v1132_v21, 1  ;;  %v1190_v36 = vstv %s4807_s12  ;;  %v1121_v39 = vsel %vm328_vm3, %v1118_v19, %v1120_v28  ;;  %s5795_s12 = sld [smem:[#allocation4 + $0x46]] }
 0x12d   : > { %717 = vrot.lane.b32.xlu1 %v714_v49, %s5270_s25  ;;  %736 = vrot.lane.b32.xlu0 %v733_v50, %s5271_s15  ;;  %v1020_v49 = vmul.f32 %v1017_v35, %v5544_v20  ;;  %v1024_v50 = vrot.slane %v1018_v42, 2  ;;  %v1139_v35 = vrot.slane %v1133_v22, 1  ;;  %v1177_v42 = vrot.slane %v1171_v32, 2 }
 0x12e   : > { %v1379_v22 = vstv %s5748_s7  ;;  %s6163_s7 = sld [smem:[#allocation4 + $0x27]] }
 0x12f   : > { %v1026_v56 = vsel %vm388_vm4, %v1024_v50, %v1025_v51  ;;  %v1140_v43 = vsel %vm328_vm3, %v1138_v34, %v1139_v35  ;;  %v1179_v50 = vrot.slane %v1172_v44, 2  ;;  %v5827_v44 = vstv %s5767_s4  ;;  %s4796_s4 = sld [smem:[#allocation4 + $0x2a]] }
 0x131   : > { %738 = vrot.lane.b32.xlu1 %v735_v55, %s5271_s15  ;;  %818 = vrot.lane.b32.xlu0 %v815_v58, %s5270_s25  ;;  %v1027_v55 = vrot.slane %v1020_v49, 2  ;;  %v1046_v58 = vrot.slane %v1040_v53, 2  ;;  %v1193_v53 = vmul.f32 %v1190_v36, %v5573_v61 }
 0x133   : > { %v1028_v24 = vsel %vm388_vm4, %v1025_v51, %v1027_v55  ;;  %v1047_v60 = vsel %vm388_vm4, %v1045_v57, %v1046_v58 }
 0x135   : > { %820 = vrot.lane.b32.xlu1 %v817_v4, %s5270_s25  ;;  %839 = vrot.lane.b32.xlu0 %v836_v5, %s5271_s15  ;;  %v1049_v4 = vsel %vm388_vm4, %v1046_v58, %v1048_v62  ;;  %v1079_v5 = vstv %s5662_s10  ;;  %s5758_s10 = sld [smem:[#allocation4 + $0x43]]  ;;  %v1200_v58 = vrot.slane %v1193_v53, 2  ;;  %v1272_v62 = vstv %s5725_s26  ;;  %s5863_s26 = sld [smem:[#allocation4 + $0x15]] }
 0x136   : > { %v1080_v13 = vmul.f32 %v1079_v5, %v5485_v26  ;;  %v1081_v23 = vmul.f32 %v1079_v5, %v5492_v31  ;;  %v321_v5 = vstv %s5727_s27  ;;  %v1274_v8 = vmul.f32 %v1272_v62, %v5472_v18  ;;  %s5865_s27 = sld [smem:[#allocation4 + $0x21]] }
 0x137   : > { %v1273_v14 = vmul.f32 %v1272_v62, %v5464_v12  ;;  %v1275_v21 = vmul.f32 %v1272_v62, %v5515_v48 }
 0x139   : > { %841 = vrot.lane.b32.xlu1 %v838_v11, %s5271_s15  ;;  %877 = vrot.lane.b32.xlu0 %v874_v16, %s5270_s25  ;;  %v1067_v11 = vmul.f32 %v1065_v63, %v5492_v31  ;;  %v1117_v16 = vrot.slane %v1111_v6, 1  ;;  %v1293_v6 = vstv %s5735_s28  ;;  %s5870_s28 = sld [smem:[#allocation4 + $0x49]] }
 0x13b   : > { %v1119_v33 = vsel %vm328_vm3, %v1117_v16, %v1118_v19  ;;  %v441_v16 = vstv %s5746_s6  ;;  %v5798_v19 = vmul.f32 %v321_v5, %v5472_v18  ;;  %v5813_v34 = vstv %s5758_s10  ;;  %s5901_s10 = sld [smem:[#allocation4 + $0x4f]]  ;;  %s6070_s6 = sld [smem:[#allocation7 + $0x80]] }
 0x13d   : > { %879 = vrot.lane.b32.xlu1 %v876_v25, %s5270_s25  ;;  %898 = vrot.lane.b32.xlu0 %v895_v30, %s5271_s15  ;;  %v1170_v30 = vmul.f32 %v1169_v15, %v5485_v26  ;;  %v5792_v15 = vstv %s5744_s5  ;;  %s5883_s5 = sld [smem:[#allocation4 + $0x4c]] }
 0x141   : > { %900 = vrot.lane.b32.xlu1 %v897_v40, %s5271_s15  ;;  %970 = vrot.lane.b32.xlu0 %v967_v41, %s5270_s25  ;;  %v1141_v40 = vrot.slane %v1134_v29, 1  ;;  %v1176_v41 = vrot.slane %v1170_v30, 2  ;;  %v1229_v30 = vmul.f32 %v1227_v59, %v5472_v18 }
 0x145   : > { %972 = vrot.lane.b32.xlu1 %v969_v45, %s5270_s25  ;;  %991 = vrot.lane.b32.xlu0 %v988_v46, %s5271_s15  ;;  %v1191_v45 = vmul.f32 %v1190_v36, %v5485_v26  ;;  %v1192_v46 = vmul.f32 %v1190_v36, %v5492_v31  ;;  %v1142_v26 = vsel %vm328_vm3, %v1139_v35, %v1141_v40  ;;  %v1280_v36 = vrot.slane %v1274_v8, 1 }
 0x146   : > { %v1178_v31 = vsel %vm388_vm4, %v1176_v41, %v1177_v42  ;;  %v5818_v40 = vmul.f32 %v1293_v6, %v5472_v18  ;;  %v1279_v41 = vrot.slane %v1273_v14, 1 }
 0x147   : > { %v1197_v51 = vrot.slane %v1191_v45, 2  ;;  %v1198_v52 = vrot.slane %v1192_v46, 2  ;;  %v330_v46 = vrot.slane %v5798_v19, 1 }
 0x149   : > { %993 = vrot.lane.b32.xlu1 %v990_v54, %s5271_s15  ;;  %1029 = vrot.lane.b32.xlu0 %v1026_v56, %s5270_s25  ;;  %v1180_v56 = vsel %vm388_vm4, %v1177_v42, %v1179_v50  ;;  %v1199_v57 = vsel %vm388_vm4, %v1197_v51, %v1198_v52  ;;  %v1201_v7 = vsel %vm388_vm4, %v1198_v52, %v1200_v58 }
 0x14a   : > { %v1294_v42 = vmul.f32 %v1293_v6, %v5464_v12  ;;  %v1281_v58 = vsel %vm328_vm3, %v1279_v41, %v1280_v36 }
 0x14b   : > { %v5666_v17 = vpop.permute.xlu0 %298 }
 0x14c   : > { %v1300_v62 = vrot.slane %v1294_v42, 1 }
 0x14d   : > { %1031 = vrot.lane.b32.xlu1 %v1028_v24, %s5270_s25  ;;  %1050 = vrot.lane.b32.xlu0 %v1047_v60, %s5271_s15  ;;  %v287_v24 = vstv %s5711_s22  ;;  %v755_v60 = vstv %s5721_s21  ;;  %s5829_s22 = sld [smem:[#allocation4 + $0x1e]]  ;;  %s6060_s21 = sld [smem:[#allocation7]] }
 0x14e   : > { %v288_v35 = vmul.f32 %v287_v24, %v5464_v12  ;;  %v289_v50 = vmul.f32 %v287_v24, %v5472_v18  ;;  %v1301_v24 = vrot.slane %v5818_v40, 1  ;;  %v5889_v40 = vmul.f32 %v5792_v15, %v5472_v18 }
 0x14f   : > { %v5673_v1 = vpop.permute.xlu1 %300  ;;  %v5675_v2 = vpop.permute.xlu0 %312 }
 0x150   : > { %v304_v45 = vadd.f32 %v5666_v17, %v288_v35 }
 0x151   : > { %1052 = vrot.lane.b32.xlu1 %v1049_v4, %s5271_s15  ;;  %1070 = vrot.lane.b32.xlu0 %v1066_v3, %s5270_s25  ;;  %v1228_v3 = vmul.f32 %v1227_v59, %v5464_v12  ;;  %v1241_v4 = vstv %s5723_s24  ;;  %s5850_s24 = sld [smem:[#allocation4 + $0x12]] }
 0x152   : > { %v1242_v32 = vmul.f32 %v1241_v4, %v5464_v12  ;;  %v1243_v53 = vmul.f32 %v1241_v4, %v5472_v18 }
 0x153   : > { %v5684_v9 = vpop.permute.xlu1 %314  ;;  %v5686_v10 = vpop.permute.xlu0 %452 }
 0x155   : > { %1072 = vrot.lane.b32.xlu1 %v1067_v11, %s5270_s25  ;;  %1084 = vrot.lane.b32.xlu0 %v1080_v13, %s5271_s15  ;;  %v5783_v11 = vstv %s5737_s29  ;;  %v5786_v13 = vstv %s5740_s30  ;;  %s5872_s29 = sld [smem:[#allocation4 + $0x18]]  ;;  %s5881_s30 = sld [smem:[#allocation4 + $0x4a]] }
 0x156   : > { %v5845_v17 = vmul.f32 %v5783_v11, %v5472_v18  ;;  %v5858_v4 = vmul.f32 %v5786_v13, %v5472_v18  ;;  %v384_v42 = vmul.f32 %v5786_v13, %v5515_v48 }
 0x157   : > { %v5696_v25 = vpop.permute.xlu1 %454  ;;  %v5698_v27 = vpop.permute.xlu0 %466 }
 0x159   : > { %1086 = vrot.lane.b32.xlu1 %v1081_v23, %s5271_s15  ;;  %1122 = vrot.lane.b32.xlu0 %v1119_v33, %s5270_s25  ;;  %v5803_v23 = vstv %s5750_s8  ;;  %v1393_v33 = vstv %s5756_s9  ;;  %s5899_s8 = sld [smem:[#allocation4 + $0x4d]]  ;;  %s6172_s9 = sld [smem:[#allocation4 + $0x24]] }
 0x15b   : > { %v5706_v37 = vpop.permute.xlu1 %468  ;;  %v5708_v38 = vpop.permute.xlu0 %604 }
 0x15d   : > { %1124 = vrot.lane.b32.xlu1 %v1121_v39, %s5270_s25  ;;  %1143 = vrot.lane.b32.xlu0 %v1140_v43, %s5271_s15  ;;  %v322_v39 = vmul.f32 %v321_v5, %v5464_v12  ;;  %v5824_v43 = vstv %s5765_s11  ;;  %s5921_s11 = sld [smem:[#allocation4 + $0x50]] }
 0x15f   : > { %v5729_v47 = vpop.permute.xlu1 %606  ;;  %v5731_v49 = vpop.permute.xlu0 %618  ;;  %v329_v59 = vrot.slane %v322_v39, 1  ;;  %v1302_v39 = vsel %vm328_vm3, %v1300_v62, %v1301_v24  ;;  %v392_v62 = vrot.slane %v384_v42, 2 }
 0x161   : > { %1145 = vrot.lane.b32.xlu1 %v1142_v26, %s5271_s15  ;;  %1181 = vrot.lane.b32.xlu0 %v1178_v31, %s5270_s25  ;;  %v1282_v26 = vrot.slane %v1275_v21, 1  ;;  %v324_v31 = vmul.f32 %v321_v5, %v5515_v48  ;;  %v305_v5 = vadd.f32 %v5673_v1, %v289_v50  ;;  %v1334_v1 = vmul.f32 %v5783_v11, %v5515_v48 }
 0x163   : > { %v5752_v54 = vpop.permute.xlu1 %620  ;;  %v5754_v55 = vpop.permute.xlu0 %766  ;;  %v332_v8 = vrot.slane %v324_v31, 1  ;;  %v319_v35 = vadd.f32 %v5684_v9, %v305_v5  ;;  %v5907_v31 = vstv %s5834_s19  ;;  %s4805_s19 = sld [smem:[#allocation4 + $0x33]] }
 0x165   : > { %1183 = vrot.lane.b32.xlu1 %v1180_v56, %s5270_s25  ;;  %1202 = vrot.lane.b32.xlu0 %v1199_v57, %s5271_s15  ;;  %v1296_v56 = vmul.f32 %v1293_v6, %v5515_v48  ;;  %v318_v57 = vadd.f32 %v5675_v2, %v304_v45  ;;  %v5861_v2 = vstv %s5795_s12  ;;  %v331_v6 = vsel %vm328_vm3, %v329_v59, %v330_v46  ;;  %s4802_s12 = sld [smem:[#allocation4 + $0x30]] }
 0x166   : > { %v5897_v45 = vstv %s5829_s22  ;;  %v333_v18 = vsel %vm328_vm3, %v330_v46, %v332_v8  ;;  %v1360_v46 = vrot.slane %v5889_v40, 2  ;;  %v5924_v8 = vstv %s5863_s26  ;;  %s6211_s22 = sld [smem:[#allocation4 + $0x2d]]  ;;  %s4813_s26 = sld [smem:[#allocation4 + $0x39]] }
 0x167   : > { %v5772_v63 = vpop.permute.xlu1 %768  ;;  %v5774_v0 = vpop.permute.xlu0 %780  ;;  %v1303_v21 = vrot.slane %v1296_v56, 1 }
 0x169   : > { %1204 = vrot.lane.b32.xlu1 %v1201_v7, %s5271_s15  ;;  %1232 = vrot.lane.b32.xlu0 %v1228_v3, %s5270_s25  ;;  %v1332_v3 = vmul.f32 %v5783_v11, %v5464_v12  ;;  %v1283_v7 = vsel %vm328_vm3, %v1280_v36, %v1282_v26  ;;  %v336_v36 = vadd.f32 %v331_v6, %v318_v57  ;;  %v390_v11 = vrot.slane %v5858_v4, 2 }
 0x16a   : > { %v1353_v26 = vmul.f32 %v5792_v15, %v5464_v12  ;;  %v1341_v57 = vrot.slane %v1334_v1, 2  ;;  %v5919_v4 = vstv %s5865_s27  ;;  %v5932_v1 = vstv %s5883_s5  ;;  %s6233_s27 = sld [smem:[#allocation7 + $0x81]]  ;;  %s4822_s5 = sld [smem:[#allocation4 + $0x42]] }
 0x16b   : > { %v5805_v28 = vpop.permute.xlu1 %782  ;;  %v5807_v29 = vpop.permute.xlu0 %918  ;;  %v1338_v41 = vrot.slane %v1332_v3, 2  ;;  %v593_v3 = vstv %s5850_s24  ;;  %s6230_s24 = sld [smem:[#allocation7 + $0x1]] }
 0x16d   : > { %1234 = vrot.lane.b32.xlu1 %v1229_v30, %s5270_s25  ;;  %1246 = vrot.lane.b32.xlu0 %v1242_v32, %s5271_s15  ;;  %v1339_v30 = vrot.slane %v5845_v17, 2  ;;  %v382_v32 = vmul.f32 %v5786_v13, %v5464_v12  ;;  %v1304_v13 = vsel %vm328_vm3, %v1301_v24, %v1303_v21  ;;  %v1355_v12 = vmul.f32 %v5792_v15, %v5515_v48 }
 0x16e   : > { %v5928_v21 = vstv %s5872_s29  ;;  %s4816_s29 = sld [smem:[#allocation4 + $0x3c]] }
 0x16f   : > { %v5837_v51 = vpop.permute.xlu1 %920  ;;  %v5839_v52 = vpop.permute.xlu0 %932  ;;  %v1340_v56 = vsel %vm388_vm4, %v1338_v41, %v1339_v30  ;;  %v389_v17 = vrot.slane %v382_v32, 2  ;;  %v1362_v40 = vrot.slane %v1355_v12, 2  ;;  %v5936_v41 = vld [vmem:[#allocation2] sm:$0xff] }
 0x170   : > { %v5941_v42 = vmul.f32 %v5936_v41, %v755_v60 }
 0x171   : > { %1248 = vrot.lane.b32.xlu1 %v1243_v53, %s5271_s15  ;;  %1284 = vrot.lane.b32.xlu0 %v1281_v58, %s5270_s25  ;;  %v337_v58 = vadd.f32 %v333_v18, %v319_v35  ;;  %v391_v24 = vsel %vm388_vm4, %v389_v17, %v390_v11  ;;  %v5947_v18 = vstv %s5899_s8  ;;  %s4825_s8 = sld [smem:[#allocation4 + $0x45]] }
 0x173   : > { %v5874_v14 = vpop.permute.xlu1 %934  ;;  %v352_v19 = vpop.permute.xlu0 %351 }
 0x174   : > { %v357_v9 = vadd.f32 %v352_v19, %v336_v36  ;;  %v1531_v19 = vstv %s5870_s28  ;;  %v1342_v36 = vsel %vm388_vm4, %v1339_v30, %v1341_v57  ;;  %s6235_s28 = sld [smem:[#allocation4 + $0x36]] }
 0x175   : > { %1286 = vrot.lane.b32.xlu1 %v1283_v7, %s5270_s25  ;;  %1305 = vrot.lane.b32.xlu0 %v1302_v39, %s5271_s15  ;;  %v1359_v7 = vrot.slane %v1353_v26, 2  ;;  %v5950_v26 = vstv %s5901_s10  ;;  %s6268_s10 = sld [smem:[#allocation4 + $0x48]] }
 0x177   : > { %v354_v50 = vpop.permute.xlu1 %353  ;;  %v373_v53 = vpop.permute.xlu0 %372  ;;  %v1361_v39 = vsel %vm388_vm4, %v1359_v7, %v1360_v46 }
 0x178   : > { %v378_v59 = vadd.f32 %v373_v53, %v357_v9  ;;  %v358_v5 = vadd.f32 %v354_v50, %v337_v58  ;;  %v393_v9 = vsel %vm388_vm4, %v390_v11, %v392_v62  ;;  %v5952_v53 = vld [vmem:[#allocation2 + $0x18] sm:$0xff]  ;;  %v5960_v11 = vld [vmem:[#allocation2 + $0x20] sm:$0xff] }
 0x179   : > { %1307 = vrot.lane.b32.xlu1 %v1304_v13, %s5271_s15  ;;  %1343 = vrot.lane.b32.xlu0 %v1340_v56, %s5270_s25  ;;  %v442_v13 = vmul.f32 %v5952_v53, %v441_v16  ;;  %v1380_v56 = vmul.f32 %v5952_v53, %v1379_v22  ;;  %v443_v58 = vmul.f32 %v5960_v11, %v441_v16 }
 0x17a   : > { %v396_v6 = vadd.f32 %v391_v24, %v378_v59  ;;  %v476_v59 = vmul.f32 %v5952_v53, %v5803_v23  ;;  %v477_v12 = vmul.f32 %v5960_v11, %v5803_v23  ;;  %v478_v24 = vmul.f32 %v5803_v23, %v5544_v20 }
 0x17b   : > { %v375_v48 = vpop.permute.xlu1 %374  ;;  %v412_v15 = vpop.permute.xlu0 %411  ;;  %v1426_v7 = vmul.f32 %v5960_v11, %v5813_v34  ;;  %v1381_v16 = vmul.f32 %v5960_v11, %v1379_v22  ;;  %v1427_v23 = vmul.f32 %v5813_v34, %v5544_v20 }
 0x17c   : > { %v379_v35 = vadd.f32 %v375_v48, %v358_v5  ;;  %v417_v30 = vadd.f32 %v412_v15, %v396_v6  ;;  %v1363_v5 = vsel %vm388_vm4, %v1360_v46, %v1362_v40  ;;  %v1425_v6 = vmul.f32 %v5952_v53, %v5813_v34 }
 0x17d   : > { %1345 = vrot.lane.b32.xlu1 %v1342_v36, %s5270_s25  ;;  %1364 = vrot.lane.b32.xlu0 %v1361_v39, %s5271_s15  ;;  %v1394_v48 = vmul.f32 %v5952_v53, %v1393_v33  ;;  %v5987_v46 = vstv %s5921_s11  ;;  %v1446_v36 = vmul.f32 %v5952_v53, %v5827_v44  ;;  %v5993_v39 = vmul.f32 %v5960_v11, %v5827_v44  ;;  %s4831_s11 = sld [smem:[#allocation4 + $0x4b]] }
 0x17e   : > { %v397_v50 = vadd.f32 %v393_v9, %v379_v35  ;;  %v482_v22 = vrot.slane %v476_v59, 1  ;;  %v483_v9 = vrot.slane %v477_v12, 1  ;;  %v535_v34 = vmul.f32 %v5952_v53, %v5824_v43 }
 0x17f   : > { %v414_v17 = vpop.permute.xlu1 %413  ;;  %v433_v57 = vpop.permute.xlu0 %432  ;;  %v6005_v59 = vmul.f32 %v5960_v11, %v5824_v43  ;;  %v1434_v12 = vrot.slane %v1427_v23, 1  ;;  %v6017_v23 = vmul.f32 %v5960_v11, %v5861_v2 }
 0x180   : > { %v438_v62 = vadd.f32 %v433_v57, %v417_v30  ;;  %v418_v15 = vadd.f32 %v414_v17, %v397_v50  ;;  %v1431_v17 = vrot.slane %v1425_v6, 1  ;;  %v1452_v6 = vrot.slane %v1446_v36, 1 }
 0x181   : > { %1366 = vrot.lane.b32.xlu1 %v1363_v5, %s5271_s15  ;;  %1384 = vrot.lane.b32.xlu0 %v1380_v56, %s5270_s25  ;;  %v485_v56 = vrot.slane %v478_v24, 1  ;;  %v1448_v24 = vmul.f32 %v5827_v44, %v5544_v20  ;;  %v541_v36 = vrot.slane %v535_v34, 2 }
 0x182   : > { %v444_v35 = vadd.f32 %v442_v13, %v438_v62  ;;  %v1432_v13 = vrot.slane %v1426_v7, 1  ;;  %v1395_v62 = vmul.f32 %v5960_v11, %v1393_v33  ;;  %v1453_v7 = vrot.slane %v5993_v39, 1 }
 0x183   : > { %v435_v40 = vpop.permute.xlu1 %434  ;;  %v505_v30 = vpop.permute.xlu0 %504  ;;  %v542_v39 = vrot.slane %v6005_v59, 2 }
 0x184   : > { %v458_v57 = vadd.f32 %v5686_v10, %v444_v35  ;;  %v439_v50 = vadd.f32 %v435_v40, %v418_v15  ;;  %v1484_v35 = vmul.f32 %v5952_v53, %v5861_v2  ;;  %v1435_v40 = vsel %vm328_vm3, %v1432_v13, %v1434_v12  ;;  %v6034_v12 = vld [vmem:[#allocation2 + $0x38] sm:$0xff] }
 0x185   : > { %1386 = vrot.lane.b32.xlu1 %v1381_v16, %s5270_s25  ;;  %1398 = vrot.lane.b32.xlu0 %v1394_v48, %s5271_s15  ;;  %v484_v16 = vsel %vm328_vm3, %v482_v22, %v483_v9  ;;  %v486_v48 = vsel %vm328_vm3, %v483_v9, %v485_v56  ;;  %v537_v22 = vmul.f32 %v5824_v43, %v5544_v20  ;;  %v1455_v9 = vrot.slane %v1448_v24, 1 }
 0x186   : > { %v445_v5 = vadd.f32 %v443_v58, %v439_v50  ;;  %v472_v10 = vadd.f32 %v5698_v27, %v458_v57  ;;  %v1433_v27 = vsel %vm328_vm3, %v1431_v17, %v1432_v13  ;;  %v6029_v50 = vld [vmem:[#allocation2 + $0x30] sm:$0xff]  ;;  %v1490_v59 = vrot.slane %v1484_v35, 2 }
 0x187   : > { %v507_v15 = vpop.permute.xlu1 %506  ;;  %v526_v33 = vpop.permute.xlu0 %525  ;;  %v628_v34 = vmul.f32 %v6029_v50, %v5924_v8  ;;  %v1491_v13 = vrot.slane %v6017_v23, 2  ;;  %v629_v43 = vmul.f32 %v6034_v12, %v5924_v8  ;;  %v543_v35 = vsel %vm388_vm4, %v541_v36, %v542_v39 }
 0x188   : > { %v459_v44 = vadd.f32 %v5696_v25, %v445_v5  ;;  %v489_v58 = vadd.f32 %v484_v16, %v472_v10  ;;  %v1454_v25 = vsel %vm328_vm3, %v1452_v6, %v1453_v7  ;;  %v1505_v5 = vmul.f32 %v5952_v53, %v5907_v31  ;;  %v6044_v6 = vld [vmem:[#allocation2 + $0x8] sm:$0xff] }
 0x189   : > { %1400 = vrot.lane.b32.xlu1 %v1395_v62, %s5271_s15  ;;  %1436 = vrot.lane.b32.xlu0 %v1433_v27, %s5270_s25  ;;  %v1506_v10 = vmul.f32 %v5960_v11, %v5907_v31  ;;  %v6049_v16 = vmul.f32 %v6044_v6, %v755_v60  ;;  %v1492_v60 = vsel %vm388_vm4, %v1490_v59, %v1491_v13 }
 0x18a   : > { %v510_v56 = vadd.f32 %v505_v30, %v489_v58  ;;  %v473_v57 = vadd.f32 %v5706_v37, %v459_v44  ;;  %v1486_v37 = vmul.f32 %v5861_v2, %v5544_v20  ;;  %v544_v2 = vrot.slane %v537_v22, 2 }
 0x18b   : > { %v528_v17 = vpop.permute.xlu1 %527  ;;  %v564_v62 = vpop.permute.xlu0 %563  ;;  %v1456_v44 = vsel %vm328_vm3, %v1453_v7, %v1455_v9  ;;  %v634_v58 = vrot.slane %v628_v34, 1  ;;  %v1511_v32 = vrot.slane %v1505_v5, 2  ;;  %v594_v7 = vmul.f32 %v6029_v50, %v593_v3 }
 0x18c   : > { %v490_v30 = vadd.f32 %v486_v48, %v473_v57  ;;  %v531_v24 = vadd.f32 %v526_v33, %v510_v56  ;;  %v630_v48 = vmul.f32 %v5924_v8, %v5573_v61  ;;  %v635_v57 = vrot.slane %v629_v43, 1 }
 0x18d   : > { %1438 = vrot.lane.b32.xlu1 %v1435_v40, %s5270_s25  ;;  %1457 = vrot.lane.b32.xlu0 %v1454_v25, %s5271_s15  ;;  %v1493_v36 = vrot.slane %v1486_v37, 2  ;;  %v1507_v40 = vmul.f32 %v5907_v31, %v5544_v20  ;;  %v1512_v8 = vrot.slane %v1506_v10, 2  ;;  %v687_v20 = vmul.f32 %v6029_v50, %v5928_v21 }
 0x18e   : > { %v511_v33 = vadd.f32 %v507_v15, %v490_v30  ;;  %v548_v23 = vadd.f32 %v543_v35, %v531_v24  ;;  %v545_v15 = vsel %vm388_vm4, %v542_v39, %v544_v2  ;;  %v637_v9 = vrot.slane %v630_v48, 1 }
 0x18f   : > { %v566_v27 = vpop.permute.xlu1 %565  ;;  %v585_v56 = vpop.permute.xlu0 %584  ;;  %v688_v39 = vmul.f32 %v6034_v12, %v5928_v21  ;;  %v636_v59 = vsel %vm328_vm3, %v634_v58, %v635_v57  ;;  %v1494_v37 = vsel %vm388_vm4, %v1491_v13, %v1493_v36  ;;  %v1514_v30 = vrot.slane %v1507_v40, 2 }
 0x190   : > { %v532_v22 = vadd.f32 %v528_v17, %v511_v33  ;;  %v569_v25 = vadd.f32 %v564_v62, %v548_v23  ;;  %v595_v17 = vmul.f32 %v6034_v12, %v593_v3  ;;  %v1532_v24 = vmul.f32 %v6029_v50, %v1531_v19 }
 0x191   : > { %1459 = vrot.lane.b32.xlu1 %v1456_v44, %s5271_s15  ;;  %1495 = vrot.lane.b32.xlu0 %v1492_v60, %s5270_s25  ;;  %v1513_v35 = vsel %vm388_vm4, %v1511_v32, %v1512_v8  ;;  %v689_v3 = vmul.f32 %v5928_v21, %v5573_v61  ;;  %v638_v2 = vsel %vm328_vm3, %v635_v57, %v637_v9  ;;  %v693_v48 = vrot.slane %v687_v20, 2 }
 0x192   : > { %v549_v31 = vadd.f32 %v545_v15, %v532_v22  ;;  %v590_v34 = vadd.f32 %v585_v56, %v569_v25  ;;  %v1533_v13 = vmul.f32 %v6034_v12, %v1531_v19  ;;  %v8903_v33 = vstv %s5881_s30  ;;  %s6253_s30 = sld [smem:[#allocation4 + $0x3f]] }
 0x193   : > { %v587_v62 = vpop.permute.xlu1 %586  ;;  %v657_v43 = vpop.permute.xlu0 %656  ;;  %v1546_v23 = vmul.f32 %v6029_v50, %v8903_v33  ;;  %v694_v21 = vrot.slane %v688_v39, 2  ;;  %v1577_v58 = vmul.f32 %v6029_v50, %v5932_v1  ;;  %v1515_v60 = vsel %vm388_vm4, %v1512_v8, %v1514_v30 }
 0x194   : > { %v570_v5 = vadd.f32 %v566_v27, %v549_v31  ;;  %v596_v10 = vadd.f32 %v594_v7, %v590_v34  ;;  %v1578_v57 = vmul.f32 %v6034_v12, %v5932_v1  ;;  %v6102_v19 = vmul.f32 %v6044_v6, %v5897_v45 }
 0x195   : > { %1497 = vrot.lane.b32.xlu1 %v1494_v37, %s5270_s25  ;;  %1516 = vrot.lane.b32.xlu0 %v1513_v35, %s5271_s15  ;;  %v696_v22 = vrot.slane %v689_v3, 2  ;;  %v745_v25 = vstv %s6060_s21  ;;  %v749_v8 = vstv %s6070_s6  ;;  %v8904_v15 = vmov %v8903_v33  ;;  %v6125_v35 = vld [vmem:[#allocation2 + $0x10] sm:$0x3]  ;;  %s4834_s21 = sld [smem:[#allocation4 + $0x4e]]  ;;  %s4837_s6 = sld [smem:[#allocation7 + $0x2]] }
 0x196   : > { %v610_v44 = vadd.f32 %v5708_v38, %v596_v10  ;;  %v591_v32 = vadd.f32 %v587_v62, %v570_v5  ;;  %v1579_v38 = vmul.f32 %v5932_v1, %v5573_v61  ;;  %v1547_v7 = vmul.f32 %v6034_v12, %v8904_v15 }
 0x197   : > { %v659_v27 = vpop.permute.xlu1 %658  ;;  %v678_v56 = vpop.permute.xlu0 %677  ;;  %v790_v9 = vmul.f32 %v5936_v41, %v5897_v45  ;;  %v1598_v20 = vmul.f32 %v6029_v50, %v5947_v18  ;;  %v1583_v31 = vrot.slane %v1577_v58, 1  ;;  %v1584_v39 = vrot.slane %v1578_v57, 1 }
 0x198   : > { %v597_v36 = vadd.f32 %v595_v17, %v591_v32  ;;  %v624_v40 = vadd.f32 %v5731_v49, %v610_v44  ;;  %v695_v49 = vsel %vm388_vm4, %v693_v48, %v694_v21  ;;  %v797_v62 = vrot.slane %v6102_v19, 1  ;;  %v6131_v48 = vld [vmem:[#allocation2 + $0x40] sm:$0x3] }
 0x199   : > { %1518 = vrot.lane.b32.xlu1 %v1515_v60, %s5271_s15  ;;  %1536 = vrot.lane.b32.xlu0 %v1532_v24, %s5270_s25  ;;  %v1586_v37 = vrot.slane %v1579_v38, 1  ;;  %v1599_v30 = vmul.f32 %v6034_v12, %v5947_v18  ;;  %v697_v10 = vsel %vm388_vm4, %v694_v21, %v696_v22  ;;  %v1604_v3 = vrot.slane %v1598_v20, 1 }
 0x19a   : > { %v611_v61 = vadd.f32 %v5729_v47, %v597_v36  ;;  %v641_v1 = vadd.f32 %v636_v59, %v624_v40  ;;  %v792_v47 = vmul.f32 %v6125_v35, %v5897_v45  ;;  %v796_v59 = vrot.slane %v790_v9, 1 }
 0x19b   : > { %v680_v34 = vpop.permute.xlu1 %679  ;;  %v716_v17 = vpop.permute.xlu0 %715  ;;  %v772_v33 = vadd.f32 %v5754_v55, %v5941_v42  ;;  %v6141_v45 = vmul.f32 %v6034_v12, %v5950_v26  ;;  %v1585_v21 = vsel %vm328_vm3, %v1583_v31, %v1584_v39  ;;  %v1605_v60 = vrot.slane %v1599_v30, 1 }
 0x19c   : > { %v662_v24 = vadd.f32 %v657_v43, %v641_v1  ;;  %v625_v5 = vadd.f32 %v5752_v54, %v611_v61  ;;  %v1600_v43 = vmul.f32 %v6131_v48, %v5947_v18  ;;  %v1636_v54 = vmul.f32 %v6029_v50, %v5950_v26 }
 0x19d   : > { %1538 = vrot.lane.b32.xlu1 %v1533_v13, %s5270_s25  ;;  %1550 = vrot.lane.b32.xlu0 %v1546_v23, %s5271_s15  ;;  %v798_v58 = vsel %vm328_vm3, %v796_v59, %v797_v62  ;;  %v1587_v18 = vsel %vm328_vm3, %v1584_v39, %v1586_v37  ;;  %v786_v57 = vadd.f32 %v5774_v0, %v772_v33  ;;  %v799_v55 = vrot.slane %v792_v47, 1 }
 0x19e   : > { %v642_v44 = vadd.f32 %v638_v2, %v625_v5  ;;  %v683_v32 = vadd.f32 %v678_v56, %v662_v24  ;;  %v1607_v42 = vrot.slane %v1600_v43, 1  ;;  %v1642_v2 = vrot.slane %v1636_v54, 2 }
 0x19f   : > { %v718_v13 = vpop.permute.xlu1 %717  ;;  %v737_v23 = vpop.permute.xlu0 %736  ;;  %v849_v56 = vmul.f32 %v5936_v41, %v5919_v4  ;;  %v850_v36 = vmul.f32 %v6044_v6, %v5919_v4  ;;  %v773_v40 = vadd.f32 %v5772_v63, %v6049_v16  ;;  %v1638_v20 = vmul.f32 %v6131_v48, %v5950_v26 }
 0x1a0   : > { %v663_v19 = vadd.f32 %v659_v27, %v642_v44  ;;  %v700_v38 = vadd.f32 %v695_v49, %v683_v32  ;;  %v1643_v27 = vrot.slane %v6141_v45, 2  ;;  %v1657_v61 = vmul.f32 %v6029_v50, %v5987_v46 }
 0x1a1   : > { %1552 = vrot.lane.b32.xlu1 %v1547_v7, %s5271_s15  ;;  %1588 = vrot.lane.b32.xlu0 %v1585_v21, %s5270_s25  ;;  %v1606_v7 = vsel %vm328_vm3, %v1604_v3, %v1605_v60  ;;  %v1658_v1 = vmul.f32 %v6034_v12, %v5987_v46  ;;  %v787_v63 = vadd.f32 %v5805_v28, %v773_v40  ;;  %v855_v24 = vrot.slane %v849_v56, 2 }
 0x1a2   : > { %v684_v22 = vadd.f32 %v680_v34, %v663_v19  ;;  %v721_v0 = vadd.f32 %v716_v17, %v700_v38  ;;  %v803_v31 = vadd.f32 %v798_v58, %v786_v57  ;;  %v800_v26 = vsel %vm328_vm3, %v797_v62, %v799_v55 }
 0x1a3   : > { %v739_v15 = vpop.permute.xlu1 %738  ;;  %v819_v9 = vpop.permute.xlu0 %818  ;;  %v1608_v34 = vsel %vm328_vm3, %v1605_v60, %v1607_v42  ;;  %v856_v17 = vrot.slane %v850_v36, 2  ;;  %v851_v39 = vmul.f32 %v6125_v35, %v5919_v4  ;;  %v1644_v28 = vsel %vm388_vm4, %v1642_v2, %v1643_v27 }
 0x1a4   : > { %v701_v16 = vadd.f32 %v697_v10, %v684_v22  ;;  %v742_v49 = vadd.f32 %v737_v23, %v721_v0  ;;  %v824_v30 = vadd.f32 %v819_v9, %v803_v31  ;;  %v1645_v62 = vrot.slane %v1638_v20, 2 }
 0x1a5   : > { %1590 = vrot.lane.b32.xlu1 %v1587_v18, %s5270_s25  ;;  %1609 = vrot.lane.b32.xlu0 %v1606_v7, %s5271_s15  ;;  %v1663_v59 = vrot.slane %v1657_v61, 2  ;;  %v1659_v3 = vmul.f32 %v6131_v48, %v5987_v46  ;;  %v804_v43 = vadd.f32 %v800_v26, %v787_v63  ;;  %v1664_v33 = vrot.slane %v1658_v1, 2  ;;  %v6201_v26 = vld [vmem:[#allocation2 + $0x28] sm:$0x3] }
 0x1a6   : > { %v722_v37 = vadd.f32 %v718_v13, %v701_v16  ;;  %v746_v5 = vmul.f32 %v745_v25, %v742_v49  ;;  %v857_v44 = vsel %vm388_vm4, %v855_v24, %v856_v17  ;;  %v858_v32 = vrot.slane %v851_v39, 2 }
 0x1a7   : > { %v821_v10 = vpop.permute.xlu1 %820  ;;  %v840_v47 = vpop.permute.xlu0 %839  ;;  %v941_v18 = vstv %s6163_s7  ;;  %v1646_v57 = vsel %vm388_vm4, %v1643_v27, %v1645_v62  ;;  %v1665_v19 = vsel %vm388_vm4, %v1663_v59, %v1664_v33  ;;  %v1666_v38 = vrot.slane %v1659_v3, 2  ;;  %s4838_s7 = sld [smem:[#allocation7 + $0x82]] }
 0x1a8   : > { %v743_v4 = vadd.f32 %v739_v15, %v722_v37  ;;  %v845_v54 = vadd.f32 %v840_v47, %v824_v30  ;;  %v825_v45 = vadd.f32 %v821_v10, %v804_v43  ;;  %v750_v23 = vadd.f32 %v749_v8, %v746_v5 }
 0x1a9   : > { %1611 = vrot.lane.b32.xlu1 %v1608_v34, %s5271_s15  ;;  %1647 = vrot.lane.b32.xlu0 %v1644_v28, %s5270_s25  ;;  %v859_v55 = vsel %vm388_vm4, %v856_v17, %v858_v32  ;;  %v907_v42 = vstv %s6172_s9  ;;  %v942_v0 = vmul.f32 %v5952_v53, %v941_v18  ;;  %v943_v27 = vmul.f32 %v5960_v11, %v941_v18  ;;  %s6285_s9 = sld [smem:[#allocation4 + $0x52]] }
 0x1aa   : > { %v862_v13 = vadd.f32 %v857_v44, %v845_v54  ;;  %v747_v46 = vmul.f32 %v745_v25, %v743_v4  ;;  %v752_v36 = vmax.f32 %v750_v23, 0.0  ;;  %v908_v15 = vmul.f32 %v5952_v53, %v907_v42 }
 0x1ab   : > { %v842_v21 = vpop.permute.xlu1 %841  ;;  %v878_v58 = vpop.permute.xlu0 %877  ;;  %v1667_v7 = vsel %vm388_vm4, %v1664_v33, %v1666_v38  ;;  %v1000_v1 = vstv %s4796_s4  ;;  %v948_v16 = vrot.slane %v942_v0, 1  ;;  %v949_v49 = vrot.slane %v943_v27, 1  ;;  %s4843_s4 = sld [smem:[#allocation4 + $0x55]] }
 0x1ac   : > { %v846_v60 = vadd.f32 %v842_v21, %v825_v45  ;;  %v883_v2 = vadd.f32 %v878_v58, %v862_v13  ;;  %v751_v25 = vadd.f32 %v749_v8, %v747_v46  ;;  %v944_v34 = vmul.f32 %v6201_v26, %v941_v18 }
 0x1ad   : > { %1649 = vrot.lane.b32.xlu1 %v1646_v57, %s5270_s25  ;;  %1668 = vrot.lane.b32.xlu0 %v1665_v19, %s5271_s15  ;;  %v909_v39 = vmul.f32 %v5960_v11, %v907_v42  ;;  %v1001_v30 = vmul.f32 %v5952_v53, %v1000_v1  ;;  %v1002_v28 = vmul.f32 %v5960_v11, %v1000_v1  ;;  %v1093_v18 = vstv %s4802_s12  ;;  %s6288_s12 = sld [smem:[#allocation4 + $0x53]] }
 0x1ae   : > { %v863_v56 = vadd.f32 %v859_v55, %v846_v60  ;;  %v753_v63 = vmax.f32 %v751_v25, 0.0  ;;  %v950_v10 = vsel %vm328_vm3, %v948_v16, %v949_v49  ;;  %v951_v47 = vrot.slane %v944_v34, 1 }
 0x1af   : > { %v880_v40 = vpop.permute.xlu1 %879  ;;  %v899_v22 = vpop.permute.xlu0 %898  ;;  %v1007_v4 = vrot.slane %v1001_v30, 2  ;;  %v1008_v43 = vrot.slane %v1002_v28, 2  ;;  %v1003_v54 = vmul.f32 %v6201_v26, %v1000_v1  ;;  %v1059_v19 = vstv %s6211_s22  ;;  %s4844_s22 = sld [smem:[#allocation4 + $0x56]] }
 0x1b0   : > { %v904_v9 = vadd.f32 %v899_v22, %v883_v2  ;;  %v884_v20 = vadd.f32 %v880_v40, %v863_v56  ;;  %v1094_v42 = vmul.f32 %v6029_v50, %v1093_v18  ;;  %v1095_v2 = vmul.f32 %v6034_v12, %v1093_v18 }
 0x1b1   : > { %1670 = vrot.lane.b32.xlu1 %v1667_v7, %s5271_s15  ;;  %1688 = vrot.lane.b32.xlu0 %v752_v36, %s5268_s23  ;;  %v1009_v46 = vsel %vm388_vm4, %v1007_v4, %v1008_v43  ;;  %v1010_v21 = vrot.slane %v1003_v54, 2  ;;  %v1060_v25 = vmul.f32 %v6029_v50, %v1059_v19  ;;  %v1096_v7 = vmul.f32 %v6131_v48, %v1093_v18 }
 0x1b2   : > { %v910_v61 = vadd.f32 %v908_v15, %v904_v9  ;;  %v1100_v15 = vrot.slane %v1094_v42, 1  ;;  %v1101_v9 = vrot.slane %v1095_v2, 1  ;;  %v1061_v1 = vmul.f32 %v6034_v12, %v1059_v19 }
 0x1b3   : > { %v901_v8 = vpop.permute.xlu1 %900  ;;  %v971_v31 = vpop.permute.xlu0 %970 }
 0x1b4   : > { %v924_v17 = vadd.f32 %v5807_v29, %v910_v61  ;;  %v905_v37 = vadd.f32 %v901_v8, %v884_v20  ;;  %v1102_v34 = vsel %vm328_vm3, %v1100_v15, %v1101_v9 }
 0x1b5   : > { %1690 = vrot.lane.b32.xlu1 %v753_v63, %s5268_s23  ;;  %v1152_v63 = vstv %s4805_s19  ;;  %s4846_s19 = sld [smem:[#allocation4 + $0x58]] }
 0x1b6   : > { %v911_v24 = vadd.f32 %v909_v39, %v905_v37  ;;  %v938_v5 = vadd.f32 %v5839_v52, %v924_v17  ;;  %v952_v52 = vsel %vm328_vm3, %v949_v49, %v951_v47  ;;  %v1103_v17 = vrot.slane %v1096_v7, 1 }
 0x1b7   : > { %v973_v62 = vpop.permute.xlu1 %972  ;;  %v992_v59 = vpop.permute.xlu0 %991  ;;  %v1153_v39 = vmul.f32 %v6029_v50, %v1152_v63  ;;  %v1154_v37 = vmul.f32 %v6034_v12, %v1152_v63 }
 0x1b8   : > { %v925_v29 = vadd.f32 %v5837_v51, %v911_v24  ;;  %v955_v3 = vadd.f32 %v950_v10, %v938_v5  ;;  %v1104_v47 = vsel %vm328_vm3, %v1101_v9, %v1103_v17 }
 0x1ba   : > { %v976_v33 = vadd.f32 %v971_v31, %v955_v3  ;;  %v939_v44 = vadd.f32 %v5874_v14, %v925_v29  ;;  %v1011_v14 = vsel %vm388_vm4, %v1008_v43, %v1010_v21  ;;  %v1155_v29 = vmul.f32 %v6131_v48, %v1152_v63 }
 0x1bb   : > { %v994_v32 = vpop.permute.xlu1 %993  ;;  %v1030_v45 = vpop.permute.xlu0 %1029 }
 0x1bc   : > { %v956_v13 = vadd.f32 %v952_v52, %v939_v44  ;;  %v997_v23 = vadd.f32 %v992_v59, %v976_v33  ;;  %v1160_v59 = vrot.slane %v1154_v37, 2  ;;  %v1162_v52 = vrot.slane %v1155_v29, 2 }
 0x1be   : > { %v977_v58 = vadd.f32 %v973_v62, %v956_v13  ;;  %v1014_v51 = vadd.f32 %v1009_v46, %v997_v23  ;;  %v1159_v62 = vrot.slane %v1153_v39, 2  ;;  %v1163_v21 = vsel %vm388_vm4, %v1160_v59, %v1162_v52 }
 0x1bf   : > { %v1032_v60 = vpop.permute.xlu1 %1031  ;;  %v1051_v57 = vpop.permute.xlu0 %1050 }
 0x1c0   : > { %v998_v38 = vadd.f32 %v994_v32, %v977_v58  ;;  %v1035_v55 = vadd.f32 %v1030_v45, %v1014_v51  ;;  %v1161_v44 = vsel %vm388_vm4, %v1159_v62, %v1160_v59 }
 0x1c2   : > { %v1015_v56 = vadd.f32 %v1011_v14, %v998_v38  ;;  %v1056_v36 = vadd.f32 %v1051_v57, %v1035_v55  ;;  %v1255_v38 = vstv %s4813_s26  ;;  %v1215_v55 = vstv %s6233_s27  ;;  %s4872_s26 = sld [smem:[#allocation4 + $0x70]]  ;;  %s4873_s27 = sld [smem:[#allocation4 + $0x71]] }
 0x1c3   : > { %v1053_v40 = vpop.permute.xlu1 %1052  ;;  %v1071_v22 = vpop.permute.xlu0 %1070  ;;  %v1221_v14 = vstv %s6235_s28  ;;  %v1257_v42 = vmul.f32 %v6044_v6, %v1255_v38  ;;  %v1258_v9 = vmul.f32 %v6125_v35, %v1255_v38  ;;  %s4875_s28 = sld [smem:[#allocation4 + $0x73]] }
 0x1c4   : > { %v1036_v0 = vadd.f32 %v1032_v60, %v1015_v56  ;;  %v1062_v27 = vadd.f32 %v1060_v25, %v1056_v36  ;;  %v1211_v60 = vstv %s6230_s24  ;;  %s4847_s24 = sld [smem:[#allocation4 + $0x59]] }
 0x1c5   : > { %v1263_v15 = vrot.slane %v1257_v42, 1  ;;  %v1265_v39 = vrot.slane %v1258_v9, 1 }
 0x1c6   : > { %v1057_v20 = vadd.f32 %v1053_v40, %v1036_v0  ;;  %v1076_v61 = vadd.f32 %v1071_v22, %v1062_v27  ;;  %v1256_v40 = vmul.f32 %v5936_v41, %v1255_v38  ;;  %v1222_v27 = vmul.f32 %v5936_v41, %v1221_v14 }
 0x1c7   : > { %v1073_v8 = vpop.permute.xlu1 %1072  ;;  %v1085_v16 = vpop.permute.xlu0 %1084  ;;  %v1266_v59 = vsel %vm328_vm3, %v1263_v15, %v1265_v39 }
 0x1c8   : > { %v1063_v49 = vadd.f32 %v1061_v1, %v1057_v20  ;;  %v1090_v31 = vadd.f32 %v1085_v16, %v1076_v61 }
 0x1ca   : > { %v1077_v30 = vadd.f32 %v1073_v8, %v1063_v49  ;;  %v1107_v28 = vadd.f32 %v1102_v34, %v1090_v31  ;;  %v1262_v8 = vrot.slane %v1256_v40, 1  ;;  %v1223_v49 = vmul.f32 %v6044_v6, %v1221_v14 }
 0x1cb   : > { %v1087_v24 = vpop.permute.xlu1 %1086  ;;  %v1123_v5 = vpop.permute.xlu0 %1122  ;;  %v1314_v34 = vstv %s4816_s29  ;;  %s4876_s29 = sld [smem:[#allocation4 + $0x74]] }
 0x1cc   : > { %v1091_v10 = vadd.f32 %v1087_v24, %v1077_v30  ;;  %v1128_v3 = vadd.f32 %v1123_v5, %v1107_v28  ;;  %v1264_v17 = vsel %vm328_vm3, %v1262_v8, %v1263_v15  ;;  %v1316_v37 = vmul.f32 %v6044_v6, %v1314_v34 }
 0x1ce   : > { %v1108_v4 = vadd.f32 %v1104_v47, %v1091_v10  ;;  %v1315_v47 = vmul.f32 %v5936_v41, %v1314_v34  ;;  %v1322_v29 = vrot.slane %v1316_v37, 2 }
 0x1cf   : > { %v1125_v43 = vpop.permute.xlu1 %1124  ;;  %v1144_v54 = vpop.permute.xlu0 %1143 }
 0x1d0   : > { %v1149_v33 = vadd.f32 %v1144_v54, %v1128_v3  ;;  %v1129_v32 = vadd.f32 %v1125_v43, %v1108_v4  ;;  %v1317_v3 = vmul.f32 %v6125_v35, %v1314_v34 }
 0x1d2   : > { %v1166_v45 = vadd.f32 %v1161_v44, %v1149_v33  ;;  %v1321_v33 = vrot.slane %v1315_v47, 2  ;;  %v1324_v52 = vrot.slane %v1317_v3, 2 }
 0x1d3   : > { %v1146_v13 = vpop.permute.xlu1 %1145  ;;  %v1182_v23 = vpop.permute.xlu0 %1181 }
 0x1d4   : > { %v1150_v46 = vadd.f32 %v1146_v13, %v1129_v32  ;;  %v1187_v58 = vadd.f32 %v1182_v23, %v1166_v45  ;;  %v1323_v41 = vsel %vm388_vm4, %v1321_v33, %v1322_v29  ;;  %v1325_v35 = vsel %vm388_vm4, %v1322_v29, %v1324_v52 }
 0x1d5   : > { %v1559_v52 = vstv %s4831_s11  ;;  %s6418_s11 = sld [smem:[#allocation4 + $0x54]] }
 0x1d6   : > { %v1167_v51 = vadd.f32 %v1163_v21, %v1150_v46  ;;  %v1373_v21 = vstv %s6253_s30  ;;  %s4901_s30 = sld [smem:[#allocation4 + $0x8b]] }
 0x1d7   : > { %v1184_v18 = vpop.permute.xlu1 %1183  ;;  %v1203_v57 = vpop.permute.xlu0 %1202  ;;  %v1374_v38 = vmul.f32 %v5952_v53, %v1373_v21  ;;  %v1375_v40 = vmul.f32 %v5960_v11, %v1373_v21 }
 0x1d8   : > { %v1208_v19 = vadd.f32 %v1203_v57, %v1187_v58  ;;  %v1188_v2 = vadd.f32 %v1184_v18, %v1167_v51  ;;  %v1407_v18 = vstv %s4822_s5  ;;  %s4902_s5 = sld [smem:[#allocation4 + $0x8c]] }
 0x1d9   : > { %v1409_v14 = vmul.f32 %v5960_v11, %v1407_v18 }
 0x1da   : > { %v1212_v56 = vmul.f32 %v1211_v60, %v1208_v19 }
 0x1db   : > { %v1205_v36 = vpop.permute.xlu1 %1204  ;;  %v1233_v25 = vpop.permute.xlu0 %1232 }
 0x1dc   : > { %v1216_v22 = vadd.f32 %v1215_v55, %v1212_v56  ;;  %v1209_v0 = vadd.f32 %v1205_v36, %v1188_v2  ;;  %v1238_v61 = vadd.f32 %v1233_v25, %v1222_v27  ;;  %v1410_v27 = vmul.f32 %v6201_v26, %v1407_v18 }
 0x1de   : > { %v1218_v7 = vmax.f32 %v1216_v22, 0.0  ;;  %v1213_v20 = vmul.f32 %v1211_v60, %v1209_v0  ;;  %v1415_v0 = vrot.slane %v1409_v14, 1  ;;  %v1417_v8 = vrot.slane %v1410_v27, 1 }
 0x1df   : > { %v1235_v1 = vpop.permute.xlu1 %1234  ;;  %v1247_v63 = vpop.permute.xlu0 %1246 }
 0x1e0   : > { %v1217_v16 = vadd.f32 %v1215_v55, %v1213_v20  ;;  %v1252_v31 = vadd.f32 %v1247_v63, %v1238_v61  ;;  %1698 = vrot.lane.b32.xlu0 %v1218_v7, %s5268_s23  ;;  %v1239_v28 = vadd.f32 %v1235_v1, %v1223_v49  ;;  %v1408_v55 = vmul.f32 %v5952_v53, %v1407_v18 }
 0x1e1   : > { %v1466_v7 = vstv %s4825_s8  ;;  %s4904_s8 = sld [smem:[#allocation4 + $0x8e]] }
 0x1e2   : > { %v1219_v30 = vmax.f32 %v1217_v16, 0.0  ;;  %v1269_v24 = vadd.f32 %v1264_v17, %v1252_v31  ;;  %v1414_v22 = vrot.slane %v1408_v55, 1  ;;  %v1467_v16 = vmul.f32 %v5952_v53, %v1466_v7 }
 0x1e3   : > { %v1249_v5 = vpop.permute.xlu1 %1248  ;;  %v1285_v10 = vpop.permute.xlu0 %1284  ;;  %v1468_v49 = vmul.f32 %v5960_v11, %v1466_v7  ;;  %v1562_v55 = vmul.f32 %v6131_v48, %v1559_v52 }
 0x1e4   : > { %v1253_v62 = vadd.f32 %v1249_v5, %v1239_v28  ;;  %1700 = vrot.lane.b32.xlu1 %v1219_v30, %s5268_s23  ;;  %v1290_v4 = vadd.f32 %v1285_v10, %v1269_v24  ;;  %v1416_v63 = vsel %vm328_vm3, %v1414_v22, %v1415_v0  ;;  %v1418_v30 = vsel %vm328_vm3, %v1415_v0, %v1417_v8 }
 0x1e5   : > { %v1473_v28 = vrot.slane %v1467_v16, 2  ;;  %v1474_v24 = vrot.slane %v1468_v49, 2  ;;  %v1469_v5 = vmul.f32 %v6201_v26, %v1466_v7  ;;  %v1525_v26 = vstv %s6268_s10  ;;  %s4905_s10 = sld [smem:[#allocation4 + $0x8f]] }
 0x1e6   : > { %v1270_v6 = vadd.f32 %v1266_v59, %v1253_v62  ;;  %v1569_v22 = vrot.slane %v1562_v55, 1 }
 0x1e7   : > { %v1287_v43 = vpop.permute.xlu1 %1286  ;;  %v1306_v54 = vpop.permute.xlu0 %1305  ;;  %v1475_v59 = vsel %vm388_vm4, %v1473_v28, %v1474_v24  ;;  %v1476_v29 = vrot.slane %v1469_v5, 2 }
 0x1e8   : > { %v1311_v44 = vadd.f32 %v1306_v54, %v1290_v4  ;;  %v1291_v32 = vadd.f32 %v1287_v43, %v1270_v6 }
 0x1e9   : > { %v1477_v33 = vsel %vm388_vm4, %v1474_v24, %v1476_v29  ;;  %v1681_v29 = vstv %s4838_s7  ;;  %s4874_s7 = sld [smem:[#allocation4 + $0x72]] }
 0x1ea   : > { %v1328_v45 = vadd.f32 %v1323_v41, %v1311_v44 }
 0x1eb   : > { %v1308_v13 = vpop.permute.xlu1 %1307  ;;  %v1344_v23 = vpop.permute.xlu0 %1343 }
 0x1ec   : > { %v1312_v46 = vadd.f32 %v1308_v13, %v1291_v32  ;;  %v1349_v58 = vadd.f32 %v1344_v23, %v1328_v45  ;;  %v1526_v23 = vmul.f32 %v6029_v50, %v1525_v26 }
 0x1ee   : > { %v1329_v51 = vadd.f32 %v1325_v35, %v1312_v46  ;;  %v1560_v46 = vmul.f32 %v6029_v50, %v1559_v52  ;;  %v1561_v35 = vmul.f32 %v6034_v12, %v1559_v52 }
 0x1ef   : > { %v1346_v60 = vpop.permute.xlu1 %1345  ;;  %v1365_v57 = vpop.permute.xlu0 %1364 }
 0x1f0   : > { %v1370_v19 = vadd.f32 %v1365_v57, %v1349_v58  ;;  %v1350_v42 = vadd.f32 %v1346_v60, %v1329_v51  ;;  %v1527_v57 = vmul.f32 %v6034_v12, %v1525_v26 }
 0x1f2   : > { %v1376_v2 = vadd.f32 %v1374_v38, %v1370_v19  ;;  %v1566_v19 = vrot.slane %v1560_v46, 1  ;;  %v1567_v38 = vrot.slane %v1561_v35, 1  ;;  %v6297_v46 = vstv %s4843_s4  ;;  %s6468_s4 = sld [smem:[#allocation4 + $0x5b]] }
 0x1f3   : > { %v1367_v56 = vpop.permute.xlu1 %1366  ;;  %v1385_v36 = vpop.permute.xlu0 %1384  ;;  %v1748_v35 = vstv %s6288_s12  ;;  %s6477_s12 = sld [smem:[#allocation4 + $0x5c]] }
 0x1f4   : > { %v1371_v25 = vadd.f32 %v1367_v56, %v1350_v42  ;;  %v1390_v15 = vadd.f32 %v1385_v36, %v1376_v2  ;;  %v1618_v2 = vstv %s4834_s21  ;;  %s4845_s21 = sld [smem:[#allocation4 + $0x57]] }
 0x1f5   : > { %v1619_v0 = vmul.f32 %v6029_v50, %v1618_v2  ;;  %v1620_v27 = vmul.f32 %v6034_v12, %v1618_v2  ;;  %v1621_v16 = vmul.f32 %v6131_v48, %v1618_v2 }
 0x1f6   : > { %v1377_v9 = vadd.f32 %v1375_v40, %v1371_v25  ;;  %v1568_v40 = vsel %vm328_vm3, %v1566_v19, %v1567_v38 }
 0x1f7   : > { %v1387_v20 = vpop.permute.xlu1 %1386  ;;  %v1399_v61 = vpop.permute.xlu0 %1398  ;;  %v1626_v8 = vrot.slane %v1620_v27, 2  ;;  %v1628_v12 = vrot.slane %v1621_v16, 2 }
 0x1f8   : > { %v1404_v1 = vadd.f32 %v1399_v61, %v1390_v15  ;;  %v1391_v31 = vadd.f32 %v1387_v20, %v1377_v9 }
 0x1fa   : > { %v1421_v34 = vadd.f32 %v1416_v63, %v1404_v1  ;;  %v1570_v1 = vsel %vm328_vm3, %v1567_v38, %v1569_v22  ;;  %v1625_v63 = vrot.slane %v1619_v0, 2  ;;  %v6338_v0 = vstv %s4875_s28  ;;  %s4903_s28 = sld [smem:[#allocation4 + $0x8d]] }
 0x1fb   : > { %v1401_v17 = vpop.permute.xlu1 %1400  ;;  %v1437_v39 = vpop.permute.xlu0 %1436  ;;  %8907 = vst [vmem:[#allocation15_spill] sm:$0xff] %v6338_v0 }
 0x1fc   : > { %v1405_v37 = vadd.f32 %v1401_v17, %v1391_v31  ;;  %v1442_v10 = vadd.f32 %v1437_v39, %v1421_v34  ;;  %v1627_v50 = vsel %vm388_vm4, %v1625_v63, %v1626_v8 }
 0x1fe   : > { %v1422_v47 = vadd.f32 %v1418_v30, %v1405_v37 }
 0x1ff   : > { %v1439_v53 = vpop.permute.xlu1 %1438  ;;  %v1458_v62 = vpop.permute.xlu0 %1457 }
 0x200   : > { %v1463_v11 = vadd.f32 %v1458_v62, %v1442_v10  ;;  %v1443_v3 = vadd.f32 %v1439_v53, %v1422_v47  ;;  %v1629_v10 = vsel %vm388_vm4, %v1626_v8, %v1628_v12  ;;  %v1677_v62 = vstv %s4837_s6  ;;  %s4871_s6 = sld [smem:[#allocation4 + $0x6f]] }
 0x202   : > { %v1480_v4 = vadd.f32 %v1475_v59, %v1463_v11 }
 0x203   : > { %v1460_v6 = vpop.permute.xlu1 %1459  ;;  %v1496_v43 = vpop.permute.xlu0 %1495 }
 0x204   : > { %v1464_v54 = vadd.f32 %v1460_v6, %v1443_v3  ;;  %v1501_v44 = vadd.f32 %v1496_v43, %v1480_v4 }
 0x206   : > { %v1481_v41 = vadd.f32 %v1477_v33, %v1464_v54 }
 0x207   : > { %v1498_v32 = vpop.permute.xlu1 %1497  ;;  %v1517_v45 = vpop.permute.xlu0 %1516 }
 0x208   : > { %v1522_v13 = vadd.f32 %v1517_v45, %v1501_v44  ;;  %v1502_v21 = vadd.f32 %v1498_v32, %v1481_v41  ;;  %v1734_v32 = vstv %s6285_s9  ;;  %s6458_s9 = sld [smem:[#allocation4 + $0x8a]] }
 0x20a   : > { %v1528_v58 = vadd.f32 %v1526_v23, %v1522_v13 }
 0x20b   : > { %v1519_v51 = vpop.permute.xlu1 %1518  ;;  %v1537_v18 = vpop.permute.xlu0 %1536 }
 0x20c   : > { %v1523_v60 = vadd.f32 %v1519_v51, %v1502_v21  ;;  %v1542_v14 = vadd.f32 %v1537_v18, %v1528_v58  ;;  %v6300_v21 = vstv %s4844_s22  ;;  %v6303_v58 = vstv %s4846_s19  ;;  %s6486_s22 = sld [smem:[#allocation4 + $0x5e]]  ;;  %s6488_s19 = sld [smem:[#allocation4 + $0x5f]] }
 0x20e   : > { %v1529_v42 = vadd.f32 %v1527_v57, %v1523_v60  ;;  %v6309_v60 = vstv %s4847_s24  ;;  %s4855_s24 = sld [smem:[#allocation4 + $0x61]] }
 0x20f   : > { %v1539_v56 = vpop.permute.xlu1 %1538  ;;  %v1551_v36 = vpop.permute.xlu0 %1550 }
 0x210   : > { %v1556_v25 = vadd.f32 %v1551_v36, %v1542_v14  ;;  %v1543_v15 = vadd.f32 %v1539_v56, %v1529_v42  ;;  %v6329_v56 = vstv %s4872_s26  ;;  %v6331_v36 = vstv %s4873_s27  ;;  %s4856_s26 = sld [smem:[#allocation4 + $0x62]]  ;;  %s4881_s27 = sld [smem:[#allocation4 + $0x79]] }
 0x211   : > { %8905 = vst [vmem:[#allocation13_spill] sm:$0xff] %v6329_v56  ;;  %8906 = vst [vmem:[#allocation14_spill] sm:$0xff] %v6331_v36 }
 0x212   : > { %v1573_v9 = vadd.f32 %v1568_v40, %v1556_v25 }
 0x213   : > { %v1553_v7 = vpop.permute.xlu1 %1552  ;;  %v1589_v20 = vpop.permute.xlu0 %1588 }
 0x214   : > { %v1557_v61 = vadd.f32 %v1553_v7, %v1543_v15  ;;  %v1594_v49 = vadd.f32 %v1589_v20, %v1573_v9 }
 0x216   : > { %v1574_v31 = vadd.f32 %v1570_v1, %v1557_v61 }
 0x217   : > { %v1591_v34 = vpop.permute.xlu1 %1590  ;;  %v1610_v17 = vpop.permute.xlu0 %1609 }
 0x218   : > { %v1615_v39 = vadd.f32 %v1610_v17, %v1594_v49  ;;  %v1595_v37 = vadd.f32 %v1591_v34, %v1574_v31 }
 0x21a   : > { %v1632_v30 = vadd.f32 %v1627_v50, %v1615_v39 }
 0x21b   : > { %v1612_v28 = vpop.permute.xlu1 %1611  ;;  %v1648_v24 = vpop.permute.xlu0 %1647 }
 0x21c   : > { %v1616_v5 = vadd.f32 %v1612_v28, %v1595_v37  ;;  %v1653_v47 = vadd.f32 %v1648_v24, %v1632_v30  ;;  %v6388_v24 = vstv %s4876_s29  ;;  %s4882_s29 = sld [smem:[#allocation4 + $0x7a]] }
 0x21d   : > { %8911 = vst [vmem:[#allocation19_spill] sm:$0xff] %v6388_v24 }
 0x21e   : > { %v1633_v53 = vadd.f32 %v1629_v10, %v1616_v5 }
 0x21f   : > { %v1650_v48 = vpop.permute.xlu1 %1649  ;;  %v1669_v11 = vpop.permute.xlu0 %1668 }
 0x220   : > { %v1674_v59 = vadd.f32 %v1669_v11, %v1653_v47  ;;  %v1654_v3 = vadd.f32 %v1650_v48, %v1633_v53 }
 0x222   : > { %v1678_v4 = vmul.f32 %v1677_v62, %v1674_v59 }
 0x223   : > { %v1671_v6 = vpop.permute.xlu1 %1670  ;;  %v1689_v43 = vpop.permute.xlu0 %1688 }
 0x224   : > { %v1682_v54 = vadd.f32 %v1681_v29, %v1678_v4  ;;  %v1675_v33 = vadd.f32 %v1671_v6, %v1654_v3  ;;  %1694 = vst.msk [vmem:[#allocation3 + $0x1] sm:$0xff] %vm252_vm2, %v1689_v43  ;;  %v2732_v6 = vstv %s4902_s5  ;;  %s6539_s5 = sld [smem:[#allocation4 + $0x7d]] }
 0x226   : > { %v1684_v26 = vmax.f32 %v1682_v54, 0.0  ;;  %v1679_v44 = vmul.f32 %v1677_v62, %v1675_v33 }
 0x227   : > { %v1691_v41 = vpop.permute.xlu1 %1690 }
 0x228   : > { %v1683_v52 = vadd.f32 %v1681_v29, %v1679_v44  ;;  %1695 = vst.msk [vmem:[#allocation3 + $0x9] sm:$0xff] %vm252_vm2, %v1691_v41  ;;  %1709 = vrot.lane.b32.xlu0 %v1684_v26, %s5268_s23  ;;  %v2711_v29 = vstv %s4901_s30  ;;  %v2770_v44 = vstv %s4904_s8  ;;  %s4884_s30 = sld [smem:[#allocation4 + $0x7c]] }
 0x229   : > { %s6547_s8 = sld [smem:[#allocation4 + $0x94]] }
 0x22a   : > { %v1685_v45 = vmax.f32 %v1683_v52, 0.0 }
 0x22b   : > { %v6293_v13 = vld [vmem:[#allocation3] sm:$0xff] }
 0x22c   : > { %1711 = vrot.lane.b32.xlu1 %v1685_v45, %s5268_s23  ;;  %v1735_v23 = vmul.f32 %v1734_v32, %v6293_v13  ;;  %v1780_v18 = vmul.f32 %v6297_v46, %v6293_v13  ;;  %v1749_v19 = vmul.f32 %v1748_v35, %v6293_v13  ;;  %v1801_v38 = vmul.f32 %v6300_v21, %v6293_v13 }
 0x22d   : > { %v1839_v14 = vmul.f32 %v6303_v58, %v6293_v13  ;;  %v1860_v2 = vmul.f32 %v6309_v60, %v6293_v13  ;;  %v2246_v63 = vmul.f32 %v6329_v56, %v6293_v13  ;;  %v2267_v17 = vmul.f32 %v6331_v36, %v6293_v13 }
 0x22e   : > { %1739 = vrot.lane.b32.xlu0 %v1735_v23, %s5270_s25  ;;  %v1786_v25 = vrot.slane %v1780_v18, 1  ;;  %v1807_v15 = vrot.slane %v1801_v38, 1  ;;  %v2305_v50 = vmul.f32 %v6338_v0, %v6293_v13  ;;  %v2326_v11 = vmul.f32 %v6388_v24, %v6293_v13 }
 0x22f   : > { %v6305_v51 = vld [vmem:[#allocation3 + $0x8] sm:$0xff]  ;;  %v1845_v61 = vrot.slane %v1839_v14, 2  ;;  %v1866_v16 = vrot.slane %v1860_v2, 2  ;;  %v2252_v12 = vrot.slane %v2246_v63, 1  ;;  %v2273_v10 = vrot.slane %v2267_v17, 1 }
 0x230   : > { %v1736_v57 = vmul.f32 %v1734_v32, %v6305_v51  ;;  %v6317_v55 = vmul.f32 %v6297_v46, %v6305_v51  ;;  %v6325_v42 = vmul.f32 %v6300_v21, %v6305_v51  ;;  %v6336_v22 = vmul.f32 %v6303_v58, %v6305_v51  ;;  %v6408_v3 = vld [vmem:[#allocation3 + $0x10] sm:$0x3] }
 0x231   : > { %v1750_v27 = vmul.f32 %v1748_v35, %v6305_v51  ;;  %v6344_v7 = vmul.f32 %v6309_v60, %v6305_v51  ;;  %v6368_v34 = vmul.f32 %v6329_v56, %v6305_v51  ;;  %v6382_v30 = vmul.f32 %v6331_v36, %v6305_v51 }
 0x232   : > { %1741 = vrot.lane.b32.xlu1 %v1736_v57, %s5270_s25  ;;  %1753 = vrot.lane.b32.xlu0 %v1749_v19, %s5271_s15  ;;  %v8801_v40 = vrot.slane %v6317_v55, 1  ;;  %v8800_v9 = vrot.slane %v6325_v42, 1  ;;  %v8799_v1 = vrot.slane %v6336_v22, 2  ;;  %v6386_v28 = vmul.f32 %v6338_v0, %v6305_v51 }
 0x233   : > { %v8798_v49 = vrot.slane %v6344_v7, 2  ;;  %8908 = vst [vmem:[#allocation16_spill] sm:$0xff] %v6368_v34  ;;  %v8797_v37 = vrot.slane %v6368_v34, 1  ;;  %8909 = vst [vmem:[#allocation17_spill] sm:$0xff] %v6382_v30  ;;  %v8796_v47 = vrot.slane %v6382_v30, 1  ;;  %v2311_v53 = vrot.slane %v2305_v50, 2 }
 0x234   : > { %v6349_v20 = vsel %vm328_vm3, %v1786_v25, %v8801_v40  ;;  %v6358_v8 = vsel %vm328_vm3, %v1807_v15, %v8800_v9  ;;  %v6364_v31 = vsel %vm388_vm4, %v1845_v61, %v8799_v1  ;;  %8910 = vst [vmem:[#allocation18_spill] sm:$0xff] %v6386_v28  ;;  %v8795_v48 = vrot.slane %v6386_v28, 2 }
 0x235   : > { %v6375_v39 = vsel %vm388_vm4, %v1866_v16, %v8798_v49  ;;  %v6393_v5 = vsel %vm328_vm3, %v2252_v12, %v8797_v37  ;;  %v6400_v62 = vsel %vm328_vm3, %v2273_v10, %v8796_v47  ;;  %v6406_v59 = vmul.f32 %v6388_v24, %v6305_v51 }
 0x236   : > { %1755 = vrot.lane.b32.xlu1 %v1750_v27, %s5271_s15  ;;  %8912 = vst [vmem:[#allocation20_spill] sm:$0xff] %v6393_v5  ;;  %8913 = vst [vmem:[#allocation21_spill] sm:$0xff] %v6400_v62  ;;  %v6413_v4 = vsel %vm388_vm4, %v2311_v53, %v8795_v48  ;;  %v2332_v43 = vrot.slane %v2326_v11, 2  ;;  %v2712_v33 = vmul.f32 %v2711_v29, %v6293_v13  ;;  %v2791_v45 = vstv %s4905_s10  ;;  %s6549_s10 = sld [smem:[#allocation4 + $0x95]] }
 0x237   : > { %8914 = vst [vmem:[#allocation22_spill] sm:$0xff] %v6406_v59  ;;  %8915 = vst [vmem:[#allocation23_spill] sm:$0xff] %v6413_v4  ;;  %v8794_v54 = vrot.slane %v6406_v59, 2  ;;  %v2713_v26 = vmul.f32 %v2711_v29, %v6305_v51  ;;  %v2714_v52 = vmul.f32 %v2711_v29, %v6408_v3  ;;  %v2733_v32 = vmul.f32 %v2732_v6, %v6293_v13 }
 0x238   : > { %v2718_v23 = vrot.slane %v2712_v33, 1  ;;  %v2734_v18 = vmul.f32 %v2732_v6, %v6305_v51  ;;  %v2735_v57 = vmul.f32 %v2732_v6, %v6408_v3  ;;  %v2771_v14 = vmul.f32 %v2770_v44, %v6293_v13 }
 0x239   : > { %v6423_v41 = vsel %vm388_vm4, %v2332_v43, %v8794_v54  ;;  %v2719_v35 = vrot.slane %v2713_v26, 1  ;;  %v2721_v19 = vrot.slane %v2714_v52, 1  ;;  %v2739_v38 = vrot.slane %v2733_v32, 1 }
 0x23a   : > { %8916 = vst [vmem:[#allocation24_spill] sm:$0xff] %v6423_v41  ;;  %v2740_v25 = vrot.slane %v2734_v18, 1  ;;  %v2742_v27 = vrot.slane %v2735_v57, 1  ;;  %v2772_v15 = vmul.f32 %v2770_v44, %v6305_v51  ;;  %v2777_v63 = vrot.slane %v2771_v14, 2 }
 0x23b   : > { %v6431_v2 = vsel %vm328_vm3, %v2718_v23, %v2719_v35  ;;  %v6435_v61 = vsel %vm328_vm3, %v2719_v35, %v2721_v19  ;;  %v2773_v16 = vmul.f32 %v2770_v44, %v6408_v3  ;;  %v2792_v17 = vmul.f32 %v2791_v45, %v6293_v13 }
 0x23c   : > { %8917 = vst [vmem:[#allocation25_spill] sm:$0xff] %v6431_v2  ;;  %8918 = vst [vmem:[#allocation26_spill] sm:$0xff] %v6435_v61  ;;  %v6440_v50 = vsel %vm328_vm3, %v2739_v38, %v2740_v25  ;;  %v6443_v12 = vsel %vm328_vm3, %v2740_v25, %v2742_v27  ;;  %v2778_v10 = vrot.slane %v2772_v15, 2  ;;  %v2793_v53 = vmul.f32 %v2791_v45, %v6305_v51 }
 0x23d   : > { %8919 = vst [vmem:[#allocation27_spill] sm:$0xff] %v6440_v50  ;;  %8920 = vst [vmem:[#allocation28_spill] sm:$0xff] %v6443_v12  ;;  %v2780_v11 = vrot.slane %v2773_v16, 2  ;;  %v2798_v6 = vrot.slane %v2792_v17, 2  ;;  %v1762_v33 = vstv %s6418_s11  ;;  %v2794_v52 = vmul.f32 %v2791_v45, %v6408_v3  ;;  %s6555_s11 = sld [smem:[#allocation4 + $0x97]] }
 0x23e   : > { %v6447_v29 = vsel %vm388_vm4, %v2777_v63, %v2778_v10  ;;  %v2799_v43 = vrot.slane %v2793_v53, 2  ;;  %v1763_v32 = vmul.f32 %v1762_v33, %v6293_v13  ;;  %v1821_v23 = vstv %s4845_s21  ;;  %s6557_s21 = sld [smem:[#allocation4 + $0x98]] }
 0x23f   : > { %8921 = vst [vmem:[#allocation29_spill] sm:$0xff] %v6447_v29  ;;  %v6451_v26 = vsel %vm388_vm4, %v2778_v10, %v2780_v11  ;;  %v2801_v35 = vrot.slane %v2794_v52, 2  ;;  %v1764_v18 = vmul.f32 %v1762_v33, %v6305_v51  ;;  %v1765_v19 = vmul.f32 %v1762_v33, %v6408_v3 }
 0x240   : > { %8922 = vst [vmem:[#allocation30_spill] sm:$0xff] %v6451_v26  ;;  %v6454_v44 = vsel %vm388_vm4, %v2798_v6, %v2799_v43  ;;  %v1769_v57 = vrot.slane %v1763_v32, 1  ;;  %v2228_v38 = vstv %s4871_s6  ;;  %v1822_v27 = vmul.f32 %v1821_v23, %v6293_v13  ;;  %s6583_s6 = sld [smem:[#allocation4 + $0x5d]] }
 0x241   : > { %8923 = vst [vmem:[#allocation31_spill] sm:$0xff] %v6454_v44  ;;  %v6463_v14 = vsel %vm388_vm4, %v2799_v43, %v2801_v35  ;;  %v1770_v25 = vrot.slane %v1764_v18, 1  ;;  %v1823_v45 = vmul.f32 %v1821_v23, %v6305_v51  ;;  %v1772_v15 = vrot.slane %v1765_v19, 1 }
 0x242   : > { %8924 = vst [vmem:[#allocation32_spill] sm:$0xff] %v6463_v14  ;;  %v1824_v63 = vmul.f32 %v1821_v23, %v6408_v3  ;;  %v2287_v16 = vstv %s4874_s7  ;;  %v1828_v10 = vrot.slane %v1822_v27, 2  ;;  %v2229_v43 = vmul.f32 %v2228_v38, %v6293_v13  ;;  %s6585_s7 = sld [smem:[#allocation4 + $0x60]] }
 0x243   : > { %v6471_v17 = vsel %vm328_vm3, %v1769_v57, %v1770_v25  ;;  %v1829_v53 = vrot.slane %v1823_v45, 2  ;;  %v6474_v11 = vsel %vm328_vm3, %v1770_v25, %v1772_v15  ;;  %v2230_v32 = vmul.f32 %v2228_v38, %v6305_v51 }
 0x244   : > { %v1831_v6 = vrot.slane %v1824_v63, 2  ;;  %v2231_v23 = vmul.f32 %v2228_v38, %v6408_v3  ;;  %v2288_v35 = vmul.f32 %v2287_v16, %v6293_v13  ;;  %v2289_v57 = vmul.f32 %v2287_v16, %v6305_v51 }
 0x245   : > { %v6480_v52 = vsel %vm388_vm4, %v1828_v10, %v1829_v53  ;;  %v2290_v19 = vmul.f32 %v2287_v16, %v6408_v3  ;;  %v6496_v25 = vstv %s6458_s9  ;;  %v2235_v38 = vrot.slane %v2229_v43, 1  ;;  %s6592_s9 = sld [smem:[#allocation4 + $0x78]] }
 0x246   : > { %8925 = vst [vmem:[#allocation33_spill] sm:$0xff] %v6480_v52  ;;  %v6491_v18 = vsel %vm388_vm4, %v1829_v53, %v1831_v6  ;;  %v2236_v27 = vrot.slane %v2230_v32, 1  ;;  %v2238_v45 = vrot.slane %v2231_v23, 1  ;;  %v2294_v15 = vrot.slane %v2288_v35, 2 }
 0x247   : > { %8926 = vst [vmem:[#allocation34_spill] sm:$0xff] %v6491_v18  ;;  %v2295_v63 = vrot.slane %v2289_v57, 2  ;;  %v2297_v10 = vrot.slane %v2290_v19, 2  ;;  %v2695_v16 = vmul.f32 %v6496_v25, %v6293_v13  ;;  %v6508_v6 = vmul.f32 %v6496_v25, %v6305_v51 }
 0x248   : > { %v6499_v54 = vsel %vm328_vm3, %v2235_v38, %v2236_v27  ;;  %v6502_v53 = vsel %vm328_vm3, %v2236_v27, %v2238_v45  ;;  %v1886_v23 = vstv %s6468_s4  ;;  %v6528_v45 = vstv %s6486_s22  ;;  %s6597_s4 = sld [smem:[#allocation4 + $0x7b]]  ;;  %s6729_s22 = sld [smem:[#allocation4 + $0x96]] }
 0x249   : > { %8927 = vst [vmem:[#allocation35_spill] sm:$0xff] %v6499_v54  ;;  %8928 = vst [vmem:[#allocation36_spill] sm:$0xff] %v6502_v53  ;;  %v6512_v43 = vsel %vm388_vm4, %v2294_v15, %v2295_v63  ;;  %v6515_v32 = vsel %vm388_vm4, %v2295_v63, %v2297_v10  ;;  %v2701_v35 = vrot.slane %v2695_v16, 1  ;;  %v8802_v57 = vrot.slane %v6508_v6, 1 }
 0x24a   : > { %8929 = vst [vmem:[#allocation37_spill] sm:$0xff] %v6512_v43  ;;  %8930 = vst [vmem:[#allocation38_spill] sm:$0xff] %v6515_v32  ;;  %v6531_v15 = vstv %s6488_s19  ;;  %v1900_v63 = vstv %s6477_s12  ;;  %v6534_v10 = vstv %s4855_s24  ;;  %v6565_v9 = vstv %s4881_s27  ;;  %s6689_s12 = sld [smem:[#allocation4 + $0x93]]  ;;  %s6819_s19 = sld [smem:[#allocation4 + $0x51]] }
 0x24b   : > { %v6524_v38 = vsel %vm328_vm3, %v2701_v35, %v8802_v57  ;;  %8932 = vst [vmem:[#allocation40_spill] sm:$0xff] %v6534_v10  ;;  %8935 = vst [vmem:[#allocation43_spill] sm:$0xff] %v6565_v9  ;;  %v6567_v40 = vstv %s4903_s28  ;;  %v6579_v32 = vstv %s4882_s29  ;;  %v6581_v43 = vstv %s4884_s30  ;;  %s6821_s24 = sld [smem:[#allocation4 + $0x6d]]  ;;  %s6825_s27 = sld [smem:[#allocation4 + $0x88]] }
 0x24c   : > { %8931 = vst [vmem:[#allocation39_spill] sm:$0xff] %v6524_v38  ;;  %8938 = vst [vmem:[#allocation46_spill] sm:$0xff] %v6579_v32  ;;  %v2922_v50 = vstv %s6555_s11  ;;  %v2943_v61 = vstv %s6557_s21  ;;  %v1973_v41 = vstv %s6585_s7  ;;  %v6670_v24 = vstv %s6592_s9  ;;  %s6827_s28 = sld [smem:[#allocation4 + $0x89]]  ;;  %s6829_s29 = sld [smem:[#allocation4 + $0x64]] }
 0x24d   : > { %8939 = vst [vmem:[#allocation47_spill] sm:$0xff] %v6581_v43  ;;  %s6831_s30 = sld [smem:[#allocation4 + $0x65]]  ;;  %s6839_s11 = sld [smem:[#allocation4 + $0x80]] }
 0x24e   : > { %v6673_v30 = vstv %s6597_s4  ;;  %s6842_s21 = sld [smem:[#allocation4 + $0x67]]  ;;  %s6847_s7 = sld [smem:[#allocation4 + $0x6a]] }
 0x24f   : > { %s6849_s9 = sld [smem:[#allocation4 + $0x6b]]  ;;  %s6855_s4 = sld [smem:[#allocation4 + $0x82]] }
 0x252   : > { %v1699_v33 = vpop.permute.xlu0 %1698 }
 0x253   : > { %1705 = vst.msk [vmem:[#allocation3 + $0x19] sm:$0xff] %vm252_vm2, %v1699_v33 }
 0x256   : > { %v1701_v33 = vpop.permute.xlu1 %1700 }
 0x257   : > { %1706 = vst.msk [vmem:[#allocation3 + $0x21] sm:$0xff] %vm252_vm2, %v1701_v33  ;;  %v6537_v33 = vstv %s4856_s26  ;;  %s6823_s26 = sld [smem:[#allocation4 + $0x6e]] }
 0x258   : > { %8933 = vst [vmem:[#allocation41_spill] sm:$0xff] %v6537_v33 }
 0x25a   : > { %v6519_v19 = vld [vmem:[#allocation3 + $0x18] sm:$0xff] }
 0x25b   : > { %v1887_v27 = vmul.f32 %v1886_v23, %v6519_v19  ;;  %v1932_v35 = vmul.f32 %v6528_v45, %v6519_v19  ;;  %v1953_v48 = vmul.f32 %v6531_v15, %v6519_v19  ;;  %v1991_v37 = vmul.f32 %v6534_v10, %v6519_v19 }
 0x25c   : > { %v2012_v1 = vmul.f32 %v6537_v33, %v6519_v19 }
 0x25d   : > { %1891 = vrot.lane.b32.xlu0 %v1887_v27, %s5270_s25  ;;  %v1901_v27 = vmul.f32 %v1900_v63, %v6519_v19  ;;  %v1938_v18 = vrot.slane %v1932_v35, 1  ;;  %v1997_v44 = vrot.slane %v1991_v37, 2 }
 0x25e   : > { %v6541_v16 = vld [vmem:[#allocation3 + $0x20] sm:$0xff]  ;;  %v2018_v35 = vrot.slane %v2012_v1, 2  ;;  %v2419_v1 = vmul.f32 %v6579_v32, %v6519_v19 }
 0x25f   : > { %v1888_v47 = vmul.f32 %v1886_v23, %v6541_v16  ;;  %v6561_v49 = vmul.f32 %v6528_v45, %v6541_v16  ;;  %v6573_v23 = vmul.f32 %v6531_v15, %v6541_v16  ;;  %v6577_v57 = vmul.f32 %v6534_v10, %v6541_v16 }
 0x260   : > { %v6590_v52 = vmul.f32 %v6537_v33, %v6541_v16  ;;  %v1902_v38 = vmul.f32 %v1900_v63, %v6541_v16  ;;  %v2398_v63 = vmul.f32 %v6565_v9, %v6519_v19  ;;  %v2425_v54 = vrot.slane %v2419_v1, 1 }
 0x261   : > { %8934 = vst [vmem:[#allocation42_spill] sm:$0xff] %v6561_v49  ;;  %1893 = vrot.lane.b32.xlu1 %v1888_v47, %s5270_s25  ;;  %1905 = vrot.lane.b32.xlu0 %v1901_v27, %s5271_s15  ;;  %8936 = vst [vmem:[#allocation44_spill] sm:$0xff] %v6573_v23  ;;  %v8805_v47 = vrot.slane %v6561_v49, 1  ;;  %v1959_v27 = vrot.slane %v1953_v48, 1  ;;  %v8804_v14 = vrot.slane %v6573_v23, 1  ;;  %v8803_v26 = vrot.slane %v6577_v57, 2 }
 0x262   : > { %8937 = vst [vmem:[#allocation45_spill] sm:$0xff] %v6577_v57  ;;  %8940 = vst [vmem:[#allocation48_spill] sm:$0xff] %v6590_v52  ;;  %v8806_v29 = vrot.slane %v6590_v52, 2  ;;  %v2404_v53 = vrot.slane %v2398_v63, 1 }
 0x263   : > { %v6602_v48 = vsel %vm328_vm3, %v1938_v18, %v8805_v47  ;;  %v6611_v37 = vsel %vm328_vm3, %v1959_v27, %v8804_v14  ;;  %v6616_v12 = vsel %vm388_vm4, %v1997_v44, %v8803_v26  ;;  %v6621_v18 = vstv %s6539_s5  ;;  %s6833_s5 = sld [smem:[#allocation4 + $0x76]] }
 0x264   : > { %8941 = vst [vmem:[#allocation49_spill] sm:$0xff] %v6602_v48  ;;  %8942 = vst [vmem:[#allocation50_spill] sm:$0xff] %v6611_v37  ;;  %v6630_v27 = vmul.f32 %v6565_v9, %v6541_v16  ;;  %v2457_v44 = vmul.f32 %v6581_v43, %v6519_v19  ;;  %v2863_v26 = vstv %s6547_s8  ;;  %v6637_v14 = vmul.f32 %v6579_v32, %v6541_v16  ;;  %v6652_v9 = vld [vmem:[#allocation3 + $0x28] sm:$0x3]  ;;  %s6835_s8 = sld [smem:[#allocation4 + $0x77]] }
 0x265   : > { %1907 = vrot.lane.b32.xlu1 %v1902_v38, %s5271_s15  ;;  %8943 = vst [vmem:[#allocation51_spill] sm:$0xff] %v6616_v12  ;;  %8944 = vst [vmem:[#allocation52_spill] sm:$0xff] %v6621_v18  ;;  %v6626_v38 = vsel %vm388_vm4, %v2018_v35, %v8806_v29  ;;  %v2884_v47 = vstv %s6549_s10  ;;  %v6645_v29 = vmul.f32 %v6581_v43, %v6541_v16  ;;  %v1914_v32 = vstv %s6583_s6  ;;  %s6837_s10 = sld [smem:[#allocation4 + $0x7f]]  ;;  %s6844_s6 = sld [smem:[#allocation4 + $0x68]] }
 0x266   : > { %8945 = vst [vmem:[#allocation53_spill] sm:$0xff] %v6626_v38  ;;  %8946 = vst [vmem:[#allocation54_spill] sm:$0xff] %v6630_v27  ;;  %v8814_v35 = vrot.slane %v6630_v27, 1  ;;  %v2478_v2 = vmul.f32 %v6621_v18, %v6519_v19  ;;  %v8816_v59 = vrot.slane %v6637_v14, 1  ;;  %v2463_v28 = vrot.slane %v2457_v44, 2 }
 0x267   : > { %8947 = vst [vmem:[#allocation55_spill] sm:$0xff] %v6637_v14  ;;  %8948 = vst [vmem:[#allocation56_spill] sm:$0xff] %v6645_v29  ;;  %v8819_v4 = vrot.slane %v6645_v29, 2  ;;  %v6662_v43 = vmul.f32 %v6621_v18, %v6541_v16  ;;  %v2865_v14 = vmul.f32 %v2863_v26, %v6541_v16  ;;  %v6696_v29 = vmul.f32 %v6567_v40, %v6305_v51 }
 0x268   : > { %v6657_v63 = vsel %vm328_vm3, %v2404_v53, %v8814_v35  ;;  %v6667_v1 = vsel %vm328_vm3, %v2425_v54, %v8816_v59  ;;  %v6677_v53 = vmul.f32 %v6496_v25, %v6408_v3  ;;  %v2484_v35 = vrot.slane %v2478_v2, 2 }
 0x269   : > { %8949 = vst [vmem:[#allocation57_spill] sm:$0xff] %v6657_v63  ;;  %8950 = vst [vmem:[#allocation58_spill] sm:$0xff] %v6662_v43  ;;  %v6682_v44 = vsel %vm388_vm4, %v2463_v28, %v8819_v4  ;;  %v8823_v18 = vrot.slane %v6662_v43, 2  ;;  %v6687_v54 = vmul.f32 %v6567_v40, %v6293_v13  ;;  %v2864_v59 = vmul.f32 %v2863_v26, %v6519_v19 }
 0x26a   : > { %8951 = vst [vmem:[#allocation59_spill] sm:$0xff] %v6667_v1  ;;  %8952 = vst [vmem:[#allocation60_spill] sm:$0xff] %v6682_v44  ;;  %v2866_v25 = vmul.f32 %v2863_v26, %v6652_v9  ;;  %v2885_v2 = vmul.f32 %v2884_v47, %v6519_v19  ;;  %v2886_v4 = vmul.f32 %v2884_v47, %v6541_v16  ;;  %v2871_v27 = vrot.slane %v2865_v14, 1 }
 0x26b   : > { %v6701_v28 = vsel %vm388_vm4, %v2484_v35, %v8823_v18  ;;  %v6707_v44 = vmul.f32 %v6567_v40, %v6408_v3  ;;  %v2870_v1 = vrot.slane %v2864_v59, 1  ;;  %v2887_v63 = vmul.f32 %v2884_v47, %v6652_v9 }
 0x26c   : > { %8953 = vst [vmem:[#allocation61_spill] sm:$0xff] %v6701_v28  ;;  %v2873_v26 = vrot.slane %v2866_v25, 1  ;;  %v2891_v62 = vrot.slane %v2885_v2, 1  ;;  %v2892_v0 = vrot.slane %v2886_v4, 1  ;;  %v2923_v43 = vmul.f32 %v2922_v50, %v6519_v19 }
 0x26d   : > { %v2704_v35 = vrot.slane %v6677_v53, 1  ;;  %v6713_v18 = vsel %vm328_vm3, %v2870_v1, %v2871_v27  ;;  %v2894_v40 = vrot.slane %v2887_v63, 1  ;;  %v2924_v59 = vmul.f32 %v2922_v50, %v6541_v16 }
 0x26e   : > { %8954 = vst [vmem:[#allocation62_spill] sm:$0xff] %v6713_v18  ;;  %v6716_v28 = vsel %vm328_vm3, %v2871_v27, %v2873_v26  ;;  %v6720_v3 = vsel %vm328_vm3, %v2891_v62, %v2892_v0  ;;  %v2925_v14 = vmul.f32 %v2922_v50, %v6652_v9  ;;  %v2944_v4 = vmul.f32 %v2943_v61, %v6519_v19 }
 0x26f   : > { %8955 = vst [vmem:[#allocation63_spill] sm:$0xff] %v6716_v28  ;;  %8956 = vst [vmem:[#allocation64_spill] sm:$0xff] %v6720_v3  ;;  %v2760_v47 = vrot.slane %v6687_v54, 2  ;;  %v6726_v53 = vsel %vm328_vm3, %v2892_v0, %v2894_v40  ;;  %v2929_v1 = vrot.slane %v2923_v43, 2  ;;  %v2930_v25 = vrot.slane %v2924_v59, 2 }
 0x270   : > { %8957 = vst [vmem:[#allocation65_spill] sm:$0xff] %v6726_v53  ;;  %v2945_v27 = vmul.f32 %v2943_v61, %v6541_v16  ;;  %v2932_v63 = vrot.slane %v2925_v14, 2  ;;  %v2950_v2 = vrot.slane %v2944_v4, 2  ;;  %v2946_v62 = vmul.f32 %v2943_v61, %v6652_v9 }
 0x271   : > { %v2846_v26 = vstv %s6689_s12  ;;  %v6734_v50 = vsel %vm388_vm4, %v2929_v1, %v2930_v25  ;;  %v1915_v54 = vmul.f32 %v1914_v32, %v6519_v19  ;;  %v1916_v0 = vmul.f32 %v1914_v32, %v6541_v16  ;;  %s6857_s12 = sld [smem:[#allocation4 + $0x83]] }
 0x272   : > { %8958 = vst [vmem:[#allocation66_spill] sm:$0xff] %v6734_v50  ;;  %v2951_v3 = vrot.slane %v2945_v27, 2  ;;  %v6739_v43 = vsel %vm388_vm4, %v2930_v25, %v2932_v63  ;;  %v2953_v40 = vrot.slane %v2946_v62, 2  ;;  %v1917_v59 = vmul.f32 %v1914_v32, %v6652_v9 }
 0x273   : > { %8959 = vst [vmem:[#allocation67_spill] sm:$0xff] %v6739_v43  ;;  %v1974_v14 = vmul.f32 %v1973_v41, %v6519_v19  ;;  %v1921_v61 = vrot.slane %v1915_v54, 1  ;;  %v1922_v53 = vrot.slane %v1916_v0, 1  ;;  %v1975_v1 = vmul.f32 %v1973_v41, %v6541_v16 }
 0x274   : > { %v6744_v4 = vsel %vm388_vm4, %v2950_v2, %v2951_v3  ;;  %v6748_v27 = vsel %vm388_vm4, %v2951_v3, %v2953_v40  ;;  %v1924_v50 = vrot.slane %v1917_v59, 1  ;;  %v1976_v25 = vmul.f32 %v1973_v41, %v6652_v9 }
 0x275   : > { %8960 = vst [vmem:[#allocation68_spill] sm:$0xff] %v6744_v4  ;;  %8961 = vst [vmem:[#allocation69_spill] sm:$0xff] %v6748_v27  ;;  %v2761_v63 = vrot.slane %v6696_v29, 2  ;;  %v6753_v32 = vsel %vm328_vm3, %v1921_v61, %v1922_v53  ;;  %v1980_v62 = vrot.slane %v1974_v14, 2  ;;  %v1981_v43 = vrot.slane %v1975_v1, 2 }
 0x276   : > { %8962 = vst [vmem:[#allocation70_spill] sm:$0xff] %v6753_v32  ;;  %v2763_v2 = vrot.slane %v6707_v44, 2  ;;  %v6757_v54 = vsel %vm328_vm3, %v1922_v53, %v1924_v50  ;;  %v1983_v0 = vrot.slane %v1976_v25, 2  ;;  %v2381_v3 = vmul.f32 %v6670_v24, %v6519_v19 }
 0x277   : > { %8963 = vst [vmem:[#allocation71_spill] sm:$0xff] %v6757_v54  ;;  %v2382_v40 = vmul.f32 %v6670_v24, %v6541_v16  ;;  %v6764_v41 = vsel %vm388_vm4, %v1980_v62, %v1981_v43  ;;  %v2383_v29 = vmul.f32 %v6670_v24, %v6652_v9  ;;  %v2440_v59 = vmul.f32 %v6673_v30, %v6519_v19 }
 0x278   : > { %8964 = vst [vmem:[#allocation72_spill] sm:$0xff] %v6764_v41  ;;  %v2905_v44 = vstv %s6729_s22  ;;  %v6772_v53 = vsel %vm388_vm4, %v1981_v43, %v1983_v0  ;;  %v2387_v50 = vrot.slane %v2381_v3, 1  ;;  %v2441_v61 = vmul.f32 %v6673_v30, %v6541_v16  ;;  %s6859_s22 = sld [smem:[#allocation4 + $0x85]] }
 0x279   : > { %8965 = vst [vmem:[#allocation73_spill] sm:$0xff] %v6772_v53  ;;  %v2388_v14 = vrot.slane %v2382_v40, 1  ;;  %v2390_v1 = vrot.slane %v2383_v29, 1  ;;  %v2446_v25 = vrot.slane %v2440_v59, 2  ;;  %v2442_v62 = vmul.f32 %v6673_v30, %v6652_v9 }
 0x27a   : > { %v8966_v41 = vrot.slane %v6508_v6, 1  ;;  %v2447_v43 = vrot.slane %v2441_v61, 2  ;;  %v6787_v0 = vsel %vm388_vm4, %v2760_v47, %v2761_v63  ;;  %v6790_v3 = vsel %vm388_vm4, %v2761_v63, %v2763_v2 }
 0x27b   : > { %v6784_v54 = vsel %vm328_vm3, %v2387_v50, %v2388_v14  ;;  %8969 = vst [vmem:[#allocation76_spill] sm:$0xff] %v6787_v0  ;;  %8970 = vst [vmem:[#allocation77_spill] sm:$0xff] %v6790_v3  ;;  %v6793_v40 = vsel %vm328_vm3, %v2388_v14, %v2390_v1  ;;  %v2449_v29 = vrot.slane %v2442_v62, 2  ;;  %v2847_v6 = vmul.f32 %v2846_v26, %v6519_v19 }
 0x27c   : > { %v6781_v24 = vsel %vm328_vm3, %v8966_v41, %v2704_v35  ;;  %8968 = vst [vmem:[#allocation75_spill] sm:$0xff] %v6784_v54  ;;  %8971 = vst [vmem:[#allocation78_spill] sm:$0xff] %v6793_v40  ;;  %v6796_v30 = vsel %vm388_vm4, %v2446_v25, %v2447_v43  ;;  %v2848_v35 = vmul.f32 %v2846_v26, %v6541_v16  ;;  %v6908_v40 = vstv %s6844_s6  ;;  %s7116_s6 = sld [smem:[#allocation4 + $0x9c]] }
 0x27d   : > { %8967 = vst [vmem:[#allocation74_spill] sm:$0xff] %v6781_v24  ;;  %8972 = vst [vmem:[#allocation79_spill] sm:$0xff] %v6796_v30  ;;  %v6801_v41 = vsel %vm388_vm4, %v2447_v43, %v2449_v29  ;;  %v2849_v47 = vmul.f32 %v2846_v26, %v6652_v9  ;;  %v2906_v59 = vmul.f32 %v2905_v44, %v6519_v19  ;;  %v2853_v2 = vrot.slane %v2847_v6, 1 }
 0x27e   : > { %8973 = vst [vmem:[#allocation80_spill] sm:$0xff] %v6801_v41  ;;  %v2907_v63 = vmul.f32 %v2905_v44, %v6541_v16  ;;  %v2854_v50 = vrot.slane %v2848_v35, 1  ;;  %v2908_v14 = vmul.f32 %v2905_v44, %v6652_v9  ;;  %v2200_v6 = vstv %s6821_s24  ;;  %s6866_s24 = sld [smem:[#allocation4 + $0x9d]]  ;;  %8979 = vst [vmem:[#allocation86_spill] sm:$0xff] %v6908_v40 }
 0x27f   : > { %v2856_v61 = vrot.slane %v2849_v47, 1  ;;  %v2912_v1 = vrot.slane %v2906_v59, 2  ;;  %v2214_v35 = vstv %s6823_s26  ;;  %v2666_v47 = vstv %s6825_s27  ;;  %s6882_s26 = sld [smem:[#allocation4 + $0x9e]]  ;;  %s6888_s27 = sld [smem:[#allocation4 + $0xa0]] }
 0x280   : > { %v2913_v25 = vrot.slane %v2907_v63, 2  ;;  %v6808_v62 = vsel %vm328_vm3, %v2853_v2, %v2854_v50  ;;  %v2915_v3 = vrot.slane %v2908_v14, 2  ;;  %v8824_v59 = vstv %s6827_s28 }
 0x281   : > { %8974 = vst [vmem:[#allocation81_spill] sm:$0xff] %v6808_v62  ;;  %v6811_v43 = vsel %vm328_vm3, %v2854_v50, %v2856_v61  ;;  %v2038_v50 = vstv %s6829_s29  ;;  %v6869_v14 = vmul.f32 %v2200_v6, %v6293_v13  ;;  %v6872_v61 = vmul.f32 %v2214_v35, %v6293_v13  ;;  %s6943_s29 = sld [smem:[#allocation4 + $0x66]] }
 0x282   : > { %8975 = vst [vmem:[#allocation82_spill] sm:$0xff] %v6811_v43  ;;  %v6814_v26 = vsel %vm388_vm4, %v2912_v1, %v2913_v25  ;;  %v6817_v29 = vsel %vm388_vm4, %v2913_v25, %v2915_v3  ;;  %v1728_v3 = vstv %s6819_s19  ;;  %s6861_s19 = sld [smem:[#allocation4 + $0x86]]  ;;  %v6875_v1 = vmul.f32 %v2666_v47, %v6293_v13 }
 0x283   : > { %8976 = vst [vmem:[#allocation83_spill] sm:$0xff] %v6814_v26  ;;  %8977 = vst [vmem:[#allocation84_spill] sm:$0xff] %v6817_v29  ;;  %v1729_v2 = vmul.f32 %v1728_v3, %v6293_v13  ;;  %v6880_v25 = vmul.f32 %v8824_v59, %v6293_v13  ;;  %v2352_v29 = vstv %s6833_s5  ;;  %v2366_v26 = vstv %s6835_s8  ;;  %s6999_s5 = sld [smem:[#allocation4 + $0x69]] }
 0x284   : > { %v6893_v62 = vmul.f32 %v2200_v6, %v6305_v51  ;;  %v6896_v13 = vmul.f32 %v2214_v35, %v6305_v51  ;;  %v6905_v30 = vstv %s6842_s21  ;;  %v6911_v54 = vmul.f32 %v2352_v29, %v6519_v19  ;;  %s7010_s8 = sld [smem:[#allocation4 + $0x81]]  ;;  %s7012_s21 = sld [smem:[#allocation4 + $0x84]] }
 0x285   : > { %8978 = vst [vmem:[#allocation85_spill] sm:$0xff] %v6905_v30  ;;  %v6914_v35 = vmul.f32 %v2352_v29, %v6541_v16  ;;  %v6917_v59 = vmul.f32 %v2366_v26, %v6519_v19  ;;  %v6927_v41 = vstv %s6849_s9  ;;  %v6930_v53 = vstv %s6855_s4  ;;  %s7178_s9 = sld [smem:[#allocation4 + $0x92]] }
 0x286   : > { %8981 = vst [vmem:[#allocation88_spill] sm:$0xff] %v6930_v53  ;;  %v2570_v32 = vstv %s6857_s12  ;;  %v2608_v28 = vstv %s6859_s22  ;;  %v6950_v5 = vstv %s6866_s24  ;;  %v6961_v38 = vstv %s6882_s26  ;;  %s7509_s4 = sld [smem:[#allocation4 + $0x9a]]  ;;  %s7518_s22 = sld [smem:[#allocation4 + $0x9b]] }
 0x287   : > { %s7515_s12 = sld [smem:[#allocation4 + $0x5a]]  ;;  %s4866_s24 = sld [smem:[#allocation7 + $0x100]] }
 0x288   : > { %s4867_s26 = sld [smem:[#allocation7 + $0x180]] }
 0x29a   : > { %v1710_v44 = vpop.permute.xlu0 %1709 }
 0x29b   : > { %1716 = vst.msk [vmem:[#allocation3 + $0x31] sm:$0xff] %vm252_vm2, %v1710_v44  ;;  %v1730_v44 = vmul.f32 %v1728_v3, %v6305_v51  ;;  %v6900_v3 = vmul.f32 %v2666_v47, %v6305_v51  ;;  %v6920_v51 = vstv %s6847_s7  ;;  %v6924_v47 = vmul.f32 %v2366_v26, %v6541_v16  ;;  %s7150_s7 = sld [smem:[#allocation4 + $0x9f]] }
 0x29c   : > { %8980 = vst [vmem:[#allocation87_spill] sm:$0xff] %v6920_v51 }
 0x29e   : > { %v1712_v63 = vpop.permute.xlu1 %1711 }
 0x29f   : > { %1717 = vst.msk [vmem:[#allocation3 + $0x39] sm:$0xff] %vm252_vm2, %v1712_v63  ;;  %v2052_v63 = vstv %s6831_s30  ;;  %s6976_s30 = sld [smem:[#allocation4 + $0xa1]] }
 0x2a0   : > { %v1740_v6 = vpop.permute.xlu0 %1739 }
 0x2a1   : > { %v1745_v36 = vadd.f32 %v1740_v6, %v1729_v2 }
 0x2a2   : > { %v6890_v43 = vld [vmem:[#allocation3 + $0x30] sm:$0xff] }
 0x2a3   : > { %v2039_v0 = vmul.f32 %v2038_v50, %v6890_v43  ;;  %v2084_v4 = vmul.f32 %v6905_v30, %v6890_v43  ;;  %v2105_v24 = vmul.f32 %v6908_v40, %v6890_v43  ;;  %v2053_v18 = vmul.f32 %v2052_v63, %v6890_v43 }
 0x2a4   : > { %v1742_v29 = vpop.permute.xlu1 %1741  ;;  %v2143_v34 = vmul.f32 %v6920_v51, %v6890_v43  ;;  %v2164_v2 = vmul.f32 %v6927_v41, %v6890_v43  ;;  %v2550_v6 = vmul.f32 %v6930_v53, %v6890_v43 }
 0x2a5   : > { %2043 = vrot.lane.b32.xlu0 %v2039_v0, %s5270_s25  ;;  %v6941_v0 = vstv %s6861_s19  ;;  %v2090_v57 = vrot.slane %v2084_v4, 1  ;;  %v2111_v12 = vrot.slane %v2105_v24, 1  ;;  %v1746_v49 = vadd.f32 %v1742_v29, %v1730_v44  ;;  %s7551_s19 = sld [smem:[#allocation4 + $0x63]] }
 0x2a6   : > { %v6933_v27 = vld [vmem:[#allocation3 + $0x38] sm:$0xff]  ;;  %v2149_v33 = vrot.slane %v2143_v34, 2  ;;  %v6986_v10 = vld [vmem:[#allocation3 + $0x40] sm:$0x3]  ;;  %v2571_v24 = vmul.f32 %v2570_v32, %v6890_v43  ;;  %v2170_v44 = vrot.slane %v2164_v2, 2  ;;  %v2556_v2 = vrot.slane %v2550_v6, 1 }
 0x2a7   : > { %v2040_v26 = vmul.f32 %v2038_v50, %v6933_v27  ;;  %v6954_v56 = vmul.f32 %v6905_v30, %v6933_v27  ;;  %v6958_v52 = vmul.f32 %v6908_v40, %v6933_v27  ;;  %v6967_v50 = vmul.f32 %v6920_v51, %v6933_v27  ;;  %v1754_v40 = vpop.permute.xlu0 %1753 }
 0x2a8   : > { %v6974_v30 = vstv %s6888_s27  ;;  %v2054_v51 = vmul.f32 %v2052_v63, %v6933_v27  ;;  %v6984_v37 = vmul.f32 %v6927_v41, %v6933_v27  ;;  %v1756_v48 = vpop.permute.xlu1 %1755  ;;  %v1759_v63 = vadd.f32 %v1754_v40, %v1745_v36  ;;  %s7587_s27 = sld [smem:[#allocation4 + $0x75]] }
 0x2a9   : > { %2045 = vrot.lane.b32.xlu1 %v2040_v26, %s5270_s25  ;;  %2057 = vrot.lane.b32.xlu0 %v2053_v18, %s5271_s15  ;;  %8982 = vst [vmem:[#allocation89_spill] sm:$0xff] %v6967_v50  ;;  %v8839_v26 = vrot.slane %v6954_v56, 1  ;;  %v8838_v18 = vrot.slane %v6958_v52, 1  ;;  %v8837_v23 = vrot.slane %v6967_v50, 2  ;;  %v7016_v36 = vmul.f32 %v6930_v53, %v6933_v27 }
 0x2aa   : > { %v8843_v29 = vrot.slane %v6984_v37, 2  ;;  %v2609_v40 = vmul.f32 %v2608_v28, %v6890_v43  ;;  %v2610_v50 = vmul.f32 %v2608_v28, %v6933_v27  ;;  %v2611_v6 = vmul.f32 %v2608_v28, %v6986_v10 }
 0x2ab   : > { %v6991_v4 = vsel %vm328_vm3, %v2090_v57, %v8839_v26  ;;  %v6996_v34 = vsel %vm328_vm3, %v2111_v12, %v8838_v18  ;;  %v7007_v57 = vsel %vm388_vm4, %v2149_v33, %v8837_v23  ;;  %v2572_v12 = vmul.f32 %v2570_v32, %v6933_v27 }
 0x2ac   : > { %v1760_v33 = vadd.f32 %v1756_v48, %v1746_v49  ;;  %v2573_v23 = vmul.f32 %v2570_v32, %v6986_v10  ;;  %v8842_v18 = vrot.slane %v7016_v36, 1  ;;  %v2577_v26 = vrot.slane %v2571_v24, 1 }
 0x2ad   : > { %2059 = vrot.lane.b32.xlu1 %v2054_v51, %s5271_s15  ;;  %2205 = vrot.lane.b32.xlu0 %v6869_v14, %s5270_s25  ;;  %v7021_v14 = vstv %s6943_s29  ;;  %v7026_v51 = vsel %vm388_vm4, %v2170_v44, %v8843_v29  ;;  %v2578_v53 = vrot.slane %v2572_v12, 1  ;;  %v7036_v48 = vadd.f32 %v6471_v17, %v1759_v63  ;;  %s4886_s29 = sld [smem:[#allocation4 + $0x7e]] }
 0x2ae   : > { %v2580_v49 = vrot.slane %v2573_v23, 1  ;;  %v7040_v32 = vstv %s6976_s30  ;;  %v7045_v24 = vsel %vm328_vm3, %v2556_v2, %v8842_v18  ;;  %v2616_v23 = vrot.slane %v2610_v50, 2  ;;  %s4906_s30 = sld [smem:[#allocation4 + $0x90]] }
 0x2af   : > { %8983 = vst [vmem:[#allocation90_spill] sm:$0xff] %v7036_v48  ;;  %v2618_v63 = vrot.slane %v2611_v6, 2  ;;  %v7054_v28 = vadd.f32 %v6474_v11, %v1760_v33  ;;  %v2630_v44 = vmul.f32 %v6941_v0, %v6890_v43  ;;  %v7066_v50 = vstv %s6999_s5  ;;  %s4895_s5 = sld [smem:[#allocation7 + $0x101]] }
 0x2b0   : > { %v7051_v17 = vsel %vm328_vm3, %v2578_v53, %v2580_v49  ;;  %v8986_v11 = vstv %s6837_s10  ;;  %v7079_v2 = vstv %s7010_s8  ;;  %v7082_v49 = vstv %s7012_s21  ;;  %s4896_s8 = sld [smem:[#allocation7 + $0x181]] }
 0x2b1   : > { %2207 = vrot.lane.b32.xlu1 %v6893_v62, %s5270_s25  ;;  %2219 = vrot.lane.b32.xlu0 %v6872_v61, %s5271_s15  ;;  %v7048_v62 = vsel %vm328_vm3, %v2577_v26, %v2578_v53  ;;  %v2615_v61 = vrot.slane %v2609_v40, 2  ;;  %8984 = vst [vmem:[#allocation91_spill] sm:$0xff] %v7054_v28  ;;  %v2631_v26 = vmul.f32 %v6941_v0, %v6933_v27  ;;  %s4915_s21 = sld [smem:[#allocation4 + $0x99]] }
 0x2b2   : > { %v2632_v40 = vmul.f32 %v6941_v0, %v6986_v10  ;;  %v2505_v53 = vmul.f32 %v8986_v11, %v6890_v43  ;;  %v7076_v33 = vsel %vm388_vm4, %v2616_v23, %v2618_v63  ;;  %v2636_v0 = vrot.slane %v2630_v44, 2 }
 0x2b3   : > { %v7059_v12 = vsel %vm388_vm4, %v2615_v61, %v2616_v23  ;;  %8987 = vst [vmem:[#allocation93_spill] sm:$0xff] %v7076_v33  ;;  %v2637_v6 = vrot.slane %v2631_v26, 2  ;;  %v3018_v11 = vmul.f32 %v6950_v5, %v6986_v10  ;;  %v3037_v23 = vmul.f32 %v6961_v38, %v6890_v43 }
 0x2b4   : > { %8985 = vst [vmem:[#allocation92_spill] sm:$0xff] %v7059_v12  ;;  %v2639_v61 = vrot.slane %v2632_v40, 2  ;;  %v3038_v63 = vmul.f32 %v6961_v38, %v6933_v27  ;;  %v8988_v44 = vstv %s6839_s11  ;;  %v8989_v12 = vstv %s6837_s10  ;;  %s7134_s10 = sld [smem:[#allocation4 + $0x91]] }
 0x2b5   : > { %2221 = vrot.lane.b32.xlu1 %v6896_v13, %s5271_s15  ;;  %2357 = vrot.lane.b32.xlu0 %v6911_v54, %s5270_s25  ;;  %v3016_v13 = vmul.f32 %v6950_v5, %v6890_v43  ;;  %v3017_v54 = vmul.f32 %v6950_v5, %v6933_v27  ;;  %v2519_v26 = vmul.f32 %v8988_v44, %v6890_v43  ;;  %v3025_v28 = vrot.slane %v3018_v11, 1 }
 0x2b6   : > { %v7098_v40 = vsel %vm388_vm4, %v2636_v0, %v2637_v6  ;;  %v7101_v18 = vsel %vm388_vm4, %v2637_v6, %v2639_v61  ;;  %v3043_v48 = vrot.slane %v3037_v23, 1  ;;  %v3044_v33 = vrot.slane %v3038_v63, 1 }
 0x2b7   : > { %v3022_v29 = vrot.slane %v3016_v13, 1  ;;  %v3023_v5 = vrot.slane %v3017_v54, 1  ;;  %v2506_v44 = vmul.f32 %v8989_v12, %v6933_v27  ;;  %v3039_v0 = vmul.f32 %v6961_v38, %v6986_v10 }
 0x2b8   : > { %v3075_v6 = vmul.f32 %v6974_v30, %v6890_v43  ;;  %v3076_v61 = vmul.f32 %v6974_v30, %v6933_v27  ;;  %v7125_v13 = vsel %vm328_vm3, %v3043_v48, %v3044_v33  ;;  %v2067_v38 = vmul.f32 %v7021_v14, %v6890_v43 }
 0x2b9   : > { %2359 = vrot.lane.b32.xlu1 %v6914_v35, %s5270_s25  ;;  %2371 = vrot.lane.b32.xlu0 %v6917_v59, %s5271_s15  ;;  %v7119_v59 = vsel %vm328_vm3, %v3022_v29, %v3023_v5  ;;  %v7122_v35 = vsel %vm328_vm3, %v3023_v5, %v3025_v28  ;;  %v3046_v12 = vrot.slane %v3039_v0, 1  ;;  %v2068_v23 = vmul.f32 %v7021_v14, %v6933_v27 }
 0x2ba   : > { %v3081_v54 = vrot.slane %v3075_v6, 2  ;;  %v3082_v11 = vrot.slane %v3076_v61, 2  ;;  %v2073_v29 = vrot.slane %v2067_v38, 1  ;;  %v3077_v48 = vmul.f32 %v6974_v30, %v6986_v10 }
 0x2bb   : > { %v3096_v28 = vmul.f32 %v7040_v32, %v6890_v43  ;;  %v3097_v63 = vmul.f32 %v7040_v32, %v6933_v27  ;;  %v7143_v5 = vsel %vm328_vm3, %v3044_v33, %v3046_v12  ;;  %v3098_v38 = vmul.f32 %v7040_v32, %v6986_v10 }
 0x2bc   : > { %v7146_v0 = vsel %vm388_vm4, %v3081_v54, %v3082_v11  ;;  %v3084_v6 = vrot.slane %v3077_v48, 2  ;;  %v2126_v54 = vmul.f32 %v7066_v50, %v6890_v43 }
 0x2bd   : > { %2373 = vrot.lane.b32.xlu1 %v6924_v47, %s5271_s15  ;;  %2509 = vrot.lane.b32.xlu0 %v2505_v53, %s5270_s25  ;;  %v2074_v47 = vrot.slane %v2068_v23, 1  ;;  %v2069_v53 = vmul.f32 %v7021_v14, %v6986_v10  ;;  %v3102_v30 = vrot.slane %v3096_v28, 2  ;;  %v3103_v61 = vrot.slane %v3097_v63, 2 }
 0x2be   : > { %v2127_v14 = vmul.f32 %v7066_v50, %v6933_v27  ;;  %v7164_v23 = vsel %vm388_vm4, %v3082_v11, %v3084_v6  ;;  %v3105_v32 = vrot.slane %v3098_v38, 2  ;;  %v2132_v63 = vrot.slane %v2126_v54, 2 }
 0x2bf   : > { %v7155_v33 = vsel %vm328_vm3, %v2073_v29, %v2074_v47  ;;  %v2076_v12 = vrot.slane %v2069_v53, 1  ;;  %v7167_v48 = vsel %vm388_vm4, %v3102_v30, %v3103_v61  ;;  %v2128_v29 = vmul.f32 %v7066_v50, %v6986_v10 }
 0x2c0   : > { %8990 = vst [vmem:[#allocation94_spill] sm:$0xff] %v7155_v33  ;;  %v2133_v53 = vrot.slane %v2127_v14, 2  ;;  %v2998_v33 = vstv %s7116_s6  ;;  %v7181_v11 = vsel %vm388_vm4, %v3103_v61, %v3105_v32  ;;  %v2533_v50 = vmul.f32 %v7079_v2, %v6890_v43  ;;  %s4924_s6 = sld [smem:[#allocation7 + $0x102]] }
 0x2c1   : > { %2511 = vrot.lane.b32.xlu1 %v2506_v44, %s5270_s25  ;;  %2523 = vrot.lane.b32.xlu0 %v2519_v26, %s5271_s15  ;;  %v7172_v28 = vsel %vm328_vm3, %v2074_v47, %v2076_v12  ;;  %v8992_v44 = vstv %s6839_s11  ;;  %8993 = vst [vmem:[#allocation96_spill] sm:$0xff] %v7181_v11  ;;  %v2135_v6 = vrot.slane %v2128_v29, 2  ;;  %v2534_v47 = vmul.f32 %v7079_v2, %v6933_v27  ;;  %s4897_s11 = sld [smem:[#allocation4 + $0x87]] }
 0x2c2   : > { %8991 = vst [vmem:[#allocation95_spill] sm:$0xff] %v7172_v28  ;;  %v2520_v26 = vmul.f32 %v8992_v44, %v6933_v27  ;;  %v7186_v30 = vsel %vm388_vm4, %v2132_v63, %v2133_v53  ;;  %v2535_v38 = vmul.f32 %v7079_v2, %v6986_v10  ;;  %v2592_v12 = vmul.f32 %v7082_v49, %v6890_v43 }
 0x2c3   : > { %8994 = vst [vmem:[#allocation97_spill] sm:$0xff] %v7186_v30  ;;  %v2818_v61 = vstv %s7134_s10  ;;  %v7199_v54 = vsel %vm388_vm4, %v2133_v53, %v2135_v6  ;;  %v2593_v14 = vmul.f32 %v7082_v49, %v6933_v27  ;;  %v2594_v32 = vmul.f32 %v7082_v49, %v6986_v10  ;;  %s4925_s10 = sld [smem:[#allocation7 + $0x182]] }
 0x2c4   : > { %v2539_v29 = vrot.slane %v2533_v50, 1  ;;  %v2540_v2 = vrot.slane %v2534_v47, 1  ;;  %v2542_v63 = vrot.slane %v2535_v38, 1  ;;  %v3057_v44 = vstv %s7150_s7  ;;  %s4927_s7 = sld [smem:[#allocation4 + $0xa3]] }
 0x2c5   : > { %2525 = vrot.lane.b32.xlu1 %v2520_v26, %s5271_s15  ;;  %2671 = vrot.lane.b32.xlu0 %v6875_v1, %s5270_s25  ;;  %v2598_v30 = vrot.slane %v2592_v12, 2  ;;  %v2599_v28 = vrot.slane %v2593_v14, 2  ;;  %v2601_v26 = vrot.slane %v2594_v32, 2  ;;  %v2999_v11 = vmul.f32 %v2998_v33, %v6890_v43 }
 0x2c6   : > { %v7208_v1 = vsel %vm328_vm3, %v2539_v29, %v2540_v2  ;;  %v7211_v53 = vsel %vm328_vm3, %v2540_v2, %v2542_v63  ;;  %v3000_v6 = vmul.f32 %v2998_v33, %v6933_v27  ;;  %v3001_v49 = vmul.f32 %v2998_v33, %v6986_v10  ;;  %v7228_v2 = vld [vmem:[#allocation3 + $0x8] sm:$0xff] }
 0x2c7   : > { %v7220_v50 = vsel %vm388_vm4, %v2598_v30, %v2599_v28  ;;  %v7223_v47 = vsel %vm388_vm4, %v2599_v28, %v2601_v26  ;;  %v3005_v38 = vrot.slane %v2999_v11, 1  ;;  %v3058_v12 = vmul.f32 %v3057_v44, %v6890_v43 }
 0x2c8   : > { %8995 = vst [vmem:[#allocation98_spill] sm:$0xff] %v7220_v50  ;;  %v3006_v14 = vrot.slane %v3000_v6, 1  ;;  %v3008_v32 = vrot.slane %v3001_v49, 1  ;;  %v3059_v29 = vmul.f32 %v3057_v44, %v6933_v27  ;;  %v3060_v33 = vmul.f32 %v3057_v44, %v6986_v10 }
 0x2c9   : > { %2673 = vrot.lane.b32.xlu1 %v6900_v3, %s5270_s25  ;;  %2685 = vrot.lane.b32.xlu0 %v6880_v25, %s5271_s15  ;;  %v8996_v3 = vstv %s6827_s28  ;;  %v2819_v30 = vmul.f32 %v2818_v61, %v6519_v19  ;;  %v2832_v63 = vstv %s7178_s9  ;;  %v3064_v50 = vrot.slane %v3058_v12, 2  ;;  %s4868_s28 = sld [smem:[#allocation4 + $0x6c]]  ;;  %s4930_s9 = sld [smem:[#allocation4 + $0xa6]] }
 0x2ca   : > { %v2682_v25 = vmul.f32 %v7228_v2, %v8996_v3  ;;  %v7236_v28 = vsel %vm328_vm3, %v3005_v38, %v3006_v14  ;;  %v7239_v11 = vsel %vm328_vm3, %v3006_v14, %v3008_v32  ;;  %v3065_v26 = vrot.slane %v3059_v29, 2  ;;  %v7251_v3 = vld [vmem:[#allocation3 + $0x10] sm:$0x3] }
 0x2cb   : > { %v3067_v6 = vrot.slane %v3060_v33, 2  ;;  %v2820_v12 = vmul.f32 %v2818_v61, %v6541_v16  ;;  %v2833_v38 = vmul.f32 %v2832_v63, %v6519_v19  ;;  %v1782_v14 = vmul.f32 %v7251_v3, %v6297_v46 }
 0x2cc   : > { %v7244_v44 = vsel %vm388_vm4, %v3064_v50, %v3065_v26  ;;  %v2834_v32 = vmul.f32 %v2832_v63, %v6541_v16  ;;  %v1803_v29 = vmul.f32 %v7251_v3, %v6300_v21  ;;  %v8997_v19 = vrot.slane %v6317_v55, 1 }
 0x2cd   : > { %2687 = vrot.lane.b32.xlu1 %v2682_v25, %s5271_s15  ;;  %2823 = vrot.lane.b32.xlu0 %v2819_v30, %s5270_s25  ;;  %v7247_v49 = vsel %vm388_vm4, %v3065_v26, %v3067_v6  ;;  %v1789_v50 = vrot.slane %v1782_v14, 1  ;;  %v1841_v33 = vmul.f32 %v7251_v3, %v6303_v58  ;;  %v8998_v21 = vrot.slane %v6325_v42, 1  ;;  %v9002_v26 = vld [vmem:[#allocation42_spill] sm:$0xff]  ;;  %v9006_v14 = vld [vmem:[#allocation44_spill] sm:$0xff] }
 0x2ce   : > { %v1810_v46 = vrot.slane %v1803_v29, 1  ;;  %v8999_v58 = vrot.slane %v6336_v22, 2  ;;  %v9001_v22 = vld [vmem:[#allocation49_spill] sm:$0xff] }
 0x2cf   : > { %v1790_v61 = vsel %vm328_vm3, %v8997_v19, %v1789_v50  ;;  %v1848_v25 = vrot.slane %v1841_v33, 2  ;;  %v9008_v29 = vld [vmem:[#allocation41_spill] sm:$0xff] }
 0x2d0   : > { %v1811_v16 = vsel %vm328_vm3, %v8998_v21, %v1810_v46  ;;  %v2014_v19 = vmul.f32 %v9008_v29, %v6652_v9  ;;  %v9010_v46 = vld [vmem:[#allocation45_spill] sm:$0xff]  ;;  %v9024_v29 = vld [vmem:[#allocation14_spill] sm:$0xff] }
 0x2d1   : > { %2825 = vrot.lane.b32.xlu1 %v2820_v12, %s5270_s25  ;;  %2837 = vrot.lane.b32.xlu0 %v2833_v38, %s5271_s15  ;;  %v1849_v55 = vsel %vm388_vm4, %v8999_v58, %v1848_v25  ;;  %v9011_v33 = vrot.slane %v9010_v46, 2  ;;  %v9012_v25 = vld [vmem:[#allocation85_spill] sm:$0xff] }
 0x2d2   : > { %v9013_v58 = vld [vmem:[#allocation53_spill] sm:$0xff] }
 0x2d5   : > { %2839 = vrot.lane.b32.xlu1 %v2834_v32, %s5271_s15  ;;  %1791 = vrot.lane.b32.xlu0 %v6349_v20, %s5270_s25  ;;  %v1862_v20 = vmul.f32 %v7251_v3, %v6309_v60  ;;  %v9000_v60 = vrot.slane %v6344_v7, 2  ;;  %v9005_v7 = vld [vmem:[#allocation50_spill] sm:$0xff] }
 0x2d7   : > { %v1869_v30 = vrot.slane %v1862_v20, 2  ;;  %v2086_v20 = vmul.f32 %v9012_v25, %v6986_v10  ;;  %v9030_v25 = vld [vmem:[#allocation17_spill] sm:$0xff] }
 0x2d9   : > { %1793 = vrot.lane.b32.xlu1 %v1790_v61, %s5270_s25  ;;  %1812 = vrot.lane.b32.xlu0 %v6358_v8, %s5271_s15  ;;  %v1934_v8 = vmul.f32 %v6528_v45, %v6652_v9  ;;  %v1870_v42 = vsel %vm388_vm4, %v9000_v60, %v1869_v30  ;;  %v9003_v45 = vrot.slane %v9002_v26, 1  ;;  %v9009_v61 = vld [vmem:[#allocation51_spill] sm:$0xff]  ;;  %v2093_v60 = vrot.slane %v2086_v20, 1 }
 0x2da   : > { %v9031_v20 = vrot.slane %v9030_v25, 1 }
 0x2db   : > { %v1941_v63 = vrot.slane %v1934_v8, 1 }
 0x2dd   : > { %1814 = vrot.lane.b32.xlu1 %v1811_v16, %s5271_s15  ;;  %1850 = vrot.lane.b32.xlu0 %v6364_v31, %s5270_s25  ;;  %v1955_v31 = vmul.f32 %v6531_v15, %v6652_v9  ;;  %v1942_v6 = vsel %vm328_vm3, %v9003_v45, %v1941_v63  ;;  %v9007_v15 = vrot.slane %v9006_v14, 1  ;;  %v2021_v16 = vrot.slane %v2014_v19, 2  ;;  %v9018_v45 = vld [vmem:[#allocation87_spill] sm:$0xff]  ;;  %v9025_v19 = vld [vmem:[#allocation20_spill] sm:$0xff] }
 0x2df   : > { %v1962_v12 = vrot.slane %v1955_v31, 1  ;;  %v9017_v31 = vrot.slane %v6954_v56, 1  ;;  %v9020_v56 = vld [vmem:[#allocation89_spill] sm:$0xff] }
 0x2e1   : > { %1852 = vrot.lane.b32.xlu1 %v1849_v55, %s5270_s25  ;;  %1871 = vrot.lane.b32.xlu0 %v6375_v39, %s5271_s15  ;;  %v9004_v39 = vld [vmem:[#allocation40_spill] sm:$0xff]  ;;  %v1963_v32 = vsel %vm328_vm3, %v9007_v15, %v1962_v12  ;;  %v9019_v12 = vrot.slane %v6958_v52, 1  ;;  %v9023_v52 = vrot.slane %v6984_v37, 2  ;;  %v9029_v37 = vld [vmem:[#allocation21_spill] sm:$0xff] }
 0x2e2   : > { %v1993_v38 = vmul.f32 %v9004_v39, %v6652_v9  ;;  %v9014_v55 = vld [vmem:[#allocation48_spill] sm:$0xff] }
 0x2e3   : > { %v9015_v30 = vrot.slane %v9014_v55, 2 }
 0x2e4   : > { %v2000_v50 = vrot.slane %v1993_v38, 2 }
 0x2e5   : > { %1873 = vrot.lane.b32.xlu1 %v1870_v42, %s5271_s15  ;;  %1943 = vrot.lane.b32.xlu0 %v9001_v22, %s5270_s25  ;;  %v2022_v8 = vsel %vm388_vm4, %v9015_v30, %v2021_v16  ;;  %v9016_v42 = vld [vmem:[#allocation86_spill] sm:$0xff]  ;;  %v2094_v22 = vsel %vm328_vm3, %v9017_v31, %v2093_v60  ;;  %v9028_v16 = vld [vmem:[#allocation15_spill] sm:$0xff]  ;;  %v7372_v60 = vpop.permute.xlu0 %1891 }
 0x2e6   : > { %v2001_v21 = vsel %vm388_vm4, %v9011_v33, %v2000_v50  ;;  %v2107_v63 = vmul.f32 %v9016_v42, %v6986_v10  ;;  %v9032_v30 = vld [vmem:[#allocation19_spill] sm:$0xff] }
 0x2e7   : > { %v9033_v42 = vld [vmem:[#allocation23_spill] sm:$0xff] }
 0x2e8   : > { %v2114_v26 = vrot.slane %v2107_v63, 1  ;;  %v9034_v63 = vld [vmem:[#allocation18_spill] sm:$0xff] }
 0x2e9   : > { %1945 = vrot.lane.b32.xlu1 %v1942_v6, %s5270_s25  ;;  %1964 = vrot.lane.b32.xlu0 %v9005_v7, %s5271_s15  ;;  %v2145_v6 = vmul.f32 %v9018_v45, %v6986_v10  ;;  %v9021_v7 = vrot.slane %v9020_v56, 2  ;;  %v9035_v31 = vrot.slane %v9034_v63, 2  ;;  %v9036_v45 = vld [vmem:[#allocation43_spill] sm:$0xff]  ;;  %v5142_v63 = vld [vmem:[#allocation3] sm:$0xff] }
 0x2ea   : > { %v2115_v39 = vsel %vm328_vm3, %v9019_v12, %v2114_v26  ;;  %v7382_v12 = vpop.permute.xlu1 %1893 }
 0x2eb   : > { %v2152_v38 = vrot.slane %v2145_v6, 2  ;;  %v2400_v6 = vmul.f32 %v9036_v45, %v6652_v9 }
 0x2ed   : > { %1966 = vrot.lane.b32.xlu1 %v1963_v32, %s5271_s15  ;;  %2002 = vrot.lane.b32.xlu0 %v9009_v61, %s5270_s25  ;;  %v2153_v14 = vsel %vm388_vm4, %v9021_v7, %v2152_v38  ;;  %v9022_v32 = vld [vmem:[#allocation13_spill] sm:$0xff]  ;;  %v9026_v61 = vld [vmem:[#allocation16_spill] sm:$0xff]  ;;  %v9038_v38 = vld [vmem:[#allocation22_spill] sm:$0xff]  ;;  %v2407_v7 = vrot.slane %v2400_v6, 1 }
 0x2ee   : > { %v9027_v46 = vrot.slane %v9026_v61, 1 }
 0x2f1   : > { %2004 = vrot.lane.b32.xlu1 %v2001_v21, %s5270_s25  ;;  %2023 = vrot.lane.b32.xlu0 %v9013_v58, %s5271_s15 }
 0x2f5   : > { %2025 = vrot.lane.b32.xlu1 %v2022_v8, %s5271_s15  ;;  %2095 = vrot.lane.b32.xlu0 %v6991_v4, %s5270_s25  ;;  %v2166_v4 = vmul.f32 %v6927_v41, %v6986_v10  ;;  %v2328_v8 = vmul.f32 %v7251_v3, %v9032_v30  ;;  %v2194_v30 = vstv %s4868_s28  ;;  %s7645_s28 = sld [smem:[#allocation4 + $0xa4]] }
 0x2f7   : > { %v2173_v15 = vrot.slane %v2166_v4, 2  ;;  %v2335_v26 = vrot.slane %v2328_v8, 2  ;;  %v9039_v4 = vrot.slane %v9038_v38, 2 }
 0x2f9   : > { %2097 = vrot.lane.b32.xlu1 %v2094_v22, %s5270_s25  ;;  %2116 = vrot.lane.b32.xlu0 %v6996_v34, %s5271_s15  ;;  %v2248_v34 = vmul.f32 %v7251_v3, %v9022_v32  ;;  %v2174_v41 = vsel %vm388_vm4, %v9023_v52, %v2173_v15  ;;  %v2336_v56 = vsel %vm388_vm4, %v9039_v4, %v2335_v26  ;;  %v9041_v32 = vld [vmem:[#allocation57_spill] sm:$0xff] }
 0x2fb   : > { %v2255_v50 = vrot.slane %v2248_v34, 1  ;;  %v7397_v34 = vpop.permute.xlu1 %1907 }
 0x2fd   : > { %2118 = vrot.lane.b32.xlu1 %v2115_v39, %s5271_s15  ;;  %2154 = vrot.lane.b32.xlu0 %v7007_v57, %s5270_s25  ;;  %v2269_v57 = vmul.f32 %v7251_v3, %v9024_v29  ;;  %v2256_v33 = vsel %vm328_vm3, %v9027_v46, %v2255_v50  ;;  %v7387_v39 = vpop.permute.xlu0 %1905  ;;  %v9045_v46 = vld [vmem:[#allocation59_spill] sm:$0xff] }
 0x2ff   : > { %v2276_v21 = vrot.slane %v2269_v57, 1 }
 0x301   : > { %2156 = vrot.lane.b32.xlu1 %v2153_v14, %s5270_s25  ;;  %2175 = vrot.lane.b32.xlu0 %v7026_v51, %s5271_s15  ;;  %v2307_v51 = vmul.f32 %v7251_v3, %v9028_v16  ;;  %v2277_v58 = vsel %vm328_vm3, %v9031_v20, %v2276_v21  ;;  %v9037_v3 = vld [vmem:[#allocation24_spill] sm:$0xff]  ;;  %v9040_v14 = vld [vmem:[#allocation46_spill] sm:$0xff]  ;;  %v9046_v16 = vld [vmem:[#allocation55_spill] sm:$0xff] }
 0x302   : > { %v2421_v15 = vmul.f32 %v9040_v14, %v6652_v9  ;;  %v9048_v20 = vld [vmem:[#allocation52_spill] sm:$0xff]  ;;  %v2196_v14 = vmul.f32 %v7228_v2, %v2194_v30 }
 0x303   : > { %v2314_v55 = vrot.slane %v2307_v51, 2  ;;  %v9047_v51 = vrot.slane %v9046_v16, 1 }
 0x304   : > { %v2428_v57 = vrot.slane %v2421_v15, 1 }
 0x305   : > { %2177 = vrot.lane.b32.xlu1 %v2174_v41, %s5271_s15  ;;  %2257 = vrot.lane.b32.xlu0 %v9025_v19, %s5270_s25  ;;  %v2315_v22 = vsel %vm388_vm4, %v9035_v31, %v2314_v55  ;;  %v9042_v41 = vld [vmem:[#allocation54_spill] sm:$0xff]  ;;  %v9044_v19 = vld [vmem:[#allocation47_spill] sm:$0xff]  ;;  %v9049_v55 = vld [vmem:[#allocation60_spill] sm:$0xff]  ;;  %v2195_v31 = vmul.f32 %v5142_v63, %v2194_v30 }
 0x306   : > { %v9043_v50 = vrot.slane %v9042_v41, 1  ;;  %v2459_v61 = vmul.f32 %v9044_v19, %v6652_v9  ;;  %v9060_v30 = vld [vmem:[#allocation26_spill] sm:$0xff] }
 0x308   : > { %v2408_v29 = vsel %vm328_vm3, %v9043_v50, %v2407_v7  ;;  %v2466_v25 = vrot.slane %v2459_v61, 2 }
 0x309   : > { %2259 = vrot.lane.b32.xlu1 %v2256_v33, %s5270_s25  ;;  %2278 = vrot.lane.b32.xlu0 %v9029_v37, %s5271_s15  ;;  %v2429_v37 = vsel %vm328_vm3, %v9047_v51, %v2428_v57  ;;  %v9056_v57 = vld [vmem:[#allocation35_spill] sm:$0xff]  ;;  %v9057_v51 = vrot.slane %v7016_v36, 1 }
 0x30d   : > { %2280 = vrot.lane.b32.xlu1 %v2277_v58, %s5271_s15  ;;  %2316 = vrot.lane.b32.xlu0 %v9033_v42, %s5270_s25  ;;  %v2480_v58 = vmul.f32 %v9048_v20, %v6652_v9  ;;  %v9053_v9 = vld [vmem:[#allocation61_spill] sm:$0xff]  ;;  %v9059_v20 = vld [vmem:[#allocation36_spill] sm:$0xff] }
 0x30f   : > { %v2487_v6 = vrot.slane %v2480_v58, 2 }
 0x311   : > { %2318 = vrot.lane.b32.xlu1 %v2315_v22, %s5270_s25  ;;  %2337 = vrot.lane.b32.xlu0 %v9037_v3, %s5271_s15  ;;  %v9050_v22 = vld [vmem:[#allocation56_spill] sm:$0xff] }
 0x312   : > { %v9051_v26 = vrot.slane %v9050_v22, 2  ;;  %v9052_v3 = vld [vmem:[#allocation88_spill] sm:$0xff] }
 0x313   : > { %v2552_v38 = vmul.f32 %v9052_v3, %v6986_v10  ;;  %v9062_v22 = vld [vmem:[#allocation28_spill] sm:$0xff]  ;;  %v9064_v3 = vld [vmem:[#allocation30_spill] sm:$0xff] }
 0x314   : > { %v2467_v45 = vsel %vm388_vm4, %v9051_v26, %v2466_v25  ;;  %v9058_v25 = vld [vmem:[#allocation25_spill] sm:$0xff] }
 0x315   : > { %2339 = vrot.lane.b32.xlu1 %v2336_v56, %s5271_s15  ;;  %2409 = vrot.lane.b32.xlu0 %v9041_v32, %s5270_s25  ;;  %v9054_v32 = vld [vmem:[#allocation58_spill] sm:$0xff]  ;;  %v9063_v26 = vld [vmem:[#allocation29_spill] sm:$0xff] }
 0x316   : > { %v9055_v41 = vrot.slane %v9054_v32, 2 }
 0x317   : > { %v7399_v52 = vpop.permute.xlu0 %2043 }
 0x318   : > { %v2488_v50 = vsel %vm388_vm4, %v9055_v41, %v2487_v6 }
 0x319   : > { %2411 = vrot.lane.b32.xlu1 %v2408_v29, %s5270_s25  ;;  %2430 = vrot.lane.b32.xlu0 %v9045_v46, %s5271_s15  ;;  %v2559_v29 = vrot.slane %v2552_v38, 1  ;;  %v9065_v38 = vld [vmem:[#allocation31_spill] sm:$0xff] }
 0x31b   : > { %v7409_v33 = vpop.permute.xlu1 %2045  ;;  %v7411_v21 = vpop.permute.xlu0 %2057 }
 0x31d   : > { %2432 = vrot.lane.b32.xlu1 %v2429_v37, %s5271_s15  ;;  %2468 = vrot.lane.b32.xlu0 %v9049_v55, %s5270_s25  ;;  %v2560_v37 = vsel %vm328_vm3, %v9057_v51, %v2559_v29 }
 0x31f   : > { %v7421_v8 = vpop.permute.xlu1 %2059  ;;  %v2206_v42 = vpop.permute.xlu0 %2205 }
 0x320   : > { %v2211_v4 = vadd.f32 %v2206_v42, %v2195_v31  ;;  %v9061_v42 = vld [vmem:[#allocation27_spill] sm:$0xff] }
 0x321   : > { %2470 = vrot.lane.b32.xlu1 %v2467_v45, %s5270_s25  ;;  %2489 = vrot.lane.b32.xlu0 %v9053_v9, %s5271_s15  ;;  %v2660_v9 = vstv %s4897_s11  ;;  %s4931_s11 = sld [smem:[#allocation4 + $0xa7]] }
 0x322   : > { %v2662_v29 = vmul.f32 %v7228_v2, %v2660_v9  ;;  %v9070_v2 = vld [vmem:[#allocation64_spill] sm:$0xff] }
 0x323   : > { %v2208_v56 = vpop.permute.xlu1 %2207  ;;  %v2220_v7 = vpop.permute.xlu0 %2219 }
 0x324   : > { %v2225_v15 = vadd.f32 %v2220_v7, %v2211_v4  ;;  %v2212_v10 = vadd.f32 %v2208_v56, %v2196_v14  ;;  %v2661_v7 = vmul.f32 %v5142_v63, %v2660_v9  ;;  %v9066_v14 = vld [vmem:[#allocation32_spill] sm:$0xff]  ;;  %v9069_v63 = vld [vmem:[#allocation39_spill] sm:$0xff]  ;;  %v9075_v9 = vld [vmem:[#allocation66_spill] sm:$0xff] }
 0x325   : > { %2491 = vrot.lane.b32.xlu1 %v2488_v50, %s5271_s15  ;;  %2561 = vrot.lane.b32.xlu0 %v7045_v24, %s5270_s25 }
 0x326   : > { %v7439_v19 = vadd.f32 %v9056_v57, %v2225_v15  ;;  %v9067_v15 = vld [vmem:[#allocation62_spill] sm:$0xff]  ;;  %v9068_v57 = vld [vmem:[#allocation63_spill] sm:$0xff] }
 0x327   : > { %v2222_v61 = vpop.permute.xlu1 %2221  ;;  %v7441_v46 = vpop.permute.xlu0 %2357 }
 0x328   : > { %v2226_v16 = vadd.f32 %v2222_v61, %v2212_v10 }
 0x329   : > { %2563 = vrot.lane.b32.xlu1 %v2560_v37, %s5270_s25  ;;  %2723 = vrot.lane.b32.xlu0 %v9058_v25, %s5270_s25 }
 0x32a   : > { %v7450_v58 = vadd.f32 %v9059_v20, %v2226_v16  ;;  %v9071_v20 = vld [vmem:[#allocation74_spill] sm:$0xff] }
 0x32b   : > { %v7452_v24 = vpop.permute.xlu1 %2359  ;;  %v7454_v55 = vpop.permute.xlu0 %2371 }
 0x32d   : > { %2725 = vrot.lane.b32.xlu1 %v9060_v30, %s5270_s25  ;;  %2744 = vrot.lane.b32.xlu0 %v9061_v42, %s5271_s15 }
 0x32f   : > { %v7460_v36 = vpop.permute.xlu1 %2373  ;;  %v7462_v31 = vpop.permute.xlu0 %2509 }
 0x331   : > { %2746 = vrot.lane.b32.xlu1 %v9062_v22, %s5271_s15  ;;  %2782 = vrot.lane.b32.xlu0 %v9063_v26, %s5270_s25  ;;  %v9072_v22 = vld [vmem:[#allocation65_spill] sm:$0xff]  ;;  %v9073_v26 = vld [vmem:[#allocation92_spill] sm:$0xff] }
 0x333   : > { %v7468_v45 = vpop.permute.xlu1 %2511  ;;  %v7470_v6 = vpop.permute.xlu0 %2523 }
 0x335   : > { %2784 = vrot.lane.b32.xlu1 %v9064_v3, %s5270_s25  ;;  %2803 = vrot.lane.b32.xlu0 %v9065_v38, %s5271_s15 }
 0x337   : > { %v7476_v4 = vpop.permute.xlu1 %2525  ;;  %v2672_v56 = vpop.permute.xlu0 %2671 }
 0x338   : > { %v2677_v32 = vadd.f32 %v2672_v56, %v2661_v7  ;;  %v9076_v56 = vld [vmem:[#allocation90_spill] sm:$0xff] }
 0x339   : > { %2805 = vrot.lane.b32.xlu1 %v9066_v14, %s5271_s15  ;;  %2875 = vrot.lane.b32.xlu0 %v9067_v15, %s5270_s25 }
 0x33b   : > { %v2674_v41 = vpop.permute.xlu1 %2673  ;;  %v2686_v50 = vpop.permute.xlu0 %2685 }
 0x33c   : > { %v2691_v10 = vadd.f32 %v2686_v50, %v2677_v32  ;;  %v2678_v61 = vadd.f32 %v2674_v41, %v2662_v29  ;;  %v9077_v41 = vld [vmem:[#allocation67_spill] sm:$0xff] }
 0x33d   : > { %2877 = vrot.lane.b32.xlu1 %v9068_v57, %s5270_s25  ;;  %2582 = vrot.lane.b32.xlu0 %v7048_v62, %s5271_s15  ;;  %v9078_v50 = vld [vmem:[#allocation91_spill] sm:$0xff] }
 0x33e   : > { %v7488_v16 = vadd.f32 %v9069_v63, %v2691_v10  ;;  %v9079_v10 = vld [vmem:[#allocation33_spill] sm:$0xff] }
 0x33f   : > { %v2688_v51 = vpop.permute.xlu1 %2687  ;;  %v7490_v37 = vpop.permute.xlu0 %2823 }
 0x340   : > { %v2692_v25 = vadd.f32 %v2688_v51, %v2678_v61 }
 0x341   : > { %2584 = vrot.lane.b32.xlu1 %v7051_v17, %s5271_s15  ;;  %2896 = vrot.lane.b32.xlu0 %v9070_v2, %s5271_s15  ;;  %v9074_v17 = vld [vmem:[#allocation93_spill] sm:$0xff]  ;;  %v9080_v2 = vld [vmem:[#allocation68_spill] sm:$0xff] }
 0x342   : > { %v7497_v30 = vadd.f32 %v9071_v20, %v2692_v25  ;;  %v2970_v25 = vstv %s7509_s4  ;;  %v1880_v20 = vstv %s7515_s12  ;;  %s4933_s4 = sld [smem:[#allocation4 + $0xa9]]  ;;  %s4934_s12 = sld [smem:[#allocation4 + $0xaa]] }
 0x343   : > { %v7499_v42 = vpop.permute.xlu1 %2825  ;;  %v7501_v62 = vpop.permute.xlu0 %2837 }
 0x345   : > { %2898 = vrot.lane.b32.xlu1 %v9072_v22, %s5271_s15  ;;  %2620 = vrot.lane.b32.xlu0 %v9073_v26, %s5270_s25  ;;  %v9081_v26 = vld [vmem:[#allocation34_spill] sm:$0xff] }
 0x347   : > { %v7507_v3 = vpop.permute.xlu1 %2839  ;;  %v1792_v38 = vpop.permute.xlu0 %1791 }
 0x348   : > { %v1797_v7 = vadd.f32 %v1792_v38, %v9076_v56  ;;  %v7534_v56 = vld [vmem:[#allocation3 + $0x18] sm:$0xff] }
 0x349   : > { %2622 = vrot.lane.b32.xlu1 %v9074_v17, %s5270_s25  ;;  %2934 = vrot.lane.b32.xlu0 %v9075_v9, %s5270_s25  ;;  %v2971_v9 = vmul.f32 %v2970_v25, %v6890_v43 }
 0x34b   : > { %v1794_v14 = vpop.permute.xlu1 %1793  ;;  %v1813_v15 = vpop.permute.xlu0 %1812 }
 0x34c   : > { %v1818_v32 = vadd.f32 %v1813_v15, %v1797_v7  ;;  %v1798_v29 = vadd.f32 %v1794_v14, %v9078_v50  ;;  %v1881_v7 = vmul.f32 %v7534_v56, %v1880_v20  ;;  %v2984_v15 = vstv %s7518_s22  ;;  %s4992_s22 = sld [smem:[#allocation4 + $0xdc]] }
 0x34d   : > { %2936 = vrot.lane.b32.xlu1 %v9077_v41, %s5270_s25  ;;  %2641 = vrot.lane.b32.xlu0 %v7098_v40, %s5271_s15 }
 0x34e   : > { %v1835_v57 = vadd.f32 %v9079_v10, %v1818_v32  ;;  %v9082_v32 = vld [vmem:[#allocation69_spill] sm:$0xff]  ;;  %v2972_v10 = vmul.f32 %v2970_v25, %v6933_v27  ;;  %v2986_v25 = vmul.f32 %v2984_v15, %v6933_v27 }
 0x34f   : > { %v1815_v61 = vpop.permute.xlu1 %1814  ;;  %v1851_v63 = vpop.permute.xlu0 %1850 }
 0x350   : > { %v1819_v51 = vadd.f32 %v1815_v61, %v1798_v29  ;;  %v1856_v22 = vadd.f32 %v1851_v63, %v1835_v57  ;;  %v2985_v57 = vmul.f32 %v2984_v15, %v6890_v43  ;;  %v7544_v63 = vld [vmem:[#allocation3 + $0x20] sm:$0xff] }
 0x351   : > { %2643 = vrot.lane.b32.xlu1 %v7101_v18, %s5271_s15  ;;  %2955 = vrot.lane.b32.xlu0 %v9080_v2, %s5271_s15 }
 0x352   : > { %v1836_v38 = vadd.f32 %v9081_v26, %v1819_v51  ;;  %v1882_v51 = vmul.f32 %v7544_v63, %v1880_v20 }
 0x353   : > { %v1853_v40 = vpop.permute.xlu1 %1852  ;;  %v1872_v17 = vpop.permute.xlu0 %1871 }
 0x354   : > { %v1877_v14 = vadd.f32 %v1872_v17, %v1856_v22  ;;  %v1857_v18 = vadd.f32 %v1853_v40, %v1836_v38  ;;  %v9083_v17 = vld [vmem:[#allocation70_spill] sm:$0xff] }
 0x355   : > { %2957 = vrot.lane.b32.xlu1 %v9082_v32, %s5271_s15  ;;  %2975 = vrot.lane.b32.xlu0 %v2971_v9, %s5270_s25  ;;  %v9084_v32 = vld [vmem:[#allocation71_spill] sm:$0xff] }
 0x356   : > { %v1883_v41 = vadd.f32 %v1881_v7, %v1877_v14 }
 0x357   : > { %v1874_v50 = vpop.permute.xlu1 %1873  ;;  %v1944_v29 = vpop.permute.xlu0 %1943 }
 0x358   : > { %v1897_v61 = vadd.f32 %v7372_v60, %v1883_v41  ;;  %v1878_v2 = vadd.f32 %v1874_v50, %v1857_v18  ;;  %v9085_v41 = vld [vmem:[#allocation72_spill] sm:$0xff] }
 0x359   : > { %2977 = vrot.lane.b32.xlu1 %v2972_v10, %s5270_s25  ;;  %2989 = vrot.lane.b32.xlu0 %v2985_v57, %s5271_s15  ;;  %v2032_v57 = vstv %s7551_s19  ;;  %s4962_s19 = sld [smem:[#allocation4 + $0xc2]] }
 0x35a   : > { %v1884_v22 = vadd.f32 %v1882_v51, %v1878_v2  ;;  %v1911_v26 = vadd.f32 %v7387_v39, %v1897_v61 }
 0x35b   : > { %v1946_v38 = vpop.permute.xlu1 %1945  ;;  %v1965_v40 = vpop.permute.xlu0 %1964 }
 0x35c   : > { %v1898_v60 = vadd.f32 %v7382_v12, %v1884_v22  ;;  %v1928_v9 = vadd.f32 %v9083_v17, %v1911_v26 }
 0x35d   : > { %2991 = vrot.lane.b32.xlu1 %v2986_v25, %s5271_s15  ;;  %3027 = vrot.lane.b32.xlu0 %v7119_v59, %s5270_s25 }
 0x35e   : > { %v1949_v20 = vadd.f32 %v1944_v29, %v1928_v9  ;;  %v1912_v7 = vadd.f32 %v7397_v34, %v1898_v60  ;;  %v9086_v34 = vld [vmem:[#allocation73_spill] sm:$0xff]  ;;  %v9087_v9 = vld [vmem:[#allocation96_spill] sm:$0xff] }
 0x35f   : > { %v1967_v39 = vpop.permute.xlu1 %1966  ;;  %v2003_v14 = vpop.permute.xlu0 %2002 }
 0x360   : > { %v1929_v18 = vadd.f32 %v9084_v32, %v1912_v7  ;;  %v1970_v15 = vadd.f32 %v1965_v40, %v1949_v20  ;;  %v9088_v7 = vld [vmem:[#allocation94_spill] sm:$0xff] }
 0x361   : > { %3029 = vrot.lane.b32.xlu1 %v7122_v35, %s5270_s25  ;;  %3048 = vrot.lane.b32.xlu0 %v7125_v13, %s5271_s15  ;;  %v2033_v35 = vmul.f32 %v2032_v57, %v6890_v43 }
 0x362   : > { %v1950_v12 = vadd.f32 %v1946_v38, %v1929_v18  ;;  %v1987_v50 = vadd.f32 %v9085_v41, %v1970_v15  ;;  %v9090_v41 = vld [vmem:[#allocation97_spill] sm:$0xff] }
 0x363   : > { %v2005_v10 = vpop.permute.xlu1 %2004  ;;  %v2024_v59 = vpop.permute.xlu0 %2023 }
 0x364   : > { %v1971_v29 = vadd.f32 %v1967_v39, %v1950_v12  ;;  %v2008_v61 = vadd.f32 %v2003_v14, %v1987_v50 }
 0x365   : > { %3050 = vrot.lane.b32.xlu1 %v7143_v5, %s5271_s15  ;;  %3086 = vrot.lane.b32.xlu0 %v7146_v0, %s5270_s25  ;;  %v2034_v0 = vmul.f32 %v2032_v57, %v6933_v27  ;;  %v9089_v27 = vld [vmem:[#allocation95_spill] sm:$0xff] }
 0x366   : > { %v1988_v51 = vadd.f32 %v9086_v34, %v1971_v29  ;;  %v2029_v2 = vadd.f32 %v2024_v59, %v2008_v61 }
 0x367   : > { %v2026_v13 = vpop.permute.xlu1 %2025  ;;  %v2096_v22 = vpop.permute.xlu0 %2095 }
 0x368   : > { %v2009_v26 = vadd.f32 %v2005_v10, %v1988_v51  ;;  %v2035_v38 = vadd.f32 %v2033_v35, %v2029_v2  ;;  %v2188_v51 = vstv %s4867_s26  ;;  %s4964_s26 = sld [smem:[#allocation4 + $0xc4]] }
 0x369   : > { %3088 = vrot.lane.b32.xlu1 %v7164_v23, %s5270_s25  ;;  %3107 = vrot.lane.b32.xlu0 %v7167_v48, %s5271_s15 }
 0x36a   : > { %v2049_v5 = vadd.f32 %v7399_v52, %v2035_v38  ;;  %v2030_v40 = vadd.f32 %v2026_v13, %v2009_v26 }
 0x36b   : > { %v2098_v25 = vpop.permute.xlu1 %2097  ;;  %v2117_v60 = vpop.permute.xlu0 %2116 }
 0x36c   : > { %v2036_v17 = vadd.f32 %v2034_v0, %v2030_v40  ;;  %v2063_v43 = vadd.f32 %v7411_v21, %v2049_v5 }
 0x36d   : > { %3109 = vrot.lane.b32.xlu1 %v9087_v9, %s5271_s15 }
 0x36e   : > { %v2050_v20 = vadd.f32 %v7409_v33, %v2036_v17  ;;  %v2080_v23 = vadd.f32 %v9088_v7, %v2063_v43  ;;  %v2184_v33 = vstv %s4866_s24  ;;  %v2346_v7 = vstv %s7587_s27  ;;  %s4993_s24 = sld [smem:[#allocation4 + $0xdd]]  ;;  %s4995_s27 = sld [smem:[#allocation4 + $0xdf]] }
 0x36f   : > { %v2119_v39 = vpop.permute.xlu1 %2118  ;;  %v2155_v14 = vpop.permute.xlu0 %2154 }
 0x370   : > { %v2101_v48 = vadd.f32 %v2096_v22, %v2080_v23  ;;  %v2064_v52 = vadd.f32 %v7421_v8, %v2050_v20 }
 0x372   : > { %v2081_v32 = vadd.f32 %v9089_v27, %v2064_v52  ;;  %v2122_v18 = vadd.f32 %v2117_v60, %v2101_v48  ;;  %v9091_v60 = vld [vmem:[#allocation37_spill] sm:$0xff]  ;;  %v2347_v27 = vmul.f32 %v7534_v56, %v2346_v7 }
 0x373   : > { %v2157_v15 = vpop.permute.xlu1 %2156  ;;  %v2176_v12 = vpop.permute.xlu0 %2175 }
 0x374   : > { %v2102_v21 = vadd.f32 %v2098_v25, %v2081_v32  ;;  %v2139_v50 = vadd.f32 %v9090_v41, %v2122_v18  ;;  %v2348_v41 = vmul.f32 %v7544_v63, %v2346_v7 }
 0x376   : > { %v2123_v10 = vadd.f32 %v2119_v39, %v2102_v21  ;;  %v2160_v57 = vadd.f32 %v2155_v14, %v2139_v50  ;;  %v9092_v39 = vld [vmem:[#allocation38_spill] sm:$0xff] }
 0x377   : > { %v2178_v59 = vpop.permute.xlu1 %2177  ;;  %v2258_v29 = vpop.permute.xlu0 %2257 }
 0x378   : > { %v2140_v61 = vadd.f32 %v7199_v54, %v2123_v10  ;;  %v2181_v34 = vadd.f32 %v2176_v12, %v2160_v57  ;;  %v2263_v2 = vadd.f32 %v2258_v29, %v7439_v19 }
 0x37a   : > { %v2161_v8 = vadd.f32 %v2157_v15, %v2140_v61  ;;  %v2185_v35 = vmul.f32 %v2184_v33, %v2181_v34  ;;  %v9093_v61 = vld [vmem:[#allocation75_spill] sm:$0xff] }
 0x37b   : > { %v2260_v13 = vpop.permute.xlu1 %2259  ;;  %v2279_v22 = vpop.permute.xlu0 %2278 }
 0x37c   : > { %v2189_v26 = vadd.f32 %v2188_v51, %v2185_v35  ;;  %v2182_v38 = vadd.f32 %v2178_v59, %v2161_v8  ;;  %v2284_v5 = vadd.f32 %v2279_v22, %v2263_v2  ;;  %v2264_v25 = vadd.f32 %v2260_v13, %v7450_v58  ;;  %v9094_v13 = vld [vmem:[#allocation78_spill] sm:$0xff] }
 0x37e   : > { %v2191_v40 = vmax.f32 %v2189_v26, 0.0  ;;  %v2186_v0 = vmul.f32 %v2184_v33, %v2182_v38  ;;  %v2301_v54 = vadd.f32 %v9091_v60, %v2284_v5  ;;  %v9095_v38 = vld [vmem:[#allocation79_spill] sm:$0xff] }
 0x37f   : > { %v2281_v17 = vpop.permute.xlu1 %2280  ;;  %v2317_v43 = vpop.permute.xlu0 %2316 }
 0x380   : > { %v2190_v9 = vadd.f32 %v2188_v51, %v2186_v0  ;;  %v2285_v20 = vadd.f32 %v2281_v17, %v2264_v25  ;;  %3129 = vrot.lane.b32.xlu0 %v2191_v40, %s5268_s23  ;;  %v2322_v19 = vadd.f32 %v2317_v43, %v2301_v54  ;;  %v9096_v54 = vld [vmem:[#allocation80_spill] sm:$0xff]  ;;  %v7606_v17 = vld [vmem:[#allocation3 + $0x30] sm:$0xff] }
 0x382   : > { %v2192_v23 = vmax.f32 %v2190_v9, 0.0  ;;  %v2302_v14 = vadd.f32 %v9092_v39, %v2285_v20  ;;  %v7610_v39 = vld [vmem:[#allocation3 + $0x38] sm:$0xff] }
 0x383   : > { %v2319_v48 = vpop.permute.xlu1 %2318  ;;  %v2338_v52 = vpop.permute.xlu0 %2337 }
 0x384   : > { %v2343_v32 = vadd.f32 %v2338_v52, %v2322_v19  ;;  %3131 = vrot.lane.b32.xlu1 %v2192_v23, %s5268_s23  ;;  %v2323_v58 = vadd.f32 %v2319_v48, %v2302_v14 }
 0x386   : > { %v2349_v18 = vadd.f32 %v2347_v27, %v2343_v32 }
 0x387   : > { %v2340_v15 = vpop.permute.xlu1 %2339  ;;  %v2410_v12 = vpop.permute.xlu0 %2409 }
 0x388   : > { %v2363_v21 = vadd.f32 %v7441_v46, %v2349_v18  ;;  %v2344_v50 = vadd.f32 %v2340_v15, %v2323_v58 }
 0x38a   : > { %v2350_v10 = vadd.f32 %v2348_v41, %v2344_v50  ;;  %v2377_v57 = vadd.f32 %v7454_v55, %v2363_v21  ;;  %v2498_v55 = vstv %s4886_s29  ;;  %s4965_s29 = sld [smem:[#allocation4 + $0xc5]] }
 0x38b   : > { %v2412_v33 = vpop.permute.xlu1 %2411  ;;  %v2431_v59 = vpop.permute.xlu0 %2430  ;;  %v2499_v43 = vmul.f32 %v7606_v17, %v2498_v55  ;;  %v2500_v14 = vmul.f32 %v7610_v39, %v2498_v55 }
 0x38c   : > { %v2364_v29 = vadd.f32 %v7452_v24, %v2350_v10  ;;  %v2394_v34 = vadd.f32 %v9093_v61, %v2377_v57 }
 0x38e   : > { %v2415_v51 = vadd.f32 %v2410_v12, %v2394_v34  ;;  %v2378_v8 = vadd.f32 %v7460_v36, %v2364_v29  ;;  %v2812_v34 = vstv %s4906_s30  ;;  %s4996_s30 = sld [smem:[#allocation4 + $0xe0]] }
 0x38f   : > { %v2433_v35 = vpop.permute.xlu1 %2432  ;;  %v2469_v2 = vpop.permute.xlu0 %2468 }
 0x390   : > { %v2395_v46 = vadd.f32 %v9094_v13, %v2378_v8  ;;  %v2436_v22 = vadd.f32 %v2431_v59, %v2415_v51  ;;  %v9098_v51 = vld [vmem:[#allocation77_spill] sm:$0xff] }
 0x392   : > { %v2416_v26 = vadd.f32 %v2412_v33, %v2395_v46  ;;  %v2453_v5 = vadd.f32 %v9095_v38, %v2436_v22  ;;  %v9097_v33 = vld [vmem:[#allocation76_spill] sm:$0xff]  ;;  %v2814_v22 = vmul.f32 %v7544_v63, %v2812_v34 }
 0x393   : > { %v2471_v40 = vpop.permute.xlu1 %2470  ;;  %v2490_v0 = vpop.permute.xlu0 %2489 }
 0x394   : > { %v2437_v25 = vadd.f32 %v2433_v35, %v2416_v26  ;;  %v2474_v60 = vadd.f32 %v2469_v2, %v2453_v5  ;;  %v2813_v35 = vmul.f32 %v7534_v56, %v2812_v34 }
 0x396   : > { %v2454_v24 = vadd.f32 %v9096_v54, %v2437_v25  ;;  %v2495_v36 = vadd.f32 %v2490_v0, %v2474_v60  ;;  %v9099_v60 = vld [vmem:[#allocation81_spill] sm:$0xff] }
 0x397   : > { %v2492_v9 = vpop.permute.xlu1 %2491  ;;  %v2562_v20 = vpop.permute.xlu0 %2561 }
 0x398   : > { %v2475_v7 = vadd.f32 %v2471_v40, %v2454_v24  ;;  %v2501_v23 = vadd.f32 %v2499_v43, %v2495_v36 }
 0x39a   : > { %v2515_v19 = vadd.f32 %v7462_v31, %v2501_v23  ;;  %v2496_v48 = vadd.f32 %v2492_v9, %v2475_v7  ;;  %v9100_v9 = vld [vmem:[#allocation98_spill] sm:$0xff] }
 0x39b   : > { %v2564_v52 = vpop.permute.xlu1 %2563  ;;  %v2724_v27 = vpop.permute.xlu0 %2723  ;;  %v9101_v23 = vld [vmem:[#allocation82_spill] sm:$0xff] }
 0x39c   : > { %v2502_v32 = vadd.f32 %v2500_v14, %v2496_v48  ;;  %v2529_v58 = vadd.f32 %v7470_v6, %v2515_v19  ;;  %v2729_v12 = vadd.f32 %v2724_v27, %v7488_v16  ;;  %v9102_v27 = vld [vmem:[#allocation83_spill] sm:$0xff] }
 0x39e   : > { %v2516_v18 = vadd.f32 %v7468_v45, %v2502_v32  ;;  %v2546_v15 = vadd.f32 %v7208_v1, %v2529_v58 }
 0x39f   : > { %v2726_v21 = vpop.permute.xlu1 %2725  ;;  %v2745_v41 = vpop.permute.xlu0 %2744 }
 0x3a0   : > { %v2530_v31 = vadd.f32 %v7476_v4, %v2516_v18  ;;  %v2750_v50 = vadd.f32 %v2745_v41, %v2729_v12  ;;  %v2730_v57 = vadd.f32 %v2726_v21, %v7497_v30  ;;  %v2567_v38 = vadd.f32 %v2562_v20, %v2546_v15 }
 0x3a2   : > { %v2547_v10 = vadd.f32 %v7211_v53, %v2530_v31  ;;  %v2767_v59 = vadd.f32 %v9097_v33, %v2750_v50  ;;  %v2650_v31 = vstv %s4895_s5  ;;  %v2964_v33 = vstv %s4915_s21  ;;  %s4929_s5 = sld [smem:[#allocation4 + $0xa5]]  ;;  %s4960_s21 = sld [smem:[#allocation4 + $0xc0]] }
 0x3a3   : > { %v2747_v29 = vpop.permute.xlu1 %2746  ;;  %v2783_v6 = vpop.permute.xlu0 %2782 }
 0x3a4   : > { %v2751_v61 = vadd.f32 %v2747_v29, %v2730_v57  ;;  %v2788_v45 = vadd.f32 %v2783_v6, %v2767_v59  ;;  %v2568_v24 = vadd.f32 %v2564_v52, %v2547_v10  ;;  %v2654_v57 = vstv %s4896_s8  ;;  %s4932_s8 = sld [smem:[#allocation4 + $0xa8]] }
 0x3a6   : > { %v2768_v1 = vadd.f32 %v9098_v51, %v2751_v61 }
 0x3a7   : > { %v2785_v8 = vpop.permute.xlu1 %2784  ;;  %v2804_v16 = vpop.permute.xlu0 %2803 }
 0x3a8   : > { %v2809_v2 = vadd.f32 %v2804_v16, %v2788_v45  ;;  %v2789_v4 = vadd.f32 %v2785_v8, %v2768_v1  ;;  %v2965_v1 = vmul.f32 %v7606_v17, %v2964_v33 }
 0x3aa   : > { %v2815_v13 = vadd.f32 %v2813_v35, %v2809_v2 }
 0x3ab   : > { %v2806_v46 = vpop.permute.xlu1 %2805  ;;  %v2876_v53 = vpop.permute.xlu0 %2875 }
 0x3ac   : > { %v2829_v30 = vadd.f32 %v7490_v37, %v2815_v13  ;;  %v2810_v26 = vadd.f32 %v2806_v46, %v2789_v4 }
 0x3ae   : > { %v2816_v5 = vadd.f32 %v2814_v22, %v2810_v26  ;;  %v2843_v40 = vadd.f32 %v7501_v62, %v2829_v30  ;;  %v2966_v30 = vmul.f32 %v7610_v39, %v2964_v33 }
 0x3af   : > { %v2878_v55 = vpop.permute.xlu1 %2877  ;;  %v2583_v0 = vpop.permute.xlu0 %2582 }
 0x3b0   : > { %v2830_v25 = vadd.f32 %v7499_v42, %v2816_v5  ;;  %v2860_v56 = vadd.f32 %v9099_v60, %v2843_v40  ;;  %v2588_v54 = vadd.f32 %v2583_v0, %v2567_v38 }
 0x3b2   : > { %v2881_v43 = vadd.f32 %v2876_v53, %v2860_v56  ;;  %v2844_v36 = vadd.f32 %v7507_v3, %v2830_v25  ;;  %v2605_v37 = vadd.f32 %v9100_v9, %v2588_v54  ;;  %v9103_v3 = vld [vmem:[#allocation84_spill] sm:$0xff] }
 0x3b3   : > { %v2585_v7 = vpop.permute.xlu1 %2584  ;;  %v2897_v63 = vpop.permute.xlu0 %2896 }
 0x3b4   : > { %v2861_v20 = vadd.f32 %v9101_v23, %v2844_v36  ;;  %v2589_v19 = vadd.f32 %v2585_v7, %v2568_v24  ;;  %v2902_v14 = vadd.f32 %v2897_v63, %v2881_v43 }
 0x3b6   : > { %v2882_v62 = vadd.f32 %v2878_v55, %v2861_v20  ;;  %v2606_v48 = vadd.f32 %v7223_v47, %v2589_v19  ;;  %v2919_v42 = vadd.f32 %v9102_v27, %v2902_v14  ;;  %v3116_v14 = vstv %s4924_s6  ;;  %s4991_s6 = sld [smem:[#allocation4 + $0xdb]] }
 0x3b7   : > { %v2899_v32 = vpop.permute.xlu1 %2898  ;;  %v2621_v58 = vpop.permute.xlu0 %2620  ;;  %v3120_v27 = vstv %s4925_s10  ;;  %s4963_s10 = sld [smem:[#allocation4 + $0xc3]] }
 0x3b8   : > { %v2903_v52 = vadd.f32 %v2899_v32, %v2882_v62  ;;  %v2626_v21 = vadd.f32 %v2621_v58, %v2605_v37 }
 0x3ba   : > { %v2920_v18 = vadd.f32 %v9103_v3, %v2903_v52 }
 0x3bb   : > { %v2623_v15 = vpop.permute.xlu1 %2622  ;;  %v2935_v12 = vpop.permute.xlu0 %2934 }
 0x3bc   : > { %v2627_v47 = vadd.f32 %v2623_v15, %v2606_v48  ;;  %v2940_v59 = vadd.f32 %v2935_v12, %v2919_v42  ;;  %v3125_v12 = vld [vmem:[#allocation3 + $0x1] sm:$0xff] }
 0x3bf   : > { %v2937_v41 = vpop.permute.xlu1 %2936  ;;  %v2642_v50 = vpop.permute.xlu0 %2641 }
 0x3c0   : > { %v2647_v10 = vadd.f32 %v2642_v50, %v2626_v21  ;;  %v2941_v8 = vadd.f32 %v2937_v41, %v2920_v18  ;;  %v3126_v41 = vld [vmem:[#allocation3 + $0x9] sm:$0xff] }
 0x3c2   : > { %v2651_v29 = vmul.f32 %v2650_v31, %v2647_v10  ;;  %v3183_v10 = vstv %s4927_s7  ;;  %s4994_s7 = sld [smem:[#allocation4 + $0xde]] }
 0x3c3   : > { %v2644_v6 = vpop.permute.xlu1 %2643  ;;  %v2956_v61 = vpop.permute.xlu0 %2955 }
 0x3c4   : > { %v2655_v34 = vadd.f32 %v2654_v57, %v2651_v29  ;;  %v2648_v45 = vadd.f32 %v2644_v6, %v2627_v47  ;;  %v2961_v51 = vadd.f32 %v2956_v61, %v2940_v59  ;;  %v7651_v47 = vstv %s4930_s9  ;;  %s4936_s9 = sld [smem:[#allocation4 + $0xac]] }
 0x3c5   : > { %v3197_v59 = vstv %s7645_s28  ;;  %v7654_v29 = vstv %s4931_s11  ;;  %v7657_v6 = vstv %s4933_s4  ;;  %s4937_s28 = sld [smem:[#allocation4 + $0xad]]  ;;  %s4948_s4 = sld [smem:[#allocation4 + $0xb8]] }
 0x3c6   : > { %v2657_v16 = vmax.f32 %v2655_v34, 0.0  ;;  %v2652_v35 = vmul.f32 %v2650_v31, %v2648_v45  ;;  %v2967_v2 = vadd.f32 %v2965_v1, %v2961_v51  ;;  %s4945_s11 = sld [smem:[#allocation4 + $0xb5]] }
 0x3c7   : > { %v2958_v4 = vpop.permute.xlu1 %2957  ;;  %v2976_v13 = vpop.permute.xlu0 %2975 }
 0x3c8   : > { %v2656_v46 = vadd.f32 %v2654_v57, %v2652_v35  ;;  %v2962_v53 = vadd.f32 %v2958_v4, %v2941_v8  ;;  %3143 = vrot.lane.b32.xlu0 %v2657_v16, %s5268_s23  ;;  %v2981_v26 = vadd.f32 %v2976_v13, %v2967_v2  ;;  %v7667_v8 = vstv %s4934_s12  ;;  %s7900_s12 = sld [smem:[#allocation4 + $0xb6]] }
 0x3ca   : > { %v2658_v22 = vmax.f32 %v2656_v46, 0.0  ;;  %v2968_v38 = vadd.f32 %v2966_v30, %v2962_v53  ;;  %v7689_v30 = vstv %s4992_s22  ;;  %s5010_s22 = sld [smem:[#allocation4 + $0xee]] }
 0x3cb   : > { %v2978_v5 = vpop.permute.xlu1 %2977  ;;  %v2990_v40 = vpop.permute.xlu0 %2989 }
 0x3cc   : > { %v2995_v55 = vadd.f32 %v2990_v40, %v2981_v26  ;;  %3145 = vrot.lane.b32.xlu1 %v2658_v22, %s5268_s23  ;;  %v2982_v17 = vadd.f32 %v2978_v5, %v2968_v38 }
 0x3ce   : > { %v3012_v0 = vadd.f32 %v7236_v28, %v2995_v55 }
 0x3cf   : > { %v2992_v25 = vpop.permute.xlu1 %2991  ;;  %v3028_v60 = vpop.permute.xlu0 %3027 }
 0x3d0   : > { %v2996_v56 = vadd.f32 %v2992_v25, %v2982_v17  ;;  %v3033_v54 = vadd.f32 %v3028_v60, %v3012_v0 }
 0x3d2   : > { %v3013_v24 = vadd.f32 %v7239_v11, %v2996_v56  ;;  %v7712_v56 = vstv %s4962_s19  ;;  %s7902_s19 = sld [smem:[#allocation4 + $0xbe]] }
 0x3d3   : > { %v3030_v43 = vpop.permute.xlu1 %3029  ;;  %v3049_v36 = vpop.permute.xlu0 %3048 }
 0x3d4   : > { %v3054_v39 = vadd.f32 %v3049_v36, %v3033_v54  ;;  %v3034_v9 = vadd.f32 %v3030_v43, %v3013_v24 }
 0x3d6   : > { %v3071_v37 = vadd.f32 %v7244_v44, %v3054_v39 }
 0x3d7   : > { %v3051_v7 = vpop.permute.xlu1 %3050  ;;  %v3087_v63 = vpop.permute.xlu0 %3086 }
 0x3d8   : > { %v3055_v23 = vadd.f32 %v3051_v7, %v3034_v9  ;;  %v3092_v20 = vadd.f32 %v3087_v63, %v3071_v37 }
 0x3da   : > { %v3072_v28 = vadd.f32 %v7247_v49, %v3055_v23 }
 0x3db   : > { %v3089_v19 = vpop.permute.xlu1 %3088  ;;  %v3108_v62 = vpop.permute.xlu0 %3107 }
 0x3dc   : > { %v3113_v48 = vadd.f32 %v3108_v62, %v3092_v20  ;;  %v3093_v11 = vadd.f32 %v3089_v19, %v3072_v28 }
 0x3de   : > { %v3117_v42 = vmul.f32 %v3116_v14, %v3113_v48  ;;  %v7750_v48 = vstv %s4964_s26  ;;  %s7905_s26 = sld [smem:[#allocation4 + $0xd9]] }
 0x3df   : > { %v3110_v32 = vpop.permute.xlu1 %3109 }
 0x3e0   : > { %v3121_v58 = vadd.f32 %v3120_v27, %v3117_v42  ;;  %v3114_v52 = vadd.f32 %v3110_v32, %v3093_v11 }
 0x3e2   : > { %v3123_v3 = vmax.f32 %v3121_v58, 0.0  ;;  %v3118_v18 = vmul.f32 %v3116_v14, %v3114_v52  ;;  %v7743_v14 = vstv %s4993_s24  ;;  %s4949_s24 = sld [smem:[#allocation4 + $0xb9]] }
 0x3e4   : > { %v3122_v15 = vadd.f32 %v3120_v27, %v3118_v18  ;;  %3157 = vrot.lane.b32.xlu0 %v3123_v3, %s5268_s23  ;;  %v7770_v18 = vstv %s4995_s27  ;;  %s7912_s27 = sld [smem:[#allocation4 + $0xd4]] }
 0x3e6   : > { %v3124_v44 = vmax.f32 %v3122_v15, 0.0 }
 0x3e8   : > { %3159 = vrot.lane.b32.xlu1 %v3124_v44, %s5268_s23  ;;  %s4961_s23 = sld [smem:[#allocation4 + $0xc1]] }
 0x3ee   : > { %v7681_v4 = vstv %s4961_s23  ;;  %s4979_s23 = sld [smem:[#allocation4 + $0xd3]] }
 0x3f2   : > { %v3130_v49 = vpop.permute.xlu0 %3129 }
 0x3f3   : > { %v3135_v21 = vadd.f32 %v3130_v49, %v3125_v12 }
 0x3f5   : > { %3137 = vst.msk [vmem:[#allocation2 + $0x1] sm:$0xff] %vm252_vm2, %v3135_v21 }
 0x3f6   : > { %v3132_v31 = vpop.permute.xlu1 %3131 }
 0x3f7   : > { %v3136_v50 = vadd.f32 %v3132_v31, %v3126_v41 }
 0x3f9   : > { %3138 = vst.msk [vmem:[#allocation2 + $0x9] sm:$0xff] %vm252_vm2, %v3136_v50  ;;  %v7785_v50 = vstv %s4965_s29  ;;  %s7917_s29 = sld [smem:[#allocation4 + $0xef]] }
 0x3fc   : > { %v7648_v57 = vld [vmem:[#allocation2] sm:$0xff] }
 0x3fd   : > { %v3184_v33 = vmul.f32 %v3183_v10, %v7648_v57  ;;  %v3229_v34 = vmul.f32 %v7651_v47, %v7648_v57  ;;  %v3198_v51 = vmul.f32 %v3197_v59, %v7648_v57  ;;  %v3250_v1 = vmul.f32 %v7654_v29, %v7648_v57 }
 0x3fe   : > { %v3288_v16 = vmul.f32 %v7657_v6, %v7648_v57  ;;  %v3309_v53 = vmul.f32 %v7667_v8, %v7648_v57  ;;  %v3705_v60 = vmul.f32 %v7681_v4, %v7648_v57  ;;  %v4181_v36 = vmul.f32 %v7689_v30, %v7648_v57 }
 0x3ff   : > { %3188 = vrot.lane.b32.xlu0 %v3184_v33, %s5270_s25  ;;  %v3235_v13 = vrot.slane %v3229_v34, 1  ;;  %v3256_v38 = vrot.slane %v3250_v1, 1  ;;  %v3726_v23 = vmul.f32 %v7712_v56, %v7648_v57  ;;  %v4202_v58 = vmul.f32 %v7743_v14, %v7648_v57 }
 0x400   : > { %v7659_v61 = vld [vmem:[#allocation2 + $0x8] sm:$0xff]  ;;  %v3294_v40 = vrot.slane %v3288_v16, 2  ;;  %v3315_v24 = vrot.slane %v3309_v53, 2  ;;  %v3711_v63 = vrot.slane %v3705_v60, 1  ;;  %v4187_v28 = vrot.slane %v4181_v36, 1 }
 0x401   : > { %v3185_v45 = vmul.f32 %v3183_v10, %v7659_v61  ;;  %v7675_v35 = vmul.f32 %v7651_v47, %v7659_v61  ;;  %v7679_v2 = vmul.f32 %v7654_v29, %v7659_v61  ;;  %v7685_v46 = vmul.f32 %v7657_v6, %v7659_v61 }
 0x402   : > { %v3199_v22 = vmul.f32 %v3197_v59, %v7659_v61  ;;  %v7697_v17 = vmul.f32 %v7667_v8, %v7659_v61  ;;  %v7724_v39 = vmul.f32 %v7681_v4, %v7659_v61  ;;  %v7733_v37 = vmul.f32 %v7689_v30, %v7659_v61 }
 0x403   : > { %3190 = vrot.lane.b32.xlu1 %v3185_v45, %s5270_s25  ;;  %3202 = vrot.lane.b32.xlu0 %v3198_v51, %s5271_s15  ;;  %v8855_v26 = vrot.slane %v7675_v35, 1  ;;  %v8854_v5 = vrot.slane %v7679_v2, 1  ;;  %v8853_v55 = vrot.slane %v7685_v46, 2  ;;  %v7741_v19 = vmul.f32 %v7712_v56, %v7659_v61 }
 0x404   : > { %v8852_v43 = vrot.slane %v7697_v17, 2  ;;  %v8851_v7 = vrot.slane %v7724_v39, 1  ;;  %v8850_v20 = vrot.slane %v7733_v37, 1  ;;  %v3732_v42 = vrot.slane %v3726_v23, 1 }
 0x405   : > { %v7703_v0 = vsel %vm328_vm3, %v3235_v13, %v8855_v26  ;;  %v7708_v25 = vsel %vm328_vm3, %v3256_v38, %v8854_v5  ;;  %v7717_v54 = vsel %vm388_vm4, %v3294_v40, %v8853_v55  ;;  %v8849_v11 = vrot.slane %v7741_v19, 1  ;;  %v7818_v38 = vld [vmem:[#allocation2 + $0x10] sm:$0x3] }
 0x406   : > { %v7729_v9 = vsel %vm388_vm4, %v3315_v24, %v8852_v43  ;;  %v7748_v62 = vsel %vm328_vm3, %v3711_v63, %v8851_v7  ;;  %v7755_v27 = vsel %vm328_vm3, %v4187_v28, %v8850_v20  ;;  %v7760_v32 = vmul.f32 %v7743_v14, %v7659_v61 }
 0x407   : > { %3204 = vrot.lane.b32.xlu1 %v3199_v22, %s5271_s15  ;;  %v7766_v52 = vmul.f32 %v7750_v48, %v7659_v61  ;;  %v3764_v3 = vmul.f32 %v7750_v48, %v7648_v57  ;;  %v7775_v15 = vsel %vm328_vm3, %v3732_v42, %v8849_v11  ;;  %v4208_v12 = vrot.slane %v4202_v58, 1 }
 0x408   : > { %v8847_v44 = vrot.slane %v7760_v32, 1  ;;  %v7781_v41 = vmul.f32 %v7770_v18, %v7659_v61  ;;  %v4240_v31 = vmul.f32 %v7770_v18, %v7648_v57  ;;  %v7799_v59 = vmul.f32 %v7785_v50, %v7659_v61 }
 0x409   : > { %v8846_v49 = vrot.slane %v7766_v52, 2  ;;  %v3770_v21 = vrot.slane %v3764_v3, 2  ;;  %v7801_v34 = vstv %s4996_s30  ;;  %v3785_v16 = vmul.f32 %v7785_v50, %v7648_v57  ;;  %s7929_s30 = sld [smem:[#allocation4 + $0xbb]] }
 0x40a   : > { %v7790_v10 = vsel %vm328_vm3, %v4208_v12, %v8847_v44  ;;  %v8845_v45 = vrot.slane %v7781_v41, 2  ;;  %v4246_v51 = vrot.slane %v4240_v31, 2  ;;  %v8844_v1 = vrot.slane %v7799_v59, 2 }
 0x40b   : > { %v7795_v33 = vsel %vm388_vm4, %v3770_v21, %v8846_v49  ;;  %v7809_v13 = vmul.f32 %v7801_v34, %v7659_v61  ;;  %v4261_v22 = vmul.f32 %v7801_v34, %v7648_v57  ;;  %v3791_v40 = vrot.slane %v3785_v16, 2 }
 0x40c   : > { %v7814_v53 = vsel %vm388_vm4, %v4246_v51, %v8845_v45  ;;  %v3211_v24 = vstv %s4929_s5  ;;  %v3270_v63 = vstv %s4932_s8  ;;  %v3687_v28 = vstv %s4960_s21  ;;  %s7937_s5 = sld [smem:[#allocation4 + $0xbf]]  ;;  %s7949_s8 = sld [smem:[#allocation4 + $0xa2]] }
 0x40d   : > { %v8848_v60 = vrot.slane %v7809_v13, 2  ;;  %v4267_v36 = vrot.slane %v4261_v22, 2  ;;  %v7824_v23 = vsel %vm388_vm4, %v3791_v40, %v8844_v1  ;;  %v4163_v42 = vstv %s4991_s6  ;;  %s7963_s21 = sld [smem:[#allocation4 + $0xd6]]  ;;  %s7965_s6 = sld [smem:[#allocation4 + $0xda]] }
 0x40e   : > { %v3746_v58 = vstv %s4963_s10  ;;  %v3212_v12 = vmul.f32 %v3211_v24, %v7648_v57  ;;  %v3213_v21 = vmul.f32 %v3211_v24, %v7659_v61  ;;  %v3214_v31 = vmul.f32 %v3211_v24, %v7818_v38  ;;  %s8003_s10 = sld [smem:[#allocation4 + $0xf1]] }
 0x40f   : > { %v7829_v3 = vsel %vm388_vm4, %v4267_v36, %v8848_v60  ;;  %v3271_v51 = vmul.f32 %v3270_v63, %v7648_v57  ;;  %v3272_v16 = vmul.f32 %v3270_v63, %v7659_v61  ;;  %v3273_v22 = vmul.f32 %v3270_v63, %v7818_v38 }
 0x410   : > { %9104 = vst [vmem:[#allocation49_spill] sm:$0xff] %v7829_v3  ;;  %v3689_v40 = vmul.f32 %v3687_v28, %v7659_v61  ;;  %v3218_v1 = vrot.slane %v3212_v12, 1  ;;  %v3219_v45 = vrot.slane %v3213_v21, 1  ;;  %v3221_v49 = vrot.slane %v3214_v31, 1 }
 0x411   : > { %v4222_v44 = vstv %s4994_s7  ;;  %v3277_v36 = vrot.slane %v3271_v51, 2  ;;  %v3278_v60 = vrot.slane %v3272_v16, 2  ;;  %v3280_v11 = vrot.slane %v3273_v22, 2  ;;  %s8018_s7 = sld [smem:[#allocation4 + $0xc7]] }
 0x412   : > { %v3690_v20 = vmul.f32 %v3687_v28, %v7818_v38  ;;  %v7840_v7 = vsel %vm328_vm3, %v3218_v1, %v3219_v45  ;;  %v7843_v24 = vsel %vm328_vm3, %v3219_v45, %v3221_v49  ;;  %v3695_v43 = vrot.slane %v3689_v40, 1 }
 0x413   : > { %v3688_v63 = vmul.f32 %v3687_v28, %v7648_v57  ;;  %v7847_v55 = vsel %vm388_vm4, %v3277_v36, %v3278_v60  ;;  %v7850_v12 = vsel %vm388_vm4, %v3278_v60, %v3280_v11  ;;  %v4165_v31 = vmul.f32 %v4163_v42, %v7659_v61 }
 0x414   : > { %9105 = vst [vmem:[#allocation42_spill] sm:$0xff] %v7847_v55  ;;  %9106 = vst [vmem:[#allocation40_spill] sm:$0xff] %v7850_v12  ;;  %v3697_v21 = vrot.slane %v3690_v20, 1  ;;  %v4166_v16 = vmul.f32 %v4163_v42, %v7818_v38  ;;  %v4164_v1 = vmul.f32 %v4163_v42, %v7648_v57  ;;  %v3748_v49 = vmul.f32 %v3746_v58, %v7659_v61 }
 0x415   : > { %v3694_v51 = vrot.slane %v3688_v63, 1  ;;  %v4171_v28 = vrot.slane %v4165_v31, 1  ;;  %v3749_v22 = vmul.f32 %v3746_v58, %v7818_v38  ;;  %v3747_v40 = vmul.f32 %v3746_v58, %v7648_v57 }
 0x416   : > { %v7857_v45 = vsel %vm328_vm3, %v3695_v43, %v3697_v21  ;;  %v4173_v20 = vrot.slane %v4166_v16, 1  ;;  %v4170_v60 = vrot.slane %v4164_v1, 1  ;;  %v3754_v36 = vrot.slane %v3748_v49, 2 }
 0x417   : > { %9107 = vst [vmem:[#allocation50_spill] sm:$0xff] %v7857_v45  ;;  %v7862_v11 = vsel %vm328_vm3, %v3694_v51, %v3695_v43  ;;  %v3756_v63 = vrot.slane %v3749_v22, 2  ;;  %v3753_v5 = vrot.slane %v3747_v40, 2  ;;  %v4224_v42 = vmul.f32 %v4222_v44, %v7659_v61 }
 0x418   : > { %9108 = vst [vmem:[#allocation44_spill] sm:$0xff] %v7862_v11  ;;  %v4225_v26 = vmul.f32 %v4222_v44, %v7818_v38  ;;  %v7867_v21 = vsel %vm328_vm3, %v4171_v28, %v4173_v20  ;;  %v7870_v31 = vsel %vm328_vm3, %v4170_v60, %v4171_v28  ;;  %v4223_v58 = vmul.f32 %v4222_v44, %v7648_v57  ;;  %v3139_v20 = vld [vmem:[#allocation3 + $0x19] sm:$0xff]  ;;  %v3140_v44 = vld [vmem:[#allocation3 + $0x21] sm:$0xff] }
 0x419   : > { %9109 = vst [vmem:[#allocation41_spill] sm:$0xff] %v7867_v21  ;;  %9110 = vst [vmem:[#allocation51_spill] sm:$0xff] %v7870_v31  ;;  %v7874_v43 = vsel %vm388_vm4, %v3754_v36, %v3756_v63  ;;  %v7877_v51 = vsel %vm388_vm4, %v3753_v5, %v3754_v36  ;;  %v4230_v16 = vrot.slane %v4224_v42, 2  ;;  %v7982_v3 = vstv %s7917_s29  ;;  %s4947_s29 = sld [smem:[#allocation4 + $0xb7]] }
 0x41a   : > { %9111 = vst [vmem:[#allocation45_spill] sm:$0xff] %v7874_v43  ;;  %9112 = vst [vmem:[#allocation85_spill] sm:$0xff] %v7877_v51  ;;  %v4232_v1 = vrot.slane %v4225_v26, 2  ;;  %v4229_v49 = vrot.slane %v4223_v58, 2  ;;  %v3335_v26 = vstv %s4936_s9  ;;  %v3349_v58 = vstv %s4937_s28  ;;  %s8041_s9 = sld [smem:[#allocation4 + $0xe2]]  ;;  %s8048_s28 = sld [smem:[#allocation4 + $0xbc]] }
 0x41b   : > { %9125 = vst [vmem:[#allocation17_spill] sm:$0xff] %v7982_v3 }
 0x41c   : > { %v7880_v22 = vsel %vm388_vm4, %v4230_v16, %v4232_v1  ;;  %v7883_v40 = vsel %vm388_vm4, %v4229_v49, %v4230_v16 }
 0x41d   : > { %9113 = vst [vmem:[#allocation53_spill] sm:$0xff] %v7880_v22  ;;  %9114 = vst [vmem:[#allocation48_spill] sm:$0xff] %v7883_v40  ;;  %v9119_v40 = vstv %s7900_s12 }
 0x43a   : > { %v3144_v28 = vpop.permute.xlu0 %3143 }
 0x43b   : > { %v3149_v60 = vadd.f32 %v3144_v28, %v3139_v20  ;;  %v3153_v28 = vld [vmem:[#allocation3 + $0x31] sm:$0xff] }
 0x43d   : > { %3151 = vst.msk [vmem:[#allocation2 + $0x19] sm:$0xff] %vm252_vm2, %v3149_v60 }
 0x43e   : > { %v3146_v63 = vpop.permute.xlu1 %3145 }
 0x43f   : > { %v3150_v5 = vadd.f32 %v3146_v63, %v3140_v44  ;;  %v3154_v63 = vld [vmem:[#allocation3 + $0x39] sm:$0xff] }
 0x441   : > { %3152 = vst.msk [vmem:[#allocation2 + $0x21] sm:$0xff] %vm252_vm2, %v3150_v5 }
 0x444   : > { %v7887_v36 = vld [vmem:[#allocation2 + $0x18] sm:$0xff] }
 0x445   : > { %v3336_v42 = vmul.f32 %v3335_v26, %v7887_v36  ;;  %v3350_v49 = vmul.f32 %v3349_v58, %v7887_v36 }
 0x447   : > { %3340 = vrot.lane.b32.xlu0 %v3336_v42, %s5270_s25  ;;  %v3487_v42 = vstv %s4945_s11  ;;  %s8074_s11 = sld [smem:[#allocation4 + $0xd7]] }
 0x448   : > { %v7891_v16 = vld [vmem:[#allocation2 + $0x20] sm:$0xff] }
 0x449   : > { %v3337_v1 = vmul.f32 %v3335_v26, %v7891_v16  ;;  %v3351_v20 = vmul.f32 %v3349_v58, %v7891_v16 }
 0x44b   : > { %3342 = vrot.lane.b32.xlu1 %v3337_v1, %s5270_s25  ;;  %3354 = vrot.lane.b32.xlu0 %v3350_v49, %s5271_s15  ;;  %v7910_v49 = vstv %s4948_s4  ;;  %s8082_s4 = sld [smem:[#allocation4 + $0xc8]] }
 0x44c   : > { %9115 = vst [vmem:[#allocation86_spill] sm:$0xff] %v7910_v49 }
 0x44f   : > { %3356 = vrot.lane.b32.xlu1 %v3351_v20, %s5271_s15 }
 0x456   : > { %v3158_v60 = vpop.permute.xlu0 %3157 }
 0x457   : > { %v3163_v44 = vadd.f32 %v3158_v60, %v3153_v28  ;;  %v7915_v28 = vstv %s4979_s23  ;;  %v7920_v60 = vstv %s5010_s22  ;;  %s5014_s23 = sld [smem:[#allocation4 + $0xf2]]  ;;  %s8105_s22 = sld [smem:[#allocation4 + $0xe3]] }
 0x458   : > { %9116 = vst [vmem:[#allocation87_spill] sm:$0xff] %v7915_v28  ;;  %9117 = vst [vmem:[#allocation89_spill] sm:$0xff] %v7920_v60 }
 0x459   : > { %3165 = vst.msk [vmem:[#allocation2 + $0x31] sm:$0xff] %vm252_vm2, %v3163_v44 }
 0x45a   : > { %v3160_v5 = vpop.permute.xlu1 %3159 }
 0x45b   : > { %v3164_v26 = vadd.f32 %v3160_v5, %v3154_v63  ;;  %v3659_v63 = vstv %s7902_s19  ;;  %s4976_s19 = sld [smem:[#allocation4 + $0xd0]] }
 0x45d   : > { %3166 = vst.msk [vmem:[#allocation2 + $0x39] sm:$0xff] %vm252_vm2, %v3164_v26  ;;  %v7927_v26 = vstv %s4949_s24  ;;  %s5007_s24 = sld [smem:[#allocation4 + $0xeb]] }
 0x45e   : > { %9118 = vst [vmem:[#allocation13_spill] sm:$0xff] %v7927_v26 }
 0x460   : > { %v7907_v58 = vld [vmem:[#allocation2 + $0x30] sm:$0xff] }
 0x461   : > { %v3488_v1 = vmul.f32 %v3487_v42, %v7907_v58  ;;  %v3533_v5 = vmul.f32 %v7910_v49, %v7907_v58  ;;  %v3502_v22 = vmul.f32 %v9119_v40, %v7907_v58  ;;  %v4485_v43 = vmul.f32 %v7920_v60, %v7907_v58 }
 0x462   : > { %v4135_v40 = vstv %s7905_s26  ;;  %v3554_v55 = vmul.f32 %v7927_v26, %v7907_v58  ;;  %s8162_s26 = sld [smem:[#allocation4 + $0xd1]] }
 0x463   : > { %3492 = vrot.lane.b32.xlu0 %v3488_v1, %s5270_s25  ;;  %v4009_v1 = vmul.f32 %v7915_v28, %v7907_v58  ;;  %v3539_v31 = vrot.slane %v3533_v5, 1 }
 0x464   : > { %v7922_v44 = vld [vmem:[#allocation2 + $0x38] sm:$0xff] }
 0x465   : > { %v3489_v20 = vmul.f32 %v3487_v42, %v7922_v44  ;;  %v7941_v51 = vmul.f32 %v7910_v49, %v7922_v44  ;;  %v3660_v42 = vmul.f32 %v3659_v63, %v7648_v57  ;;  %v7953_v12 = vmul.f32 %v7915_v28, %v7922_v44 }
 0x466   : > { %v3661_v49 = vmul.f32 %v3659_v63, %v7659_v61  ;;  %v4015_v21 = vrot.slane %v4009_v1, 1  ;;  %v7970_v11 = vmul.f32 %v7927_v26, %v7922_v44  ;;  %v7973_v63 = vstv %s7912_s27  ;;  %s8165_s27 = sld [smem:[#allocation4 + $0xec]] }
 0x467   : > { %9120 = vst [vmem:[#allocation14_spill] sm:$0xff] %v7941_v51  ;;  %3494 = vrot.lane.b32.xlu1 %v3489_v20, %s5270_s25  ;;  %3506 = vrot.lane.b32.xlu0 %v3502_v22, %s5271_s15  ;;  %9121 = vst [vmem:[#allocation20_spill] sm:$0xff] %v7953_v12  ;;  %v8860_v20 = vrot.slane %v7941_v51, 1  ;;  %v7961_v22 = vmul.f32 %v7920_v60, %v7922_v44  ;;  %v8861_v28 = vrot.slane %v7953_v12, 1  ;;  %v4491_v60 = vrot.slane %v4485_v43, 1 }
 0x468   : > { %9123 = vst [vmem:[#allocation15_spill] sm:$0xff] %v7970_v11  ;;  %9124 = vst [vmem:[#allocation21_spill] sm:$0xff] %v7973_v63  ;;  %v3560_v26 = vrot.slane %v3554_v55, 1  ;;  %v4136_v43 = vmul.f32 %v4135_v40, %v7648_v57 }
 0x469   : > { %9122 = vst [vmem:[#allocation16_spill] sm:$0xff] %v7961_v22  ;;  %v7978_v5 = vsel %vm328_vm3, %v3539_v31, %v8860_v20  ;;  %v8862_v45 = vrot.slane %v7961_v22, 1  ;;  %v7989_v1 = vsel %vm328_vm3, %v4015_v21, %v8861_v28  ;;  %v8863_v31 = vrot.slane %v7970_v11, 1 }
 0x46a   : > { %9126 = vst [vmem:[#allocation19_spill] sm:$0xff] %v7989_v1  ;;  %v4137_v21 = vmul.f32 %v4135_v40, %v7659_v61  ;;  %v8013_v28 = vmul.f32 %v7973_v63, %v7922_v44  ;;  %v8022_v40 = vmul.f32 %v7982_v3, %v7922_v44 }
 0x46b   : > { %3664 = vrot.lane.b32.xlu1 %v3660_v42, %s5270_s25  ;;  %3666 = vrot.lane.b32.xlu0 %v3661_v49, %s5270_s25  ;;  %v7996_v20 = vsel %vm328_vm3, %v4491_v60, %v8862_v45  ;;  %v4030_v42 = vmul.f32 %v7973_v63, %v7907_v58  ;;  %v8001_v49 = vstv %s7929_s30  ;;  %v8009_v55 = vsel %vm328_vm3, %v3560_v26, %v8863_v31  ;;  %s4978_s30 = sld [smem:[#allocation4 + $0xd2]] }
 0x46c   : > { %9127 = vst [vmem:[#allocation23_spill] sm:$0xff] %v7996_v20  ;;  %9128 = vst [vmem:[#allocation18_spill] sm:$0xff] %v8001_v49  ;;  %v4506_v60 = vmul.f32 %v7982_v3, %v7907_v58  ;;  %v3673_v45 = vstv %s7937_s5  ;;  %v3177_v26 = vstv %s7949_s8  ;;  %v8871_v11 = vrot.slane %v8013_v28, 1  ;;  %s5009_s5 = sld [smem:[#allocation4 + $0xed]]  ;;  %s4950_s8 = sld [smem:[#allocation4 + $0xba]] }
 0x46d   : > { %9129 = vst [vmem:[#allocation43_spill] sm:$0xff] %v8009_v55  ;;  %9130 = vst [vmem:[#allocation24_spill] sm:$0xff] %v8013_v28  ;;  %v4036_v31 = vrot.slane %v4030_v42, 1  ;;  %v3592_v55 = vmul.f32 %v8001_v49, %v7907_v58  ;;  %v8033_v20 = vmul.f32 %v8001_v49, %v7922_v44  ;;  %v8036_v3 = vstv %s7963_s21  ;;  %s8201_s21 = sld [smem:[#allocation4 + $0xd5]] }
 0x46e   : > { %9131 = vst [vmem:[#allocation22_spill] sm:$0xff] %v8022_v40  ;;  %v4512_v63 = vrot.slane %v4506_v60, 1  ;;  %9133 = vst [vmem:[#allocation57_spill] sm:$0xff] %v8036_v3  ;;  %v4149_v42 = vstv %s7965_s6  ;;  %v3178_v22 = vmul.f32 %v3177_v26, %v7648_v57  ;;  %v9135_v49 = vrot.slane %v8022_v40, 1  ;;  %s8203_s6 = sld [smem:[#allocation4 + $0xf0]] }
 0x46f   : > { %4140 = vrot.lane.b32.xlu1 %v4136_v43, %s5270_s25  ;;  %4142 = vrot.lane.b32.xlu0 %v4137_v21, %s5270_s25  ;;  %9132 = vst [vmem:[#allocation46_spill] sm:$0xff] %v8033_v20  ;;  %v3674_v43 = vmul.f32 %v3673_v45, %v7648_v57  ;;  %v3675_v21 = vmul.f32 %v3673_v45, %v7659_v61  ;;  %v3598_v51 = vrot.slane %v3592_v55, 2  ;;  %v8875_v45 = vrot.slane %v8033_v20, 2 }
 0x470   : > { %v8046_v60 = vsel %vm328_vm3, %v4036_v31, %v8871_v11  ;;  %v8054_v1 = vsel %vm328_vm3, %v4512_v63, %v9135_v49  ;;  %v4068_v31 = vmul.f32 %v8036_v3, %v7907_v58  ;;  %v8063_v11 = vmul.f32 %v8036_v3, %v7922_v44 }
 0x471   : > { %v3189_v12 = vpop.permute.xlu0 %3188  ;;  %9134 = vst [vmem:[#allocation54_spill] sm:$0xff] %v8046_v60  ;;  %9136 = vst [vmem:[#allocation47_spill] sm:$0xff] %v8054_v1  ;;  %v4150_v40 = vmul.f32 %v4149_v42, %v7648_v57  ;;  %v8069_v63 = vsel %vm388_vm4, %v3598_v51, %v8875_v45  ;;  %v8072_v49 = vstv %s8003_s10  ;;  %v3179_v57 = vmul.f32 %v3177_v26, %v7659_v61  ;;  %s4940_s10 = sld [smem:[#allocation4 + $0xb0]] }
 0x472   : > { %9137 = vst [vmem:[#allocation59_spill] sm:$0xff] %v8063_v11  ;;  %v3194_v28 = vadd.f32 %v3189_v12, %v3178_v22  ;;  %9138 = vst [vmem:[#allocation55_spill] sm:$0xff] %v8069_v63  ;;  %v4074_v1 = vrot.slane %v4068_v31, 2  ;;  %v8879_v3 = vrot.slane %v8063_v11, 2  ;;  %v4544_v12 = vmul.f32 %v8072_v49, %v7907_v58 }
 0x473   : > { %3678 = vrot.lane.b32.xlu1 %v3674_v43, %s5271_s15  ;;  %3680 = vrot.lane.b32.xlu0 %v3675_v21, %s5271_s15  ;;  %9139 = vst [vmem:[#allocation52_spill] sm:$0xff] %v8072_v49  ;;  %v4151_v21 = vmul.f32 %v4149_v42, %v7659_v61  ;;  %v3811_v51 = vstv %s8018_s7  ;;  %v8086_v45 = vmul.f32 %v8072_v49, %v7922_v44  ;;  %v8103_v11 = vstv %s8048_s28  ;;  %s4942_s7 = sld [smem:[#allocation4 + $0xb2]] }
 0x474   : > { %v8093_v42 = vsel %vm388_vm4, %v4074_v1, %v8879_v3  ;;  %v4550_v26 = vrot.slane %v4544_v12, 2  ;;  %v3812_v49 = vmul.f32 %v3811_v51, %v7887_v36  ;;  %9143 = vst [vmem:[#allocation61_spill] sm:$0xff] %v8103_v11  ;;  %v8118_v12 = vmul.f32 %v8103_v11, %v7922_v44  ;;  %s4970_s28 = sld [smem:[#allocation4 + $0xca]] }
 0x475   : > { %v3191_v55 = vpop.permute.xlu1 %3190  ;;  %v3203_v43 = vpop.permute.xlu0 %3202  ;;  %9140 = vst [vmem:[#allocation60_spill] sm:$0xff] %v8086_v45  ;;  %9141 = vst [vmem:[#allocation56_spill] sm:$0xff] %v8093_v42  ;;  %v8878_v31 = vrot.slane %v8086_v45, 2  ;;  %v4467_v20 = vstv %s5009_s5  ;;  %v3574_v63 = vstv %s4950_s8  ;;  %s4938_s5 = sld [smem:[#allocation4 + $0xae]]  ;;  %s4941_s8 = sld [smem:[#allocation4 + $0xb1]] }
 0x476   : > { %v3208_v22 = vadd.f32 %v3203_v43, %v3194_v28  ;;  %v3195_v61 = vadd.f32 %v3191_v55, %v3179_v57  ;;  %v3613_v55 = vmul.f32 %v8103_v11, %v7907_v58  ;;  %9145 = vst [vmem:[#allocation35_spill] sm:$0xff] %v8118_v12  ;;  %v4468_v60 = vmul.f32 %v4467_v20, %v7907_v58 }
 0x477   : > { %4154 = vrot.lane.b32.xlu1 %v4150_v40, %s5271_s15  ;;  %4156 = vrot.lane.b32.xlu0 %v4151_v21, %s5271_s15  ;;  %v3813_v40 = vmul.f32 %v3811_v51, %v7891_v16  ;;  %v4287_v21 = vstv %s8041_s9  ;;  %v8125_v51 = vstv %s8074_s11  ;;  %s4943_s9 = sld [smem:[#allocation4 + $0xb3]]  ;;  %s5001_s11 = sld [smem:[#allocation4 + $0xe5]] }
 0x478   : > { %v8096_v28 = vadd.f32 %v7840_v7, %v3208_v22  ;;  %v8110_v7 = vsel %vm388_vm4, %v4550_v26, %v8878_v31  ;;  %v4288_v57 = vmul.f32 %v4287_v21, %v7887_v36  ;;  %9147 = vst [vmem:[#allocation36_spill] sm:$0xff] %v8125_v51  ;;  %v3619_v26 = vrot.slane %v3613_v55, 2 }
 0x479   : > { %v3205_v43 = vpop.permute.xlu1 %3204  ;;  %9144 = vst [vmem:[#allocation58_spill] sm:$0xff] %v8110_v7  ;;  %v8134_v31 = vmul.f32 %v8125_v51, %v7922_v44 }
 0x47a   : > { %9142 = vst [vmem:[#allocation88_spill] sm:$0xff] %v8096_v28  ;;  %v3209_v1 = vadd.f32 %v3205_v43, %v3195_v61  ;;  %v4289_v61 = vmul.f32 %v4287_v21, %v7891_v16  ;;  %v8882_v43 = vrot.slane %v8118_v12, 2  ;;  %v8143_v21 = vstv %s5014_s23  ;;  %s4971_s23 = sld [smem:[#allocation4 + $0xcb]] }
 0x47b   : > { %3816 = vrot.lane.b32.xlu1 %v3812_v49, %s5270_s25  ;;  %3818 = vrot.lane.b32.xlu0 %v3813_v40, %s5270_s25  ;;  %v4089_v49 = vmul.f32 %v8125_v51, %v7907_v58  ;;  %v3825_v40 = vstv %s8082_s4  ;;  %9148 = vst [vmem:[#allocation26_spill] sm:$0xff] %v8134_v31  ;;  %9150 = vst [vmem:[#allocation28_spill] sm:$0xff] %v8143_v21  ;;  %v8884_v55 = vrot.slane %v8134_v31, 2  ;;  %s8382_s4 = sld [smem:[#allocation4 + $0xbd]] }
 0x47c   : > { %v8122_v22 = vadd.f32 %v7843_v24, %v3209_v1  ;;  %v8141_v24 = vsel %vm388_vm4, %v3619_v26, %v8882_v43  ;;  %v3826_v3 = vmul.f32 %v3825_v40, %v7887_v36  ;;  %v3827_v45 = vmul.f32 %v3825_v40, %v7891_v16 }
 0x47d   : > { %9149 = vst [vmem:[#allocation27_spill] sm:$0xff] %v8141_v24  ;;  %v4095_v1 = vrot.slane %v4089_v49, 2  ;;  %v4565_v51 = vmul.f32 %v8143_v21, %v7907_v58 }
 0x47e   : > { %9146 = vst [vmem:[#allocation25_spill] sm:$0xff] %v8122_v22 }
 0x47f   : > { %4292 = vrot.lane.b32.xlu1 %v4288_v57, %s5270_s25  ;;  %4294 = vrot.lane.b32.xlu0 %v4289_v61, %s5270_s25  ;;  %v8152_v57 = vmul.f32 %v8143_v21, %v7922_v44  ;;  %v4301_v61 = vstv %s8105_s22  ;;  %v8158_v26 = vsel %vm388_vm4, %v4095_v1, %v8884_v55  ;;  %v4571_v49 = vrot.slane %v4565_v51, 2  ;;  %s8394_s22 = sld [smem:[#allocation4 + $0xd8]] }
 0x480   : > { %9152 = vst [vmem:[#allocation30_spill] sm:$0xff] %v8158_v26  ;;  %v4302_v43 = vmul.f32 %v4301_v61, %v7887_v36  ;;  %v4303_v31 = vmul.f32 %v4301_v61, %v7891_v16  ;;  %v4439_v55 = vstv %s5007_s24  ;;  %v3977_v61 = vstv %s8162_s26  ;;  %s8412_s24 = sld [smem:[#allocation4 + $0xcd]]  ;;  %s8427_s26 = sld [smem:[#allocation4 + $0xe8]] }
 0x481   : > { %9151 = vst [vmem:[#allocation29_spill] sm:$0xff] %v8152_v57  ;;  %v8885_v40 = vrot.slane %v8152_v57, 2  ;;  %v3978_v57 = vmul.f32 %v3977_v61, %v7907_v58  ;;  %v3515_v26 = vstv %s4947_s29  ;;  %v3991_v21 = vstv %s4978_s30  ;;  %s8449_s29 = sld [smem:[#allocation4 + $0xe9]]  ;;  %s8569_s30 = sld [smem:[#allocation4 + $0xab]] }
 0x482   : > { %v3516_v12 = vmul.f32 %v3515_v26, %v7907_v58  ;;  %v3993_v24 = vmul.f32 %v3991_v21, %v7922_v44 }
 0x483   : > { %3830 = vrot.lane.b32.xlu1 %v3826_v3, %s5271_s15  ;;  %3832 = vrot.lane.b32.xlu0 %v3827_v45, %s5271_s15  ;;  %v8172_v1 = vsel %vm388_vm4, %v4571_v49, %v8885_v40  ;;  %v3963_v3 = vstv %s4976_s19  ;;  %v4453_v49 = vstv %s8165_s27  ;;  %v8184_v40 = vld [vmem:[#allocation2 + $0x40] sm:$0x3]  ;;  %s8396_s19 = sld [smem:[#allocation4 + $0xe6]] }
 0x484   : > { %9153 = vst [vmem:[#allocation31_spill] sm:$0xff] %v8172_v1  ;;  %v3964_v45 = vmul.f32 %v3963_v3, %v7907_v58  ;;  %v3965_v51 = vmul.f32 %v3963_v3, %v7922_v44  ;;  %v8189_v3 = vmul.f32 %v7651_v47, %v7818_v38  ;;  %v8193_v1 = vmul.f32 %v7654_v29, %v7818_v38  ;;  %s8437_s27 = sld [smem:[#allocation4 + $0xce]] }
 0x485   : > { %v3979_v47 = vmul.f32 %v3977_v61, %v7922_v44  ;;  %v4455_v29 = vmul.f32 %v4453_v49, %v7922_v44  ;;  %v3994_v7 = vmul.f32 %v3991_v21, %v8184_v40  ;;  %v3522_v11 = vrot.slane %v3516_v12, 1 }
 0x486   : > { %v3999_v22 = vrot.slane %v3993_v24, 1  ;;  %v4469_v12 = vmul.f32 %v4467_v20, %v7922_v44 }
 0x487   : > { %4306 = vrot.lane.b32.xlu1 %v4302_v43, %s5271_s15  ;;  %4308 = vrot.lane.b32.xlu0 %v4303_v31, %s5271_s15  ;;  %v4440_v43 = vmul.f32 %v4439_v55, %v7907_v58  ;;  %v4441_v31 = vmul.f32 %v4439_v55, %v7922_v44  ;;  %v4454_v55 = vmul.f32 %v4453_v49, %v7907_v58  ;;  %v4001_v28 = vrot.slane %v3994_v7, 1 }
 0x488   : > { %v4474_v7 = vrot.slane %v4468_v60, 1 }
 0x489   : > { %v8228_v24 = vsel %vm328_vm3, %v3999_v22, %v4001_v28 }
 0x48b   : > { %3968 = vrot.lane.b32.xlu1 %v3964_v45, %s5270_s25  ;;  %3970 = vrot.lane.b32.xlu0 %v3965_v51, %s5270_s25  ;;  %v9154_v45 = vstv %s7900_s12  ;;  %s4939_s12 = sld [smem:[#allocation4 + $0xaf]] }
 0x48c   : > { %v3503_v51 = vmul.f32 %v9154_v45, %v7922_v44  ;;  %v3992_v45 = vmul.f32 %v3991_v21, %v7907_v58  ;;  %v4470_v21 = vmul.f32 %v4467_v20, %v8184_v40 }
 0x48e   : > { %v3998_v49 = vrot.slane %v3992_v45, 1  ;;  %v3576_v45 = vmul.f32 %v3574_v63, %v7922_v44 }
 0x48f   : > { %4444 = vrot.lane.b32.xlu1 %v4440_v43, %s5270_s25  ;;  %4446 = vrot.lane.b32.xlu0 %v4441_v31, %s5270_s25  ;;  %v3517_v43 = vmul.f32 %v3515_v26, %v7922_v44  ;;  %v3518_v31 = vmul.f32 %v3515_v26, %v8184_v40 }
 0x490   : > { %v3582_v60 = vrot.slane %v3576_v45, 2 }
 0x491   : > { %v3523_v42 = vrot.slane %v3517_v43, 1  ;;  %v3525_v61 = vrot.slane %v3518_v31, 1  ;;  %v4477_v31 = vrot.slane %v4470_v21, 1 }
 0x493   : > { %3508 = vrot.lane.b32.xlu1 %v3503_v51, %s5271_s15  ;;  %3982 = vrot.lane.b32.xlu0 %v3978_v57, %s5271_s15  ;;  %v8216_v26 = vsel %vm328_vm3, %v3522_v11, %v3523_v42  ;;  %v8222_v43 = vsel %vm328_vm3, %v3523_v42, %v3525_v61  ;;  %v8225_v57 = vsel %vm328_vm3, %v3998_v49, %v3999_v22  ;;  %v4475_v51 = vrot.slane %v4469_v12, 1 }
 0x494   : > { %9155 = vst [vmem:[#allocation32_spill] sm:$0xff] %v8225_v57  ;;  %v3575_v11 = vmul.f32 %v3574_v63, %v7907_v58  ;;  %v3577_v42 = vmul.f32 %v3574_v63, %v8184_v40  ;;  %v4050_v61 = vstv %s8201_s21  ;;  %v4526_v49 = vstv %s8203_s6  ;;  %s4997_s21 = sld [smem:[#allocation4 + $0xe1]] }
 0x495   : > { %v8238_v57 = vsel %vm328_vm3, %v4474_v7, %v4475_v51  ;;  %v8241_v28 = vsel %vm328_vm3, %v4475_v51, %v4477_v31  ;;  %v4051_v22 = vmul.f32 %v4050_v61, %v7907_v58  ;;  %v4527_v21 = vmul.f32 %v4526_v49, %v7907_v58  ;;  %s4969_s6 = sld [smem:[#allocation4 + $0xc9]] }
 0x496   : > { %v3581_v20 = vrot.slane %v3575_v11, 2  ;;  %9156 = vst [vmem:[#allocation62_spill] sm:$0xff] %v8238_v57  ;;  %v3584_v12 = vrot.slane %v3577_v42, 2  ;;  %v3238_v63 = vrot.slane %v8189_v3, 1  ;;  %v4528_v7 = vmul.f32 %v4526_v49, %v7922_v44 }
 0x497   : > { %3984 = vrot.lane.b32.xlu1 %v3979_v47, %s5271_s15  ;;  %4458 = vrot.lane.b32.xlu0 %v4454_v55, %s5271_s15  ;;  %v4052_v47 = vmul.f32 %v4050_v61, %v7922_v44  ;;  %v4053_v55 = vmul.f32 %v4050_v61, %v8184_v40  ;;  %v4529_v51 = vmul.f32 %v4526_v49, %v8184_v40  ;;  %v4057_v45 = vrot.slane %v4051_v22, 2 }
 0x498   : > { %v8249_v11 = vsel %vm388_vm4, %v3581_v20, %v3582_v60  ;;  %v8257_v31 = vsel %vm388_vm4, %v3582_v60, %v3584_v12  ;;  %v4533_v61 = vrot.slane %v4527_v21, 2  ;;  %v4534_v3 = vrot.slane %v4528_v7, 2 }
 0x499   : > { %v4058_v42 = vrot.slane %v4052_v47, 2  ;;  %v4060_v58 = vrot.slane %v4053_v55, 2  ;;  %v4536_v57 = vrot.slane %v4529_v51, 2  ;;  %v3290_v20 = vmul.f32 %v7657_v6, %v7818_v38 }
 0x49a   : > { %v3259_v60 = vrot.slane %v8193_v1, 1  ;;  %v8272_v22 = vsel %vm388_vm4, %v4533_v61, %v4534_v3  ;;  %v3311_v6 = vmul.f32 %v7667_v8, %v7818_v38  ;;  %v3380_v47 = vstv %s4939_s12  ;;  %s5000_s12 = sld [smem:[#allocation4 + $0xe4]] }
 0x49b   : > { %4460 = vrot.lane.b32.xlu1 %v4455_v29, %s5271_s15  ;;  %3240 = vrot.lane.b32.xlu0 %v7703_v0, %s5270_s25  ;;  %v8262_v44 = vsel %vm388_vm4, %v4057_v45, %v4058_v42  ;;  %v8265_v29 = vsel %vm388_vm4, %v4058_v42, %v4060_v58  ;;  %v9157_v0 = vrot.slane %v7675_v35, 1  ;;  %9158 = vst [vmem:[#allocation63_spill] sm:$0xff] %v8272_v22  ;;  %v9160_v35 = vrot.slane %v7679_v2, 1 }
 0x49c   : > { %v8275_v12 = vsel %vm388_vm4, %v4534_v3, %v4536_v57  ;;  %v3297_v55 = vrot.slane %v3290_v20, 2  ;;  %v3382_v21 = vmul.f32 %v3380_v47, %v7891_v16  ;;  %v3318_v8 = vrot.slane %v3311_v6, 2 }
 0x49d   : > { %v3239_v49 = vsel %vm328_vm3, %v9157_v0, %v3238_v63  ;;  %9159 = vst [vmem:[#allocation39_spill] sm:$0xff] %v8275_v12  ;;  %v3260_v1 = vsel %vm328_vm3, %v9160_v35, %v3259_v60  ;;  %v8286_v63 = vld [vmem:[#allocation2 + $0x28] sm:$0x3]  ;;  %v3401_v57 = vstv %s4940_s10  ;;  %v9161_v7 = vrot.slane %v7685_v46, 2  ;;  %s4972_s10 = sld [smem:[#allocation4 + $0xcc]] }
 0x49e   : > { %v3388_v51 = vrot.slane %v3382_v21, 1  ;;  %v3383_v45 = vmul.f32 %v3380_v47, %v8286_v63  ;;  %v3403_v42 = vmul.f32 %v3401_v57, %v7891_v16  ;;  %v3402_v58 = vmul.f32 %v3401_v57, %v7887_v36 }
 0x49f   : > { %3242 = vrot.lane.b32.xlu1 %v3239_v49, %s5270_s25  ;;  %3261 = vrot.lane.b32.xlu0 %v7708_v25, %s5271_s15  ;;  %v3381_v25 = vmul.f32 %v3380_v47, %v7887_v36  ;;  %v3298_v2 = vsel %vm388_vm4, %v9161_v7, %v3297_v55  ;;  %v9162_v61 = vrot.slane %v7697_v17, 2  ;;  %v3404_v46 = vmul.f32 %v3401_v57, %v8286_v63 }
 0x4a0   : > { %v3439_v20 = vstv %s4942_s7  ;;  %v3390_v49 = vrot.slane %v3383_v45, 1  ;;  %v3409_v60 = vrot.slane %v3403_v42, 1  ;;  %v3460_v35 = vstv %s4943_s9  ;;  %s5003_s7 = sld [smem:[#allocation4 + $0xe7]] }
 0x4a1   : > { %v3319_v3 = vsel %vm388_vm4, %v9162_v61, %v3318_v8  ;;  %v3441_v6 = vmul.f32 %v3439_v20, %v7891_v16  ;;  %v3440_v47 = vmul.f32 %v3439_v20, %v7887_v36  ;;  %v3442_v17 = vmul.f32 %v3439_v20, %v8286_v63  ;;  %s8702_s9 = sld [smem:[#allocation4 + $0xcf]] }
 0x4a2   : > { %v3391_v55 = vsel %vm328_vm3, %v3388_v51, %v3390_v49  ;;  %v3461_v7 = vmul.f32 %v3460_v35, %v7887_v36  ;;  %v3707_v45 = vmul.f32 %v7681_v4, %v7818_v38 }
 0x4a3   : > { %3263 = vrot.lane.b32.xlu1 %v3260_v1, %s5271_s15  ;;  %3299 = vrot.lane.b32.xlu0 %v7717_v54, %s5270_s25  ;;  %v3387_v54 = vrot.slane %v3381_v25, 1  ;;  %v3462_v1 = vmul.f32 %v3460_v35, %v7891_v16  ;;  %v3411_v25 = vrot.slane %v3404_v46, 1  ;;  %v3447_v8 = vrot.slane %v3441_v6, 2 }
 0x4a4   : > { %v3446_v57 = vrot.slane %v3440_v47, 2  ;;  %v3467_v61 = vrot.slane %v3461_v7, 2  ;;  %v9164_v47 = vrot.slane %v7733_v37, 1  ;;  %v9166_v37 = vrot.slane %v7760_v32, 1 }
 0x4a5   : > { %v3389_v0 = vsel %vm328_vm3, %v3387_v54, %v3388_v51  ;;  %v3412_v42 = vsel %vm328_vm3, %v3409_v60, %v3411_v25  ;;  %v3468_v51 = vrot.slane %v3462_v1, 2  ;;  %v4204_v1 = vmul.f32 %v7743_v14, %v7818_v38 }
 0x4a6   : > { %v3448_v54 = vsel %vm388_vm4, %v3446_v57, %v3447_v8  ;;  %v4242_v25 = vmul.f32 %v7770_v18, %v7818_v38  ;;  %v3787_v32 = vmul.f32 %v7785_v50, %v7818_v38  ;;  %v9168_v18 = vrot.slane %v7781_v41, 2 }
 0x4a7   : > { %3301 = vrot.lane.b32.xlu1 %v3298_v2, %s5270_s25  ;;  %3320 = vrot.lane.b32.xlu0 %v7729_v9, %s5271_s15  ;;  %v3408_v9 = vrot.slane %v3402_v58, 1  ;;  %v3449_v2 = vrot.slane %v3442_v17, 2  ;;  %v3463_v58 = vmul.f32 %v3460_v35, %v8286_v63  ;;  %v3469_v20 = vsel %vm388_vm4, %v3467_v61, %v3468_v51 }
 0x4a8   : > { %v3794_v57 = vrot.slane %v3787_v32, 2  ;;  %v9169_v41 = vrot.slane %v7799_v59, 2 }
 0x4a9   : > { %v3410_v21 = vsel %vm328_vm3, %v3408_v9, %v3409_v60  ;;  %v3450_v46 = vsel %vm388_vm4, %v3447_v8, %v3449_v2  ;;  %v3470_v4 = vrot.slane %v3463_v58, 2  ;;  %v9163_v60 = vrot.slane %v7724_v39, 1 }
 0x4aa   : > { %v9165_v39 = vrot.slane %v7741_v19, 1  ;;  %v9167_v19 = vrot.slane %v7766_v52, 2  ;;  %v4263_v52 = vmul.f32 %v7801_v34, %v7818_v38  ;;  %v3795_v2 = vsel %vm388_vm4, %v9169_v41, %v3794_v57 }
 0x4ab   : > { %3322 = vrot.lane.b32.xlu1 %v3319_v3, %s5271_s15  ;;  %3392 = vrot.lane.b32.xlu0 %v3389_v0, %s5270_s25  ;;  %v4183_v3 = vmul.f32 %v7689_v30, %v7818_v38  ;;  %v3714_v0 = vrot.slane %v3707_v45, 1  ;;  %v3471_v49 = vsel %vm388_vm4, %v3468_v51, %v3470_v4  ;;  %v3728_v30 = vmul.f32 %v7712_v56, %v7818_v38 }
 0x4ac   : > { %v4270_v45 = vrot.slane %v4263_v52, 2  ;;  %v9170_v58 = vrot.slane %v7809_v13, 2  ;;  %v3877_v4 = vstv %s4971_s23  ;;  %s8743_s23 = sld [smem:[#allocation7 + $0x201]] }
 0x4ad   : > { %v3715_v6 = vsel %vm328_vm3, %v9163_v60, %v3714_v0  ;;  %v4190_v9 = vrot.slane %v4183_v3, 1  ;;  %v3735_v17 = vrot.slane %v3728_v30, 1  ;;  %v9171_v30 = vld [vmem:[#allocation49_spill] sm:$0xff]  ;;  %v3878_v52 = vmul.f32 %v3877_v4, %v7887_v36 }
 0x4ae   : > { %v4271_v61 = vsel %vm388_vm4, %v9170_v58, %v4270_v45 }
 0x4af   : > { %3394 = vrot.lane.b32.xlu1 %v3391_v55, %s5270_s25  ;;  %3413 = vrot.lane.b32.xlu0 %v3410_v21, %s5271_s15  ;;  %v4191_v35 = vsel %vm328_vm3, %v9164_v47, %v4190_v9  ;;  %v3736_v56 = vsel %vm328_vm3, %v9165_v39, %v3735_v17  ;;  %v4211_v55 = vrot.slane %v4204_v1, 1  ;;  %v3766_v21 = vmul.f32 %v7750_v48, %v7818_v38  ;;  %v5147_v17 = vld [vmem:[#allocation2] sm:$0xff]  ;;  %v5148_v39 = vld [vmem:[#allocation2 + $0x8] sm:$0xff] }
 0x4b1   : > { %v4212_v14 = vsel %vm328_vm3, %v9166_v37, %v4211_v55  ;;  %v4129_v55 = vstv %s8394_s22  ;;  %s8745_s22 = sld [smem:[#allocation7 + $0x281]] }
 0x4b2   : > { %v4131_v41 = vmul.f32 %v5148_v39, %v4129_v55 }
 0x4b3   : > { %3415 = vrot.lane.b32.xlu1 %v3412_v42, %s5271_s15  ;;  %3451 = vrot.lane.b32.xlu0 %v3448_v54, %s5270_s25 }
 0x4b7   : > { %3453 = vrot.lane.b32.xlu1 %v3450_v46, %s5270_s25  ;;  %3472 = vrot.lane.b32.xlu0 %v3469_v20, %s5271_s15  ;;  %v3653_v20 = vstv %s8382_s4  ;;  %s8741_s4 = sld [smem:[#allocation7 + $0x280]] }
 0x4b8   : > { %v3654_v1 = vmul.f32 %v5147_v17, %v3653_v20 }
 0x4b9   : > { %v8367_v8 = vpop.permute.xlu0 %3340 }
 0x4bb   : > { %3474 = vrot.lane.b32.xlu1 %v3471_v49, %s5271_s15  ;;  %3718 = vrot.lane.b32.xlu0 %v3715_v6, %s5270_s25  ;;  %v3879_v6 = vmul.f32 %v3877_v4, %v7891_v16 }
 0x4bd   : > { %v8377_v7 = vpop.permute.xlu1 %3342  ;;  %v8384_v50 = vpop.permute.xlu0 %3354 }
 0x4bf   : > { %3716 = vrot.lane.b32.xlu1 %v7748_v62, %s5270_s25  ;;  %4194 = vrot.lane.b32.xlu0 %v4191_v35, %s5270_s25  ;;  %v3773_v62 = vrot.slane %v3766_v21, 2  ;;  %v4353_v21 = vstv %s8396_s19  ;;  %s8747_s19 = sld [smem:[#allocation7 + $0x202]] }
 0x4c1   : > { %v3774_v48 = vsel %vm388_vm4, %v9167_v19, %v3773_v62  ;;  %v8398_v42 = vpop.permute.xlu1 %3356  ;;  %v3885_v19 = vrot.slane %v3879_v6, 1 }
 0x4c3   : > { %4192 = vrot.lane.b32.xlu1 %v7755_v27, %s5270_s25  ;;  %3739 = vrot.lane.b32.xlu0 %v3736_v56, %s5271_s15  ;;  %v4249_v27 = vrot.slane %v4242_v25, 2  ;;  %v3655_v56 = vmul.f32 %v5148_v39, %v3653_v20  ;;  %v4354_v20 = vmul.f32 %v4353_v21, %v7887_v36 }
 0x4c5   : > { %v4360_v39 = vrot.slane %v4354_v20, 1 }
 0x4c7   : > { %3737 = vrot.lane.b32.xlu1 %v7775_v15, %s5271_s15  ;;  %4215 = vrot.lane.b32.xlu0 %v4212_v14, %s5271_s15  ;;  %v4250_v15 = vsel %vm388_vm4, %v9168_v18, %v4249_v27  ;;  %v4355_v18 = vmul.f32 %v4353_v21, %v7891_v16 }
 0x4cb   : > { %4213 = vrot.lane.b32.xlu1 %v7790_v10, %s5271_s15  ;;  %3777 = vrot.lane.b32.xlu0 %v3774_v48, %s5270_s25  ;;  %v3856_v10 = vstv %s4970_s28  ;;  %s8708_s28 = sld [smem:[#allocation4 + $0xea]] }
 0x4cc   : > { %v3858_v34 = vmul.f32 %v3856_v10, %v7891_v16  ;;  %v3859_v38 = vmul.f32 %v3856_v10, %v8286_v63  ;;  %v3857_v46 = vmul.f32 %v3856_v10, %v7887_v36  ;;  %v4130_v10 = vmul.f32 %v5147_v17, %v4129_v55 }
 0x4cd   : > { %v3936_v55 = vstv %s8437_s27 }
 0x4ce   : > { %v3866_v3 = vrot.slane %v3859_v38, 1  ;;  %v3863_v47 = vrot.slane %v3857_v46, 1  ;;  %v3884_v46 = vrot.slane %v3878_v52, 1 }
 0x4cf   : > { %3775 = vrot.lane.b32.xlu1 %v7795_v33, %s5270_s25  ;;  %4253 = vrot.lane.b32.xlu0 %v4250_v15, %s5270_s25  ;;  %v4332_v33 = vstv %s5001_s11  ;;  %v4356_v15 = vmul.f32 %v4353_v21, %v8286_v63  ;;  %v9172_v21 = vld [vmem:[#allocation50_spill] sm:$0xff]  ;;  %s4953_s11 = sld [smem:[#allocation7 + $0x200]] }
 0x4d0   : > { %v4334_v54 = vmul.f32 %v4332_v33, %v7891_v16  ;;  %v4335_v51 = vmul.f32 %v4332_v33, %v8286_v63  ;;  %v4333_v35 = vmul.f32 %v4332_v33, %v7887_v36  ;;  %v3886_v6 = vsel %vm328_vm3, %v3884_v46, %v3885_v19 }
 0x4d2   : > { %v4340_v49 = vrot.slane %v4334_v54, 1  ;;  %v4342_v60 = vrot.slane %v4335_v51, 1  ;;  %v4339_v57 = vrot.slane %v4333_v35, 1 }
 0x4d3   : > { %4251 = vrot.lane.b32.xlu1 %v7814_v53, %s5270_s25  ;;  %3798 = vrot.lane.b32.xlu0 %v3795_v2, %s5271_s15  ;;  %v3864_v53 = vrot.slane %v3858_v34, 1  ;;  %v3915_v2 = vstv %s8412_s24  ;;  %s8750_s24 = sld [smem:[#allocation7 + $0x282]] }
 0x4d4   : > { %v4343_v25 = vsel %vm328_vm3, %v4340_v49, %v4342_v60  ;;  %v4341_v38 = vsel %vm328_vm3, %v4339_v57, %v4340_v49  ;;  %v3917_v54 = vmul.f32 %v3915_v2, %v7891_v16  ;;  %v3918_v51 = vmul.f32 %v3915_v2, %v8286_v63 }
 0x4d5   : > { %v8400_v59 = vpop.permute.xlu0 %3492  ;;  %v3867_v9 = vsel %vm328_vm3, %v3864_v53, %v3866_v3  ;;  %v3865_v62 = vsel %vm328_vm3, %v3863_v47, %v3864_v53  ;;  %v4361_v53 = vrot.slane %v4355_v18, 1  ;;  %v4363_v3 = vrot.slane %v4356_v15, 1 }
 0x4d6   : > { %v3938_v18 = vmul.f32 %v3936_v55, %v7891_v16 }
 0x4d7   : > { %3796 = vrot.lane.b32.xlu1 %v7824_v23, %s5271_s15  ;;  %4274 = vrot.lane.b32.xlu0 %v4271_v61, %s5271_s15  ;;  %v3880_v23 = vmul.f32 %v3877_v4, %v8286_v63  ;;  %v4391_v4 = vstv %s8427_s26  ;;  %v4364_v17 = vsel %vm328_vm3, %v4361_v53, %v4363_v3  ;;  %s5028_s26 = smul.u32 48, %s9240_s16 }
 0x4d9   : > { %v8414_v0 = vpop.permute.xlu1 %3494  ;;  %v8416_v13 = vpop.permute.xlu0 %3506  ;;  %v3887_v48 = vrot.slane %v3880_v23, 1  ;;  %v3923_v23 = vrot.slane %v3917_v54, 2 }
 0x4db   : > { %4272 = vrot.lane.b32.xlu1 %v9171_v30, %s5271_s15  ;;  %3870 = vrot.lane.b32.xlu0 %v3867_v9, %s5270_s25  ;;  %v3888_v33 = vsel %vm328_vm3, %v3885_v19, %v3887_v48  ;;  %v3925_v9 = vrot.slane %v3918_v51, 2  ;;  %v4393_v30 = vmul.f32 %v4391_v4, %v7891_v16  ;;  %v4362_v48 = vsel %vm328_vm3, %v4360_v39, %v4361_v53 }
 0x4dc   : > { %v4412_v53 = vstv %s8449_s29 }
 0x4dd   : > { %v3665_v37 = vpop.permute.xlu1 %3664  ;;  %v3667_v14 = vpop.permute.xlu0 %3666  ;;  %v4414_v20 = vmul.f32 %v4412_v53, %v7891_v16 }
 0x4de   : > { %v3670_v27 = vadd.f32 %v3665_v37, %v3654_v1  ;;  %v3671_v32 = vadd.f32 %v3667_v14, %v3655_v56  ;;  %v4394_v1 = vmul.f32 %v4391_v4, %v8286_v63  ;;  %v3916_v56 = vmul.f32 %v3915_v2, %v7887_v36  ;;  %v9173_v14 = vld [vmem:[#allocation44_spill] sm:$0xff] }
 0x4df   : > { %3868 = vrot.lane.b32.xlu1 %v3865_v62, %s5270_s25  ;;  %4346 = vrot.lane.b32.xlu0 %v4343_v25, %s5270_s25  ;;  %v4392_v2 = vmul.f32 %v4391_v4, %v7887_v36  ;;  %v4415_v4 = vmul.f32 %v4412_v53, %v8286_v63 }
 0x4e0   : > { %v4401_v52 = vrot.slane %v4394_v1, 2 }
 0x4e1   : > { %v4141_v45 = vpop.permute.xlu1 %4140  ;;  %v4143_v34 = vpop.permute.xlu0 %4142 }
 0x4e2   : > { %v4146_v58 = vadd.f32 %v4141_v45, %v4130_v10  ;;  %v4147_v61 = vadd.f32 %v4143_v34, %v4131_v41  ;;  %v3939_v10 = vmul.f32 %v3936_v55, %v8286_v63  ;;  %v3922_v41 = vrot.slane %v3916_v56, 2  ;;  %v9174_v45 = vld [vmem:[#allocation41_spill] sm:$0xff] }
 0x4e3   : > { %4344 = vrot.lane.b32.xlu1 %v4341_v38, %s5270_s25  ;;  %3891 = vrot.lane.b32.xlu0 %v3888_v33, %s5271_s15  ;;  %v9175_v38 = vld [vmem:[#allocation51_spill] sm:$0xff] }
 0x4e4   : > { %v3946_v46 = vrot.slane %v3939_v10, 2 }
 0x4e5   : > { %v3679_v49 = vpop.permute.xlu1 %3678  ;;  %v3681_v60 = vpop.permute.xlu0 %3680 }
 0x4e6   : > { %v3684_v47 = vadd.f32 %v3679_v49, %v3670_v27  ;;  %v3685_v35 = vadd.f32 %v3681_v60, %v3671_v32  ;;  %v3926_v27 = vsel %vm388_vm4, %v3923_v23, %v3925_v9  ;;  %v4399_v32 = vrot.slane %v4393_v30, 2 }
 0x4e7   : > { %3889 = vrot.lane.b32.xlu1 %v3886_v6, %s5271_s15  ;;  %4367 = vrot.lane.b32.xlu0 %v4364_v17, %s5271_s15  ;;  %v4398_v49 = vrot.slane %v4392_v2, 2  ;;  %v3937_v60 = vmul.f32 %v3936_v55, %v7887_v36  ;;  %v4413_v17 = vmul.f32 %v4412_v53, %v7887_v36  ;;  %v9182_v53 = vld [vmem:[#allocation20_spill] sm:$0xff] }
 0x4e8   : > { %v8458_v37 = vadd.f32 %v9172_v21, %v3685_v35  ;;  %v8461_v62 = vadd.f32 %v9173_v14, %v3684_v47  ;;  %v4402_v3 = vsel %vm388_vm4, %v4399_v32, %v4401_v52  ;;  %v4420_v47 = vrot.slane %v4414_v20, 2  ;;  %v9176_v21 = vld [vmem:[#allocation86_spill] sm:$0xff] }
 0x4e9   : > { %v4155_v25 = vpop.permute.xlu1 %4154  ;;  %v4157_v19 = vpop.permute.xlu0 %4156  ;;  %v4422_v35 = vrot.slane %v4415_v4, 2  ;;  %v3943_v16 = vrot.slane %v3937_v60, 2  ;;  %v3535_v14 = vmul.f32 %v9176_v21, %v8184_v40  ;;  %v9178_v52 = vld [vmem:[#allocation14_spill] sm:$0xff]  ;;  %v9184_v4 = vld [vmem:[#allocation13_spill] sm:$0xff]  ;;  %v9185_v60 = vld [vmem:[#allocation23_spill] sm:$0xff] }
 0x4ea   : > { %v4160_v15 = vadd.f32 %v4155_v25, %v4146_v58  ;;  %v4161_v57 = vadd.f32 %v4157_v19, %v4147_v61  ;;  %v3924_v58 = vsel %vm388_vm4, %v3922_v41, %v3923_v23  ;;  %v3944_v61 = vrot.slane %v3938_v18, 2  ;;  %v9189_v21 = vld [vmem:[#allocation43_spill] sm:$0xff] }
 0x4eb   : > { %4365 = vrot.lane.b32.xlu1 %v4362_v48, %s5271_s15  ;;  %3929 = vrot.lane.b32.xlu0 %v3926_v27, %s5270_s25  ;;  %v4400_v23 = vsel %vm388_vm4, %v4398_v49, %v4399_v32  ;;  %v4423_v55 = vsel %vm388_vm4, %v4420_v47, %v4422_v35  ;;  %v4419_v25 = vrot.slane %v4413_v17, 2  ;;  %v3542_v27 = vrot.slane %v3535_v14, 1  ;;  %v9177_v32 = vld [vmem:[#allocation87_spill] sm:$0xff] }
 0x4ec   : > { %v8471_v34 = vadd.f32 %v9174_v45, %v4161_v57  ;;  %v8474_v33 = vadd.f32 %v9175_v38, %v4160_v15  ;;  %v3947_v30 = vsel %vm388_vm4, %v3944_v61, %v3946_v46  ;;  %v3945_v56 = vsel %vm388_vm4, %v3943_v16, %v3944_v61  ;;  %v9180_v45 = vld [vmem:[#allocation89_spill] sm:$0xff] }
 0x4ed   : > { %v8476_v54 = vpop.permute.xlu1 %3816  ;;  %v8478_v51 = vpop.permute.xlu0 %3818  ;;  %v4421_v36 = vsel %vm388_vm4, %v4419_v25, %v4420_v47  ;;  %v4011_v18 = vmul.f32 %v9177_v32, %v8184_v40  ;;  %v9179_v10 = vrot.slane %v9178_v52, 1  ;;  %v4487_v38 = vmul.f32 %v9180_v45, %v8184_v40  ;;  %v9186_v47 = vld [vmem:[#allocation16_spill] sm:$0xff]  ;;  %v9192_v52 = vld [vmem:[#allocation17_spill] sm:$0xff] }
 0x4ee   : > { %v3556_v49 = vmul.f32 %v9184_v4, %v8184_v40  ;;  %v9187_v35 = vrot.slane %v9186_v47, 1 }
 0x4ef   : > { %3927 = vrot.lane.b32.xlu1 %v3924_v58, %s5270_s25  ;;  %4405 = vrot.lane.b32.xlu0 %v4402_v3, %s5270_s25  ;;  %v3543_v41 = vsel %vm328_vm3, %v9179_v10, %v3542_v27  ;;  %v4018_v2 = vrot.slane %v4011_v18, 1  ;;  %v9181_v58 = vld [vmem:[#allocation19_spill] sm:$0xff]  ;;  %v9183_v3 = vrot.slane %v9182_v53, 1  ;;  %v4494_v20 = vrot.slane %v4487_v38, 1  ;;  %v9194_v38 = vld [vmem:[#allocation18_spill] sm:$0xff]  ;;  %v9195_v53 = vld [vmem:[#allocation88_spill] sm:$0xff] }
 0x4f0   : > { %v3563_v17 = vrot.slane %v3556_v49, 1  ;;  %v4508_v10 = vmul.f32 %v9192_v52, %v8184_v40  ;;  %v9203_v52 = vld [vmem:[#allocation55_spill] sm:$0xff] }
 0x4f1   : > { %v8488_v6 = vpop.permute.xlu1 %4292  ;;  %v8490_v9 = vpop.permute.xlu0 %4294  ;;  %v4019_v46 = vsel %vm328_vm3, %v9183_v3, %v4018_v2  ;;  %v4495_v16 = vsel %vm328_vm3, %v9187_v35, %v4494_v20 }
 0x4f2   : > { %v4515_v49 = vrot.slane %v4508_v10, 1  ;;  %v9204_v10 = vld [vmem:[#allocation42_spill] sm:$0xff] }
 0x4f3   : > { %4403 = vrot.lane.b32.xlu1 %v4400_v23, %s5270_s25  ;;  %3950 = vrot.lane.b32.xlu0 %v3947_v30, %s5271_s15 }
 0x4f5   : > { %v8497_v1 = vpop.permute.xlu1 %3830  ;;  %v8499_v39 = vpop.permute.xlu0 %3832 }
 0x4f7   : > { %3948 = vrot.lane.b32.xlu1 %v3945_v56, %s5271_s15  ;;  %4426 = vrot.lane.b32.xlu0 %v4423_v55, %s5271_s15  ;;  %v9188_v56 = vld [vmem:[#allocation21_spill] sm:$0xff] }
 0x4f8   : > { %v4032_v55 = vmul.f32 %v9188_v56, %v8184_v40 }
 0x4f9   : > { %v8507_v19 = vpop.permute.xlu1 %4306  ;;  %v8509_v48 = vpop.permute.xlu0 %4308 }
 0x4fa   : > { %v4039_v18 = vrot.slane %v4032_v55, 1 }
 0x4fb   : > { %4424 = vrot.lane.b32.xlu1 %v4421_v36, %s5271_s15  ;;  %3544 = vrot.lane.b32.xlu0 %v7978_v5, %s5270_s25  ;;  %v9190_v36 = vld [vmem:[#allocation15_spill] sm:$0xff] }
 0x4fc   : > { %v9191_v27 = vrot.slane %v9190_v36, 1 }
 0x4fd   : > { %v8517_v15 = vpop.permute.xlu1 %3968  ;;  %v8519_v57 = vpop.permute.xlu0 %3970 }
 0x4fe   : > { %v3564_v32 = vsel %vm328_vm3, %v9191_v27, %v3563_v17  ;;  %v9199_v17 = vld [vmem:[#allocation25_spill] sm:$0xff] }
 0x4ff   : > { %3546 = vrot.lane.b32.xlu1 %v3543_v41, %s5270_s25  ;;  %4020 = vrot.lane.b32.xlu0 %v9181_v58, %s5270_s25  ;;  %v9193_v41 = vld [vmem:[#allocation54_spill] sm:$0xff]  ;;  %v3594_v58 = vmul.f32 %v9194_v38, %v8184_v40 }
 0x501   : > { %v8529_v61 = vpop.permute.xlu1 %4444  ;;  %v8531_v5 = vpop.permute.xlu0 %4446 }
 0x503   : > { %4022 = vrot.lane.b32.xlu1 %v4019_v46, %s5270_s25  ;;  %4496 = vrot.lane.b32.xlu0 %v9185_v60, %s5270_s25  ;;  %v9196_v46 = vld [vmem:[#allocation24_spill] sm:$0xff]  ;;  %v9198_v60 = vld [vmem:[#allocation47_spill] sm:$0xff] }
 0x504   : > { %v9197_v20 = vrot.slane %v9196_v46, 1  ;;  %v3329_v46 = vstv %s8569_s30  ;;  %s217_s30 = scalar_lea.vmem %s8789_s3, %s5028_s26 }
 0x505   : > { %v8541_v23 = vpop.permute.xlu1 %3508  ;;  %v8543_v30 = vpop.permute.xlu0 %3982 }
 0x506   : > { %v4040_v4 = vsel %vm328_vm3, %v9197_v20, %v4039_v18 }
 0x507   : > { %4498 = vrot.lane.b32.xlu1 %v4495_v16, %s5270_s25  ;;  %3565 = vrot.lane.b32.xlu0 %v9189_v21, %s5271_s15  ;;  %v3601_v16 = vrot.slane %v3594_v58, 2  ;;  %v9200_v21 = vld [vmem:[#allocation22_spill] sm:$0xff] }
 0x508   : > { %v9201_v36 = vrot.slane %v9200_v21, 1  ;;  %v9205_v58 = vld [vmem:[#allocation46_spill] sm:$0xff]  ;;  %v3363_v21 = vstv %s4938_s5 }
 0x509   : > { %v8553_v14 = vpop.permute.xlu1 %3984  ;;  %v8555_v25 = vpop.permute.xlu0 %4458 }
 0x50a   : > { %v4516_v27 = vsel %vm328_vm3, %v9201_v36, %v4515_v49 }
 0x50b   : > { %3567 = vrot.lane.b32.xlu1 %v3564_v32, %s5271_s15  ;;  %4041 = vrot.lane.b32.xlu0 %v9193_v41, %s5271_s15  ;;  %v9202_v32 = vld [vmem:[#allocation57_spill] sm:$0xff] }
 0x50c   : > { %v4070_v18 = vmul.f32 %v9202_v32, %v8184_v40 }
 0x50d   : > { %v8565_v2 = vpop.permute.xlu1 %4460  ;;  %v3241_v45 = vpop.permute.xlu0 %3240 }
 0x50e   : > { %v3246_v3 = vadd.f32 %v3241_v45, %v9195_v53  ;;  %v9206_v53 = vrot.slane %v9205_v58, 2  ;;  %v4077_v49 = vrot.slane %v4070_v18, 2 }
 0x50f   : > { %4043 = vrot.lane.b32.xlu1 %v4040_v4, %s5271_s15  ;;  %4517 = vrot.lane.b32.xlu0 %v9198_v60, %s5271_s15  ;;  %v9207_v60 = vld [vmem:[#allocation52_spill] sm:$0xff] }
 0x511   : > { %v3243_v47 = vpop.permute.xlu1 %3242  ;;  %v3262_v35 = vpop.permute.xlu0 %3261 }
 0x512   : > { %v3247_v56 = vadd.f32 %v3243_v47, %v9199_v17  ;;  %v3267_v55 = vadd.f32 %v3262_v35, %v3246_v3  ;;  %v3602_v3 = vsel %vm388_vm4, %v9206_v53, %v3601_v16  ;;  %v4546_v47 = vmul.f32 %v9207_v60, %v8184_v40  ;;  %v9208_v35 = vld [vmem:[#allocation56_spill] sm:$0xff] }
 0x513   : > { %4519 = vrot.lane.b32.xlu1 %v4516_v27, %s5271_s15  ;;  %3603 = vrot.lane.b32.xlu0 %v9203_v52, %s5270_s25  ;;  %v9209_v17 = vld [vmem:[#allocation40_spill] sm:$0xff]  ;;  %v8598_v27 = vld [vmem:[#allocation2 + $0x18] sm:$0xff]  ;;  %v9210_v52 = vld [vmem:[#allocation61_spill] sm:$0xff] }
 0x514   : > { %v3284_v41 = vadd.f32 %v9204_v10, %v3267_v55  ;;  %v3330_v16 = vmul.f32 %v8598_v27, %v3329_v46  ;;  %v3615_v10 = vmul.f32 %v9210_v52, %v8184_v40  ;;  %v3364_v60 = vmul.f32 %v8598_v27, %v3363_v21 }
 0x515   : > { %v3264_v45 = vpop.permute.xlu1 %3263  ;;  %v3300_v38 = vpop.permute.xlu0 %3299 }
 0x516   : > { %v3268_v20 = vadd.f32 %v3264_v45, %v3247_v56  ;;  %v3305_v4 = vadd.f32 %v3300_v38, %v3284_v41  ;;  %v8601_v56 = vld [vmem:[#allocation2 + $0x20] sm:$0xff] }
 0x517   : > { %3605 = vrot.lane.b32.xlu1 %v3602_v3, %s5270_s25  ;;  %4079 = vrot.lane.b32.xlu0 %v9208_v35, %s5270_s25  ;;  %v3365_v18 = vmul.f32 %v8601_v56, %v3363_v21  ;;  %v9211_v38 = vld [vmem:[#allocation59_spill] sm:$0xff]  ;;  %v4553_v3 = vrot.slane %v4546_v47, 2  ;;  %v3331_v12 = vmul.f32 %v8601_v56, %v3329_v46 }
 0x518   : > { %v3285_v55 = vadd.f32 %v9209_v17, %v3268_v20  ;;  %v9212_v58 = vrot.slane %v9211_v38, 2  ;;  %v9213_v20 = vld [vmem:[#allocation58_spill] sm:$0xff]  ;;  %v3422_v17 = vstv %s4941_s8  ;;  %v9217_v46 = vld [vmem:[#allocation27_spill] sm:$0xff] }
 0x519   : > { %v3302_v36 = vpop.permute.xlu1 %3301  ;;  %v3321_v32 = vpop.permute.xlu0 %3320  ;;  %v3371_v52 = vrot.slane %v3365_v18, 1  ;;  %v3424_v18 = vmul.f32 %v8601_v56, %v3422_v17 }
 0x51a   : > { %v3306_v41 = vadd.f32 %v3302_v36, %v3285_v55  ;;  %v3326_v45 = vadd.f32 %v3321_v32, %v3305_v4  ;;  %v4078_v53 = vsel %vm388_vm4, %v9212_v58, %v4077_v49  ;;  %v3366_v4 = vmul.f32 %v3363_v21, %v8286_v63  ;;  %v9214_v32 = vld [vmem:[#allocation60_spill] sm:$0xff] }
 0x51b   : > { %4081 = vrot.lane.b32.xlu1 %v4078_v53, %s5270_s25  ;;  %4555 = vrot.lane.b32.xlu0 %v9213_v20, %s5270_s25  ;;  %v3622_v36 = vrot.slane %v3615_v10, 2  ;;  %v9215_v38 = vrot.slane %v9214_v32, 2  ;;  %v9216_v53 = vld [vmem:[#allocation36_spill] sm:$0xff] }
 0x51c   : > { %v3332_v35 = vadd.f32 %v3330_v16, %v3326_v45  ;;  %v4091_v20 = vmul.f32 %v9216_v53, %v8184_v40  ;;  %v3370_v16 = vrot.slane %v3364_v60, 1  ;;  %v3423_v60 = vmul.f32 %v8598_v27, %v3422_v17 }
 0x51d   : > { %v3323_v22 = vpop.permute.xlu1 %3322  ;;  %v3393_v55 = vpop.permute.xlu0 %3392  ;;  %v4554_v58 = vsel %vm388_vm4, %v9215_v38, %v4553_v3  ;;  %v9218_v3 = vld [vmem:[#allocation35_spill] sm:$0xff] }
 0x51e   : > { %v3346_v49 = vadd.f32 %v8367_v8, %v3332_v35  ;;  %v3327_v47 = vadd.f32 %v3323_v22, %v3306_v41  ;;  %v3372_v22 = vsel %vm328_vm3, %v3370_v16, %v3371_v52  ;;  %v3373_v8 = vrot.slane %v3366_v4, 1  ;;  %v9221_v4 = vld [vmem:[#allocation30_spill] sm:$0xff] }
 0x51f   : > { %4557 = vrot.lane.b32.xlu1 %v4554_v58, %s5270_s25  ;;  %3624 = vrot.lane.b32.xlu0 %v9217_v46, %s5271_s15  ;;  %v9219_v35 = vrot.slane %v9218_v3, 2  ;;  %s8631_s25 = sld [smem:[#allocation4 + $0xb4]]  ;;  %v4098_v53 = vrot.slane %v4091_v20, 2 }
 0x520   : > { %v3333_v21 = vadd.f32 %v3331_v12, %v3327_v47  ;;  %v3360_v10 = vadd.f32 %v8384_v50, %v3346_v49  ;;  %v9220_v12 = vld [vmem:[#allocation28_spill] sm:$0xff]  ;;  %v3430_v49 = vrot.slane %v3424_v18, 2  ;;  %v3425_v47 = vmul.f32 %v3422_v17, %v8286_v63  ;;  %v9224_v17 = vld [vmem:[#allocation31_spill] sm:$0xff] }
 0x521   : > { %v3395_v41 = vpop.permute.xlu1 %3394  ;;  %v3414_v45 = vpop.permute.xlu0 %3413  ;;  %v3623_v32 = vsel %vm388_vm4, %v9219_v35, %v3622_v36  ;;  %v4567_v50 = vmul.f32 %v9220_v12, %v8184_v40  ;;  %v3374_v46 = vsel %vm328_vm3, %v3371_v52, %v3373_v8  ;;  %v9222_v40 = vld [vmem:[#allocation26_spill] sm:$0xff]  ;;  %v9225_v12 = vld [vmem:[#allocation29_spill] sm:$0xff] }
 0x522   : > { %v3347_v38 = vadd.f32 %v8377_v7, %v3333_v21  ;;  %v3377_v58 = vadd.f32 %v3372_v22, %v3360_v10  ;;  %v3429_v21 = vrot.slane %v3423_v60, 2  ;;  %v9223_v3 = vrot.slane %v9222_v40, 2  ;;  %v8660_v40 = vld [vmem:[#allocation2 + $0x38] sm:$0xff] }
 0x523   : > { %3626 = vrot.lane.b32.xlu1 %v3623_v32, %s5271_s15  ;;  %4100 = vrot.lane.b32.xlu0 %v9221_v4, %s5271_s15  ;;  %v4574_v32 = vrot.slane %v4567_v50, 2  ;;  %v9226_v4 = vrot.slane %v9225_v12, 2 }
 0x524   : > { %v3398_v36 = vadd.f32 %v3393_v55, %v3377_v58  ;;  %v3361_v16 = vadd.f32 %v8398_v42, %v3347_v38  ;;  %v4099_v35 = vsel %vm388_vm4, %v9223_v3, %v4098_v53  ;;  %v3431_v18 = vsel %vm388_vm4, %v3429_v21, %v3430_v49 }
 0x525   : > { %v3416_v7 = vpop.permute.xlu1 %3415  ;;  %v3452_v20 = vpop.permute.xlu0 %3451  ;;  %v3432_v42 = vrot.slane %v3425_v47, 2  ;;  %v3481_v60 = vstv %s8631_s25  ;;  %v4575_v53 = vsel %vm388_vm4, %v9226_v4, %v4574_v32 }
 0x526   : > { %v3378_v10 = vadd.f32 %v3374_v46, %v3361_v16  ;;  %v3419_v22 = vadd.f32 %v3414_v45, %v3398_v36  ;;  %v8655_v16 = vld [vmem:[#allocation2 + $0x30] sm:$0xff] }
 0x527   : > { %4102 = vrot.lane.b32.xlu1 %v4099_v35, %s5271_s15  ;;  %4576 = vrot.lane.b32.xlu0 %v9224_v17, %s5271_s15  ;;  %v3433_v50 = vsel %vm388_vm4, %v3430_v49, %v3432_v42  ;;  %v3482_v47 = vmul.f32 %v8655_v16, %v3481_v60  ;;  %v3483_v49 = vmul.f32 %v8660_v40, %v3481_v60 }
 0x528   : > { %v3399_v55 = vadd.f32 %v3395_v41, %v3378_v10  ;;  %v3436_v52 = vadd.f32 %v3431_v18, %v3419_v22 }
 0x529   : > { %v3454_v8 = vpop.permute.xlu1 %3453  ;;  %v3473_v38 = vpop.permute.xlu0 %3472 }
 0x52a   : > { %v3420_v58 = vadd.f32 %v3416_v7, %v3399_v55  ;;  %v3457_v45 = vadd.f32 %v3452_v20, %v3436_v52 }
 0x52b   : > { %4578 = vrot.lane.b32.xlu1 %v4575_v53, %s5271_s15  ;;  %s4966_s15 = sld [smem:[#allocation4 + $0xc6]] }
 0x52c   : > { %v3437_v36 = vadd.f32 %v3433_v50, %v3420_v58  ;;  %v3478_v41 = vadd.f32 %v3473_v38, %v3457_v45  ;;  %v9227_v58 = vld [vmem:[#allocation45_spill] sm:$0xff] }
 0x52d   : > { %v3475_v46 = vpop.permute.xlu1 %3474  ;;  %v3719_v21 = vpop.permute.xlu0 %3718 }
 0x52e   : > { %v3458_v10 = vadd.f32 %v3454_v8, %v3437_v36  ;;  %v3484_v22 = vadd.f32 %v3482_v47, %v3478_v41  ;;  %v3723_v7 = vadd.f32 %v3719_v21, %v8458_v37  ;;  %v9229_v36 = vld [vmem:[#allocation53_spill] sm:$0xff]  ;;  %v9230_v21 = vld [vmem:[#allocation48_spill] sm:$0xff] }
 0x530   : > { %v3498_v20 = vadd.f32 %v8400_v59, %v3484_v22  ;;  %v3479_v3 = vadd.f32 %v3475_v46, %v3458_v10 }
 0x531   : > { %v3717_v35 = vpop.permute.xlu1 %3716  ;;  %v4195_v32 = vpop.permute.xlu0 %4194 }
 0x532   : > { %v3485_v18 = vadd.f32 %v3483_v49, %v3479_v3  ;;  %v4199_v17 = vadd.f32 %v4195_v32, %v8471_v34  ;;  %v3512_v42 = vadd.f32 %v8416_v13, %v3498_v20  ;;  %v3722_v60 = vadd.f32 %v3717_v35, %v8461_v62 }
 0x533   : > { %v3805_v3 = vstv %s4966_s15 }
 0x534   : > { %v3499_v55 = vadd.f32 %v8414_v0, %v3485_v18  ;;  %v8667_v52 = vadd.f32 %v8216_v26, %v3512_v42  ;;  %v9228_v26 = vld [vmem:[#allocation85_spill] sm:$0xff] }
 0x535   : > { %v4193_v37 = vpop.permute.xlu1 %4192  ;;  %v3740_v8 = vpop.permute.xlu0 %3739 }
 0x536   : > { %v3744_v59 = vadd.f32 %v3740_v8, %v3723_v7  ;;  %v3513_v38 = vadd.f32 %v8541_v23, %v3499_v55  ;;  %v4198_v0 = vadd.f32 %v4193_v37, %v8474_v33  ;;  %v4281_v8 = vstv %s4997_s21 }
 0x538   : > { %v3761_v45 = vadd.f32 %v9227_v58, %v3744_v59  ;;  %v8673_v12 = vadd.f32 %v8222_v43, %v3513_v38  ;;  %v3806_v58 = vmul.f32 %v8598_v27, %v3805_v3 }
 0x539   : > { %v3738_v34 = vpop.permute.xlu1 %3737  ;;  %v4216_v4 = vpop.permute.xlu0 %4215 }
 0x53a   : > { %v3743_v13 = vadd.f32 %v3738_v34, %v3722_v60  ;;  %v4220_v53 = vadd.f32 %v4216_v4, %v4199_v17  ;;  %v3807_v17 = vmul.f32 %v8601_v56, %v3805_v3  ;;  %v3839_v34 = vstv %s4969_s6 }
 0x53b   : > { %v3841_v4 = vmul.f32 %v8601_v56, %v3839_v34 }
 0x53c   : > { %v3760_v50 = vadd.f32 %v9228_v26, %v3743_v13  ;;  %v4237_v47 = vadd.f32 %v9229_v36, %v4220_v53  ;;  %v3842_v13 = vmul.f32 %v3839_v34, %v8286_v63 }
 0x53d   : > { %v4214_v41 = vpop.permute.xlu1 %4213  ;;  %v3778_v46 = vpop.permute.xlu0 %3777 }
 0x53e   : > { %v4219_v23 = vadd.f32 %v4214_v41, %v4198_v0  ;;  %v3782_v20 = vadd.f32 %v3778_v46, %v3761_v45  ;;  %v4283_v45 = vmul.f32 %v8601_v56, %v4281_v8  ;;  %v4282_v41 = vmul.f32 %v8598_v27, %v4281_v8 }
 0x53f   : > { %v4315_v46 = vstv %s5000_s12 }
 0x540   : > { %v4236_v62 = vadd.f32 %v9230_v21, %v4219_v23  ;;  %v3847_v23 = vrot.slane %v3841_v4, 1  ;;  %v3849_v21 = vrot.slane %v3842_v13, 1  ;;  %v4374_v4 = vstv %s5003_s7 }
 0x541   : > { %v3776_v10 = vpop.permute.xlu1 %3775  ;;  %v4254_v22 = vpop.permute.xlu0 %4253 }
 0x542   : > { %v3781_v32 = vadd.f32 %v3776_v10, %v3760_v50  ;;  %v4258_v18 = vadd.f32 %v4254_v22, %v4237_v47  ;;  %v4318_v10 = vmul.f32 %v4315_v46, %v8286_v63 }
 0x545   : > { %v4252_v43 = vpop.permute.xlu1 %4251  ;;  %v3799_v7 = vpop.permute.xlu0 %3798 }
 0x546   : > { %v3803_v49 = vadd.f32 %v3799_v7, %v3782_v20  ;;  %v4257_v60 = vadd.f32 %v4252_v43, %v4236_v62  ;;  %v4317_v62 = vmul.f32 %v8601_v56, %v4315_v46  ;;  %v3840_v20 = vmul.f32 %v8598_v27, %v3839_v34 }
 0x548   : > { %v3809_v42 = vadd.f32 %v3807_v17, %v3803_v49  ;;  %v4316_v17 = vmul.f32 %v8598_v27, %v4315_v46  ;;  %v4377_v46 = vmul.f32 %v4374_v4, %v8286_v63 }
 0x549   : > { %v3797_v33 = vpop.permute.xlu1 %3796  ;;  %v4275_v35 = vpop.permute.xlu0 %4274 }
 0x54a   : > { %v3802_v55 = vadd.f32 %v3797_v33, %v3781_v32  ;;  %v4279_v37 = vadd.f32 %v4275_v35, %v4258_v18  ;;  %v3823_v53 = vadd.f32 %v8478_v51, %v3809_v42  ;;  %v3898_v33 = vstv %s4972_s10 }
 0x54b   : > { %v3850_v35 = vsel %vm328_vm3, %v3847_v23, %v3849_v21  ;;  %v4323_v32 = vrot.slane %v4317_v62, 1  ;;  %v4325_v18 = vrot.slane %v4318_v10, 1  ;;  %v4322_v34 = vrot.slane %v4316_v17, 1 }
 0x54c   : > { %v3808_v0 = vadd.f32 %v3806_v58, %v3802_v55  ;;  %v4285_v26 = vadd.f32 %v4283_v45, %v4279_v37  ;;  %v3837_v7 = vadd.f32 %v8499_v39, %v3823_v53  ;;  %v3846_v37 = vrot.slane %v3840_v20, 1 }
 0x54d   : > { %v4273_v59 = vpop.permute.xlu1 %4272  ;;  %v3871_v38 = vpop.permute.xlu0 %3870  ;;  %v4326_v45 = vsel %vm328_vm3, %v4323_v32, %v4325_v18  ;;  %v4324_v21 = vsel %vm328_vm3, %v4322_v34, %v4323_v32  ;;  %v3899_v62 = vmul.f32 %v8598_v27, %v3898_v33  ;;  %v4375_v32 = vmul.f32 %v8598_v27, %v4374_v4 }
 0x54e   : > { %v4278_v50 = vadd.f32 %v4273_v59, %v4257_v60  ;;  %v3822_v22 = vadd.f32 %v8476_v54, %v3808_v0  ;;  %v4299_v43 = vadd.f32 %v8490_v9, %v4285_v26  ;;  %v3854_v55 = vadd.f32 %v3850_v35, %v3837_v7 }
 0x54f   : > { %v3900_v59 = vmul.f32 %v8601_v56, %v3898_v33  ;;  %v3901_v60 = vmul.f32 %v3898_v33, %v8286_v63  ;;  %v3848_v58 = vsel %vm328_vm3, %v3846_v37, %v3847_v23  ;;  %v4384_v7 = vrot.slane %v4377_v46, 2 }
 0x550   : > { %v4284_v51 = vadd.f32 %v4282_v41, %v4278_v50  ;;  %v3836_v54 = vadd.f32 %v8497_v1, %v3822_v22  ;;  %v4313_v9 = vadd.f32 %v8509_v48, %v4299_v43  ;;  %v3875_v13 = vadd.f32 %v3871_v38, %v3854_v55 }
 0x551   : > { %v3869_v36 = vpop.permute.xlu1 %3868  ;;  %v4347_v47 = vpop.permute.xlu0 %4346  ;;  %v3906_v0 = vrot.slane %v3900_v59, 2  ;;  %v3908_v26 = vrot.slane %v3901_v60, 2  ;;  %v4376_v41 = vmul.f32 %v8601_v56, %v4374_v4  ;;  %v3957_v33 = vstv %s8702_s9 }
 0x552   : > { %v4298_v42 = vadd.f32 %v8488_v6, %v4284_v51  ;;  %v3853_v6 = vadd.f32 %v3848_v58, %v3836_v54  ;;  %v4330_v53 = vadd.f32 %v4326_v45, %v4313_v9  ;;  %v3959_v55 = vmul.f32 %v8660_v40, %v3957_v33 }
 0x553   : > { %v4382_v51 = vrot.slane %v4376_v41, 2  ;;  %v4381_v59 = vrot.slane %v4375_v32, 2  ;;  %v3958_v4 = vmul.f32 %v8655_v16, %v3957_v33 }
 0x554   : > { %v4312_v1 = vadd.f32 %v8507_v19, %v4298_v42  ;;  %v3874_v38 = vadd.f32 %v3869_v36, %v3853_v6  ;;  %v4351_v10 = vadd.f32 %v4347_v47, %v4330_v53  ;;  %v3909_v19 = vsel %vm388_vm4, %v3906_v0, %v3908_v26 }
 0x555   : > { %v4345_v49 = vpop.permute.xlu1 %4344  ;;  %v3892_v3 = vpop.permute.xlu0 %3891  ;;  %v4385_v17 = vsel %vm388_vm4, %v4382_v51, %v4384_v7  ;;  %v4383_v45 = vsel %vm388_vm4, %v4381_v59, %v4382_v51  ;;  %v9233_v59 = vld [vmem:[#allocation63_spill] sm:$0xff] }
 0x556   : > { %v3896_v23 = vadd.f32 %v3892_v3, %v3875_v13  ;;  %v4329_v22 = vadd.f32 %v4324_v21, %v4312_v1  ;;  %v3905_v3 = vrot.slane %v3899_v62, 2 }
 0x558   : > { %v3913_v63 = vadd.f32 %v3909_v19, %v3896_v23  ;;  %v4350_v18 = vadd.f32 %v4345_v49, %v4329_v22  ;;  %v3907_v47 = vsel %vm388_vm4, %v3905_v3, %v3906_v0  ;;  %v4433_v49 = vstv %s8708_s28 }
 0x559   : > { %v3890_v39 = vpop.permute.xlu1 %3889  ;;  %v4368_v8 = vpop.permute.xlu0 %4367  ;;  %v4435_v13 = vmul.f32 %v8660_v40, %v4433_v49 }
 0x55a   : > { %v3895_v56 = vadd.f32 %v3890_v39, %v3874_v38  ;;  %v4372_v35 = vadd.f32 %v4368_v8, %v4351_v10  ;;  %v4434_v10 = vmul.f32 %v8655_v16, %v4433_v49  ;;  %v9234_v49 = vld [vmem:[#allocation39_spill] sm:$0xff] }
 0x55c   : > { %v3912_v37 = vadd.f32 %v3907_v47, %v3895_v56  ;;  %v4389_v39 = vadd.f32 %v4385_v17, %v4372_v35 }
 0x55d   : > { %v4366_v48 = vpop.permute.xlu1 %4365  ;;  %v3930_v50 = vpop.permute.xlu0 %3929 }
 0x55e   : > { %v3934_v36 = vadd.f32 %v3930_v50, %v3913_v63  ;;  %v4371_v9 = vadd.f32 %v4366_v48, %v4350_v18  ;;  %v9232_v63 = vld [vmem:[#allocation62_spill] sm:$0xff] }
 0x560   : > { %v4388_v53 = vadd.f32 %v4383_v45, %v4371_v9 }
 0x561   : > { %v3928_v43 = vpop.permute.xlu1 %3927  ;;  %v4406_v20 = vpop.permute.xlu0 %4405 }
 0x562   : > { %v3933_v60 = vadd.f32 %v3928_v43, %v3912_v37  ;;  %v4410_v58 = vadd.f32 %v4406_v20, %v4389_v39  ;;  %v9231_v20 = vld [vmem:[#allocation32_spill] sm:$0xff] }
 0x565   : > { %v4404_v42 = vpop.permute.xlu1 %4403  ;;  %v3951_v54 = vpop.permute.xlu0 %3950 }
 0x566   : > { %v3955_v8 = vadd.f32 %v3951_v54, %v3934_v36  ;;  %v4409_v26 = vadd.f32 %v4404_v42, %v4388_v53 }
 0x568   : > { %v3961_v27 = vadd.f32 %v3959_v55, %v3955_v8 }
 0x569   : > { %v3949_v34 = vpop.permute.xlu1 %3948  ;;  %v4427_v6 = vpop.permute.xlu0 %4426 }
 0x56a   : > { %v3975_v1 = vadd.f32 %v8519_v57, %v3961_v27  ;;  %v3954_v48 = vadd.f32 %v3949_v34, %v3933_v60  ;;  %v4431_v0 = vadd.f32 %v4427_v6, %v4410_v58  ;;  %v3633_v6 = vstv %s4953_s11 }
 0x56c   : > { %v3960_v50 = vadd.f32 %v3958_v4, %v3954_v48  ;;  %v4437_v41 = vadd.f32 %v4435_v13, %v4431_v0  ;;  %v3989_v46 = vadd.f32 %v8553_v14, %v3975_v1  ;;  %v3637_v48 = vstv %s8741_s4 }
 0x56d   : > { %v4425_v23 = vpop.permute.xlu1 %4424  ;;  %v3545_v21 = vpop.permute.xlu0 %3544 }
 0x56e   : > { %v3974_v62 = vadd.f32 %v8517_v15, %v3960_v50  ;;  %v4451_v38 = vadd.f32 %v8531_v5, %v4437_v41  ;;  %v4430_v40 = vadd.f32 %v4425_v23, %v4409_v26  ;;  %v4006_v22 = vadd.f32 %v8228_v24, %v3989_v46 }
 0x56f   : > { %v3550_v24 = vadd.f32 %v3545_v21, %v8667_v52  ;;  %v4109_v46 = vstv %s8743_s23 }
 0x570   : > { %v4436_v19 = vadd.f32 %v4434_v10, %v4430_v40  ;;  %v3988_v57 = vadd.f32 %v8543_v30, %v3974_v62  ;;  %v4465_v43 = vadd.f32 %v8565_v2, %v4451_v38  ;;  %v4113_v10 = vstv %s8745_s22 }
 0x571   : > { %v3547_v51 = vpop.permute.xlu1 %3546  ;;  %v4021_v7 = vpop.permute.xlu0 %4020 }
 0x572   : > { %v4450_v14 = vadd.f32 %v8529_v61, %v4436_v19  ;;  %v4005_v56 = vadd.f32 %v9231_v20, %v3988_v57  ;;  %v4482_v15 = vadd.f32 %v8241_v28, %v4465_v43  ;;  %v3551_v2 = vadd.f32 %v3547_v51, %v8673_v12 }
 0x574   : > { %v4464_v5 = vadd.f32 %v8555_v25, %v4450_v14  ;;  %v4026_v36 = vadd.f32 %v4021_v7, %v4005_v56  ;;  %v4585_v7 = vstv %s8747_s19 }
 0x575   : > { %v4023_v35 = vpop.permute.xlu1 %4022  ;;  %v4497_v16 = vpop.permute.xlu0 %4496 }
 0x576   : > { %v4481_v3 = vadd.f32 %v9232_v63, %v4464_v5  ;;  %v4027_v42 = vadd.f32 %v4023_v35, %v4006_v22  ;;  %v4589_v5 = vstv %s8750_s24 }
 0x578   : > { %v4502_v25 = vadd.f32 %v4497_v16, %v4481_v3 }
 0x579   : > { %v4499_v32 = vpop.permute.xlu1 %4498  ;;  %v3566_v30 = vpop.permute.xlu0 %3565 }
 0x57a   : > { %v3571_v18 = vadd.f32 %v3566_v30, %v3550_v24  ;;  %v4503_v8 = vadd.f32 %v4499_v32, %v4482_v15 }
 0x57c   : > { %v3588_v61 = vadd.f32 %v8249_v11, %v3571_v18 }
 0x57d   : > { %v3568_v33 = vpop.permute.xlu1 %3567  ;;  %v4042_v47 = vpop.permute.xlu0 %4041 }
 0x57e   : > { %v3572_v17 = vadd.f32 %v3568_v33, %v3551_v2  ;;  %v4047_v28 = vadd.f32 %v4042_v47, %v4026_v36 }
 0x580   : > { %v3589_v55 = vadd.f32 %v8257_v31, %v3572_v17  ;;  %v4064_v54 = vadd.f32 %v8262_v44, %v4047_v28 }
 0x581   : > { %v4044_v9 = vpop.permute.xlu1 %4043  ;;  %v4518_v52 = vpop.permute.xlu0 %4517 }
 0x582   : > { %v4048_v37 = vadd.f32 %v4044_v9, %v4027_v42  ;;  %v4523_v39 = vadd.f32 %v4518_v52, %v4502_v25 }
 0x584   : > { %v4065_v12 = vadd.f32 %v8265_v29, %v4048_v37  ;;  %v4540_v60 = vadd.f32 %v9233_v59, %v4523_v39 }
 0x585   : > { %v4520_v11 = vpop.permute.xlu1 %4519  ;;  %v3604_v58 = vpop.permute.xlu0 %3603 }
 0x586   : > { %v4524_v27 = vadd.f32 %v4520_v11, %v4503_v8  ;;  %v3609_v29 = vadd.f32 %v3604_v58, %v3588_v61  ;;  %v5153_v58 = vld [vmem:[%s5422_s18] sm:$0xff] }
 0x588   : > { %v4541_v45 = vadd.f32 %v9234_v49, %v4524_v27 }
 0x589   : > { %v3606_v34 = vpop.permute.xlu1 %3605  ;;  %v4080_v4 = vpop.permute.xlu0 %4079 }
 0x58a   : > { %v3610_v0 = vadd.f32 %v3606_v34, %v3589_v55  ;;  %v4085_v26 = vadd.f32 %v4080_v4, %v4064_v54 }
 0x58d   : > { %v4082_v31 = vpop.permute.xlu1 %4081  ;;  %v4556_v44 = vpop.permute.xlu0 %4555 }
 0x58e   : > { %v4086_v40 = vadd.f32 %v4082_v31, %v4065_v12  ;;  %v4561_v43 = vadd.f32 %v4556_v44, %v4540_v60  ;;  %v5154_v31 = vld [vmem:[%s5422_s18 + $0x8] sm:$0xff] }
 0x591   : > { %v4558_v13 = vpop.permute.xlu1 %4557  ;;  %v3625_v53 = vpop.permute.xlu0 %3624 }
 0x592   : > { %v3630_v1 = vadd.f32 %v3625_v53, %v3609_v29  ;;  %v4562_v16 = vadd.f32 %v4558_v13, %v4541_v45  ;;  %v5155_v29 = vld [vmem:[%s5422_s18 + $0x10] sm:$0xff] }
 0x594   : > { %v3634_v50 = vmul.f32 %v3633_v6, %v3630_v1 }
 0x595   : > { %v3627_v41 = vpop.permute.xlu1 %3626  ;;  %v4101_v23 = vpop.permute.xlu0 %4100 }
 0x596   : > { %v3638_v21 = vadd.f32 %v3637_v48, %v3634_v50  ;;  %v3631_v62 = vadd.f32 %v3627_v41, %v3610_v0  ;;  %v4106_v38 = vadd.f32 %v4101_v23, %v4085_v26  ;;  %v5156_v26 = vld [vmem:[%s5422_s18 + $0x18] sm:$0xff] }
 0x598   : > { %v4955_v22 = vmul.f32 -1.442695, %v3638_v21  ;;  %v3635_v19 = vmul.f32 %v3633_v6, %v3631_v62  ;;  %v4110_v57 = vmul.f32 %v4109_v46, %v4106_v38 }
 0x599   : > { %v4103_v51 = vpop.permute.xlu1 %4102  ;;  %v4577_v14 = vpop.permute.xlu0 %4576 }
 0x59a   : > { %5095 = vpow2.f32 %v4955_v22  ;;  %v3639_v20 = vadd.f32 %v3637_v48, %v3635_v19  ;;  %v4114_v56 = vadd.f32 %v4113_v10, %v4110_v57  ;;  %v4107_v15 = vadd.f32 %v4103_v51, %v4086_v40  ;;  %v5158_v40 = vld [vmem:[%s5422_s18 + $0x28] sm:$0xff] }
 0x59b   : > { %v4582_v35 = vadd.f32 %v4577_v14, %v4561_v43 }
 0x59c   : > { %v4956_v63 = vmul.f32 -1.442695, %v3639_v20  ;;  %v4986_v3 = vmul.f32 -1.442695, %v4114_v56  ;;  %v4111_v24 = vmul.f32 %v4109_v46, %v4107_v15  ;;  %v5157_v46 = vld [vmem:[%s5422_s18 + $0x20] sm:$0xff] }
 0x59d   : > { %v4586_v32 = vmul.f32 %v4585_v7, %v4582_v35  ;;  %v4579_v30 = vpop.permute.xlu1 %4578 }
 0x59e   : > { %5097 = vpow2.f32 %v4956_v63  ;;  %v4115_v18 = vadd.f32 %v4113_v10, %v4111_v24  ;;  %v4583_v2 = vadd.f32 %v4579_v30, %v4562_v16 }
 0x59f   : > { %5099 = vpow2.f32 %v4986_v3  ;;  %v4590_v36 = vadd.f32 %v4589_v5, %v4586_v32 }
 0x5a0   : > { %v4987_v61 = vmul.f32 -1.442695, %v4115_v18  ;;  %v4587_v33 = vmul.f32 %v4585_v7, %v4583_v2 }
 0x5a1   : > { %v5017_v47 = vmul.f32 -1.442695, %v4590_v36 }
 0x5a2   : > { %5101 = vpow2.f32 %v4987_v61  ;;  %v4591_v17 = vadd.f32 %v4589_v5, %v4587_v33 }
 0x5a3   : > { %5103 = vpow2.f32 %v5017_v47 }
 0x5a4   : > { %v5096_v28 = vpop.eup %5095  ;;  %v5018_v42 = vmul.f32 -1.442695, %v4591_v17 }
 0x5a5   : > { %v3646_v25 = vadd.f32 1.0, %v5096_v28 }
 0x5a6   : > { %5105 = vpow2.f32 %v5018_v42 }
 0x5a7   : > { %5107 = vrcp.f32 %v3646_v25 }
 0x5a8   : > { %v5098_v55 = vpop.eup %5097 }
 0x5a9   : > { %v5100_v54 = vpop.eup %5099  ;;  %v3647_v9 = vadd.f32 1.0, %v5098_v55 }
 0x5aa   : > { %v4122_v52 = vadd.f32 1.0, %v5100_v54 }
 0x5ab   : > { %5109 = vrcp.f32 %v3647_v9 }
 0x5ac   : > { %v5102_v37 = vpop.eup %5101  ;;  %5111 = vrcp.f32 %v4122_v52 }
 0x5ad   : > { %v5104_v39 = vpop.eup %5103  ;;  %v4123_v8 = vadd.f32 1.0, %v5102_v37 }
 0x5ae   : > { %v4598_v12 = vadd.f32 1.0, %v5104_v39 }
 0x5af   : > { %5113 = vrcp.f32 %v4123_v8 }
 0x5b0   : > { %v5106_v59 = vpop.eup %5105  ;;  %5115 = vrcp.f32 %v4598_v12 }
 0x5b1   : > { %v5108_v60 = vpop.eup %5107  ;;  %v4599_v11 = vadd.f32 1.0, %v5106_v59 }
 0x5b2   : > { %v4604_v27 = vadd.f32 %v5153_v58, %v5108_v60 }
 0x5b3   : > { %5117 = vrcp.f32 %v4599_v11 }
 0x5b4   : > { %v4606_v49 = vmax.f32 %v4604_v27, 0.0001 }
 0x5b5   : > { %v5110_v45 = vpop.eup %5109 }
 0x5b6   : > { %v5112_v34 = vpop.eup %5111  ;;  %v4608_v4 = vmin.f32 %v4606_v49, 1.0  ;;  %v4605_v44 = vadd.f32 %v5154_v31, %v5110_v45 }
 0x5b7   : > { %v4621_v13 = vadd.f32 %v5155_v29, %v5112_v34 }
 0x5b8   : > { %5119 = vrcp.f32 %v4608_v4  ;;  %v4607_v6 = vmax.f32 %v4605_v44, 0.0001 }
 0x5b9   : > { %v5114_v53 = vpop.eup %5113  ;;  %v4623_v1 = vmax.f32 %v4621_v13, 0.0001 }
 0x5ba   : > { %v5116_v48 = vpop.eup %5115  ;;  %v4609_v0 = vmin.f32 %v4607_v6, 1.0  ;;  %v4622_v50 = vadd.f32 %v5156_v26, %v5114_v53 }
 0x5bb   : > { %v4625_v41 = vmin.f32 %v4623_v1, 1.0  ;;  %v4638_v23 = vadd.f32 %v5157_v46, %v5116_v48 }
 0x5bc   : > { %5121 = vrcp.f32 %v4609_v0  ;;  %v4624_v21 = vmax.f32 %v4622_v50, 0.0001 }
 0x5bd   : > { %v5118_v62 = vpop.eup %5117  ;;  %5123 = vrcp.f32 %v4625_v41  ;;  %v4640_v38 = vmax.f32 %v4638_v23, 0.0001 }
 0x5be   : > { %v4626_v10 = vmin.f32 %v4624_v21, 1.0  ;;  %v4639_v22 = vadd.f32 %v5158_v40, %v5118_v62 }
 0x5bf   : > { %v4642_v19 = vmin.f32 %v4640_v38, 1.0 }
 0x5c0   : > { %5125 = vrcp.f32 %v4626_v10  ;;  %v4641_v57 = vmax.f32 %v4639_v22, 0.0001 }
 0x5c1   : > { %5127 = vrcp.f32 %v4642_v19 }
 0x5c2   : > { %v5120_v43 = vpop.eup %5119  ;;  %v4643_v51 = vmin.f32 %v4641_v57, 1.0 }
 0x5c3   : > { %v4611_v7 = vmul.f32 %v5153_v58, %v5120_v43 }
 0x5c4   : > { %5129 = vrcp.f32 %v4643_v51 }
 0x5c5   : > { %v4614_v14 = vmax.f32 %v4611_v7, 0.0 }
 0x5c6   : > { %v5122_v20 = vpop.eup %5121 }
 0x5c7   : > { %v5124_v56 = vpop.eup %5123  ;;  %v4616_v15 = vmin.f32 %v4614_v14, 1.0  ;;  %v4613_v5 = vmul.f32 %v5154_v31, %v5122_v20 }
 0x5c8   : > { %v4628_v35 = vmul.f32 %v5155_v29, %v5124_v56 }
 0x5c9   : > { %4619 = vst.msk [vmem:[%s217_s30] sm:$0xff] %vm4618_vm5, %v4616_v15  ;;  %v4615_v16 = vmax.f32 %v4613_v5, 0.0 }
 0x5ca   : > { %v5126_v63 = vpop.eup %5125  ;;  %v4631_v3 = vmax.f32 %v4628_v35, 0.0 }
 0x5cb   : > { %v5128_v24 = vpop.eup %5127  ;;  %v4617_v32 = vmin.f32 %v4615_v16, 1.0  ;;  %v4630_v30 = vmul.f32 %v5156_v26, %v5126_v63 }
 0x5cc   : > { %v4633_v18 = vmin.f32 %v4631_v3, 1.0  ;;  %v4645_v2 = vmul.f32 %v5157_v46, %v5128_v24 }
 0x5cd   : > { %4620 = vst.msk [vmem:[%s217_s30 + $0x8] sm:$0xff] %vm4618_vm5, %v4617_v32  ;;  %v4632_v36 = vmax.f32 %v4630_v30, 0.0 }
 0x5ce   : > { %v5130_v61 = vpop.eup %5129  ;;  %5019 = vst.msk [vmem:[%s217_s30 + $0x10] sm:$0xff] %vm4618_vm5, %v4633_v18  ;;  %v4648_v33 = vmax.f32 %v4645_v2, 0.0 }
 0x5cf   : > { %v4634_v47 = vmin.f32 %v4632_v36, 1.0  ;;  %v4647_v17 = vmul.f32 %v5158_v40, %v5130_v61 }
 0x5d0   : > { %v4650_v28 = vmin.f32 %v4648_v33, 1.0 }
 0x5d1   : > { %5020 = vst.msk [vmem:[%s217_s30 + $0x18] sm:$0xff] %vm4618_vm5, %v4634_v47  ;;  %v4649_v42 = vmax.f32 %v4647_v17, 0.0 }
 0x5d2   : > { %5021 = vst.msk [vmem:[%s217_s30 + $0x20] sm:$0xff] %vm4618_vm5, %v4650_v28 }
 0x5d3   : > { %v4651_v25 = vmin.f32 %v4649_v42, 1.0 }
 0x5d5   : > { %5022 = vst.msk [vmem:[%s217_s30 + $0x28] sm:$0xff] %vm4618_vm5, %v4651_v25 }
 0x5d6 PF: > { %p15_p11 = scmp.ge.s32.totalorder %s5314_s17, 4   ;;  %s9235_s12 = smov %s5253_s13 }
 0x5d7   : > { %s9236_s13 = smov %s5257_s14  ;;  %s9237_s14 = smov %s5324_s20 }
 0x5d8   : > { %s9238_s15 = smov %s5314_s17  ;;  %17 = sbr.rel (!%p15_p11) target bundleno = 5 (0x5), region = 87 }
 0x5df   :  { %4676 = vsyncpa [#allocation5], 1 }
 0x5e0   :  { %4678 = vsyncpa [#allocation5 + $0x1], 1 }
 0x5e1   :  { %4679 = vsyncpa [#allocation6], 1 }
 0x5e2   :  { %4681 = vsyncpa [#allocation6 + $0x1], 1 }
 0x5e3   :  { %4682 = vsyncpa [#allocation8], 1 }

</bundles_post_ra>
